<compile_context>
chip_gen: v7x
topology: tpu7x:2x2x1
jax: 0.10.0
libtpu: 0.0.40
codegen_flags: <defaults>
</compile_context>

<pallas_src>
import functools

import jax
import jax.numpy as jnp
from jax.experimental import pallas as pl
from jax.experimental.pallas import tpu as pltpu

_LN_EPS = 1e-6
_N_PATHS = 2                # path 0 = "clean" (GELU in proj), path 1 = "ref" (no GELU)
DIM = (112, 72, 40, 24)     # default dims of the PyTorch module


def _gelu_tanh(x):
    # tanh-approx GELU: the transcendental goes to the otherwise-idle EUP slot.
    # TODO(synk): |err| vs nn.GELU()'s exact erf is ~1e-3, below the bf16 activation noise.
    c = 0.7978845608028654  # sqrt(2/pi)
    return 0.5 * x * (1.0 + jnp.tanh(c * (x + 0.044715 * x * x * x)))


# --------------------------------------------------------------------------------------
# Fused dual-path stage kernel (channels on sublanes, spatial pixels on lanes):
#   (optional skip multiply, shared) -> per-path 1x1 conv (bf16 MXU, f32 acc)
#   -> (optional channels-first LayerNorm, f32) -> (GELU on clean path only) -> bf16 store
# --------------------------------------------------------------------------------------
def _dual_stage_kernel(*refs, shared_x, use_skip, use_ln, gelu_path0, cout):
    """Per grid step (one batch image, one lane tile of ts pixels):
         x_ref      (1, Cin, ts) bf16   if shared_x else (2, 1, Cin, ts) bf16
         [skip_ref] (1, Cin, ts) bf16                       (only if use_skip)
         w_ref      (2*Cout, Cin) bf16  if shared_x else (2, Cout, Cin) bf16
         b_ref      (2, Cout, 1) f32
         [g_ref, beta_ref] (2, Cout, 1) f32                  (only if use_ln)
         o_ref      (2, 1, Cout, ts)
    """
    it = iter(refs)
    x_ref = next(it)
    skip_ref = next(it) if use_skip else None
    w_ref = next(it)
    b_ref = next(it)
    g_ref = next(it) if use_ln else None
    beta_ref = next(it) if use_ln else None
    o_ref = next(it)

    if shared_x:
        # Single (2*Cout, Cin) x (Cin, ts) matmul serving both paths: halves MXU pushes
        # and widens the accumulation tile vs. two Cout-wide matmuls.
        y_all = jnp.dot(w_ref[...], x_ref[0], preferred_element_type=jnp.float32)
    else:
        skip = skip_ref[0] if use_skip else None          # read once, shared by both paths

    for p in range(_N_PATHS):                             # static unroll over the two paths
        if shared_x:
            y = y_all[p * cout:(p + 1) * cout]            # (Cout, ts), sublane-aligned slice
        else:
            xb = x_ref[p, 0]                              # (Cin, ts) bf16
            if use_skip:
                xb = xb * skip                            # skip multiply fused from prev stage
            y = jnp.dot(w_ref[p], xb, preferred_element_type=jnp.float32)
        y = y + b_ref[p]                                  # (Cout, 1) broadcast over lanes
        if use_ln:
            # PyTorch LayerNorm(channels_first): biased moments over the channel axis.
            u = jnp.mean(y, axis=0, keepdims=True)
            yc = y - u
            var = jnp.mean(yc * yc, axis=0, keepdims=True)
            y = yc * jax.lax.rsqrt(var + _LN_EPS)         # rsqrt -> EUP slot
            y = y * g_ref[p] + beta_ref[p]
        if gelu_path0 and p == 0:                         # clean path only
            y = _gelu_tanh(y)
        o_ref[p, 0] = y.astype(o_ref.dtype)


def _pick_tile(s, cap=4096):
    """Largest lane tile that divides s exactly (no jnp.pad copy of big activations),
       preferring multiples of 128 for lane-dense loads/stores."""
    if s <= cap:
        return s
    best = None
    d = 128
    while d <= cap:
        if s % d == 0:
            best = d
        d += 128
    return best if best is not None else s


def fused_dual_stage(x, skip, prm, *, shared_x, use_ln, gelu_path0, cap=4096):
    """x: (B, Cin, S) bf16 if shared_x else (2, B, Cin, S) bf16; skip: (B, Cin, S) or None.
       prm: dict with w (2, Cout, Cin), b (2, Cout, 1) [, gamma/beta (2, Cout, 1)].
       Returns (2, B, Cout, S) bf16."""
    w = prm["w"]
    _, cout, cin = w.shape
    if shared_x:
        B, _, S = x.shape
    else:
        _, B, _, S = x.shape
    ts = _pick_tile(S, cap)
    grid = (B, S // ts)

    in_specs, args = [], []
    if shared_x:
        in_specs.append(pl.BlockSpec((1, cin, ts), lambda b_, j: (b_, 0, j)))
    else:
        in_specs.append(pl.BlockSpec((_N_PATHS, 1, cin, ts), lambda b_, j: (0, b_, 0, j)))
    args.append(x)
    if skip is not None:
        in_specs.append(pl.BlockSpec((1, cin, ts), lambda b_, j: (b_, 0, j)))
        args.append(skip)
    if shared_x:
        in_specs.append(pl.BlockSpec((_N_PATHS * cout, cin), lambda b_, j: (0, 0)))
        args.append(w.reshape(_N_PATHS * cout, cin).astype(jnp.bfloat16))
    else:
        in_specs.append(pl.BlockSpec((_N_PATHS, cout, cin), lambda b_, j: (0, 0, 0)))
        args.append(w.astype(jnp.bfloat16))
    in_specs.append(pl.BlockSpec((_N_PATHS, cout, 1), lambda b_, j: (0, 0, 0)))
    args.append(prm["b"].astype(jnp.float32))
    if use_ln:
        for key in ("gamma", "beta"):
            in_specs.append(pl.BlockSpec((_N_PATHS, cout, 1), lambda b_, j: (0, 0, 0)))
            args.append(prm[key].astype(jnp.float32))

    kernel = functools.partial(_dual_stage_kernel, shared_x=shared_x,
                               use_skip=skip is not None, use_ln=use_ln,
                               gelu_path0=gelu_path0, cout=cout)
    return pl.pallas_call(
        kernel,
        out_shape=jax.ShapeDtypeStruct((_N_PATHS, B, cout, S), jnp.bfloat16),
        grid=grid,
        in_specs=in_specs,
        out_specs=pl.BlockSpec((_N_PATHS, 1, cout, ts), lambda b_, j: (0, b_, 0, j)),
        compiler_params=pltpu.CompilerParams(
            dimension_semantics=("parallel", "parallel")),
    )(*args)


# --------------------------------------------------------------------------------------
# XLA glue: matmul-ized bilinear x2 upsample (align_corners=True) and PixelShuffle, NCHW.
# --------------------------------------------------------------------------------------
def _interp_matrix_x2(n_in, dtype):
    """(2*n_in, n_in) bilinear interpolation matrix, align_corners=True (as nn.Upsample)."""
    n_out = 2 * n_in
    if n_in == 1:
        return jnp.ones((n_out, 1), dtype)
    src = jnp.arange(n_out, dtype=jnp.float32) * (n_in - 1) / (n_out - 1)
    lo = jnp.clip(jnp.floor(src).astype(jnp.int32), 0, n_in - 2)
    frac = src - lo.astype(jnp.float32)
    i = jnp.arange(n_in)
    m = ((i[None, :] == lo[:, None]) * (1.0 - frac)[:, None]
         + (i[None, :] == (lo + 1)[:, None]) * frac[:, None])
    return m.astype(dtype)


def upsample_x2_nchw(x, weight_dtype=jnp.bfloat16):
    """x: (..., C, H, W) -> (..., C, 2H, 2W).  MXU-friendly interp-matrix einsums
       (no gathers); operands in x.dtype, f32 accumulation.
       TODO(synk): fuse the H-interp contraction into the consumer Pallas kernel."""
    h, w = x.shape[-2], x.shape[-1]
    uh = _interp_matrix_x2(h, weight_dtype)
    uw = _interp_matrix_x2(w, weight_dtype)
    x = jnp.einsum('oh,...hw->...ow', uh, x,
                   preferred_element_type=jnp.float32).astype(x.dtype)
    x = jnp.einsum('ow,...hw->...ho', uw, x,
                   preferred_element_type=jnp.float32).astype(x.dtype)
    return x


def pixel_shuffle_nchw(x, r=2):
    """x: (B, C*r*r, H, W) -> (B, C, H*r, W*r), matching nn.PixelShuffle(r)."""
    B, C, H, W = x.shape
    co = C // (r * r)
    x = x.reshape(B, co, r, r, H, W)
    x = jnp.transpose(x, (0, 1, 4, 2, 5, 3))
    return x.reshape(B, co, H * r, W * r)


# --------------------------------------------------------------------------------------
# Decoder: parameters + forward
# --------------------------------------------------------------------------------------
def init_params(key, dim=DIM):
    """Stacked params: index 0 = 'clean' path (proj_layers 0-2 / projback_),
       index 1 = 'ref' path (proj_layers 3-5 / projback_2)."""
    keys = iter(jax.random.split(key, 8 * len(dim)))
    proj = []
    for i in range(1, len(dim)):
        cin, cout = dim[i - 1], dim[i]
        w = jnp.stack([jax.random.normal(next(keys), (cout, cin), jnp.float32) / jnp.sqrt(cin)
                       for _ in range(_N_PATHS)])                        # (2, cout, cin)
        b = jnp.stack([jax.random.normal(next(keys), (cout, 1), jnp.float32) * 0.01
                       for _ in range(_N_PATHS)])                        # (2, cout, 1)
        proj.append(dict(w=w, b=b,
                         gamma=jnp.ones((_N_PATHS, cout, 1), jnp.float32),   # LN default init
                         beta=jnp.zeros((_N_PATHS, cout, 1), jnp.float32)))
    w_pb = jnp.stack([jax.random.normal(next(keys), (12, dim[-1]), jnp.float32) / jnp.sqrt(dim[-1])
                      for _ in range(_N_PATHS)])
    b_pb = jnp.stack([jax.random.normal(next(keys), (12, 1), jnp.float32) * 0.01
                      for _ in range(_N_PATHS)])
    return dict(proj=proj, projback=dict(w=w_pb, b=b_pb))


def decoder_forward(params, c3, c2, c1, c0):
    """Inputs NCHW f32 (PyTorch convention). Output (B, 6, 16H, 16W) f32:
       channels 0:3 = clean path, 3:6 = ref path (torch.cat((x_clean, x_ref), dim=1))."""
    # Cast to bf16 first thing: all inter-stage HBM traffic is half-width, no layout change.
    c3, c2, c1, c0 = (t.astype(jnp.bfloat16) for t in (c3, c2, c1, c0))
    B, cin0, H, W = c3.shape
    skips = (c2, c1, c0)

    # ---- stage 0 (clean + ref merged): one shared c3 read, concatenated-weight matmul.
    p0 = params["proj"][0]
    cout = p0["w"].shape[1]
    y = fused_dual_stage(c3.reshape(B, cin0, H * W), None, p0,
                         shared_x=True, use_ln=True, gelu_path0=True)
    y = y.reshape(_N_PATHS, B, cout, H, W)
    h, w = H, W

    # ---- stages 1, 2: upsample(prev) -> (x * skip) -> 1x1 conv -> LN (-> GELU clean only).
    #      The skip multiply of the PyTorch graph is fused into the consumer stage's kernel.
    for s in (1, 2):
        x = upsample_x2_nchw(y)
        h, w = 2 * h, 2 * w
        ps = params["proj"][s]
        cin, cout = ps["w"].shape[2], ps["w"].shape[1]
        y = fused_dual_stage(x.reshape(_N_PATHS, B, cin, h * w),
                             skips[s - 1].reshape(B, cin, h * w), ps,
                             shared_x=False, use_ln=True, gelu_path0=True)
        y = y.reshape(_N_PATHS, B, cout, h, w)
        # TODO(synk): normal_layers are built from block_type=None in the reference module
        # (unspecified block class) -> treated as identity here.

    # ---- projback_ / projback_2: (upsample(prev) * c0) -> Conv2d(24->12, 1x1) -> PixelShuffle(2)
    x = upsample_x2_nchw(y)
    h, w = 2 * h, 2 * w
    pb = params["projback"]
    cin = pb["w"].shape[2]
    y = fused_dual_stage(x.reshape(_N_PATHS, B, cin, h * w),
                         c0.reshape(B, cin, h * w), pb,
                         shared_x=False, use_ln=False, gelu_path0=False)
    y = y.reshape(_N_PATHS, B, 12, h, w)

    # bf16 pixel-shuffle + concat; single f32 cast at the very end.
    out = jnp.concatenate([pixel_shuffle_nchw(y[0], 2), pixel_shuffle_nchw(y[1], 2)], axis=1)
    return out.astype(jnp.float32)


# --------------------------------------------------------------------------------------
# Pure-JAX f32 reference mirroring the PyTorch graph (structural-correctness check).
# --------------------------------------------------------------------------------------
def _reference_forward(params, c3, c2, c1, c0):
    skips = (c2, c1, c0)
    outs = []
    for p in range(_N_PATHS):
        x = c3
        for s in range(3):
            pr = params["proj"][s]
            x = jnp.einsum('oc,bchw->bohw', pr["w"][p], x) + pr["b"][p].reshape(1, -1, 1, 1)
            u = x.mean(axis=1, keepdims=True)
            v = ((x - u) ** 2).mean(axis=1, keepdims=True)
            x = (x - u) / jnp.sqrt(v + _LN_EPS)
            x = x * pr["gamma"][p].reshape(1, -1, 1, 1) + pr["beta"][p].reshape(1, -1, 1, 1)
            if p == 0:                                     # clean path has GELU in proj
                x = _gelu_tanh(x)
            x = upsample_x2_nchw(x, weight_dtype=jnp.float32)
            x = x * skips[s]
        pb = params["projback"]
        x = jnp.einsum('oc,bchw->bohw', pb["w"][p], x) + pb["b"][p].reshape(1, -1, 1, 1)
        outs.append(pixel_shuffle_nchw(x, 2))
    return jnp.concatenate(outs, axis=1)


if __name__ == "__main__":
    key = jax.random.PRNGKey(0)
    k_par, k3, k2, k1, k0 = jax.random.split(key, 5)

    params = init_params(k_par)

    B, H, W = 2, 4, 4                                      # c3 spatial size
    c3 = jax.random.normal(k3, (B, DIM[0], H, W), jnp.float32)
    c2 = jax.random.normal(k2, (B, DIM[1], 2 * H, 2 * W), jnp.float32)
    c1 = jax.random.normal(k1, (B, DIM[2], 4 * H, 4 * W), jnp.float32)
    c0 = jax.random.normal(k0, (B, DIM[3], 8 * H, 8 * W), jnp.float32)

    out = jax.jit(decoder_forward)(params, c3, c2, c1, c0)
    out = jax.block_until_ready(out)
    assert out.shape == (B, 6, 16 * H, 16 * W), out.shape
    assert bool(jnp.all(jnp.isfinite(out)))

    # bf16 pipeline vs f32 reference: loose tolerance (bf16 noise ~1%), catches real bugs.
    ref = jax.jit(_reference_forward)(params, c3, c2, c1, c0)
    rel_err = float(jnp.max(jnp.abs(out - ref)) / (jnp.max(jnp.abs(ref)) + 1e-6))
    assert rel_err < 0.1, rel_err
    print("KERNEL_OK")
</pallas_src>

<mosaic_0001>
module attributes {stable_mosaic.version = 11 : i64} {
  func.func @_dual_stage_kernel(%arg0: i32, %arg1: i32, %arg2: memref<1x112x16xbf16, #tpu.memory_space<vmem>>, %arg3: memref<144x112xbf16, #tpu.memory_space<vmem>>, %arg4: memref<2x72x1xf32, #tpu.memory_space<vmem>>, %arg5: memref<2x72x1xf32, #tpu.memory_space<vmem>>, %arg6: memref<2x72x1xf32, #tpu.memory_space<vmem>>, %arg7: memref<2x1x72x16xbf16, #tpu.memory_space<vmem>>) attributes {dimension_semantics = [#tpu.dimension_semantics<parallel>, #tpu.dimension_semantics<parallel>], iteration_bounds = array<i64: 2, 1>, scalar_prefetch = 0 : i64, scratch_operands = 0 : i64, tpu.core_type = #tpu.core_type<tc>, window_params = [{transform_indices = @transform_0, window_bounds = array<i64: 1, 112, 16>}, {pipeline_mode = #tpu.pipeline_mode<synchronous>, transform_indices = @transform_1, window_bounds = array<i64: 144, 112>}, {pipeline_mode = #tpu.pipeline_mode<synchronous>, transform_indices = @transform_2, window_bounds = array<i64: 2, 72, 1>}, {pipeline_mode = #tpu.pipeline_mode<synchronous>, transform_indices = @transform_3, window_bounds = array<i64: 2, 72, 1>}, {pipeline_mode = #tpu.pipeline_mode<synchronous>, transform_indices = @transform_4, window_bounds = array<i64: 2, 72, 1>}, {transform_indices = @transform_5, window_bounds = array<i64: 2, 1, 72, 16>}]} {
    %c0 = arith.constant 0 : index
    %c0_0 = arith.constant 0 : index
    %0 = vector.load %arg3[%c0, %c0_0] : memref<144x112xbf16, #tpu.memory_space<vmem>>, vector<144x112xbf16>
    %c0_1 = arith.constant 0 : index
    %c0_2 = arith.constant 0 : index
    %c0_3 = arith.constant 0 : index
    %1 = vector.load %arg2[%c0_1, %c0_2, %c0_3] : memref<1x112x16xbf16, #tpu.memory_space<vmem>>, vector<1x112x16xbf16>
    %2 = vector.shape_cast %1 : vector<1x112x16xbf16> to vector<112x16xbf16>
    %cst = arith.constant dense<0.000000e+00> : vector<144x16xf32>
    %3 = tpu.matmul %0, %2, %cst {dimension_numbers = #tpu.dot_dimension_numbers<[1], [0], [0], [1], [0, 0, 1, 1], [], []>} : vector<144x112xbf16>, vector<112x16xbf16>, vector<144x16xf32> -> vector<144x16xf32>
    %4 = vector.extract_strided_slice %3 {offsets = [0, 0], sizes = [72, 16], strides = [1, 1]} : vector<144x16xf32> to vector<72x16xf32>
    %c0_4 = arith.constant 0 : index
    %c0_5 = arith.constant 0 : index
    %c0_6 = arith.constant 0 : index
    %5 = vector.load %arg4[%c0_4, %c0_5, %c0_6] : memref<2x72x1xf32, #tpu.memory_space<vmem>>, vector<1x72x1xf32>
    %6 = vector.shape_cast %5 : vector<1x72x1xf32> to vector<72x1xf32>
    %7 = vector.broadcast %6 : vector<72x1xf32> to vector<72x16xf32>
    %8 = arith.addf %4, %7 : vector<72x16xf32>
    %cst_7 = arith.constant dense<0.000000e+00> : vector<16xf32>
    %9 = vector.multi_reduction <add>, %8, %cst_7 [0] : vector<72x16xf32> to vector<16xf32>
    %10 = vector.shape_cast %9 : vector<16xf32> to vector<1x16xf32>
    %cst_8 = arith.constant 7.200000e+01 : f32
    %11 = vector.broadcast %cst_8 : f32 to vector<1x16xf32>
    %12 = arith.divf %10, %11 : vector<1x16xf32>
    %13 = vector.broadcast %12 : vector<1x16xf32> to vector<72x16xf32>
    %14 = arith.subf %8, %13 : vector<72x16xf32>
    %15 = arith.mulf %14, %14 : vector<72x16xf32>
    %cst_9 = arith.constant dense<0.000000e+00> : vector<16xf32>
    %16 = vector.multi_reduction <add>, %15, %cst_9 [0] : vector<72x16xf32> to vector<16xf32>
    %17 = vector.shape_cast %16 : vector<16xf32> to vector<1x16xf32>
    %cst_10 = arith.constant 7.200000e+01 : f32
    %18 = vector.broadcast %cst_10 : f32 to vector<1x16xf32>
    %19 = arith.divf %17, %18 : vector<1x16xf32>
    %cst_11 = arith.constant 9.99999997E-7 : f32
    %20 = vector.broadcast %cst_11 : f32 to vector<1x16xf32>
    %21 = arith.addf %19, %20 : vector<1x16xf32>
    %22 = math.rsqrt %21 : vector<1x16xf32>
    %23 = vector.broadcast %22 : vector<1x16xf32> to vector<72x16xf32>
    %24 = arith.mulf %14, %23 : vector<72x16xf32>
    %c0_12 = arith.constant 0 : index
    %c0_13 = arith.constant 0 : index
    %c0_14 = arith.constant 0 : index
    %25 = vector.load %arg5[%c0_12, %c0_13, %c0_14] : memref<2x72x1xf32, #tpu.memory_space<vmem>>, vector<1x72x1xf32>
    %26 = vector.shape_cast %25 : vector<1x72x1xf32> to vector<72x1xf32>
    %27 = vector.broadcast %26 : vector<72x1xf32> to vector<72x16xf32>
    %28 = arith.mulf %24, %27 : vector<72x16xf32>
    %c0_15 = arith.constant 0 : index
    %c0_16 = arith.constant 0 : index
    %c0_17 = arith.constant 0 : index
    %29 = vector.load %arg6[%c0_15, %c0_16, %c0_17] : memref<2x72x1xf32, #tpu.memory_space<vmem>>, vector<1x72x1xf32>
    %30 = vector.shape_cast %29 : vector<1x72x1xf32> to vector<72x1xf32>
    %31 = vector.broadcast %30 : vector<72x1xf32> to vector<72x16xf32>
    %32 = arith.addf %28, %31 : vector<72x16xf32>
    %cst_18 = arith.constant 5.000000e-01 : f32
    %33 = vector.broadcast %cst_18 : f32 to vector<72x16xf32>
    %34 = arith.mulf %33, %32 : vector<72x16xf32>
    %cst_19 = arith.constant 4.471500e-02 : f32
    %35 = vector.broadcast %cst_19 : f32 to vector<72x16xf32>
    %36 = arith.mulf %35, %32 : vector<72x16xf32>
    %37 = arith.mulf %36, %32 : vector<72x16xf32>
    %38 = arith.mulf %37, %32 : vector<72x16xf32>
    %39 = arith.addf %32, %38 : vector<72x16xf32>
    %cst_20 = arith.constant 0.797884583 : f32
    %40 = vector.broadcast %cst_20 : f32 to vector<72x16xf32>
    %41 = arith.mulf %40, %39 : vector<72x16xf32>
    %42 = math.tanh %41 : vector<72x16xf32>
    %cst_21 = arith.constant 1.000000e+00 : f32
    %43 = vector.broadcast %cst_21 : f32 to vector<72x16xf32>
    %44 = arith.addf %43, %42 : vector<72x16xf32>
    %45 = arith.mulf %34, %44 : vector<72x16xf32>
    %46 = arith.truncf %45 : vector<72x16xf32> to vector<72x16xbf16>
    %c0_22 = arith.constant 0 : index
    %c0_23 = arith.constant 0 : index
    %c0_24 = arith.constant 0 : index
    %c0_25 = arith.constant 0 : index
    %47 = vector.load %arg7[%c0_22, %c0_23, %c0_24, %c0_25] : memref<2x1x72x16xbf16, #tpu.memory_space<vmem>>, vector<1x1x72x16xbf16>
    %48 = vector.shape_cast %47 : vector<1x1x72x16xbf16> to vector<72x16xbf16>
    %49 = vector.shape_cast %46 : vector<72x16xbf16> to vector<1x1x72x16xbf16>
    tpu.vector_store %arg7[%c0_22, %c0_23, %c0_24, %c0_25], %49 {strides = array<i32>} : memref<2x1x72x16xbf16, #tpu.memory_space<vmem>>, vector<1x1x72x16xbf16>,
    %50 = vector.extract_strided_slice %3 {offsets = [72, 0], sizes = [72, 16], strides = [1, 1]} : vector<144x16xf32> to vector<72x16xf32>
    %c1 = arith.constant 1 : index
    %c0_26 = arith.constant 0 : index
    %c0_27 = arith.constant 0 : index
    %51 = vector.load %arg4[%c1, %c0_26, %c0_27] : memref<2x72x1xf32, #tpu.memory_space<vmem>>, vector<1x72x1xf32>
    %52 = vector.shape_cast %51 : vector<1x72x1xf32> to vector<72x1xf32>
    %53 = vector.broadcast %52 : vector<72x1xf32> to vector<72x16xf32>
    %54 = arith.addf %50, %53 : vector<72x16xf32>
    %cst_28 = arith.constant dense<0.000000e+00> : vector<16xf32>
    %55 = vector.multi_reduction <add>, %54, %cst_28 [0] : vector<72x16xf32> to vector<16xf32>
    %56 = vector.shape_cast %55 : vector<16xf32> to vector<1x16xf32>
    %cst_29 = arith.constant 7.200000e+01 : f32
    %57 = vector.broadcast %cst_29 : f32 to vector<1x16xf32>
    %58 = arith.divf %56, %57 : vector<1x16xf32>
    %59 = vector.broadcast %58 : vector<1x16xf32> to vector<72x16xf32>
    %60 = arith.subf %54, %59 : vector<72x16xf32>
    %61 = arith.mulf %60, %60 : vector<72x16xf32>
    %cst_30 = arith.constant dense<0.000000e+00> : vector<16xf32>
    %62 = vector.multi_reduction <add>, %61, %cst_30 [0] : vector<72x16xf32> to vector<16xf32>
    %63 = vector.shape_cast %62 : vector<16xf32> to vector<1x16xf32>
    %cst_31 = arith.constant 7.200000e+01 : f32
    %64 = vector.broadcast %cst_31 : f32 to vector<1x16xf32>
    %65 = arith.divf %63, %64 : vector<1x16xf32>
    %cst_32 = arith.constant 9.99999997E-7 : f32
    %66 = vector.broadcast %cst_32 : f32 to vector<1x16xf32>
    %67 = arith.addf %65, %66 : vector<1x16xf32>
    %68 = math.rsqrt %67 : vector<1x16xf32>
    %69 = vector.broadcast %68 : vector<1x16xf32> to vector<72x16xf32>
    %70 = arith.mulf %60, %69 : vector<72x16xf32>
    %c1_33 = arith.constant 1 : index
    %c0_34 = arith.constant 0 : index
    %c0_35 = arith.constant 0 : index
    %71 = vector.load %arg5[%c1_33, %c0_34, %c0_35] : memref<2x72x1xf32, #tpu.memory_space<vmem>>, vector<1x72x1xf32>
    %72 = vector.shape_cast %71 : vector<1x72x1xf32> to vector<72x1xf32>
    %73 = vector.broadcast %72 : vector<72x1xf32> to vector<72x16xf32>
    %74 = arith.mulf %70, %73 : vector<72x16xf32>
    %c1_36 = arith.constant 1 : index
    %c0_37 = arith.constant 0 : index
    %c0_38 = arith.constant 0 : index
    %75 = vector.load %arg6[%c1_36, %c0_37, %c0_38] : memref<2x72x1xf32, #tpu.memory_space<vmem>>, vector<1x72x1xf32>
    %76 = vector.shape_cast %75 : vector<1x72x1xf32> to vector<72x1xf32>
    %77 = vector.broadcast %76 : vector<72x1xf32> to vector<72x16xf32>
    %78 = arith.addf %74, %77 : vector<72x16xf32>
    %79 = arith.truncf %78 : vector<72x16xf32> to vector<72x16xbf16>
    %c1_39 = arith.constant 1 : index
    %c0_40 = arith.constant 0 : index
    %c0_41 = arith.constant 0 : index
    %c0_42 = arith.constant 0 : index
    %80 = vector.load %arg7[%c1_39, %c0_40, %c0_41, %c0_42] : memref<2x1x72x16xbf16, #tpu.memory_space<vmem>>, vector<1x1x72x16xbf16>
    %81 = vector.shape_cast %80 : vector<1x1x72x16xbf16> to vector<72x16xbf16>
    %82 = vector.shape_cast %79 : vector<72x16xbf16> to vector<1x1x72x16xbf16>
    tpu.vector_store %arg7[%c1_39, %c0_40, %c0_41, %c0_42], %82 {strides = array<i32>} : memref<2x1x72x16xbf16, #tpu.memory_space<vmem>>, vector<1x1x72x16xbf16>,
    return
  }
  func.func @transform_0(%arg0: i32, %arg1: i32) -> (i32, i32, i32) {
    %c0_i32 = arith.constant 0 : i32
    %c0_i32_0 = arith.constant 0 : i32
    return %arg0, %c0_i32, %arg1 : i32, i32, i32
  }
  func.func @transform_1(%arg0: i32, %arg1: i32) -> (i32, i32) {
    %c0_i32 = arith.constant 0 : i32
    %c0_i32_0 = arith.constant 0 : i32
    %c0_i32_1 = arith.constant 0 : i32
    return %c0_i32, %c0_i32_0 : i32, i32
  }
  func.func @transform_2(%arg0: i32, %arg1: i32) -> (i32, i32, i32) {
    %c0_i32 = arith.constant 0 : i32
    %c0_i32_0 = arith.constant 0 : i32
    %c0_i32_1 = arith.constant 0 : i32
    %c0_i32_2 = arith.constant 0 : i32
    return %c0_i32, %c0_i32_0, %c0_i32_1 : i32, i32, i32
  }
  func.func @transform_3(%arg0: i32, %arg1: i32) -> (i32, i32, i32) {
    %c0_i32 = arith.constant 0 : i32
    %c0_i32_0 = arith.constant 0 : i32
    %c0_i32_1 = arith.constant 0 : i32
    %c0_i32_2 = arith.constant 0 : i32
    return %c0_i32, %c0_i32_0, %c0_i32_1 : i32, i32, i32
  }
  func.func @transform_4(%arg0: i32, %arg1: i32) -> (i32, i32, i32) {
    %c0_i32 = arith.constant 0 : i32
    %c0_i32_0 = arith.constant 0 : i32
    %c0_i32_1 = arith.constant 0 : i32
    %c0_i32_2 = arith.constant 0 : i32
    return %c0_i32, %c0_i32_0, %c0_i32_1 : i32, i32, i32
  }
  func.func @transform_5(%arg0: i32, %arg1: i32) -> (i32, i32, i32, i32) {
    %c0_i32 = arith.constant 0 : i32
    %c0_i32_0 = arith.constant 0 : i32
    %c0_i32_1 = arith.constant 0 : i32
    return %c0_i32, %arg0, %c0_i32_0, %arg1 : i32, i32, i32, i32
  }
}

module attributes {stable_mosaic.version = 11 : i64} {
  func.func @_dual_stage_kernel(%arg0: i32, %arg1: i32, %arg2: memref<2x1x72x64xbf16, #tpu.memory_space<vmem>>, %arg3: memref<1x72x64xbf16, #tpu.memory_space<vmem>>, %arg4: memref<2x40x72xbf16, #tpu.memory_space<vmem>>, %arg5: memref<2x40x1xf32, #tpu.memory_space<vmem>>, %arg6: memref<2x40x1xf32, #tpu.memory_space<vmem>>, %arg7: memref<2x40x1xf32, #tpu.memory_space<vmem>>, %arg8: memref<2x1x40x64xbf16, #tpu.memory_space<vmem>>) attributes {dimension_semantics = [#tpu.dimension_semantics<parallel>, #tpu.dimension_semantics<parallel>], iteration_bounds = array<i64: 2, 1>, scalar_prefetch = 0 : i64, scratch_operands = 0 : i64, tpu.core_type = #tpu.core_type<tc>, window_params = [{transform_indices = @transform_0, window_bounds = array<i64: 2, 1, 72, 64>}, {transform_indices = @transform_1, window_bounds = array<i64: 1, 72, 64>}, {pipeline_mode = #tpu.pipeline_mode<synchronous>, transform_indices = @transform_2, window_bounds = array<i64: 2, 40, 72>}, {pipeline_mode = #tpu.pipeline_mode<synchronous>, transform_indices = @transform_3, window_bounds = array<i64: 2, 40, 1>}, {pipeline_mode = #tpu.pipeline_mode<synchronous>, transform_indices = @transform_4, window_bounds = array<i64: 2, 40, 1>}, {pipeline_mode = #tpu.pipeline_mode<synchronous>, transform_indices = @transform_5, window_bounds = array<i64: 2, 40, 1>}, {transform_indices = @transform_6, window_bounds = array<i64: 2, 1, 40, 64>}]} {
    %c0 = arith.constant 0 : index
    %c0_0 = arith.constant 0 : index
    %c0_1 = arith.constant 0 : index
    %0 = vector.load %arg3[%c0, %c0_0, %c0_1] : memref<1x72x64xbf16, #tpu.memory_space<vmem>>, vector<1x72x64xbf16>
    %1 = vector.shape_cast %0 : vector<1x72x64xbf16> to vector<72x64xbf16>
    %c0_2 = arith.constant 0 : index
    %c0_3 = arith.constant 0 : index
    %c0_4 = arith.constant 0 : index
    %c0_5 = arith.constant 0 : index
    %2 = vector.load %arg2[%c0_2, %c0_3, %c0_4, %c0_5] : memref<2x1x72x64xbf16, #tpu.memory_space<vmem>>, vector<1x1x72x64xbf16>
    %3 = vector.shape_cast %2 : vector<1x1x72x64xbf16> to vector<72x64xbf16>
    %4 = arith.mulf %3, %1 : vector<72x64xbf16>
    %c0_6 = arith.constant 0 : index
    %c0_7 = arith.constant 0 : index
    %c0_8 = arith.constant 0 : index
    %5 = vector.load %arg4[%c0_6, %c0_7, %c0_8] : memref<2x40x72xbf16, #tpu.memory_space<vmem>>, vector<1x40x72xbf16>
    %6 = vector.shape_cast %5 : vector<1x40x72xbf16> to vector<40x72xbf16>
    %cst = arith.constant dense<0.000000e+00> : vector<40x64xf32>
    %7 = tpu.matmul %6, %4, %cst {dimension_numbers = #tpu.dot_dimension_numbers<[1], [0], [0], [1], [0, 0, 1, 1], [], []>} : vector<40x72xbf16>, vector<72x64xbf16>, vector<40x64xf32> -> vector<40x64xf32>
    %c0_9 = arith.constant 0 : index
    %c0_10 = arith.constant 0 : index
    %c0_11 = arith.constant 0 : index
    %8 = vector.load %arg5[%c0_9, %c0_10, %c0_11] : memref<2x40x1xf32, #tpu.memory_space<vmem>>, vector<1x40x1xf32>
    %9 = vector.shape_cast %8 : vector<1x40x1xf32> to vector<40x1xf32>
    %10 = vector.broadcast %9 : vector<40x1xf32> to vector<40x64xf32>
    %11 = arith.addf %7, %10 : vector<40x64xf32>
    %cst_12 = arith.constant dense<0.000000e+00> : vector<64xf32>
    %12 = vector.multi_reduction <add>, %11, %cst_12 [0] : vector<40x64xf32> to vector<64xf32>
    %13 = vector.shape_cast %12 : vector<64xf32> to vector<1x64xf32>
    %cst_13 = arith.constant 4.000000e+01 : f32
    %14 = vector.broadcast %cst_13 : f32 to vector<1x64xf32>
    %15 = arith.divf %13, %14 : vector<1x64xf32>
    %16 = vector.broadcast %15 : vector<1x64xf32> to vector<40x64xf32>
    %17 = arith.subf %11, %16 : vector<40x64xf32>
    %18 = arith.mulf %17, %17 : vector<40x64xf32>
    %cst_14 = arith.constant dense<0.000000e+00> : vector<64xf32>
    %19 = vector.multi_reduction <add>, %18, %cst_14 [0] : vector<40x64xf32> to vector<64xf32>
    %20 = vector.shape_cast %19 : vector<64xf32> to vector<1x64xf32>
    %cst_15 = arith.constant 4.000000e+01 : f32
    %21 = vector.broadcast %cst_15 : f32 to vector<1x64xf32>
    %22 = arith.divf %20, %21 : vector<1x64xf32>
    %cst_16 = arith.constant 9.99999997E-7 : f32
    %23 = vector.broadcast %cst_16 : f32 to vector<1x64xf32>
    %24 = arith.addf %22, %23 : vector<1x64xf32>
    %25 = math.rsqrt %24 : vector<1x64xf32>
    %26 = vector.broadcast %25 : vector<1x64xf32> to vector<40x64xf32>
    %27 = arith.mulf %17, %26 : vector<40x64xf32>
    %c0_17 = arith.constant 0 : index
    %c0_18 = arith.constant 0 : index
    %c0_19 = arith.constant 0 : index
    %28 = vector.load %arg6[%c0_17, %c0_18, %c0_19] : memref<2x40x1xf32, #tpu.memory_space<vmem>>, vector<1x40x1xf32>
    %29 = vector.shape_cast %28 : vector<1x40x1xf32> to vector<40x1xf32>
    %30 = vector.broadcast %29 : vector<40x1xf32> to vector<40x64xf32>
    %31 = arith.mulf %27, %30 : vector<40x64xf32>
    %c0_20 = arith.constant 0 : index
    %c0_21 = arith.constant 0 : index
    %c0_22 = arith.constant 0 : index
    %32 = vector.load %arg7[%c0_20, %c0_21, %c0_22] : memref<2x40x1xf32, #tpu.memory_space<vmem>>, vector<1x40x1xf32>
    %33 = vector.shape_cast %32 : vector<1x40x1xf32> to vector<40x1xf32>
    %34 = vector.broadcast %33 : vector<40x1xf32> to vector<40x64xf32>
    %35 = arith.addf %31, %34 : vector<40x64xf32>
    %cst_23 = arith.constant 5.000000e-01 : f32
    %36 = vector.broadcast %cst_23 : f32 to vector<40x64xf32>
    %37 = arith.mulf %36, %35 : vector<40x64xf32>
    %cst_24 = arith.constant 4.471500e-02 : f32
    %38 = vector.broadcast %cst_24 : f32 to vector<40x64xf32>
    %39 = arith.mulf %38, %35 : vector<40x64xf32>
    %40 = arith.mulf %39, %35 : vector<40x64xf32>
    %41 = arith.mulf %40, %35 : vector<40x64xf32>
    %42 = arith.addf %35, %41 : vector<40x64xf32>
    %cst_25 = arith.constant 0.797884583 : f32
    %43 = vector.broadcast %cst_25 : f32 to vector<40x64xf32>
    %44 = arith.mulf %43, %42 : vector<40x64xf32>
    %45 = math.tanh %44 : vector<40x64xf32>
    %cst_26 = arith.constant 1.000000e+00 : f32
    %46 = vector.broadcast %cst_26 : f32 to vector<40x64xf32>
    %47 = arith.addf %46, %45 : vector<40x64xf32>
    %48 = arith.mulf %37, %47 : vector<40x64xf32>
    %49 = arith.truncf %48 : vector<40x64xf32> to vector<40x64xbf16>
    %c0_27 = arith.constant 0 : index
    %c0_28 = arith.constant 0 : index
    %c0_29 = arith.constant 0 : index
    %c0_30 = arith.constant 0 : index
    %50 = vector.load %arg8[%c0_27, %c0_28, %c0_29, %c0_30] : memref<2x1x40x64xbf16, #tpu.memory_space<vmem>>, vector<1x1x40x64xbf16>
    %51 = vector.shape_cast %50 : vector<1x1x40x64xbf16> to vector<40x64xbf16>
    %52 = vector.shape_cast %49 : vector<40x64xbf16> to vector<1x1x40x64xbf16>
    tpu.vector_store %arg8[%c0_27, %c0_28, %c0_29, %c0_30], %52 {strides = array<i32>} : memref<2x1x40x64xbf16, #tpu.memory_space<vmem>>, vector<1x1x40x64xbf16>,
    %c1 = arith.constant 1 : index
    %c0_31 = arith.constant 0 : index
    %c0_32 = arith.constant 0 : index
    %c0_33 = arith.constant 0 : index
    %53 = vector.load %arg2[%c1, %c0_31, %c0_32, %c0_33] : memref<2x1x72x64xbf16, #tpu.memory_space<vmem>>, vector<1x1x72x64xbf16>
    %54 = vector.shape_cast %53 : vector<1x1x72x64xbf16> to vector<72x64xbf16>
    %55 = arith.mulf %54, %1 : vector<72x64xbf16>
    %c1_34 = arith.constant 1 : index
    %c0_35 = arith.constant 0 : index
    %c0_36 = arith.constant 0 : index
    %56 = vector.load %arg4[%c1_34, %c0_35, %c0_36] : memref<2x40x72xbf16, #tpu.memory_space<vmem>>, vector<1x40x72xbf16>
    %57 = vector.shape_cast %56 : vector<1x40x72xbf16> to vector<40x72xbf16>
    %cst_37 = arith.constant dense<0.000000e+00> : vector<40x64xf32>
    %58 = tpu.matmul %57, %55, %cst_37 {dimension_numbers = #tpu.dot_dimension_numbers<[1], [0], [0], [1], [0, 0, 1, 1], [], []>} : vector<40x72xbf16>, vector<72x64xbf16>, vector<40x64xf32> -> vector<40x64xf32>
    %c1_38 = arith.constant 1 : index
    %c0_39 = arith.constant 0 : index
    %c0_40 = arith.constant 0 : index
    %59 = vector.load %arg5[%c1_38, %c0_39, %c0_40] : memref<2x40x1xf32, #tpu.memory_space<vmem>>, vector<1x40x1xf32>
    %60 = vector.shape_cast %59 : vector<1x40x1xf32> to vector<40x1xf32>
    %61 = vector.broadcast %60 : vector<40x1xf32> to vector<40x64xf32>
    %62 = arith.addf %58, %61 : vector<40x64xf32>
    %cst_41 = arith.constant dense<0.000000e+00> : vector<64xf32>
    %63 = vector.multi_reduction <add>, %62, %cst_41 [0] : vector<40x64xf32> to vector<64xf32>
    %64 = vector.shape_cast %63 : vector<64xf32> to vector<1x64xf32>
    %cst_42 = arith.constant 4.000000e+01 : f32
    %65 = vector.broadcast %cst_42 : f32 to vector<1x64xf32>
    %66 = arith.divf %64, %65 : vector<1x64xf32>
    %67 = vector.broadcast %66 : vector<1x64xf32> to vector<40x64xf32>
    %68 = arith.subf %62, %67 : vector<40x64xf32>
    %69 = arith.mulf %68, %68 : vector<40x64xf32>
    %cst_43 = arith.constant dense<0.000000e+00> : vector<64xf32>
    %70 = vector.multi_reduction <add>, %69, %cst_43 [0] : vector<40x64xf32> to vector<64xf32>
    %71 = vector.shape_cast %70 : vector<64xf32> to vector<1x64xf32>
    %cst_44 = arith.constant 4.000000e+01 : f32
    %72 = vector.broadcast %cst_44 : f32 to vector<1x64xf32>
    %73 = arith.divf %71, %72 : vector<1x64xf32>
    %cst_45 = arith.constant 9.99999997E-7 : f32
    %74 = vector.broadcast %cst_45 : f32 to vector<1x64xf32>
    %75 = arith.addf %73, %74 : vector<1x64xf32>
    %76 = math.rsqrt %75 : vector<1x64xf32>
    %77 = vector.broadcast %76 : vector<1x64xf32> to vector<40x64xf32>
    %78 = arith.mulf %68, %77 : vector<40x64xf32>
    %c1_46 = arith.constant 1 : index
    %c0_47 = arith.constant 0 : index
    %c0_48 = arith.constant 0 : index
    %79 = vector.load %arg6[%c1_46, %c0_47, %c0_48] : memref<2x40x1xf32, #tpu.memory_space<vmem>>, vector<1x40x1xf32>
    %80 = vector.shape_cast %79 : vector<1x40x1xf32> to vector<40x1xf32>
    %81 = vector.broadcast %80 : vector<40x1xf32> to vector<40x64xf32>
    %82 = arith.mulf %78, %81 : vector<40x64xf32>
    %c1_49 = arith.constant 1 : index
    %c0_50 = arith.constant 0 : index
    %c0_51 = arith.constant 0 : index
    %83 = vector.load %arg7[%c1_49, %c0_50, %c0_51] : memref<2x40x1xf32, #tpu.memory_space<vmem>>, vector<1x40x1xf32>
    %84 = vector.shape_cast %83 : vector<1x40x1xf32> to vector<40x1xf32>
    %85 = vector.broadcast %84 : vector<40x1xf32> to vector<40x64xf32>
    %86 = arith.addf %82, %85 : vector<40x64xf32>
    %87 = arith.truncf %86 : vector<40x64xf32> to vector<40x64xbf16>
    %c1_52 = arith.constant 1 : index
    %c0_53 = arith.constant 0 : index
    %c0_54 = arith.constant 0 : index
    %c0_55 = arith.constant 0 : index
    %88 = vector.load %arg8[%c1_52, %c0_53, %c0_54, %c0_55] : memref<2x1x40x64xbf16, #tpu.memory_space<vmem>>, vector<1x1x40x64xbf16>
    %89 = vector.shape_cast %88 : vector<1x1x40x64xbf16> to vector<40x64xbf16>
    %90 = vector.shape_cast %87 : vector<40x64xbf16> to vector<1x1x40x64xbf16>
    tpu.vector_store %arg8[%c1_52, %c0_53, %c0_54, %c0_55], %90 {strides = array<i32>} : memref<2x1x40x64xbf16, #tpu.memory_space<vmem>>, vector<1x1x40x64xbf16>,
    return
  }
  func.func @transform_0(%arg0: i32, %arg1: i32) -> (i32, i32, i32, i32) {
    %c0_i32 = arith.constant 0 : i32
    %c0_i32_0 = arith.constant 0 : i32
    %c0_i32_1 = arith.constant 0 : i32
    return %c0_i32, %arg0, %c0_i32_0, %arg1 : i32, i32, i32, i32
  }
  func.func @transform_1(%arg0: i32, %arg1: i32) -> (i32, i32, i32) {
    %c0_i32 = arith.constant 0 : i32
    %c0_i32_0 = arith.constant 0 : i32
    return %arg0, %c0_i32, %arg1 : i32, i32, i32
  }
  func.func @transform_2(%arg0: i32, %arg1: i32) -> (i32, i32, i32) {
    %c0_i32 = arith.constant 0 : i32
    %c0_i32_0 = arith.constant 0 : i32
    %c0_i32_1 = arith.constant 0 : i32
    %c0_i32_2 = arith.constant 0 : i32
    return %c0_i32, %c0_i32_0, %c0_i32_1 : i32, i32, i32
  }
  func.func @transform_3(%arg0: i32, %arg1: i32) -> (i32, i32, i32) {
    %c0_i32 = arith.constant 0 : i32
    %c0_i32_0 = arith.constant 0 : i32
    %c0_i32_1 = arith.constant 0 : i32
    %c0_i32_2 = arith.constant 0 : i32
    return %c0_i32, %c0_i32_0, %c0_i32_1 : i32, i32, i32
  }
  func.func @transform_4(%arg0: i32, %arg1: i32) -> (i32, i32, i32) {
    %c0_i32 = arith.constant 0 : i32
    %c0_i32_0 = arith.constant 0 : i32
    %c0_i32_1 = arith.constant 0 : i32
    %c0_i32_2 = arith.constant 0 : i32
    return %c0_i32, %c0_i32_0, %c0_i32_1 : i32, i32, i32
  }
  func.func @transform_5(%arg0: i32, %arg1: i32) -> (i32, i32, i32) {
    %c0_i32 = arith.constant 0 : i32
    %c0_i32_0 = arith.constant 0 : i32
    %c0_i32_1 = arith.constant 0 : i32
    %c0_i32_2 = arith.constant 0 : i32
    return %c0_i32, %c0_i32_0, %c0_i32_1 : i32, i32, i32
  }
  func.func @transform_6(%arg0: i32, %arg1: i32) -> (i32, i32, i32, i32) {
    %c0_i32 = arith.constant 0 : i32
    %c0_i32_0 = arith.constant 0 : i32
    %c0_i32_1 = arith.constant 0 : i32
    return %c0_i32, %arg0, %c0_i32_0, %arg1 : i32, i32, i32, i32
  }
}

module attributes {stable_mosaic.version = 11 : i64} {
  func.func @_dual_stage_kernel(%arg0: i32, %arg1: i32, %arg2: memref<2x1x40x256xbf16, #tpu.memory_space<vmem>>, %arg3: memref<1x40x256xbf16, #tpu.memory_space<vmem>>, %arg4: memref<2x24x40xbf16, #tpu.memory_space<vmem>>, %arg5: memref<2x24x1xf32, #tpu.memory_space<vmem>>, %arg6: memref<2x24x1xf32, #tpu.memory_space<vmem>>, %arg7: memref<2x24x1xf32, #tpu.memory_space<vmem>>, %arg8: memref<2x1x24x256xbf16, #tpu.memory_space<vmem>>) attributes {dimension_semantics = [#tpu.dimension_semantics<parallel>, #tpu.dimension_semantics<parallel>], iteration_bounds = array<i64: 2, 1>, scalar_prefetch = 0 : i64, scratch_operands = 0 : i64, tpu.core_type = #tpu.core_type<tc>, window_params = [{transform_indices = @transform_0, window_bounds = array<i64: 2, 1, 40, 256>}, {transform_indices = @transform_1, window_bounds = array<i64: 1, 40, 256>}, {pipeline_mode = #tpu.pipeline_mode<synchronous>, transform_indices = @transform_2, window_bounds = array<i64: 2, 24, 40>}, {pipeline_mode = #tpu.pipeline_mode<synchronous>, transform_indices = @transform_3, window_bounds = array<i64: 2, 24, 1>}, {pipeline_mode = #tpu.pipeline_mode<synchronous>, transform_indices = @transform_4, window_bounds = array<i64: 2, 24, 1>}, {pipeline_mode = #tpu.pipeline_mode<synchronous>, transform_indices = @transform_5, window_bounds = array<i64: 2, 24, 1>}, {transform_indices = @transform_6, window_bounds = array<i64: 2, 1, 24, 256>}]} {
    %c0 = arith.constant 0 : index
    %c0_0 = arith.constant 0 : index
    %c0_1 = arith.constant 0 : index
    %0 = vector.load %arg3[%c0, %c0_0, %c0_1] : memref<1x40x256xbf16, #tpu.memory_space<vmem>>, vector<1x40x256xbf16>
    %1 = vector.shape_cast %0 : vector<1x40x256xbf16> to vector<40x256xbf16>
    %c0_2 = arith.constant 0 : index
    %c0_3 = arith.constant 0 : index
    %c0_4 = arith.constant 0 : index
    %c0_5 = arith.constant 0 : index
    %2 = vector.load %arg2[%c0_2, %c0_3, %c0_4, %c0_5] : memref<2x1x40x256xbf16, #tpu.memory_space<vmem>>, vector<1x1x40x256xbf16>
    %3 = vector.shape_cast %2 : vector<1x1x40x256xbf16> to vector<40x256xbf16>
    %4 = arith.mulf %3, %1 : vector<40x256xbf16>
    %c0_6 = arith.constant 0 : index
    %c0_7 = arith.constant 0 : index
    %c0_8 = arith.constant 0 : index
    %5 = vector.load %arg4[%c0_6, %c0_7, %c0_8] : memref<2x24x40xbf16, #tpu.memory_space<vmem>>, vector<1x24x40xbf16>
    %6 = vector.shape_cast %5 : vector<1x24x40xbf16> to vector<24x40xbf16>
    %cst = arith.constant dense<0.000000e+00> : vector<24x256xf32>
    %7 = tpu.matmul %6, %4, %cst {dimension_numbers = #tpu.dot_dimension_numbers<[1], [0], [0], [1], [0, 0, 1, 1], [], []>} : vector<24x40xbf16>, vector<40x256xbf16>, vector<24x256xf32> -> vector<24x256xf32>
    %c0_9 = arith.constant 0 : index
    %c0_10 = arith.constant 0 : index
    %c0_11 = arith.constant 0 : index
    %8 = vector.load %arg5[%c0_9, %c0_10, %c0_11] : memref<2x24x1xf32, #tpu.memory_space<vmem>>, vector<1x24x1xf32>
    %9 = vector.shape_cast %8 : vector<1x24x1xf32> to vector<24x1xf32>
    %10 = vector.broadcast %9 : vector<24x1xf32> to vector<24x256xf32>
    %11 = arith.addf %7, %10 : vector<24x256xf32>
    %cst_12 = arith.constant dense<0.000000e+00> : vector<256xf32>
    %12 = vector.multi_reduction <add>, %11, %cst_12 [0] : vector<24x256xf32> to vector<256xf32>
    %13 = vector.shape_cast %12 : vector<256xf32> to vector<1x256xf32>
    %cst_13 = arith.constant 2.400000e+01 : f32
    %14 = vector.broadcast %cst_13 : f32 to vector<1x256xf32>
    %15 = arith.divf %13, %14 : vector<1x256xf32>
    %16 = vector.broadcast %15 : vector<1x256xf32> to vector<24x256xf32>
    %17 = arith.subf %11, %16 : vector<24x256xf32>
    %18 = arith.mulf %17, %17 : vector<24x256xf32>
    %cst_14 = arith.constant dense<0.000000e+00> : vector<256xf32>
    %19 = vector.multi_reduction <add>, %18, %cst_14 [0] : vector<24x256xf32> to vector<256xf32>
    %20 = vector.shape_cast %19 : vector<256xf32> to vector<1x256xf32>
    %cst_15 = arith.constant 2.400000e+01 : f32
    %21 = vector.broadcast %cst_15 : f32 to vector<1x256xf32>
    %22 = arith.divf %20, %21 : vector<1x256xf32>
    %cst_16 = arith.constant 9.99999997E-7 : f32
    %23 = vector.broadcast %cst_16 : f32 to vector<1x256xf32>
    %24 = arith.addf %22, %23 : vector<1x256xf32>
    %25 = math.rsqrt %24 : vector<1x256xf32>
    %26 = vector.broadcast %25 : vector<1x256xf32> to vector<24x256xf32>
    %27 = arith.mulf %17, %26 : vector<24x256xf32>
    %c0_17 = arith.constant 0 : index
    %c0_18 = arith.constant 0 : index
    %c0_19 = arith.constant 0 : index
    %28 = vector.load %arg6[%c0_17, %c0_18, %c0_19] : memref<2x24x1xf32, #tpu.memory_space<vmem>>, vector<1x24x1xf32>
    %29 = vector.shape_cast %28 : vector<1x24x1xf32> to vector<24x1xf32>
    %30 = vector.broadcast %29 : vector<24x1xf32> to vector<24x256xf32>
    %31 = arith.mulf %27, %30 : vector<24x256xf32>
    %c0_20 = arith.constant 0 : index
    %c0_21 = arith.constant 0 : index
    %c0_22 = arith.constant 0 : index
    %32 = vector.load %arg7[%c0_20, %c0_21, %c0_22] : memref<2x24x1xf32, #tpu.memory_space<vmem>>, vector<1x24x1xf32>
    %33 = vector.shape_cast %32 : vector<1x24x1xf32> to vector<24x1xf32>
    %34 = vector.broadcast %33 : vector<24x1xf32> to vector<24x256xf32>
    %35 = arith.addf %31, %34 : vector<24x256xf32>
    %cst_23 = arith.constant 5.000000e-01 : f32
    %36 = vector.broadcast %cst_23 : f32 to vector<24x256xf32>
    %37 = arith.mulf %36, %35 : vector<24x256xf32>
    %cst_24 = arith.constant 4.471500e-02 : f32
    %38 = vector.broadcast %cst_24 : f32 to vector<24x256xf32>
    %39 = arith.mulf %38, %35 : vector<24x256xf32>
    %40 = arith.mulf %39, %35 : vector<24x256xf32>
    %41 = arith.mulf %40, %35 : vector<24x256xf32>
    %42 = arith.addf %35, %41 : vector<24x256xf32>
    %cst_25 = arith.constant 0.797884583 : f32
    %43 = vector.broadcast %cst_25 : f32 to vector<24x256xf32>
    %44 = arith.mulf %43, %42 : vector<24x256xf32>
    %45 = math.tanh %44 : vector<24x256xf32>
    %cst_26 = arith.constant 1.000000e+00 : f32
    %46 = vector.broadcast %cst_26 : f32 to vector<24x256xf32>
    %47 = arith.addf %46, %45 : vector<24x256xf32>
    %48 = arith.mulf %37, %47 : vector<24x256xf32>
    %49 = arith.truncf %48 : vector<24x256xf32> to vector<24x256xbf16>
    %c0_27 = arith.constant 0 : index
    %c0_28 = arith.constant 0 : index
    %c0_29 = arith.constant 0 : index
    %c0_30 = arith.constant 0 : index
    %50 = vector.load %arg8[%c0_27, %c0_28, %c0_29, %c0_30] : memref<2x1x24x256xbf16, #tpu.memory_space<vmem>>, vector<1x1x24x256xbf16>
    %51 = vector.shape_cast %50 : vector<1x1x24x256xbf16> to vector<24x256xbf16>
    %52 = vector.shape_cast %49 : vector<24x256xbf16> to vector<1x1x24x256xbf16>
    tpu.vector_store %arg8[%c0_27, %c0_28, %c0_29, %c0_30], %52 {strides = array<i32>} : memref<2x1x24x256xbf16, #tpu.memory_space<vmem>>, vector<1x1x24x256xbf16>,
    %c1 = arith.constant 1 : index
    %c0_31 = arith.constant 0 : index
    %c0_32 = arith.constant 0 : index
    %c0_33 = arith.constant 0 : index
    %53 = vector.load %arg2[%c1, %c0_31, %c0_32, %c0_33] : memref<2x1x40x256xbf16, #tpu.memory_space<vmem>>, vector<1x1x40x256xbf16>
    %54 = vector.shape_cast %53 : vector<1x1x40x256xbf16> to vector<40x256xbf16>
    %55 = arith.mulf %54, %1 : vector<40x256xbf16>
    %c1_34 = arith.constant 1 : index
    %c0_35 = arith.constant 0 : index
    %c0_36 = arith.constant 0 : index
    %56 = vector.load %arg4[%c1_34, %c0_35, %c0_36] : memref<2x24x40xbf16, #tpu.memory_space<vmem>>, vector<1x24x40xbf16>
    %57 = vector.shape_cast %56 : vector<1x24x40xbf16> to vector<24x40xbf16>
    %cst_37 = arith.constant dense<0.000000e+00> : vector<24x256xf32>
    %58 = tpu.matmul %57, %55, %cst_37 {dimension_numbers = #tpu.dot_dimension_numbers<[1], [0], [0], [1], [0, 0, 1, 1], [], []>} : vector<24x40xbf16>, vector<40x256xbf16>, vector<24x256xf32> -> vector<24x256xf32>
    %c1_38 = arith.constant 1 : index
    %c0_39 = arith.constant 0 : index
    %c0_40 = arith.constant 0 : index
    %59 = vector.load %arg5[%c1_38, %c0_39, %c0_40] : memref<2x24x1xf32, #tpu.memory_space<vmem>>, vector<1x24x1xf32>
    %60 = vector.shape_cast %59 : vector<1x24x1xf32> to vector<24x1xf32>
    %61 = vector.broadcast %60 : vector<24x1xf32> to vector<24x256xf32>
    %62 = arith.addf %58, %61 : vector<24x256xf32>
    %cst_41 = arith.constant dense<0.000000e+00> : vector<256xf32>
    %63 = vector.multi_reduction <add>, %62, %cst_41 [0] : vector<24x256xf32> to vector<256xf32>
    %64 = vector.shape_cast %63 : vector<256xf32> to vector<1x256xf32>
    %cst_42 = arith.constant 2.400000e+01 : f32
    %65 = vector.broadcast %cst_42 : f32 to vector<1x256xf32>
    %66 = arith.divf %64, %65 : vector<1x256xf32>
    %67 = vector.broadcast %66 : vector<1x256xf32> to vector<24x256xf32>
    %68 = arith.subf %62, %67 : vector<24x256xf32>
    %69 = arith.mulf %68, %68 : vector<24x256xf32>
    %cst_43 = arith.constant dense<0.000000e+00> : vector<256xf32>
    %70 = vector.multi_reduction <add>, %69, %cst_43 [0] : vector<24x256xf32> to vector<256xf32>
    %71 = vector.shape_cast %70 : vector<256xf32> to vector<1x256xf32>
    %cst_44 = arith.constant 2.400000e+01 : f32
    %72 = vector.broadcast %cst_44 : f32 to vector<1x256xf32>
    %73 = arith.divf %71, %72 : vector<1x256xf32>
    %cst_45 = arith.constant 9.99999997E-7 : f32
    %74 = vector.broadcast %cst_45 : f32 to vector<1x256xf32>
    %75 = arith.addf %73, %74 : vector<1x256xf32>
    %76 = math.rsqrt %75 : vector<1x256xf32>
    %77 = vector.broadcast %76 : vector<1x256xf32> to vector<24x256xf32>
    %78 = arith.mulf %68, %77 : vector<24x256xf32>
    %c1_46 = arith.constant 1 : index
    %c0_47 = arith.constant 0 : index
    %c0_48 = arith.constant 0 : index
    %79 = vector.load %arg6[%c1_46, %c0_47, %c0_48] : memref<2x24x1xf32, #tpu.memory_space<vmem>>, vector<1x24x1xf32>
    %80 = vector.shape_cast %79 : vector<1x24x1xf32> to vector<24x1xf32>
    %81 = vector.broadcast %80 : vector<24x1xf32> to vector<24x256xf32>
    %82 = arith.mulf %78, %81 : vector<24x256xf32>
    %c1_49 = arith.constant 1 : index
    %c0_50 = arith.constant 0 : index
    %c0_51 = arith.constant 0 : index
    %83 = vector.load %arg7[%c1_49, %c0_50, %c0_51] : memref<2x24x1xf32, #tpu.memory_space<vmem>>, vector<1x24x1xf32>
    %84 = vector.shape_cast %83 : vector<1x24x1xf32> to vector<24x1xf32>
    %85 = vector.broadcast %84 : vector<24x1xf32> to vector<24x256xf32>
    %86 = arith.addf %82, %85 : vector<24x256xf32>
    %87 = arith.truncf %86 : vector<24x256xf32> to vector<24x256xbf16>
    %c1_52 = arith.constant 1 : index
    %c0_53 = arith.constant 0 : index
    %c0_54 = arith.constant 0 : index
    %c0_55 = arith.constant 0 : index
    %88 = vector.load %arg8[%c1_52, %c0_53, %c0_54, %c0_55] : memref<2x1x24x256xbf16, #tpu.memory_space<vmem>>, vector<1x1x24x256xbf16>
    %89 = vector.shape_cast %88 : vector<1x1x24x256xbf16> to vector<24x256xbf16>
    %90 = vector.shape_cast %87 : vector<24x256xbf16> to vector<1x1x24x256xbf16>
    tpu.vector_store %arg8[%c1_52, %c0_53, %c0_54, %c0_55], %90 {strides = array<i32>} : memref<2x1x24x256xbf16, #tpu.memory_space<vmem>>, vector<1x1x24x256xbf16>,
    return
  }
  func.func @transform_0(%arg0: i32, %arg1: i32) -> (i32, i32, i32, i32) {
    %c0_i32 = arith.constant 0 : i32
    %c0_i32_0 = arith.constant 0 : i32
    %c0_i32_1 = arith.constant 0 : i32
    return %c0_i32, %arg0, %c0_i32_0, %arg1 : i32, i32, i32, i32
  }
  func.func @transform_1(%arg0: i32, %arg1: i32) -> (i32, i32, i32) {
    %c0_i32 = arith.constant 0 : i32
    %c0_i32_0 = arith.constant 0 : i32
    return %arg0, %c0_i32, %arg1 : i32, i32, i32
  }
  func.func @transform_2(%arg0: i32, %arg1: i32) -> (i32, i32, i32) {
    %c0_i32 = arith.constant 0 : i32
    %c0_i32_0 = arith.constant 0 : i32
    %c0_i32_1 = arith.constant 0 : i32
    %c0_i32_2 = arith.constant 0 : i32
    return %c0_i32, %c0_i32_0, %c0_i32_1 : i32, i32, i32
  }
  func.func @transform_3(%arg0: i32, %arg1: i32) -> (i32, i32, i32) {
    %c0_i32 = arith.constant 0 : i32
    %c0_i32_0 = arith.constant 0 : i32
    %c0_i32_1 = arith.constant 0 : i32
    %c0_i32_2 = arith.constant 0 : i32
    return %c0_i32, %c0_i32_0, %c0_i32_1 : i32, i32, i32
  }
  func.func @transform_4(%arg0: i32, %arg1: i32) -> (i32, i32, i32) {
    %c0_i32 = arith.constant 0 : i32
    %c0_i32_0 = arith.constant 0 : i32
    %c0_i32_1 = arith.constant 0 : i32
    %c0_i32_2 = arith.constant 0 : i32
    return %c0_i32, %c0_i32_0, %c0_i32_1 : i32, i32, i32
  }
  func.func @transform_5(%arg0: i32, %arg1: i32) -> (i32, i32, i32) {
    %c0_i32 = arith.constant 0 : i32
    %c0_i32_0 = arith.constant 0 : i32
    %c0_i32_1 = arith.constant 0 : i32
    %c0_i32_2 = arith.constant 0 : i32
    return %c0_i32, %c0_i32_0, %c0_i32_1 : i32, i32, i32
  }
  func.func @transform_6(%arg0: i32, %arg1: i32) -> (i32, i32, i32, i32) {
    %c0_i32 = arith.constant 0 : i32
    %c0_i32_0 = arith.constant 0 : i32
    %c0_i32_1 = arith.constant 0 : i32
    return %c0_i32, %arg0, %c0_i32_0, %arg1 : i32, i32, i32, i32
  }
}

module attributes {stable_mosaic.version = 11 : i64} {
  func.func @_dual_stage_kernel(%arg0: i32, %arg1: i32, %arg2: memref<2x1x24x1024xbf16, #tpu.memory_space<vmem>>, %arg3: memref<1x24x1024xbf16, #tpu.memory_space<vmem>>, %arg4: memref<2x12x24xbf16, #tpu.memory_space<vmem>>, %arg5: memref<2x12x1xf32, #tpu.memory_space<vmem>>, %arg6: memref<2x1x12x1024xbf16, #tpu.memory_space<vmem>>) attributes {dimension_semantics = [#tpu.dimension_semantics<parallel>, #tpu.dimension_semantics<parallel>], iteration_bounds = array<i64: 2, 1>, scalar_prefetch = 0 : i64, scratch_operands = 0 : i64, tpu.core_type = #tpu.core_type<tc>, window_params = [{transform_indices = @transform_0, window_bounds = array<i64: 2, 1, 24, 1024>}, {transform_indices = @transform_1, window_bounds = array<i64: 1, 24, 1024>}, {pipeline_mode = #tpu.pipeline_mode<synchronous>, transform_indices = @transform_2, window_bounds = array<i64: 2, 12, 24>}, {pipeline_mode = #tpu.pipeline_mode<synchronous>, transform_indices = @transform_3, window_bounds = array<i64: 2, 12, 1>}, {transform_indices = @transform_4, window_bounds = array<i64: 2, 1, 12, 1024>}]} {
    %c0 = arith.constant 0 : index
    %c0_0 = arith.constant 0 : index
    %c0_1 = arith.constant 0 : index
    %0 = vector.load %arg3[%c0, %c0_0, %c0_1] : memref<1x24x1024xbf16, #tpu.memory_space<vmem>>, vector<1x24x1024xbf16>
    %1 = vector.shape_cast %0 : vector<1x24x1024xbf16> to vector<24x1024xbf16>
    %c0_2 = arith.constant 0 : index
    %c0_3 = arith.constant 0 : index
    %c0_4 = arith.constant 0 : index
    %c0_5 = arith.constant 0 : index
    %2 = vector.load %arg2[%c0_2, %c0_3, %c0_4, %c0_5] : memref<2x1x24x1024xbf16, #tpu.memory_space<vmem>>, vector<1x1x24x1024xbf16>
    %3 = vector.shape_cast %2 : vector<1x1x24x1024xbf16> to vector<24x1024xbf16>
    %4 = arith.mulf %3, %1 : vector<24x1024xbf16>
    %c0_6 = arith.constant 0 : index
    %c0_7 = arith.constant 0 : index
    %c0_8 = arith.constant 0 : index
    %5 = vector.load %arg4[%c0_6, %c0_7, %c0_8] : memref<2x12x24xbf16, #tpu.memory_space<vmem>>, vector<1x12x24xbf16>
    %6 = vector.shape_cast %5 : vector<1x12x24xbf16> to vector<12x24xbf16>
    %cst = arith.constant dense<0.000000e+00> : vector<12x1024xf32>
    %7 = tpu.matmul %6, %4, %cst {dimension_numbers = #tpu.dot_dimension_numbers<[1], [0], [0], [1], [0, 0, 1, 1], [], []>} : vector<12x24xbf16>, vector<24x1024xbf16>, vector<12x1024xf32> -> vector<12x1024xf32>
    %c0_9 = arith.constant 0 : index
    %c0_10 = arith.constant 0 : index
    %c0_11 = arith.constant 0 : index
    %8 = vector.load %arg5[%c0_9, %c0_10, %c0_11] : memref<2x12x1xf32, #tpu.memory_space<vmem>>, vector<1x12x1xf32>
    %9 = vector.shape_cast %8 : vector<1x12x1xf32> to vector<12x1xf32>
    %10 = vector.broadcast %9 : vector<12x1xf32> to vector<12x1024xf32>
    %11 = arith.addf %7, %10 : vector<12x1024xf32>
    %12 = arith.truncf %11 : vector<12x1024xf32> to vector<12x1024xbf16>
    %c0_12 = arith.constant 0 : index
    %c0_13 = arith.constant 0 : index
    %c0_14 = arith.constant 0 : index
    %c0_15 = arith.constant 0 : index
    %13 = vector.load %arg6[%c0_12, %c0_13, %c0_14, %c0_15] : memref<2x1x12x1024xbf16, #tpu.memory_space<vmem>>, vector<1x1x12x1024xbf16>
    %14 = vector.shape_cast %13 : vector<1x1x12x1024xbf16> to vector<12x1024xbf16>
    %15 = vector.shape_cast %12 : vector<12x1024xbf16> to vector<1x1x12x1024xbf16>
    tpu.vector_store %arg6[%c0_12, %c0_13, %c0_14, %c0_15], %15 {strides = array<i32>} : memref<2x1x12x1024xbf16, #tpu.memory_space<vmem>>, vector<1x1x12x1024xbf16>,
    %c1 = arith.constant 1 : index
    %c0_16 = arith.constant 0 : index
    %c0_17 = arith.constant 0 : index
    %c0_18 = arith.constant 0 : index
    %16 = vector.load %arg2[%c1, %c0_16, %c0_17, %c0_18] : memref<2x1x24x1024xbf16, #tpu.memory_space<vmem>>, vector<1x1x24x1024xbf16>
    %17 = vector.shape_cast %16 : vector<1x1x24x1024xbf16> to vector<24x1024xbf16>
    %18 = arith.mulf %17, %1 : vector<24x1024xbf16>
    %c1_19 = arith.constant 1 : index
    %c0_20 = arith.constant 0 : index
    %c0_21 = arith.constant 0 : index
    %19 = vector.load %arg4[%c1_19, %c0_20, %c0_21] : memref<2x12x24xbf16, #tpu.memory_space<vmem>>, vector<1x12x24xbf16>
    %20 = vector.shape_cast %19 : vector<1x12x24xbf16> to vector<12x24xbf16>
    %cst_22 = arith.constant dense<0.000000e+00> : vector<12x1024xf32>
    %21 = tpu.matmul %20, %18, %cst_22 {dimension_numbers = #tpu.dot_dimension_numbers<[1], [0], [0], [1], [0, 0, 1, 1], [], []>} : vector<12x24xbf16>, vector<24x1024xbf16>, vector<12x1024xf32> -> vector<12x1024xf32>
    %c1_23 = arith.constant 1 : index
    %c0_24 = arith.constant 0 : index
    %c0_25 = arith.constant 0 : index
    %22 = vector.load %arg5[%c1_23, %c0_24, %c0_25] : memref<2x12x1xf32, #tpu.memory_space<vmem>>, vector<1x12x1xf32>
    %23 = vector.shape_cast %22 : vector<1x12x1xf32> to vector<12x1xf32>
    %24 = vector.broadcast %23 : vector<12x1xf32> to vector<12x1024xf32>
    %25 = arith.addf %21, %24 : vector<12x1024xf32>
    %26 = arith.truncf %25 : vector<12x1024xf32> to vector<12x1024xbf16>
    %c1_26 = arith.constant 1 : index
    %c0_27 = arith.constant 0 : index
    %c0_28 = arith.constant 0 : index
    %c0_29 = arith.constant 0 : index
    %27 = vector.load %arg6[%c1_26, %c0_27, %c0_28, %c0_29] : memref<2x1x12x1024xbf16, #tpu.memory_space<vmem>>, vector<1x1x12x1024xbf16>
    %28 = vector.shape_cast %27 : vector<1x1x12x1024xbf16> to vector<12x1024xbf16>
    %29 = vector.shape_cast %26 : vector<12x1024xbf16> to vector<1x1x12x1024xbf16>
    tpu.vector_store %arg6[%c1_26, %c0_27, %c0_28, %c0_29], %29 {strides = array<i32>} : memref<2x1x12x1024xbf16, #tpu.memory_space<vmem>>, vector<1x1x12x1024xbf16>,
    return
  }
  func.func @transform_0(%arg0: i32, %arg1: i32) -> (i32, i32, i32, i32) {
    %c0_i32 = arith.constant 0 : i32
    %c0_i32_0 = arith.constant 0 : i32
    %c0_i32_1 = arith.constant 0 : i32
    return %c0_i32, %arg0, %c0_i32_0, %arg1 : i32, i32, i32, i32
  }
  func.func @transform_1(%arg0: i32, %arg1: i32) -> (i32, i32, i32) {
    %c0_i32 = arith.constant 0 : i32
    %c0_i32_0 = arith.constant 0 : i32
    return %arg0, %c0_i32, %arg1 : i32, i32, i32
  }
  func.func @transform_2(%arg0: i32, %arg1: i32) -> (i32, i32, i32) {
    %c0_i32 = arith.constant 0 : i32
    %c0_i32_0 = arith.constant 0 : i32
    %c0_i32_1 = arith.constant 0 : i32
    %c0_i32_2 = arith.constant 0 : i32
    return %c0_i32, %c0_i32_0, %c0_i32_1 : i32, i32, i32
  }
  func.func @transform_3(%arg0: i32, %arg1: i32) -> (i32, i32, i32) {
    %c0_i32 = arith.constant 0 : i32
    %c0_i32_0 = arith.constant 0 : i32
    %c0_i32_1 = arith.constant 0 : i32
    %c0_i32_2 = arith.constant 0 : i32
    return %c0_i32, %c0_i32_0, %c0_i32_1 : i32, i32, i32
  }
  func.func @transform_4(%arg0: i32, %arg1: i32) -> (i32, i32, i32, i32) {
    %c0_i32 = arith.constant 0 : i32
    %c0_i32_0 = arith.constant 0 : i32
    %c0_i32_1 = arith.constant 0 : i32
    return %c0_i32, %arg0, %c0_i32_0, %arg1 : i32, i32, i32, i32
  }
}

</mosaic_0001>

<bundles_post_ra>
// kernel: decoder_forward.5
= control target key start
LH: loop header
LB: loop body
LE: loop exit
PB: predicated region body
PF: predicated region fallthrough
CT: control target
= control target key end

     0   :  { %s1550_s21 = smov 0   ;;  %s1552_s22 = smov 0   ;;  %s1962_s0 = inlined_call_operand.vmem [shape: bf16[2,2,72,64], index: 0, kind: input, shape index: {}]   ;;  %s1963_s1 = inlined_call_operand.vmem [shape: bf16[2,72,64], index: 1, kind: input, shape index: {}]   ;;  %s1964_s2 = inlined_call_operand.vmem [shape: bf16[2,40,72], index: 2, kind: input, shape index: {}]   ;;  %s1965_s3 = inlined_call_operand.vmem [shape: f32[2,40,1], index: 3, kind: input, shape index: {}]   ;;  %s1966_s4 = inlined_call_operand.vmem [shape: f32[2,40,1], index: 4, kind: input, shape index: {}]   ;;  %s1967_s5 = inlined_call_operand.vmem [shape: f32[2,40,1], index: 5, kind: input, shape index: {}]   ;;  %s1968_s6 = inlined_call_operand.vmem [shape: bf16[2,2,40,64], index: 6, kind: output, shape index: {}]  }
   0x1   :  { %s1554_s23 = smov 0   ;;  %s1556_s24 = smov 0  }
   0x2   :  { %s1558_s25 = smov 0  }
   0x3 LB: > { %s28_s26 = sadd.s32 1, %s1506_s24  ;;  %s1255_s27 = sadd.s32 4294967295, %s1510_s25   ;;  %s1510_s25 = sphi %s1558_s25, %s16_s25   ;;  %s1506_s24 = sphi %s1556_s24, %s1973_s24   ;;  %s1502_s23 = sphi %s1554_s23, %s1972_s23   ;;  %s1498_s22 = sphi %s1552_s22, %s1971_s22   ;;  %s1494_s21 = sphi %s1550_s21, %s1970_s21  }
   0x4   : > { %p30_p0 = scmp.ge.s32.totalorder %s28_s26, 2  ;;  %p44_p1 = scmp.ne.s32.totalorder %s1498_s22, %s1494_s21 }
   0x5   : > { %p45_p2 = scmp.eq.s32.totalorder %s1510_s25, 0  ;;  %p188_p4 = scmp.eq.s32.totalorder %s1255_s27, 1 }
   0x6   : > { %s1975_s26 = smov (%p30_p0, %s28_s26), 0  ;;  %s37_s29 = sadd.s32 1, %s1498_s22 }
   0x7   : > { %p46_p3 = por %p45_p2, %p44_p1  ;;  %s32_s28 = ssub.s32 %s1506_s24, %s1975_s26 }
   0x8   : > { %p35_p5 = scmp.eq.s32.totalorder %s32_s28, 0  ;;  %p1585_p6 = por %p188_p4, %p44_p1 }
   0x9   : > { %p1258_p7 = scmp.ge.s32.totalorder %s1510_s25, 2 }
   0xa   : > { %s1590_s7 = scalar_select %p35_p5, %s1498_s22, %s37_s29  }
   0xb   : > { %222 = sbr.rel (%p1258_p7) target bundleno = 28 (0x1c), region = 32 }
  0x12   : > { %225 = sbr.rel (!%p46_p3) target bundleno = 28 (0x1c), region = 36  ;;  %s227_s8 = sand.u32 (%p46_p3), 1, %s1498_s22  }
  0x13   : > { %s1402_s9 = smul.u32 (%p46_p3), 36, %s1506_s24 }
  0x14   : > { %s1401_s10 = smul.u32 (%p46_p3), 72, %s227_s8 }
  0x15   : > { %s233_s13 = scalar_lea.vmem (%p46_p3), %s1962_s0, %s1402_s9 }
  0x16   : > { %v249_v0 = vld [vmem:[%s233_s13] sm:$0xff] (%p46_p3)   ;;  %v253_v1 = vld [vmem:[%s233_s13 + $0x8] sm:$0xff] (%p46_p3)   ;;  %v257_v2 = vld [vmem:[%s233_s13 + $0x10] sm:$0xff] (%p46_p3)   ;;  %s229_s14 = scalar_lea.vmem (%p46_p3), [#allocation2], %s1401_s10 }
  0x17   : > { %250 = vst [vmem:[%s229_s14] sm:$0xff] (%p46_p3), %v249_v0   ;;  %254 = vst [vmem:[%s229_s14 + $0x8] sm:$0xff] (%p46_p3), %v253_v1   ;;  %v261_v3 = vld [vmem:[%s233_s13 + $0x18] sm:$0xff] (%p46_p3)   ;;  %v265_v4 = vld [vmem:[%s233_s13 + $0x20] sm:$0xf] (%p46_p3) }
  0x18   : > { %258 = vst [vmem:[%s229_s14 + $0x10] sm:$0xff] (%p46_p3), %v257_v2   ;;  %v267_v5 = vld [vmem:[%s233_s13 + $0x48] sm:$0xff] (%p46_p3)   ;;  %262 = vst [vmem:[%s229_s14 + $0x18] sm:$0xff] (%p46_p3), %v261_v3   ;;  %v271_v6 = vld [vmem:[%s233_s13 + $0x50] sm:$0xff] (%p46_p3)  }
  0x19   : > { %266 = vst [vmem:[%s229_s14 + $0x20] sm:$0xf] %v265_v4  ;;  %268 = vst [vmem:[%s229_s14 + $0x24] sm:$0xff] %v267_v5   ;;  %v275_v7 = vld [vmem:[%s233_s13 + $0x58] sm:$0xff]   ;;  %v279_v8 = vld [vmem:[%s233_s13 + $0x60] sm:$0xff]  }
  0x1a   : > { %272 = vst [vmem:[%s229_s14 + $0x2c] sm:$0xff] %v271_v6   ;;  %276 = vst [vmem:[%s229_s14 + $0x34] sm:$0xff] %v275_v7   ;;  %v283_v9 = vld [vmem:[%s233_s13 + $0x68] sm:$0xf] }
  0x1b   : > { %280 = vst [vmem:[%s229_s14 + $0x3c] sm:$0xff] %v279_v8   ;;  %284 = vst [vmem:[%s229_s14 + $0x44] sm:$0xf] %v283_v9 }
  0x1c PF: > { %p1260_p8 = scmp.ge.s32.totalorder %s1510_s25, 1  ;;  %p353_p9 = scmp.lt.s32.totalorder %s1510_s25, 3 }
  0x1e   : > { %p354_p10 = pnand %p1260_p8, %p353_p9 }
  0x1f   : > { %s360_s15 = sand.u32 (!%p354_p10), 1, %s1494_s21   ;;  %p396_p11 = scmp.lt.s32.totalorder (!%p354_p10), %s1502_s23, 1  ;;  %v1512_v10 = vmov (!%p354_p10), 0.0   ;;  %vm1513_vm0 = vmmov (!%p354_p10), 0   ;;  %v437_v60 = vld [vmem:[%s1965_s3] sm:$0xff] (!%p354_p10)  ;;  %v439_v61 = vld [vmem:[%s1965_s3 + $0x10] sm:$0xff] (!%p354_p10) }
  0x20   : > { %357 = sbr.rel (%p354_p10) target bundleno = 401 (0x191), region = 81  ;;  %1357 = vmatprep.subr.bf16.mxu0 (!%p354_p10), %v1512_v10  ;;  %1379 = vmatprep.subr.bf16.mxu1 (!%p354_p10), %v1512_v10  ;;  %v1514_v0 = vmov (!%p354_p10), 0   ;;  %v438_v3 = vld [vmem:[%s1965_s3 + $0x8] sm:$0xff] (!%p354_p10)  ;;  %v440_v4 = vld [vmem:[%s1965_s3 + $0x18] sm:$0xff] (!%p354_p10)  ;;  %vm517_vm1 = vcmask (!%p354_p10), 1043456   ;;  %v441_v7 = vld [vmem:[%s1965_s3 + $0x20] sm:$0xff] (!%p354_p10) }
  0x21   : > { %s1403_s16 = smul.u32 (!%p354_p10), 72, %s360_s15  ;;  %1367 = vmatprep.mubr.msk.bf16.mxu0 (!%p354_p10), %vm1513_vm0, %v1512_v10  ;;  %1389 = vmatprep.mubr.msk.bf16.mxu1 (!%p354_p10), %vm1513_vm0, %v1512_v10  ;;  %v1292_v8 = vld [vmem:[%s1965_s3 + $0x28] sm:$0xff] (!%p354_p10)  ;;  %vm507_vm2 = vcmask (!%p354_p10), 588800   ;;  %vm577_vm3 = vcmask (!%p354_p10), 523264   ;;  %vm764_vm4 = vcmask (!%p354_p10), 519168  }
  0x22   : > { %1450 = vset.pattern.permute.xlu0 (!%p354_p10), %v1514_v0  ;;  %1451 = vset.pattern.permute.xlu1 (!%p354_p10), %v1514_v0  ;;  %s1885_s20 = smul.u32 (!%p354_p10), 40, %s360_s15 }
  0x23   : > { %s1611_s19 = scalar_lea.vmem (!%p354_p10), [#allocation2], %s1403_s16  ;;  %444 = vperm.xlu0 (!%p354_p10), %1450, %v437_v60   ;;  %454 = vperm.xlu1 (!%p354_p10), %1451, %v439_v61  }
  0x24   : > { %v414_v11 = vld [vmem:[%s1611_s19] sm:$0xf] (!%p354_p10)  ;;  %v415_v12 = vld [vmem:[%s1611_s19 + $0x4] sm:$0xf] (!%p354_p10)  ;;  %v1279_v14 = vld [vmem:[%s1611_s19 + $0x28] sm:$0xf] (!%p354_p10) }
  0x25   : > { %v1278_v13 = vld [vmem:[%s1611_s19 + $0x24] sm:$0xf] (!%p354_p10)  ;;  %v416_v15 = vld [vmem:[%s1611_s19 + $0x8] sm:$0xf] (!%p354_p10)  ;;  %v417_v16 = vld [vmem:[%s1611_s19 + $0xc] sm:$0xf] (!%p354_p10) }
  0x26   : > { %v1280_v17 = vld [vmem:[%s1611_s19 + $0x2c] sm:$0xf] (!%p354_p10)  ;;  %v1281_v18 = vld [vmem:[%s1611_s19 + $0x30] sm:$0xf] (!%p354_p10)  ;;  %v419_v34 = vld [vmem:[%s1611_s19 + $0x14] sm:$0xf] (!%p354_p10) }
  0x27   : > { %s397_s17 = scalar_select %p396_p11, %s1502_s23, 1  ;;  %v418_v33 = vld [vmem:[%s1611_s19 + $0x10] sm:$0xf]  ;;  %v1282_v35 = vld [vmem:[%s1611_s19 + $0x34] sm:$0xf]  ;;  %449 = vperm.xlu0 %1450, %v438_v3   ;;  %459 = vperm.xlu1 %1451, %v440_v4  }
  0x28   : > { %v1283_v38 = vld [vmem:[%s1611_s19 + $0x38] sm:$0xf]  ;;  %v421_v45 = vld [vmem:[%s1611_s19 + $0x1c] sm:$0xf]  ;;  %v1285_v50 = vld [vmem:[%s1611_s19 + $0x40] sm:$0xf] }
  0x29   : > { %s1405_s18 = smul.u32 36, %s397_s17  ;;  %v420_v44 = vld [vmem:[%s1611_s19 + $0x18] sm:$0xf]  ;;  %v1284_v49 = vld [vmem:[%s1611_s19 + $0x3c] sm:$0xf]  ;;  %s1908_s21 = scalar_lea.vmem [#allocation3], %s1885_s20 }
  0x2a   : > { %v422_v52 = vld [vmem:[%s1611_s19 + $0x20] sm:$0xf]  ;;  %v1286_v53 = vld [vmem:[%s1611_s19 + $0x44] sm:$0xf]  ;;  %s1406_s15 = smul.u32 (%p1585_p6), 20, %s1502_s23 }
  0x2b   : > { %s1621_s28 = scalar_lea.vmem %s1963_s1, %s1405_s18  ;;  %464 = vperm.xlu0 %1450, %v441_v7   ;;  %803 = vperm.xlu1 %1451, %v1292_v8  }
  0x2c   : > { %v405_v19 = vld [vmem:[%s1621_s28] sm:$0xf]  ;;  %v406_v20 = vld [vmem:[%s1621_s28 + $0x4] sm:$0xf]  ;;  %v407_v21 = vld [vmem:[%s1621_s28 + $0x8] sm:$0xf]  ;;  %s1092_s29 = scalar_lea.vmem (%p1585_p6), %s1968_s6, %s1406_s15 }
  0x2d   : > { %v423_v22 = vmul.bf16 %v414_v11, %v405_v19  ;;  %v424_v23 = vmul.bf16 %v415_v12, %v406_v20  ;;  %v780_v24 = vmul.bf16 %v1278_v13, %v405_v19  ;;  %v781_v25 = vmul.bf16 %v1279_v14, %v406_v20  ;;  %v408_v26 = vld [vmem:[%s1621_s28 + $0xc] sm:$0xf]  ;;  %v409_v27 = vld [vmem:[%s1621_s28 + $0x10] sm:$0xf]  ;;  %v410_v28 = vld [vmem:[%s1621_s28 + $0x14] sm:$0xf] }
  0x2e   : > { %v425_v29 = vmul.bf16 %v416_v15, %v407_v21  ;;  %v426_v30 = vmul.bf16 %v417_v16, %v408_v26  ;;  %v782_v31 = vmul.bf16 %v1280_v17, %v407_v21  ;;  %v783_v32 = vmul.bf16 %v1281_v18, %v408_v26  ;;  %v411_v39 = vld [vmem:[%s1621_s28 + $0x18] sm:$0xf]  ;;  %v412_v43 = vld [vmem:[%s1621_s28 + $0x1c] sm:$0xf]  ;;  %v413_v51 = vld [vmem:[%s1621_s28 + $0x20] sm:$0xf] }
  0x2f   : > { %v1265_v36 = vcombine.low %v423_v22, %v424_v23  ;;  %v1300_v37 = vcombine.low %v780_v24, %v781_v25  ;;  %v427_v41 = vmul.bf16 %v418_v33, %v409_v27  ;;  %v428_v42 = vmul.bf16 %v419_v34, %v410_v28  ;;  %v1452_v12 = vld [vmem:[%s1964_s2] sm:$0xff]   ;;  %v1453_v13 = vld [vmem:[%s1964_s2 + $0x14] sm:$0xff]   ;;  %v1296_v17 = vld [vmem:[%s1965_s3 + $0x48] sm:$0xff] }
  0x30   : > { %v1266_v40 = vcombine.low %v425_v29, %v426_v30  ;;  %v1301_v46 = vcombine.low %v782_v31, %v783_v32  ;;  %v784_v47 = vmul.bf16 %v1282_v35, %v409_v27  ;;  %v785_v48 = vmul.bf16 %v1283_v38, %v410_v28  ;;  %v1293_v14 = vld [vmem:[%s1965_s3 + $0x30] sm:$0xff]  ;;  %v1294_v15 = vld [vmem:[%s1965_s3 + $0x38] sm:$0xff]  ;;  %v1295_v16 = vld [vmem:[%s1965_s3 + $0x40] sm:$0xff] }
  0x31   : > { %1358 = vmatpush3.bf16.msra.mxu0 %v1265_v36  ;;  %1380 = vmatpush3.bf16.msra.mxu1 %v1300_v37  ;;  %v1267_v54 = vcombine.low %v427_v41, %v428_v42  ;;  %v429_v55 = vmul.bf16 %v420_v44, %v411_v39  ;;  %v430_v56 = vmul.bf16 %v421_v45, %v412_v43  ;;  %v1454_v18 = vld [vmem:[%s1964_s2 + $0x8] sm:$0xff]   ;;  %v1455_v19 = vld [vmem:[%s1964_s2 + $0x1c] sm:$0xff]   ;;  %v630_v22 = vld [vmem:[%s1966_s4 + $0x10] sm:$0xff] }
  0x32   : > { %1359 = vmatprep.subr.bf16.mxu0 %v1512_v10  ;;  %1381 = vmatprep.subr.bf16.mxu1 %v1512_v10  ;;  %v1302_v57 = vcombine.low %v784_v47, %v785_v48  ;;  %v786_v58 = vmul.bf16 %v1284_v49, %v411_v39  ;;  %v787_v59 = vmul.bf16 %v1285_v50, %v412_v43  ;;  %v628_v20 = vld [vmem:[%s1966_s4] sm:$0xff]  ;;  %v629_v21 = vld [vmem:[%s1966_s4 + $0x8] sm:$0xff]  ;;  %v631_v23 = vld [vmem:[%s1966_s4 + $0x18] sm:$0xff] }
  0x33   : > { %v431_v62 = vmul.bf16 %v422_v52, %v413_v51  ;;  %v788_v63 = vmul.bf16 %v1286_v53, %v413_v51  ;;  %v1268_v1 = vcombine.low %v429_v55, %v430_v56  ;;  %808 = vperm.xlu0 %1450, %v1293_v14   ;;  %813 = vperm.xlu1 %1451, %v1294_v15   ;;  %v1456_v24 = vld [vmem:[%s1964_s2 + $0x10] ss:$0 sps:$4 sm:$0xff]   ;;  %v1457_v25 = vld [vmem:[%s1964_s2 + $0x24] ss:$0 sps:$4 sm:$0xff]   ;;  %v664_v27 = vld [vmem:[%s1967_s5 + $0x8] sm:$0xff] }
  0x34   : > { %v1303_v2 = vcombine.low %v786_v58, %v787_v59  ;;  %v663_v26 = vld [vmem:[%s1967_s5] sm:$0xff]  ;;  %v665_v28 = vld [vmem:[%s1967_s5 + $0x10] sm:$0xff]  ;;  %v666_v29 = vld [vmem:[%s1967_s5 + $0x18] sm:$0xff] }
  0x35   : > { %1360 = vmatpush3.bf16.msra.mxu0 %v1266_v40  ;;  %1382 = vmatpush3.bf16.msra.mxu1 %v1301_v46  ;;  %v1269_v5 = vcombine.low %v431_v62, %v431_v62  ;;  %v1304_v6 = vcombine.low %v788_v63, %v788_v63  ;;  %v667_v30 = vld [vmem:[%s1967_s5 + $0x20] sm:$0xff]  ;;  %v1308_v31 = vld [vmem:[%s1966_s4 + $0x28] sm:$0xff]  ;;  %v1309_v32 = vld [vmem:[%s1966_s4 + $0x30] sm:$0xff] }
  0x36   : > { %1361 = vmatprep.subr.bf16.mxu0 %v1512_v10  ;;  %1383 = vmatprep.subr.bf16.mxu1 %v1512_v10  ;;  %v1310_v33 = vld [vmem:[%s1966_s4 + $0x38] sm:$0xff]  ;;  %v1311_v34 = vld [vmem:[%s1966_s4 + $0x40] sm:$0xff]  ;;  %v1312_v35 = vld [vmem:[%s1966_s4 + $0x48] sm:$0xff] }
  0x37   : > { %v519_v9 = vsel %vm517_vm1, %v1269_v5, 0  ;;  %v876_v11 = vsel %vm517_vm1, %v1304_v6, 0  ;;  %818 = vperm.xlu0 %1450, %v1295_v16   ;;  %823 = vperm.xlu1 %1451, %v1296_v17   ;;  %v1313_v36 = vld [vmem:[%s1967_s5 + $0x28] sm:$0xff]  ;;  %v1314_v37 = vld [vmem:[%s1967_s5 + $0x30] sm:$0xff]  ;;  %v1315_v38 = vld [vmem:[%s1967_s5 + $0x38] sm:$0xff] }
  0x38   : > { %v1316_v39 = vld [vmem:[%s1967_s5 + $0x40] sm:$0xff]  ;;  %v1317_v40 = vld [vmem:[%s1967_s5 + $0x48] sm:$0xff] }
  0x39   : > { %1362 = vmatpush3.bf16.msra.mxu0 %v1267_v54  ;;  %1384 = vmatpush3.bf16.msra.mxu1 %v1302_v57 }
  0x3a   : > { %1363 = vmatprep.subr.bf16.mxu0 %v1512_v10  ;;  %1385 = vmatprep.subr.bf16.mxu1 %v1512_v10 }
  0x3b   : > { %635 = vperm.xlu0 %1450, %v628_v20   ;;  %640 = vperm.xlu1 %1451, %v629_v21  }
  0x3d   : > { %1364 = vmatpush3.bf16.msra.mxu0 %v1268_v1  ;;  %1386 = vmatpush3.bf16.msra.mxu1 %v1303_v2 }
  0x3e   : > { %1365 = vmatprep.subr.bf16.mxu0 %v1512_v10  ;;  %1387 = vmatprep.subr.bf16.mxu1 %v1512_v10 }
  0x3f   : > { %645 = vperm.xlu0 %1450, %v630_v22   ;;  %650 = vperm.xlu1 %1451, %v631_v23  }
  0x41   : > { %1366 = vmatpush3.bf16.msra.mxu0 %v519_v9  ;;  %1388 = vmatpush3.bf16.msra.mxu1 %v876_v11 }
  0x43   : > { %670 = vperm.xlu1 %1451, %v663_v26  }
  0x44   : > { %1368 = vmatmul.mubr.msk.bf16.vlgmr.msra.gmra.mrb[0].mxu0 %vm507_vm2, %v1452_v12  ;;  %1390 = vmatmul.mubr.msk.bf16.vlgmr.msra.gmra.mrb[0].mxu1 %vm507_vm2, %v1453_v13 }
  0x45   : > { %1371 = vmatprep.mubr.msk.bf16.mxu0 %vm1513_vm0, %v1512_v10  ;;  %1393 = vmatprep.mubr.msk.bf16.mxu1 %vm1513_vm0, %v1512_v10 }
  0x47   : > { %680 = vperm.xlu1 %1451, %v665_v28  }
  0x4b   : > { %690 = vperm.xlu1 %1451, %v667_v30  }
  0x4c   : > { %1372 = vmatmul.mubr.msk.bf16.gmra.mrb[4].mxu0 %vm507_vm2, %v1454_v18  ;;  %1394 = vmatmul.mubr.msk.bf16.gmra.mrb[4].mxu1 %vm507_vm2, %v1455_v19 }
  0x4d   : > { %1375 = vmatprep.mubr.msk.bf16.mxu0 %vm1513_vm0, %v1512_v10  ;;  %1397 = vmatprep.mubr.msk.bf16.mxu1 %vm1513_vm0, %v1512_v10  ;;  %v632_v10 = vld [vmem:[%s1966_s4 + $0x20] sm:$0xff] }
  0x4e   : > { %655 = vperm.xlu0 %1450, %v632_v10  }
  0x4f   : > { %996 = vperm.xlu1 %1451, %v1309_v32  }
  0x52   : > { %675 = vperm.xlu0 %1450, %v664_v27  }
  0x53   : > { %1006 = vperm.xlu1 %1451, %v1311_v34  }
  0x54   : > { %1376 = vmatmul.mubr.msk.bf16.gmra.mrb[8].mxu0 %vm507_vm2, %v1456_v24  ;;  %1398 = vmatmul.mubr.msk.bf16.gmra.mrb[8].mxu1 %vm507_vm2, %v1457_v25 }
  0x56   : > { %685 = vperm.xlu0 %1450, %v666_v29  }
  0x57   : > { %1027 = vperm.xlu1 %1451, %v1313_v36  }
  0x5a   : > { %991 = vperm.xlu0 %1450, %v1308_v31  }
  0x5b   : > { %1037 = vperm.xlu1 %1451, %v1315_v38  }
  0x5e   : > { %1001 = vperm.xlu0 %1450, %v1310_v33  }
  0x5f   : > { %1047 = vperm.xlu1 %1451, %v1317_v40  }
  0x62   : > { %1011 = vperm.xlu0 %1450, %v1312_v35  }
  0x66   : > { %1032 = vperm.xlu0 %1450, %v1314_v37  }
  0x6a   : > { %1042 = vperm.xlu0 %1450, %v1316_v39  }
  0xa2   : > { %v445_v41 = vpop.permute.xlu0 %444  ;;  %v455_v42 = vpop.permute.xlu1 %454 }
  0xa6   : > { %v450_v43 = vpop.permute.xlu0 %449  ;;  %v460_v44 = vpop.permute.xlu1 %459 }
  0xaa   : > { %v465_v45 = vpop.permute.xlu0 %464  ;;  %v804_v46 = vpop.permute.xlu1 %803 }
  0xb2   : > { %v809_v47 = vpop.permute.xlu0 %808  ;;  %v814_v2 = vpop.permute.xlu1 %813 }
  0xb6   : > { %v819_v3 = vpop.permute.xlu0 %818  ;;  %v824_v25 = vpop.permute.xlu1 %823 }
 0x117   : > { %v555_v48 = vpop.f32.mrb[0].mxu0  ;;  %v912_v49 = vpop.f32.mrb[0].mxu1 }
 0x118   : > { %v1775_v50 = vadd.f32 %v555_v48, %v445_v41  ;;  %v1369_v51 = vpop.f32.mrb[1].mxu0  ;;  %v1777_v52 = vadd.f32 %v912_v49, %v804_v46  ;;  %v1391_v53 = vpop.f32.mrb[1].mxu1 }
 0x119   : > { %v558_v54 = vpop.f32.mrb[2].mxu0  ;;  %v915_v55 = vpop.f32.mrb[2].mxu1 }
 0x11a   : > { %v1779_v56 = vadd.f32 %v558_v54, %v450_v43  ;;  %v1370_v57 = vpop.f32.mrb[3].mxu0  ;;  %v934_v58 = vsel %vm577_vm3, %v1777_v52, 0.0  ;;  %v1783_v59 = vadd.f32 %v915_v55, %v809_v47  ;;  %v1392_v60 = vpop.f32.mrb[3].mxu1  ;;  %v578_v61 = vsel %vm577_vm3, %v1775_v50, 0.0 }
 0x11b   : > { %v1797_v53 = vpop.permute.xlu0 %635  ;;  %v1799_v54 = vpop.permute.xlu1 %640 }
 0x11c   : > { %v579_v62 = vsel %vm577_vm3, %v1779_v56, 0.0  ;;  %v935_v63 = vsel %vm577_vm3, %v1783_v59, 0.0 }
 0x11d   : > { %v580_v0 = vadd.f32 %v579_v62, %v578_v61  ;;  %v936_v1 = vadd.f32 %v935_v63, %v934_v58 }
 0x11f   : > { %v563_v4 = vpop.f32.mrb[4].mxu0  ;;  %v920_v5 = vpop.f32.mrb[4].mxu1 }
 0x120   : > { %v564_v6 = vadd.f32 %v563_v4, %v455_v42  ;;  %v921_v7 = vadd.f32 %v920_v5, %v814_v2  ;;  %v1373_v8 = vpop.f32.mrb[5].mxu0  ;;  %v1395_v9 = vpop.f32.mrb[5].mxu1 }
 0x121   : > { %v566_v11 = vpop.f32.mrb[6].mxu0  ;;  %v923_v12 = vpop.f32.mrb[6].mxu1 }
 0x122   : > { %v581_v13 = vsel %vm577_vm3, %v564_v6, 0.0  ;;  %v937_v14 = vsel %vm577_vm3, %v921_v7, 0.0  ;;  %v567_v15 = vadd.f32 %v566_v11, %v460_v44  ;;  %v924_v16 = vadd.f32 %v923_v12, %v819_v3  ;;  %v1374_v17 = vpop.f32.mrb[7].mxu0  ;;  %v1396_v18 = vpop.f32.mrb[7].mxu1 }
 0x123   : > { %v582_v19 = vadd.f32 %v581_v13, %v580_v0  ;;  %v938_v20 = vadd.f32 %v937_v14, %v936_v1  ;;  %v1827_v4 = vpop.permute.xlu0 %645 }
 0x124   : > { %v583_v21 = vsel %vm577_vm3, %v567_v15, 0.0  ;;  %v939_v22 = vsel %vm577_vm3, %v924_v16, 0.0 }
 0x125   : > { %v584_v23 = vadd.f32 %v583_v21, %v582_v19  ;;  %v940_v24 = vadd.f32 %v939_v22, %v938_v20 }
 0x127   : > { %v571_v10 = vpop.f32.mrb[8].mxu0  ;;  %v928_v26 = vpop.f32.mrb[8].mxu1 }
 0x128   : > { %v572_v27 = vadd.f32 %v571_v10, %v465_v45  ;;  %v929_v28 = vadd.f32 %v928_v26, %v824_v25  ;;  %v1377_v29 = vpop.f32.mrb[9].mxu0  ;;  %v1399_v30 = vpop.f32.mrb[9].mxu1 }
 0x129   : > { %v574_v31 = vpop.f32.mrb[10].mxu0  ;;  %v931_v32 = vpop.f32.mrb[10].mxu1 }
 0x12a   : > { %v585_v33 = vsel %vm577_vm3, %v572_v27, 0.0  ;;  %v941_v34 = vsel %vm577_vm3, %v929_v28, 0.0  ;;  %v1378_v35 = vpop.f32.mrb[11].mxu0  ;;  %v1400_v36 = vpop.f32.mrb[11].mxu1 }
 0x12b   : > { %v586_v37 = vadd.f32 %v585_v33, %v584_v23  ;;  %v942_v38 = vadd.f32 %v941_v34, %v940_v24  ;;  %v656_v22 = vpop.permute.xlu0 %655 }
 0x12d   : > { %v587_v39 = vrot.slane %v586_v37, 4  ;;  %v943_v40 = vrot.slane %v942_v38, 4 }
 0x12f   : > { %v588_v41 = vadd.f32 %v587_v39, %v586_v37  ;;  %v944_v42 = vadd.f32 %v943_v40, %v942_v38  ;;  %v676_v34 = vpop.permute.xlu0 %675 }
 0x131   : > { %v589_v43 = vrot.slane %v588_v41, 2  ;;  %v945_v44 = vrot.slane %v944_v42, 2 }
 0x133   : > { %v590_v45 = vadd.f32 %v589_v43, %v588_v41  ;;  %v946_v46 = vadd.f32 %v945_v44, %v944_v42  ;;  %v686_v42 = vpop.permute.xlu0 %685 }
 0x135   : > { %v591_v47 = vrot.slane %v590_v45, 1  ;;  %v947_v48 = vrot.slane %v946_v46, 1 }
 0x137   : > { %v592_v49 = vadd.f32 %v591_v47, %v590_v45  ;;  %v948_v51 = vadd.f32 %v947_v48, %v946_v46 }
 0x139   : > { %v594_v55 = vmul.f32 0.025, %v592_v49  ;;  %v949_v57 = vmul.f32 0.025, %v948_v51  ;;  %v992_v51 = vpop.permute.xlu0 %991 }
 0x13b   : > { %v1802_v58 = vsub.f32 %v1775_v50, %v594_v55  ;;  %v1805_v60 = vsub.f32 %v1779_v56, %v594_v55  ;;  %v1807_v61 = vsub.f32 %v564_v6, %v594_v55  ;;  %v1809_v62 = vsub.f32 %v567_v15, %v594_v55  ;;  %v1835_v6 = vpop.permute.xlu1 %650 }
 0x13c   : > { %v1811_v63 = vsub.f32 %v572_v27, %v594_v55  ;;  %v1814_v0 = vsub.f32 %v1777_v52, %v949_v57  ;;  %v1817_v1 = vsub.f32 %v1783_v59, %v949_v57  ;;  %v1819_v2 = vsub.f32 %v921_v7, %v949_v57 }
 0x13d   : > { %v600_v50 = vmul.f32 %v1802_v58, %v1802_v58  ;;  %v601_v56 = vmul.f32 %v1805_v60, %v1805_v60  ;;  %v602_v3 = vmul.f32 %v1807_v61, %v1807_v61  ;;  %v1829_v5 = vsub.f32 %v924_v16, %v949_v57 }
 0x13e   : > { %v1831_v52 = vsub.f32 %v929_v28, %v949_v57  ;;  %v955_v59 = vmul.f32 %v1814_v0, %v1814_v0  ;;  %v603_v7 = vmul.f32 %v1809_v62, %v1809_v62  ;;  %v956_v12 = vmul.f32 %v1817_v1, %v1817_v1 }
 0x13f   : > { %v605_v8 = vsel %vm577_vm3, %v600_v50, 0.0  ;;  %v606_v9 = vsel %vm577_vm3, %v601_v56, 0.0  ;;  %v957_v13 = vmul.f32 %v1819_v2, %v1819_v2  ;;  %v604_v14 = vmul.f32 %v1811_v63, %v1811_v63  ;;  %v671_v10 = vpop.permute.xlu1 %670 }
 0x140   : > { %v607_v11 = vadd.f32 %v606_v9, %v605_v8  ;;  %v608_v15 = vsel %vm577_vm3, %v602_v3, 0.0  ;;  %v960_v16 = vsel %vm577_vm3, %v955_v59, 0.0  ;;  %v958_v18 = vmul.f32 %v1829_v5, %v1829_v5  ;;  %v1002_v3 = vpop.permute.xlu0 %1001 }
 0x141   : > { %v961_v19 = vsel %vm577_vm3, %v956_v12, 0.0  ;;  %v610_v20 = vsel %vm577_vm3, %v603_v7, 0.0  ;;  %v959_v24 = vmul.f32 %v1831_v52, %v1831_v52  ;;  %v963_v25 = vsel %vm577_vm3, %v957_v13, 0.0 }
 0x142   : > { %v609_v17 = vadd.f32 %v608_v15, %v607_v11  ;;  %v962_v21 = vadd.f32 %v961_v19, %v960_v16  ;;  %v612_v26 = vsel %vm577_vm3, %v604_v14, 0.0  ;;  %v965_v29 = vsel %vm577_vm3, %v958_v18, 0.0 }
 0x143   : > { %v967_v32 = vsel %vm577_vm3, %v959_v24, 0.0  ;;  %v681_v36 = vpop.permute.xlu1 %680 }
 0x144   : > { %v611_v23 = vadd.f32 %v610_v20, %v609_v17  ;;  %v964_v27 = vadd.f32 %v963_v25, %v962_v21  ;;  %v1012_v8 = vpop.permute.xlu0 %1011 }
 0x146   : > { %v613_v28 = vadd.f32 %v612_v26, %v611_v23  ;;  %v966_v30 = vadd.f32 %v965_v29, %v964_v27 }
 0x147   : > { %v691_v44 = vpop.permute.xlu1 %690 }
 0x148   : > { %v614_v31 = vrot.slane %v613_v28, 4  ;;  %v968_v33 = vadd.f32 %v967_v32, %v966_v30 }
 0x14a   : > { %v615_v35 = vadd.f32 %v614_v31, %v613_v28  ;;  %v969_v37 = vrot.slane %v968_v33, 4 }
 0x14b   : > { %v997_v57 = vpop.permute.xlu1 %996 }
 0x14c   : > { %v616_v38 = vrot.slane %v615_v35, 2  ;;  %v970_v39 = vadd.f32 %v969_v37, %v968_v33 }
 0x14e   : > { %v617_v40 = vadd.f32 %v616_v38, %v615_v35  ;;  %v971_v41 = vrot.slane %v970_v39, 2 }
 0x14f   : > { %v1007_v59 = vpop.permute.xlu1 %1006 }
 0x150   : > { %v618_v43 = vrot.slane %v617_v40, 1  ;;  %v972_v45 = vadd.f32 %v971_v41, %v970_v39 }
 0x152   : > { %v619_v46 = vadd.f32 %v618_v43, %v617_v40  ;;  %v973_v47 = vrot.slane %v972_v45, 1 }
 0x153   : > { %v1028_v9 = vpop.permute.xlu1 %1027 }
 0x154   : > { %v620_v48 = vmul.f32 0.025, %v619_v46  ;;  %v974_v49 = vadd.f32 %v973_v47, %v972_v45 }
 0x156   : > { %v621_v55 = vadd.f32 1e-06, %v620_v48  ;;  %v975_v50 = vmul.f32 0.025, %v974_v49 }
 0x158   : > { %1458 = vrsqrt.f32 %v621_v55  ;;  %v976_v56 = vadd.f32 1e-06, %v975_v50 }
 0x15a   : > { %1460 = vrsqrt.f32 %v976_v56 }
 0x162   : > { %v1459_v7 = vpop.eup %1458 }
 0x163   : > { %v623_v11 = vmul.f32 %v1459_v7, %v1802_v58  ;;  %v624_v12 = vmul.f32 %v1459_v7, %v1805_v60  ;;  %v625_v13 = vmul.f32 %v1459_v7, %v1807_v61  ;;  %v626_v14 = vmul.f32 %v1459_v7, %v1809_v62 }
 0x164   : > { %v627_v15 = vmul.f32 %v1459_v7, %v1811_v63  ;;  %v1461_v16 = vpop.eup %1460 }
 0x165   : > { %v658_v17 = vmul.f32 %v1797_v53, %v623_v11  ;;  %v659_v18 = vmul.f32 %v1799_v54, %v624_v12  ;;  %v660_v19 = vmul.f32 %v1827_v4, %v625_v13  ;;  %v661_v20 = vmul.f32 %v1835_v6, %v626_v14  ;;  %v1033_v54 = vpop.permute.xlu0 %1032 }
 0x166   : > { %v662_v21 = vmul.f32 %v656_v22, %v627_v15  ;;  %v978_v58 = vmul.f32 %v1461_v16, %v1814_v0  ;;  %v979_v60 = vmul.f32 %v1461_v16, %v1817_v1  ;;  %v980_v61 = vmul.f32 %v1461_v16, %v1819_v2  ;;  %v1038_v0 = vpop.permute.xlu1 %1037 }
 0x167   : > { %v1871_v62 = vadd.f32 %v671_v10, %v658_v17  ;;  %v1873_v63 = vadd.f32 %v676_v34, %v659_v18  ;;  %v1875_v23 = vadd.f32 %v681_v36, %v660_v19  ;;  %v1877_v53 = vadd.f32 %v686_v42, %v661_v20 }
 0x168   : > { %v1879_v4 = vadd.f32 %v691_v44, %v662_v21  ;;  %v981_v6 = vmul.f32 %v1461_v16, %v1829_v5  ;;  %v982_v22 = vmul.f32 %v1461_v16, %v1831_v52  ;;  %v1014_v24 = vmul.f32 %v992_v51, %v978_v58 }
 0x169   : > { %v703_v1 = vmul.f32 0.044715, %v1871_v62  ;;  %v704_v2 = vmul.f32 0.044715, %v1873_v63  ;;  %v1015_v25 = vmul.f32 %v997_v57, %v979_v60  ;;  %v705_v10 = vmul.f32 0.044715, %v1875_v23  ;;  %v1043_v35 = vpop.permute.xlu0 %1042 }
 0x16a   : > { %v706_v26 = vmul.f32 0.044715, %v1877_v53  ;;  %v707_v27 = vmul.f32 0.044715, %v1879_v4  ;;  %v1016_v5 = vmul.f32 %v1002_v3, %v980_v61  ;;  %v1017_v29 = vmul.f32 %v1007_v59, %v981_v6  ;;  %v1048_v40 = vpop.permute.xlu1 %1047 }
 0x16b   : > { %v708_v52 = vmul.f32 %v703_v1, %v1871_v62  ;;  %v709_v28 = vmul.f32 %v704_v2, %v1873_v63  ;;  %v1018_v30 = vmul.f32 %v1012_v8, %v982_v22  ;;  %v710_v31 = vmul.f32 %v705_v10, %v1875_v23 }
 0x16c   : > { %v711_v32 = vmul.f32 %v706_v26, %v1877_v53  ;;  %v712_v33 = vmul.f32 %v707_v27, %v1879_v4  ;;  %v1050_v34 = vadd.f32 %v1028_v9, %v1014_v24  ;;  %v1051_v38 = vadd.f32 %v1033_v54, %v1015_v25 }
 0x16d   : > { %v713_v36 = vmul.f32 %v708_v52, %v1871_v62  ;;  %v714_v37 = vmul.f32 %v709_v28, %v1873_v63  ;;  %v1052_v39 = vadd.f32 %v1038_v0, %v1016_v5  ;;  %v715_v41 = vmul.f32 %v710_v31, %v1875_v23 }
 0x16e   : > { %v716_v42 = vmul.f32 %v711_v32, %v1877_v53  ;;  %v717_v43 = vmul.f32 %v712_v33, %v1879_v4  ;;  %v1053_v44 = vadd.f32 %v1043_v35, %v1017_v29  ;;  %v1054_v47 = vadd.f32 %v1048_v40, %v1018_v30 }
 0x16f   : > { %v718_v45 = vadd.f32 %v713_v36, %v1871_v62  ;;  %v719_v46 = vadd.f32 %v714_v37, %v1873_v63  ;;  %v1336_v48 = vpack.c.bf16 %v1050_v34, %v1050_v34  ;;  %v720_v49 = vadd.f32 %v715_v41, %v1875_v23 }
 0x170   : > { %v721_v51 = vadd.f32 %v716_v42, %v1877_v53  ;;  %v722_v55 = vadd.f32 %v717_v43, %v1879_v4  ;;  %v1337_v57 = vpack.c.bf16 %v1051_v38, %v1051_v38  ;;  %v1338_v3 = vpack.c.bf16 %v1052_v39, %v1052_v39 }
 0x171   : > { %v723_v50 = vmul.f32 0.7978846, %v718_v45  ;;  %v724_v56 = vmul.f32 0.7978846, %v719_v46  ;;  %v1339_v59 = vpack.c.bf16 %v1053_v44, %v1053_v44  ;;  %1323 = vst.msk [vmem:[%s1908_s21 + $0x14] sm:$0xf] %vm764_vm4, %v1336_v48  ;;  %v1340_v9 = vpack.c.bf16 %v1054_v47, %v1054_v47 }
 0x172   : > { %v725_v7 = vmul.f32 0.7978846, %v720_v49  ;;  %v726_v8 = vmul.f32 0.7978846, %v721_v51  ;;  %1324 = vst.msk [vmem:[%s1908_s21 + $0x18] sm:$0xf] %vm764_vm4, %v1337_v57 }
 0x173   : > { %v727_v11 = vmul.f32 0.7978846, %v722_v55  ;;  %1462 = vtanh.f32 %v723_v50  ;;  %1325 = vst.msk [vmem:[%s1908_s21 + $0x1c] sm:$0xf] %vm764_vm4, %v1338_v3  ;;  %1326 = vst.msk [vmem:[%s1908_s21 + $0x20] sm:$0xf] %vm764_vm4, %v1339_v59 }
 0x174   : > { %1464 = vtanh.f32 %v724_v56  ;;  %1327 = vst.msk [vmem:[%s1908_s21 + $0x24] sm:$0xf] %vm764_vm4, %v1340_v9  ;;  %v698_v14 = vmul.f32 0.5, %v1871_v62  ;;  %v699_v17 = vmul.f32 0.5, %v1873_v63  ;;  %v700_v20 = vmul.f32 0.5, %v1875_v23 }
 0x175   : > { %1466 = vtanh.f32 %v725_v7  ;;  %v701_v61 = vmul.f32 0.5, %v1877_v53  ;;  %v702_v6 = vmul.f32 0.5, %v1879_v4 }
 0x176   : > { %1468 = vtanh.f32 %v726_v8 }
 0x177   : > { %1470 = vtanh.f32 %v727_v11 }
 0x179   : > { %v1118_v27 = vld [vmem:[%s1908_s21 + $0x14] sm:$0xff] (%p1585_p6)  }
 0x17a   : > { %v1122_v5 = vld [vmem:[%s1908_s21 + $0x1c] sm:$0xff] (%p1585_p6)   ;;  %1119 = vst [vmem:[%s1092_s29 + $0x28] sm:$0xff] (%p1585_p6), %v1118_v27  }
 0x17b   : > { %v1126_v52 = vld [vmem:[%s1908_s21 + $0x24] sm:$0xf] (%p1585_p6)  ;;  %1123 = vst [vmem:[%s1092_s29 + $0x30] sm:$0xff] (%p1585_p6), %v1122_v5  }
 0x17c   : > { %1127 = vst [vmem:[%s1092_s29 + $0x38] sm:$0xf] (%p1585_p6), %v1126_v52 }
 0x17d   : > { %v1463_v12 = vpop.eup %1462 }
 0x17e   : > { %v1465_v13 = vpop.eup %1464  ;;  %v733_v15 = vadd.f32 1.0, %v1463_v12 }
 0x17f   : > { %v1467_v16 = vpop.eup %1466  ;;  %v734_v18 = vadd.f32 1.0, %v1465_v13 }
 0x180   : > { %v1469_v19 = vpop.eup %1468  ;;  %v735_v21 = vadd.f32 1.0, %v1467_v16  ;;  %v738_v58 = vmul.f32 %v733_v15, %v698_v14 }
 0x181   : > { %v1471_v60 = vpop.eup %1470  ;;  %v736_v54 = vadd.f32 1.0, %v1469_v19  ;;  %v739_v62 = vmul.f32 %v734_v18, %v699_v17 }
 0x182   : > { %v737_v22 = vadd.f32 1.0, %v1471_v60  ;;  %v740_v63 = vmul.f32 %v735_v21, %v700_v20  ;;  %v1331_v0 = vpack.c.bf16 %v738_v58, %v738_v58  ;;  %1088 = sbr.rel (!%p1585_p6) target bundleno = 401 (0x191), region = 89 }
 0x183   : > { %v741_v24 = vmul.f32 %v736_v54, %v701_v61  ;;  %v1332_v1 = vpack.c.bf16 %v739_v62, %v739_v62 }
 0x184   : > { %v742_v2 = vmul.f32 %v737_v22, %v702_v6  ;;  %v1333_v23 = vpack.c.bf16 %v740_v63, %v740_v63  ;;  %765 = vst.msk [vmem:[%s1908_s21] sm:$0xf] %vm764_vm4, %v1331_v0 }
 0x185   : > { %v1334_v25 = vpack.c.bf16 %v741_v24, %v741_v24  ;;  %766 = vst.msk [vmem:[%s1908_s21 + $0x4] sm:$0xf] %vm764_vm4, %v1332_v1 }
 0x186   : > { %v1335_v10 = vpack.c.bf16 %v742_v2, %v742_v2  ;;  %767 = vst.msk [vmem:[%s1908_s21 + $0x8] sm:$0xf] %vm764_vm4, %v1333_v23 }
 0x187   : > { %768 = vst.msk [vmem:[%s1908_s21 + $0xc] sm:$0xf] %vm764_vm4, %v1334_v25 }
 0x188   : > { %769 = vst.msk [vmem:[%s1908_s21 + $0x10] sm:$0xf] %vm764_vm4, %v1335_v10 }
 0x18c   : > { %v1108_v53 = vld [vmem:[%s1908_s21] sm:$0xff]  }
 0x18d   : > { %1109 = vst [vmem:[%s1092_s29] sm:$0xff] %v1108_v53  }
 0x18e   : > { %v1112_v4 = vld [vmem:[%s1908_s21 + $0x8] sm:$0xff]  }
 0x18f   : > { %v1116_v26 = vld [vmem:[%s1908_s21 + $0x10] sm:$0xf]  ;;  %1113 = vst [vmem:[%s1092_s29 + $0x8] sm:$0xff] %v1112_v4  }
 0x190   : > { %1117 = vst [vmem:[%s1092_s29 + $0x10] sm:$0xf] %v1116_v26 }
 0x191 PF: > { %s16_s25 = sadd.s32 1, %s1510_s25   ;;  %s1970_s21 = smov %s1498_s22 }
 0x192   : > { %p13_p12 = scmp.ge.s32.totalorder %s16_s25, 4   ;;  %s1971_s22 = smov %s1590_s7 }
 0x193   : > { %s1972_s23 = smov %s1506_s24  ;;  %s1973_s24 = smov %s1975_s26 }
 0x194   :  { %15 = sbr.rel (!%p13_p12) target bundleno = 3 (0x3), region = 170 }

// kernel: decoder_forward.4
= control target key start
LH: loop header
LB: loop body
LE: loop exit
PB: predicated region body
PF: predicated region fallthrough
CT: control target
= control target key end

     0   :  { %s1739_s18 = smov 0   ;;  %s1741_s19 = smov 0   ;;  %s2427_s0 = inlined_call_operand.vmem [shape: bf16[2,112,16], index: 0, kind: input, shape index: {}]   ;;  %s2428_s1 = inlined_call_operand.vmem [shape: bf16[144,112], index: 1, kind: input, shape index: {}]   ;;  %s2429_s2 = inlined_call_operand.vmem [shape: f32[2,72,1], index: 2, kind: input, shape index: {}]   ;;  %s2430_s3 = inlined_call_operand.vmem [shape: f32[2,72,1], index: 3, kind: input, shape index: {}]   ;;  %s2431_s4 = inlined_call_operand.vmem [shape: f32[2,72,1], index: 4, kind: input, shape index: {}]   ;;  %s2432_s5 = inlined_call_operand.vmem [shape: bf16[2,2,72,16], index: 5, kind: output, shape index: {}]  }
   0x1   :  { %s1743_s20 = smov 0   ;;  %s1745_s21 = smov 0  }
   0x2   :  { %s1747_s22 = smov 0  }
   0x3 LB: > { %s1394_s23 = sadd.s32 4294967295, %s1704_s22   ;;  %s27_s24 = sadd.s32 1, %s1700_s21  ;;  %s1704_s22 = sphi %s1747_s22, %s15_s22   ;;  %s1700_s21 = sphi %s1745_s21, %s2437_s21   ;;  %s1696_s20 = sphi %s1743_s20, %s2436_s20   ;;  %s1692_s19 = sphi %s1741_s19, %s2435_s19   ;;  %s1688_s18 = sphi %s1739_s18, %s2434_s18  }
   0x4   : > { %p29_p0 = scmp.ge.s32.totalorder %s27_s24, 2  ;;  %s148_s25 = sadd.s32 1, %s1692_s19 }
   0x5   : > { %p158_p1 = scmp.ne.s32.totalorder %s1692_s19, %s1688_s18  ;;  %p159_p2 = scmp.eq.s32.totalorder %s1394_s23, 1 }
   0x6   : > { %s2439_s24 = smov (%p29_p0, %s27_s24), 0  ;;  %p1398_p4 = scmp.ge.s32.totalorder %s1704_s22, 1 }
   0x7   : > { %p1771_p3 = por %p159_p2, %p158_p1  ;;  %s143_s27 = ssub.s32 %s1700_s21, %s2439_s24 }
   0x8   : > { %p206_p5 = scmp.lt.s32.totalorder %s1704_s22, 3  ;;  %p146_p6 = scmp.eq.s32.totalorder %s143_s27, 0 }
   0xa   : > { %p207_p7 = pnand %p1398_p4, %p206_p5 }
   0xb   : > { %s1780_s28 = scalar_select %p146_p6, %s1692_s19, %s148_s25  }
   0xc   : > { %210 = sbr.rel (%p207_p7) target bundleno = 426 (0x1aa), region = 40  ;;  %p236_p8 = scmp.lt.s32.totalorder (!%p207_p7), %s1696_s20, 1  ;;  %v497_v0 = vld [vmem:[%s2429_s2] sm:$0xff] (!%p207_p7)  ;;  %v499_v1 = vld [vmem:[%s2429_s2 + $0x10] sm:$0xff] (!%p207_p7)  ;;  %v1706_v2 = vmov (!%p207_p7), 0.0   ;;  %v1707_v3 = vmov (!%p207_p7), 0  }
   0xd   : > { %1516 = vmatprep.subr.bf16.mxu0 (!%p207_p7), %v1706_v2  ;;  %1566 = vmatprep.subr.bf16.mxu1 (!%p207_p7), %v1706_v2  ;;  %v498_v4 = vld [vmem:[%s2429_s2 + $0x8] sm:$0xff] (!%p207_p7)  ;;  %v500_v5 = vld [vmem:[%s2429_s2 + $0x18] sm:$0xff] (!%p207_p7)  ;;  %vm1708_vm0 = vmmov (!%p207_p7), 0   ;;  %v501_v6 = vld [vmem:[%s2429_s2 + $0x20] sm:$0xff] (!%p207_p7)  ;;  %vm364_vm1 = vcmask (!%p207_p7), 916480   ;;  %vm560_vm2 = vcmask (!%p207_p7), 130048  }
   0xe   : > { %1626 = vset.pattern.permute.xlu0 (!%p207_p7), %v1707_v3  ;;  %1627 = vset.pattern.permute.xlu1 (!%p207_p7), %v1707_v3  ;;  %v502_v8 = vld [vmem:[%s2429_s2 + $0x28] sm:$0xff] (!%p207_p7)  ;;  %v503_v10 = vld [vmem:[%s2429_s2 + $0x30] sm:$0xff] (!%p207_p7)  ;;  %v504_v11 = vld [vmem:[%s2429_s2 + $0x38] sm:$0xff] (!%p207_p7)  ;;  %s233_s17 = sand.u32 (!%p207_p7), 1, %s1688_s18   ;;  %vm883_vm3 = vcmask (!%p207_p7), 125952  }
   0xf   : > { %508 = vperm.xlu0 (!%p207_p7), %1626, %v497_v0   ;;  %518 = vperm.xlu1 (!%p207_p7), %1627, %v499_v1   ;;  %v505_v13 = vld [vmem:[%s2429_s2 + $0x40] sm:$0xff] (!%p207_p7)  ;;  %v640_v16 = vld [vmem:[%s2430_s3 + $0x8] sm:$0xff] (!%p207_p7)  ;;  %v641_v17 = vld [vmem:[%s2430_s3 + $0x10] sm:$0xff] (!%p207_p7)  ;;  %s1580_s23 = smul.u32 (!%p207_p7), 72, %s233_s17 }
  0x10   : > { %1530 = vmatprep.mubr.msk.bf16.mxu0 (!%p207_p7), %vm1708_vm0, %v1706_v2  ;;  %1550 = vmatprep.mubr.msk.bf16.mxu1 (!%p207_p7), %vm1708_vm0, %v1706_v2  ;;  %v639_v14 = vld [vmem:[%s2430_s3] sm:$0xff] (!%p207_p7)  ;;  %v642_v19 = vld [vmem:[%s2430_s3 + $0x18] sm:$0xff] (!%p207_p7)  ;;  %v644_v22 = vld [vmem:[%s2430_s3 + $0x28] sm:$0xff] (!%p207_p7) }
  0x11   : > { %v643_v20 = vld [vmem:[%s2430_s3 + $0x20] sm:$0xff] (!%p207_p7)  ;;  %v645_v23 = vld [vmem:[%s2430_s3 + $0x30] sm:$0xff] (!%p207_p7)  ;;  %v1636_v26 = vld [vmem:[%s2428_s1 + $0x28] sm:$0xff] (!%p207_p7)   ;;  %s2335_s18 = scalar_lea.vmem (!%p207_p7), [#allocation2], %s1580_s23 }
  0x12   : > { %v1635_v25 = vld [vmem:[%s2428_s1] sm:$0xff] (!%p207_p7)   ;;  %v1434_v27 = vld [vmem:[%s2429_s2 + $0x48] sm:$0xff] (!%p207_p7)  ;;  %v1435_v28 = vld [vmem:[%s2429_s2 + $0x50] sm:$0xff] (!%p207_p7) }
  0x13   : > { %s237_s8 = scalar_select %p236_p8, %s1696_s20, 1  ;;  %513 = vperm.xlu0 %1626, %v498_v4   ;;  %523 = vperm.xlu1 %1627, %v500_v5   ;;  %v1436_v29 = vld [vmem:[%s2429_s2 + $0x58] sm:$0xff]  ;;  %v1437_v30 = vld [vmem:[%s2429_s2 + $0x60] sm:$0xff]  ;;  %v1637_v31 = vld [vmem:[%s2428_s1 + $0x8] sm:$0xff]  }
  0x14   : > { %v1638_v32 = vld [vmem:[%s2428_s1 + $0x30] sm:$0xff]   ;;  %v1438_v33 = vld [vmem:[%s2429_s2 + $0x68] sm:$0xff]  ;;  %v1440_v35 = vld [vmem:[%s2429_s2 + $0x78] sm:$0xff]  ;;  %s1582_s25 = smul.u32 (%p1771_p3), 36, %s1696_s20 }
  0x15   : > { %s1581_s9 = smul.u32 56, %s237_s8  ;;  %v1439_v34 = vld [vmem:[%s2429_s2 + $0x70] sm:$0xff]  ;;  %v1441_v36 = vld [vmem:[%s2429_s2 + $0x80] sm:$0xff]  ;;  %v1640_v38 = vld [vmem:[%s2428_s1 + $0x38] sm:$0xff]  }
  0x16   : > { %v1639_v37 = vld [vmem:[%s2428_s1 + $0x10] sm:$0xff]   ;;  %v1442_v39 = vld [vmem:[%s2429_s2 + $0x88] sm:$0xff]  ;;  %v646_v40 = vld [vmem:[%s2430_s3 + $0x38] sm:$0xff]  ;;  %s1219_s29 = scalar_lea.vmem (%p1771_p3), %s2432_s5, %s1582_s25 }
  0x17   : > { %s1805_s16 = scalar_lea.vmem %s2427_s0, %s1581_s9  ;;  %528 = vperm.xlu0 %1626, %v501_v6   ;;  %533 = vperm.xlu1 %1627, %v502_v8   ;;  %v647_v41 = vld [vmem:[%s2430_s3 + $0x40] sm:$0xff]  ;;  %v1641_v43 = vld [vmem:[%s2428_s1 + $0x18] sm:$0xff]   ;;  %v703_v45 = vld [vmem:[%s2431_s4 + $0x8] sm:$0xff] }
  0x18   : > { %v1628_v7 = vld [vmem:[%s1805_s16] sm:$0xff]   ;;  %v1629_v9 = vld [vmem:[%s1805_s16 + $0x8] sm:$0xff]   ;;  %v1630_v12 = vld [vmem:[%s1805_s16 + $0x10] sm:$0xff]  }
  0x19   : > { %1517 = vmatpush3.bf16.msra.mxu0 %v1628_v7  ;;  %1573 = vmatpush3.bf16.msra.mxu1 %v1628_v7  ;;  %v1631_v15 = vld [vmem:[%s1805_s16 + $0x18] sm:$0xff]   ;;  %v1632_v18 = vld [vmem:[%s1805_s16 + $0x20] sm:$0xff]   ;;  %v1633_v21 = vld [vmem:[%s1805_s16 + $0x28] sm:$0xff]  }
  0x1a   : > { %1518 = vmatprep.subr.bf16.mxu0 %v1706_v2  ;;  %1567 = vmatprep.subr.bf16.mxu1 %v1706_v2  ;;  %v1634_v24 = vld [vmem:[%s1805_s16 + $0x30] sm:$0xff]   ;;  %v702_v42 = vld [vmem:[%s2431_s4] sm:$0xff]  ;;  %v705_v47 = vld [vmem:[%s2431_s4 + $0x18] sm:$0xff] }
  0x1b   : > { %538 = vperm.xlu0 %1626, %v503_v10   ;;  %543 = vperm.xlu1 %1627, %v504_v11   ;;  %v1642_v44 = vld [vmem:[%s2428_s1 + $0x40] sm:$0xff]   ;;  %v704_v46 = vld [vmem:[%s2431_s4 + $0x10] sm:$0xff]  ;;  %v707_v50 = vld [vmem:[%s2431_s4 + $0x28] sm:$0xff] }
  0x1c   : > { %v706_v48 = vld [vmem:[%s2431_s4 + $0x20] sm:$0xff]  ;;  %v708_v51 = vld [vmem:[%s2431_s4 + $0x30] sm:$0xff]  ;;  %v709_v52 = vld [vmem:[%s2431_s4 + $0x38] sm:$0xff] }
  0x1d   : > { %1519 = vmatpush3.bf16.msra.mxu0 %v1629_v9  ;;  %1574 = vmatpush3.bf16.msra.mxu1 %v1629_v9  ;;  %v1643_v49 = vld [vmem:[%s2428_s1 + $0x20] sm:$0xff]   ;;  %v1443_v54 = vld [vmem:[%s2430_s3 + $0x48] sm:$0xff]  ;;  %v1444_v55 = vld [vmem:[%s2430_s3 + $0x50] sm:$0xff] }
  0x1e   : > { %1520 = vmatprep.subr.bf16.mxu0 %v1706_v2  ;;  %1568 = vmatprep.subr.bf16.mxu1 %v1706_v2  ;;  %v710_v53 = vld [vmem:[%s2431_s4 + $0x40] sm:$0xff]  ;;  %v1445_v56 = vld [vmem:[%s2430_s3 + $0x58] sm:$0xff]  ;;  %v1447_v58 = vld [vmem:[%s2430_s3 + $0x68] sm:$0xff] }
  0x1f   : > { %548 = vperm.xlu0 %1626, %v505_v13   ;;  %650 = vperm.xlu1 %1627, %v639_v14   ;;  %v1446_v57 = vld [vmem:[%s2430_s3 + $0x60] sm:$0xff]  ;;  %v1448_v59 = vld [vmem:[%s2430_s3 + $0x70] sm:$0xff]  ;;  %v1449_v60 = vld [vmem:[%s2430_s3 + $0x78] sm:$0xff] }
  0x20   : > { %v1450_v61 = vld [vmem:[%s2430_s3 + $0x80] sm:$0xff]  ;;  %v1451_v62 = vld [vmem:[%s2430_s3 + $0x88] sm:$0xff]  ;;  %v1453_v0 = vld [vmem:[%s2431_s4 + $0x50] sm:$0xff] }
  0x21   : > { %1521 = vmatpush3.bf16.msra.mxu0 %v1630_v12  ;;  %1575 = vmatpush3.bf16.msra.mxu1 %v1630_v12  ;;  %v1452_v63 = vld [vmem:[%s2431_s4 + $0x48] sm:$0xff]  ;;  %v1454_v1 = vld [vmem:[%s2431_s4 + $0x58] sm:$0xff]  ;;  %v1457_v4 = vld [vmem:[%s2431_s4 + $0x70] sm:$0xff] }
  0x22   : > { %1522 = vmatprep.subr.bf16.mxu0 %v1706_v2  ;;  %1569 = vmatprep.subr.bf16.mxu1 %v1706_v2  ;;  %v1456_v3 = vld [vmem:[%s2431_s4 + $0x68] sm:$0xff]  ;;  %v1458_v5 = vld [vmem:[%s2431_s4 + $0x78] sm:$0xff]  ;;  %v1459_v6 = vld [vmem:[%s2431_s4 + $0x80] sm:$0xff] }
  0x23   : > { %655 = vperm.xlu0 %1626, %v640_v16   ;;  %660 = vperm.xlu1 %1627, %v641_v17   ;;  %v1460_v7 = vld [vmem:[%s2431_s4 + $0x88] sm:$0xff] }
  0x25   : > { %1523 = vmatpush3.bf16.msra.mxu0 %v1631_v15  ;;  %1576 = vmatpush3.bf16.msra.mxu1 %v1631_v15 }
  0x26   : > { %1524 = vmatprep.subr.bf16.mxu0 %v1706_v2  ;;  %1570 = vmatprep.subr.bf16.mxu1 %v1706_v2 }
  0x27   : > { %665 = vperm.xlu0 %1626, %v642_v19   ;;  %670 = vperm.xlu1 %1627, %v643_v20  }
  0x29   : > { %1525 = vmatpush3.bf16.msra.mxu0 %v1632_v18  ;;  %1577 = vmatpush3.bf16.msra.mxu1 %v1632_v18 }
  0x2a   : > { %1526 = vmatprep.subr.bf16.mxu0 %v1706_v2  ;;  %1571 = vmatprep.subr.bf16.mxu1 %v1706_v2 }
  0x2b   : > { %675 = vperm.xlu0 %1626, %v644_v22   ;;  %680 = vperm.xlu1 %1627, %v645_v23  }
  0x2d   : > { %1527 = vmatpush3.bf16.msra.mxu0 %v1633_v21  ;;  %1578 = vmatpush3.bf16.msra.mxu1 %v1633_v21 }
  0x2e   : > { %1528 = vmatprep.subr.bf16.mxu0 %v1706_v2  ;;  %1572 = vmatprep.subr.bf16.mxu1 %v1706_v2 }
  0x2f   : > { %905 = vperm.xlu0 %1626, %v1434_v27   ;;  %910 = vperm.xlu1 %1627, %v1435_v28  }
  0x31   : > { %1529 = vmatpush3.bf16.msra.mxu0 %v1634_v24  ;;  %1579 = vmatpush3.bf16.msra.mxu1 %v1634_v24 }
  0x33   : > { %915 = vperm.xlu0 %1626, %v1436_v29   ;;  %920 = vperm.xlu1 %1627, %v1437_v30  }
  0x34   : > { %1531 = vmatmul.mubr.msk.bf16.vlgmr.msra.gmra.mrb[0].mxu0 %vm364_vm1, %v1635_v25  ;;  %1551 = vmatmul.mubr.msk.bf16.vlgmr.msra.gmra.mrb[0].mxu1 %vm364_vm1, %v1636_v26 }
  0x35   : > { %1534 = vmatprep.mubr.msk.bf16.mxu0 %vm1708_vm0, %v1706_v2  ;;  %1554 = vmatprep.mubr.msk.bf16.mxu1 %vm1708_vm0, %v1706_v2 }
  0x37   : > { %925 = vperm.xlu0 %1626, %v1438_v33   ;;  %930 = vperm.xlu1 %1627, %v1439_v34  }
  0x3b   : > { %935 = vperm.xlu0 %1626, %v1440_v35   ;;  %940 = vperm.xlu1 %1627, %v1441_v36  }
  0x3c   : > { %1535 = vmatmul.mubr.msk.bf16.gmra.mrb[4].mxu0 %vm364_vm1, %v1637_v31  ;;  %1555 = vmatmul.mubr.msk.bf16.gmra.mrb[4].mxu1 %vm364_vm1, %v1638_v32 }
  0x3d   : > { %1538 = vmatprep.mubr.msk.bf16.mxu0 %vm1708_vm0, %v1706_v2  ;;  %1558 = vmatprep.mubr.msk.bf16.mxu1 %vm1708_vm0, %v1706_v2 }
  0x3f   : > { %945 = vperm.xlu0 %1626, %v1442_v39   ;;  %685 = vperm.xlu1 %1627, %v646_v40  }
  0x43   : > { %690 = vperm.xlu0 %1626, %v647_v41   ;;  %713 = vperm.xlu1 %1627, %v702_v42  }
  0x44   : > { %1539 = vmatmul.mubr.msk.bf16.gmra.mrb[8].mxu0 %vm364_vm1, %v1639_v37  ;;  %1559 = vmatmul.mubr.msk.bf16.gmra.mrb[8].mxu1 %vm364_vm1, %v1640_v38 }
  0x45   : > { %1542 = vmatprep.mubr.msk.bf16.mxu0 %vm1708_vm0, %v1706_v2  ;;  %1562 = vmatprep.mubr.msk.bf16.mxu1 %vm1708_vm0, %v1706_v2 }
  0x47   : > { %718 = vperm.xlu0 %1626, %v703_v45   ;;  %723 = vperm.xlu1 %1627, %v704_v46  }
  0x4b   : > { %728 = vperm.xlu0 %1626, %v705_v47   ;;  %733 = vperm.xlu1 %1627, %v706_v48  }
  0x4c   : > { %1543 = vmatmul.mubr.msk.bf16.gmra.mrb[12].mxu0 %vm364_vm1, %v1641_v43  ;;  %1563 = vmatmul.mubr.msk.bf16.gmra.mrb[12].mxu1 %vm364_vm1, %v1642_v44 }
  0x4d   : > { %1546 = vmatprep.mubr.msk.bf16.mxu0 %vm1708_vm0, %v1706_v2  ;;  %v1455_v2 = vld [vmem:[%s2431_s4 + $0x60] sm:$0xff] }
  0x4f   : > { %738 = vperm.xlu0 %1626, %v707_v50   ;;  %743 = vperm.xlu1 %1627, %v708_v51  }
  0x53   : > { %748 = vperm.xlu0 %1626, %v709_v52   ;;  %753 = vperm.xlu1 %1627, %v710_v53  }
  0x54   : > { %1547 = vmatmul.mubr.msk.bf16.gmra.mrb[16].mxu0 %vm364_vm1, %v1643_v49 }
  0x57   : > { %1046 = vperm.xlu0 %1626, %v1443_v54   ;;  %1051 = vperm.xlu1 %1627, %v1444_v55  }
  0x5b   : > { %1056 = vperm.xlu0 %1626, %v1445_v56   ;;  %1061 = vperm.xlu1 %1627, %v1446_v57  }
  0x5f   : > { %1066 = vperm.xlu0 %1626, %v1447_v58   ;;  %1071 = vperm.xlu1 %1627, %v1448_v59  }
  0x63   : > { %1076 = vperm.xlu0 %1626, %v1449_v60   ;;  %1081 = vperm.xlu1 %1627, %v1450_v61  }
  0x67   : > { %1086 = vperm.xlu0 %1626, %v1451_v62   ;;  %1110 = vperm.xlu1 %1627, %v1452_v63  }
  0x6b   : > { %1115 = vperm.xlu0 %1626, %v1453_v0   ;;  %1120 = vperm.xlu1 %1627, %v1454_v1  }
  0x6f   : > { %1125 = vperm.xlu0 %1626, %v1455_v2   ;;  %1130 = vperm.xlu1 %1627, %v1456_v3  }
  0x73   : > { %1135 = vperm.xlu0 %1626, %v1457_v4   ;;  %1140 = vperm.xlu1 %1627, %v1458_v5  }
  0x77   : > { %1145 = vperm.xlu0 %1626, %v1459_v6   ;;  %1150 = vperm.xlu1 %1627, %v1460_v7  }
  0x8e   : > { %v509_v8 = vpop.permute.xlu0 %508  ;;  %v519_v9 = vpop.permute.xlu1 %518 }
  0x92   : > { %v514_v10 = vpop.permute.xlu0 %513  ;;  %v524_v11 = vpop.permute.xlu1 %523 }
  0x96   : > { %v529_v12 = vpop.permute.xlu0 %528  ;;  %v534_v13 = vpop.permute.xlu1 %533 }
  0x9a   : > { %v539_v14 = vpop.permute.xlu0 %538  ;;  %v544_v15 = vpop.permute.xlu1 %543 }
  0x9e   : > { %v2026_v16 = vpop.permute.xlu0 %548  ;;  %v2028_v17 = vpop.permute.xlu1 %650 }
  0xa2   : > { %v2030_v18 = vpop.permute.xlu0 %655  ;;  %v2032_v19 = vpop.permute.xlu1 %660 }
  0xa6   : > { %v2044_v33 = vpop.permute.xlu0 %665  ;;  %v2046_v34 = vpop.permute.xlu1 %670 }
  0xaa   : > { %v2056_v49 = vpop.permute.xlu0 %675  ;;  %v2058_v50 = vpop.permute.xlu1 %680 }
  0xae   : > { %v906_v1 = vpop.permute.xlu0 %905  ;;  %v911_v2 = vpop.permute.xlu1 %910 }
 0x107   : > { %v426_v20 = vpop.f32.mrb[0].mxu0  ;;  %v2034_v21 = vpop.f32.mrb[0].mxu1 }
 0x108   : > { %v2036_v22 = vadd.f32 %v509_v8, %v426_v20  ;;  %v1532_v23 = vpop.f32.mrb[1].mxu0  ;;  %v1552_v24 = vpop.f32.mrb[1].mxu1 }
 0x109   : > { %v429_v25 = vpop.f32.mrb[2].mxu0  ;;  %v469_v26 = vpop.f32.mrb[2].mxu1 }
 0x10a   : > { %v2038_v27 = vadd.f32 %v514_v10, %v429_v25  ;;  %v1533_v28 = vpop.f32.mrb[3].mxu0  ;;  %v1553_v29 = vpop.f32.mrb[3].mxu1  ;;  %v561_v30 = vsel %vm560_vm2, %v2036_v22, 0.0 }
 0x10b   : > { %v916_v24 = vpop.permute.xlu0 %915  ;;  %v921_v28 = vpop.permute.xlu1 %920 }
 0x10c   : > { %v562_v31 = vsel %vm560_vm2, %v2038_v27, 0.0 }
 0x10d   : > { %v563_v32 = vadd.f32 %v562_v31, %v561_v30 }
 0x10f   : > { %v434_v35 = vpop.f32.mrb[4].mxu0  ;;  %v474_v36 = vpop.f32.mrb[4].mxu1 }
 0x110   : > { %v2048_v37 = vadd.f32 %v519_v9, %v434_v35  ;;  %v1536_v38 = vpop.f32.mrb[5].mxu0  ;;  %v1556_v39 = vpop.f32.mrb[5].mxu1  ;;  %v2077_v35 = vadd.f32 %v916_v24, %v469_v26 }
 0x111   : > { %v437_v40 = vpop.f32.mrb[6].mxu0  ;;  %v477_v41 = vpop.f32.mrb[6].mxu1 }
 0x112   : > { %v564_v42 = vsel %vm560_vm2, %v2048_v37, 0.0  ;;  %v2052_v43 = vadd.f32 %v524_v11, %v437_v40  ;;  %v1537_v44 = vpop.f32.mrb[7].mxu0  ;;  %v1557_v45 = vpop.f32.mrb[7].mxu1  ;;  %v960_v26 = vsel %vm560_vm2, %v2077_v35, 0.0 }
 0x113   : > { %v565_v46 = vadd.f32 %v564_v42, %v563_v32  ;;  %v926_v40 = vpop.permute.xlu0 %925  ;;  %v2084_v45 = vadd.f32 %v921_v28, %v474_v36 }
 0x114   : > { %v566_v47 = vsel %vm560_vm2, %v2052_v43, 0.0 }
 0x115   : > { %v567_v48 = vadd.f32 %v566_v47, %v565_v46 }
 0x117   : > { %v442_v51 = vpop.f32.mrb[8].mxu0  ;;  %v482_v52 = vpop.f32.mrb[8].mxu1 }
 0x118   : > { %v2060_v53 = vadd.f32 %v529_v12, %v442_v51  ;;  %v1540_v54 = vpop.f32.mrb[9].mxu0  ;;  %v1560_v55 = vpop.f32.mrb[9].mxu1 }
 0x119   : > { %v445_v56 = vpop.f32.mrb[10].mxu0  ;;  %v485_v57 = vpop.f32.mrb[10].mxu1  ;;  %v962_v55 = vsel %vm560_vm2, %v2084_v45, 0.0 }
 0x11a   : > { %v568_v58 = vsel %vm560_vm2, %v2060_v53, 0.0  ;;  %v2064_v59 = vadd.f32 %v534_v13, %v445_v56  ;;  %v1541_v60 = vpop.f32.mrb[11].mxu0  ;;  %v1561_v61 = vpop.f32.mrb[11].mxu1 }
 0x11b   : > { %v569_v62 = vadd.f32 %v568_v58, %v567_v48  ;;  %v2090_v48 = vadd.f32 %v926_v40, %v477_v41  ;;  %v936_v36 = vpop.permute.xlu0 %935 }
 0x11c   : > { %v570_v63 = vsel %vm560_vm2, %v2064_v59, 0.0 }
 0x11d   : > { %v571_v0 = vadd.f32 %v570_v63, %v569_v62  ;;  %v964_v61 = vsel %vm560_vm2, %v2090_v48, 0.0  ;;  %v2098_v62 = vadd.f32 %v936_v36, %v485_v57 }
 0x11f   : > { %v450_v3 = vpop.f32.mrb[12].mxu0  ;;  %v490_v4 = vpop.f32.mrb[12].mxu1 }
 0x120   : > { %v2068_v5 = vadd.f32 %v539_v14, %v450_v3  ;;  %v1544_v6 = vpop.f32.mrb[13].mxu0  ;;  %v1564_v7 = vpop.f32.mrb[13].mxu1  ;;  %v2074_v14 = vadd.f32 %v911_v2, %v2034_v21 }
 0x121   : > { %v453_v8 = vpop.f32.mrb[14].mxu0  ;;  %v493_v9 = vpop.f32.mrb[14].mxu1 }
 0x122   : > { %v572_v10 = vsel %vm560_vm2, %v2068_v5, 0.0  ;;  %v558_v11 = vadd.f32 %v544_v15, %v453_v8  ;;  %v1545_v12 = vpop.f32.mrb[15].mxu0  ;;  %v1565_v13 = vpop.f32.mrb[15].mxu1  ;;  %v958_v44 = vsel %vm560_vm2, %v2074_v14, 0.0 }
 0x123   : > { %v573_v20 = vadd.f32 %v572_v10, %v571_v0  ;;  %v946_v57 = vpop.permute.xlu0 %945 }
 0x124   : > { %v574_v23 = vsel %vm560_vm2, %v558_v11, 0.0 }
 0x125   : > { %v575_v25 = vadd.f32 %v574_v23, %v573_v20  ;;  %v956_v20 = vadd.f32 %v946_v57, %v493_v9 }
 0x127   : > { %v458_v29 = vpop.f32.mrb[16].mxu0 }
 0x128   : > { %v559_v30 = vadd.f32 %v2026_v16, %v458_v29  ;;  %v1548_v31 = vpop.f32.mrb[17].mxu0  ;;  %v931_v16 = vpop.permute.xlu1 %930 }
 0x129   : > { %v461_v32 = vpop.f32.mrb[18].mxu0  ;;  %v2094_v56 = vadd.f32 %v931_v16, %v482_v52  ;;  %v968_v52 = vsel %vm560_vm2, %v2098_v62, 0.0 }
 0x12a   : > { %v576_v15 = vsel %vm560_vm2, %v559_v30, 0.0  ;;  %v2080_v38 = vadd.f32 %v906_v1, %v461_v32  ;;  %v1549_v39 = vpop.f32.mrb[19].mxu0 }
 0x12b   : > { %v577_v42 = vadd.f32 %v576_v15, %v575_v25  ;;  %v966_v41 = vsel %vm560_vm2, %v2094_v56, 0.0 }
 0x12c   : > { %v957_v21 = vsel %vm560_vm2, %v2080_v38, 0.0  ;;  %v941_v63 = vpop.permute.xlu1 %940 }
 0x12d   : > { %v578_v46 = vrot.slane %v577_v42, 4  ;;  %v959_v47 = vadd.f32 %v958_v44, %v957_v21  ;;  %v2102_v2 = vadd.f32 %v941_v63, %v490_v4 }
 0x12f   : > { %v579_v51 = vadd.f32 %v578_v46, %v577_v42  ;;  %v961_v54 = vadd.f32 %v960_v26, %v959_v47  ;;  %v970_v10 = vsel %vm560_vm2, %v2102_v2, 0.0 }
 0x130   : > { %v2156_v36 = vpop.permute.xlu1 %685 }
 0x131   : > { %v580_v58 = vrot.slane %v579_v51, 2  ;;  %v963_v60 = vadd.f32 %v962_v55, %v961_v54 }
 0x133   : > { %v581_v0 = vadd.f32 %v580_v58, %v579_v51  ;;  %v965_v1 = vadd.f32 %v964_v61, %v963_v60 }
 0x135   : > { %v582_v3 = vrot.slane %v581_v0, 1  ;;  %v967_v6 = vadd.f32 %v966_v41, %v965_v1 }
 0x137   : > { %v583_v7 = vadd.f32 %v582_v3, %v581_v0  ;;  %v969_v8 = vadd.f32 %v968_v52, %v967_v6 }
 0x139   : > { %v585_v12 = vmul.f32 0.013888889, %v583_v7  ;;  %v971_v13 = vadd.f32 %v970_v10, %v969_v8  ;;  %v2163_v7 = vpop.permute.xlu0 %690  ;;  %v2165_v8 = vpop.permute.xlu1 %713 }
 0x13b   : > { %v2109_v23 = vsub.f32 %v2036_v22, %v585_v12  ;;  %v2112_v4 = vsub.f32 %v2038_v27, %v585_v12  ;;  %v2115_v24 = vsub.f32 %v2048_v37, %v585_v12  ;;  %v2118_v25 = vsub.f32 %v2052_v43, %v585_v12 }
 0x13c   : > { %v2121_v28 = vsub.f32 %v2060_v53, %v585_v12  ;;  %v2124_v29 = vsub.f32 %v2064_v59, %v585_v12  ;;  %v2127_v9 = vsub.f32 %v2068_v5, %v585_v12  ;;  %v2129_v22 = vsub.f32 %v558_v11, %v585_v12 }
 0x13d   : > { %v2131_v31 = vsub.f32 %v559_v30, %v585_v12  ;;  %v595_v27 = vmul.f32 %v2109_v23, %v2109_v23  ;;  %v596_v37 = vmul.f32 %v2112_v4, %v2112_v4  ;;  %v597_v43 = vmul.f32 %v2115_v24, %v2115_v24 }
 0x13e   : > { %v598_v53 = vmul.f32 %v2118_v25, %v2118_v25  ;;  %v972_v30 = vsel %vm560_vm2, %v956_v20, 0.0  ;;  %v599_v32 = vmul.f32 %v2121_v28, %v2121_v28  ;;  %v600_v42 = vmul.f32 %v2124_v29, %v2124_v29 }
 0x13f   : > { %v604_v59 = vsel %vm560_vm2, %v595_v27, 0.0  ;;  %v605_v5 = vsel %vm560_vm2, %v596_v37, 0.0  ;;  %v607_v15 = vsel %vm560_vm2, %v597_v43, 0.0  ;;  %v973_v40 = vadd.f32 %v972_v30, %v971_v13 }
 0x140   : > { %v606_v11 = vadd.f32 %v605_v5, %v604_v59  ;;  %v609_v44 = vsel %vm560_vm2, %v598_v53, 0.0  ;;  %v601_v46 = vmul.f32 %v2127_v9, %v2127_v9  ;;  %v611_v47 = vsel %vm560_vm2, %v599_v32, 0.0  ;;  %v2190_v32 = vpop.permute.xlu1 %723 }
 0x141   : > { %v974_v16 = vrot.slane %v973_v40, 4  ;;  %v602_v54 = vmul.f32 %v2129_v22, %v2129_v22  ;;  %v613_v55 = vsel %vm560_vm2, %v600_v42, 0.0  ;;  %v603_v61 = vmul.f32 %v2131_v31, %v2131_v31 }
 0x142   : > { %v608_v39 = vadd.f32 %v607_v15, %v606_v11  ;;  %v615_v63 = vsel %vm560_vm2, %v601_v46, 0.0 }
 0x143   : > { %v975_v51 = vadd.f32 %v974_v16, %v973_v40  ;;  %v617_v41 = vsel %vm560_vm2, %v602_v54, 0.0  ;;  %v619_v52 = vsel %vm560_vm2, %v603_v61, 0.0 }
 0x144   : > { %v610_v21 = vadd.f32 %v609_v44, %v608_v39  ;;  %v734_v46 = vpop.permute.xlu1 %733 }
 0x145   : > { %v976_v60 = vrot.slane %v975_v51, 2 }
 0x146   : > { %v612_v26 = vadd.f32 %v611_v47, %v610_v21 }
 0x147   : > { %v977_v1 = vadd.f32 %v976_v60, %v975_v51 }
 0x148   : > { %v614_v58 = vadd.f32 %v613_v55, %v612_v26 }
 0x149   : > { %v978_v6 = vrot.slane %v977_v1, 1 }
 0x14a   : > { %v616_v0 = vadd.f32 %v615_v63, %v614_v58 }
 0x14b   : > { %v979_v57 = vadd.f32 %v978_v6, %v977_v1  ;;  %v744_v6 = vpop.permute.xlu1 %743 }
 0x14c   : > { %v618_v3 = vadd.f32 %v617_v41, %v616_v0 }
 0x14d   : > { %v980_v13 = vmul.f32 0.013888889, %v979_v57 }
 0x14e   : > { %v620_v10 = vadd.f32 %v619_v52, %v618_v3 }
 0x14f   : > { %v2168_v37 = vsub.f32 %v2080_v38, %v980_v13  ;;  %v2171_v43 = vsub.f32 %v2074_v14, %v980_v13  ;;  %v2174_v53 = vsub.f32 %v2077_v35, %v980_v13  ;;  %v2177_v59 = vsub.f32 %v2084_v45, %v980_v13  ;;  %v2188_v38 = vpop.permute.xlu0 %718 }
 0x150   : > { %v621_v12 = vrot.slane %v620_v10, 4  ;;  %v2180_v5 = vsub.f32 %v2090_v48, %v980_v13  ;;  %v2183_v11 = vsub.f32 %v2094_v56, %v980_v13  ;;  %v2186_v30 = vsub.f32 %v2098_v62, %v980_v13 }
 0x151   : > { %v2193_v35 = vsub.f32 %v2102_v2, %v980_v13  ;;  %v2195_v15 = vsub.f32 %v956_v20, %v980_v13  ;;  %v990_v45 = vmul.f32 %v2168_v37, %v2168_v37  ;;  %v991_v48 = vmul.f32 %v2171_v43, %v2171_v43 }
 0x152   : > { %v622_v27 = vadd.f32 %v621_v12, %v620_v10  ;;  %v992_v56 = vmul.f32 %v2174_v53, %v2174_v53  ;;  %v993_v39 = vmul.f32 %v2177_v59, %v2177_v59  ;;  %v994_v44 = vmul.f32 %v2180_v5, %v2180_v5 }
 0x153   : > { %v999_v40 = vsel %vm560_vm2, %v990_v45, 0.0  ;;  %v1000_v2 = vsel %vm560_vm2, %v991_v48, 0.0  ;;  %v729_v16 = vpop.permute.xlu0 %728  ;;  %v995_v51 = vmul.f32 %v2183_v11, %v2183_v11  ;;  %v996_v60 = vmul.f32 %v2186_v30, %v2186_v30  ;;  %v754_v48 = vpop.permute.xlu1 %753 }
 0x154   : > { %v623_v14 = vrot.slane %v622_v27, 2  ;;  %v1001_v20 = vadd.f32 %v1000_v2, %v999_v40  ;;  %v1002_v21 = vsel %vm560_vm2, %v992_v56, 0.0  ;;  %v1004_v54 = vsel %vm560_vm2, %v993_v39, 0.0 }
 0x155   : > { %v1006_v61 = vsel %vm560_vm2, %v994_v44, 0.0  ;;  %v997_v1 = vmul.f32 %v2193_v35, %v2193_v35  ;;  %v1008_v41 = vsel %vm560_vm2, %v995_v51, 0.0  ;;  %v998_v10 = vmul.f32 %v2195_v15, %v2195_v15 }
 0x156   : > { %v624_v62 = vadd.f32 %v623_v14, %v622_v27  ;;  %v1003_v26 = vadd.f32 %v1002_v21, %v1001_v20  ;;  %v1010_v57 = vsel %vm560_vm2, %v996_v60, 0.0 }
 0x157   : > { %v739_v3 = vpop.permute.xlu0 %738  ;;  %v1012_v13 = vsel %vm560_vm2, %v997_v1, 0.0  ;;  %v1014_v14 = vsel %vm560_vm2, %v998_v10, 0.0  ;;  %v2232_v44 = vpop.permute.xlu1 %1051 }
 0x158   : > { %v625_v42 = vrot.slane %v624_v62, 1  ;;  %v1005_v58 = vadd.f32 %v1004_v54, %v1003_v26 }
 0x15a   : > { %v626_v47 = vadd.f32 %v625_v42, %v624_v62  ;;  %v1007_v0 = vadd.f32 %v1006_v61, %v1005_v58 }
 0x15b   : > { %v749_v45 = vpop.permute.xlu0 %748 }
 0x15c   : > { %v627_v55 = vmul.f32 0.013888889, %v626_v47  ;;  %v1009_v52 = vadd.f32 %v1008_v41, %v1007_v0 }
 0x15e   : > { %v628_v63 = vadd.f32 1e-06, %v627_v55  ;;  %v1011_v12 = vadd.f32 %v1010_v57, %v1009_v52 }
 0x15f   : > { %v2230_v20 = vpop.permute.xlu0 %1046 }
 0x160   : > { %1644 = vrsqrt.f32 %v628_v63  ;;  %v1013_v27 = vadd.f32 %v1012_v13, %v1011_v12 }
 0x162   : > { %v2224_v56 = vadd.f32 %v1014_v14, %v1013_v27 }
 0x16a   : > { %v1645_v62 = vpop.eup %1644 }
 0x16b   : > { %v630_v39 = vmul.f32 %v1645_v62, %v2109_v23  ;;  %v631_v40 = vmul.f32 %v1645_v62, %v2112_v4  ;;  %v632_v2 = vmul.f32 %v1645_v62, %v2115_v24  ;;  %v633_v42 = vmul.f32 %v1645_v62, %v2118_v25 }
 0x16c   : > { %v634_v21 = vmul.f32 %v1645_v62, %v2121_v28  ;;  %v635_v47 = vmul.f32 %v1645_v62, %v2124_v29  ;;  %v636_v26 = vmul.f32 %v1645_v62, %v2127_v9  ;;  %v637_v51 = vmul.f32 %v1645_v62, %v2129_v22 }
 0x16d   : > { %v638_v23 = vmul.f32 %v1645_v62, %v2131_v31  ;;  %v693_v4 = vmul.f32 %v2028_v17, %v630_v39  ;;  %v694_v24 = vmul.f32 %v2030_v18, %v631_v40  ;;  %v695_v25 = vmul.f32 %v2032_v19, %v632_v2 }
 0x16e   : > { %v696_v54 = vmul.f32 %v2044_v33, %v633_v42  ;;  %v697_v55 = vmul.f32 %v2046_v34, %v634_v21  ;;  %v698_v28 = vmul.f32 %v2056_v49, %v635_v47  ;;  %v699_v29 = vmul.f32 %v2058_v50, %v636_v26  ;;  %v2263_v49 = vpop.permute.xlu0 %1056  ;;  %v2265_v50 = vpop.permute.xlu1 %1061 }
 0x16f   : > { %v700_v9 = vmul.f32 %v2156_v36, %v637_v51  ;;  %v701_v22 = vmul.f32 %v2163_v7, %v638_v23  ;;  %v2249_v31 = vadd.f32 %v2165_v8, %v693_v4  ;;  %v2252_v17 = vadd.f32 %v2188_v38, %v694_v24 }
 0x170   : > { %v2255_v18 = vadd.f32 %v2190_v32, %v695_v25  ;;  %v2257_v19 = vadd.f32 %v729_v16, %v696_v54  ;;  %v2259_v33 = vadd.f32 %v734_v46, %v697_v55  ;;  %v2261_v34 = vadd.f32 %v739_v3, %v698_v28 }
 0x171   : > { %v2267_v36 = vadd.f32 %v744_v6, %v699_v29  ;;  %v2269_v7 = vadd.f32 %v749_v45, %v700_v9  ;;  %v2271_v8 = vadd.f32 %v754_v48, %v701_v22  ;;  %v1016_v38 = vrot.slane %v2224_v56, 4 }
 0x172   : > { %v774_v32 = vmul.f32 0.044715, %v2249_v31  ;;  %v775_v16 = vmul.f32 0.044715, %v2252_v17  ;;  %v776_v46 = vmul.f32 0.044715, %v2255_v18  ;;  %v2288_v57 = vpop.permute.xlu0 %1066  ;;  %v2290_v12 = vpop.permute.xlu1 %1071 }
 0x173   : > { %v777_v58 = vmul.f32 0.044715, %v2257_v19  ;;  %v778_v60 = vmul.f32 0.044715, %v2259_v33  ;;  %v779_v61 = vmul.f32 0.044715, %v2261_v34  ;;  %v1017_v55 = vadd.f32 %v1016_v38, %v2224_v56 }
 0x174   : > { %v780_v63 = vmul.f32 0.044715, %v2267_v36  ;;  %v781_v0 = vmul.f32 0.044715, %v2269_v7  ;;  %v782_v1 = vmul.f32 0.044715, %v2271_v8  ;;  %v783_v41 = vmul.f32 %v774_v32, %v2249_v31 }
 0x175   : > { %v784_v3 = vmul.f32 %v775_v16, %v2252_v17  ;;  %v785_v6 = vmul.f32 %v776_v46, %v2255_v18  ;;  %v786_v52 = vmul.f32 %v777_v58, %v2257_v19  ;;  %v787_v10 = vmul.f32 %v778_v60, %v2259_v33 }
 0x176   : > { %v788_v13 = vmul.f32 %v779_v61, %v2261_v34  ;;  %v789_v27 = vmul.f32 %v780_v63, %v2267_v36  ;;  %v790_v14 = vmul.f32 %v781_v0, %v2269_v7  ;;  %v791_v45 = vmul.f32 %v782_v1, %v2271_v8  ;;  %v2313_v22 = vpop.permute.xlu0 %1076  ;;  %v2315_v32 = vpop.permute.xlu1 %1081 }
 0x177   : > { %v792_v48 = vmul.f32 %v783_v41, %v2249_v31  ;;  %v793_v62 = vmul.f32 %v784_v3, %v2252_v17  ;;  %v794_v39 = vmul.f32 %v785_v6, %v2255_v18  ;;  %v795_v40 = vmul.f32 %v786_v52, %v2257_v19 }
 0x178   : > { %v796_v2 = vmul.f32 %v787_v10, %v2259_v33  ;;  %v797_v42 = vmul.f32 %v788_v13, %v2261_v34  ;;  %v798_v21 = vmul.f32 %v789_v27, %v2267_v36  ;;  %v799_v47 = vmul.f32 %v790_v14, %v2269_v7 }
 0x179   : > { %v800_v26 = vmul.f32 %v791_v45, %v2271_v8  ;;  %v801_v51 = vadd.f32 %v792_v48, %v2249_v31  ;;  %v802_v23 = vadd.f32 %v793_v62, %v2252_v17  ;;  %v803_v4 = vadd.f32 %v794_v39, %v2255_v18 }
 0x17a   : > { %v804_v24 = vadd.f32 %v795_v40, %v2257_v19  ;;  %v805_v25 = vadd.f32 %v796_v2, %v2259_v33  ;;  %v806_v54 = vadd.f32 %v797_v42, %v2261_v34  ;;  %v807_v28 = vadd.f32 %v798_v21, %v2267_v36  ;;  %v2319_v3 = vpop.permute.xlu0 %1086  ;;  %v2321_v6 = vpop.permute.xlu1 %1110 }
 0x17b   : > { %v810_v29 = vmul.f32 0.7978846, %v801_v51  ;;  %v811_v9 = vmul.f32 0.7978846, %v802_v23  ;;  %v808_v16 = vadd.f32 %v799_v47, %v2269_v7  ;;  %v812_v46 = vmul.f32 0.7978846, %v803_v4 }
 0x17c   : > { %v813_v58 = vmul.f32 0.7978846, %v804_v24  ;;  %v809_v60 = vadd.f32 %v800_v26, %v2271_v8  ;;  %v814_v61 = vmul.f32 0.7978846, %v805_v25  ;;  %v815_v63 = vmul.f32 0.7978846, %v806_v54 }
 0x17d   : > { %1646 = vtanh.f32 %v810_v29  ;;  %v1018_v0 = vrot.slane %v1017_v55, 2  ;;  %v816_v56 = vmul.f32 0.7978846, %v807_v28  ;;  %v817_v38 = vmul.f32 0.7978846, %v808_v16 }
 0x17e   : > { %1648 = vtanh.f32 %v811_v9  ;;  %v818_v41 = vmul.f32 0.7978846, %v809_v60  ;;  %v2324_v45 = vpop.permute.xlu0 %1115  ;;  %v2326_v48 = vpop.permute.xlu1 %1120  ;;  %v765_v62 = vmul.f32 0.5, %v2249_v31  ;;  %v766_v42 = vmul.f32 0.5, %v2252_v17 }
 0x17f   : > { %1650 = vtanh.f32 %v812_v46  ;;  %v1019_v1 = vadd.f32 %v1018_v0, %v1017_v55  ;;  %v767_v26 = vmul.f32 0.5, %v2255_v18  ;;  %v768_v24 = vmul.f32 0.5, %v2257_v19 }
 0x180   : > { %1652 = vtanh.f32 %v813_v58  ;;  %v769_v55 = vmul.f32 0.5, %v2259_v33  ;;  %v770_v16 = vmul.f32 0.5, %v2261_v34  ;;  %v771_v19 = vmul.f32 0.5, %v2267_v36 }
 0x181   : > { %1654 = vtanh.f32 %v814_v61  ;;  %v1020_v52 = vrot.slane %v1019_v1, 1  ;;  %v772_v34 = vmul.f32 0.5, %v2269_v7  ;;  %v773_v36 = vmul.f32 0.5, %v2271_v8 }
 0x182   : > { %1656 = vtanh.f32 %v815_v63  ;;  %v1126_v61 = vpop.permute.xlu0 %1125  ;;  %v1131_v63 = vpop.permute.xlu1 %1130 }
 0x183   : > { %1658 = vtanh.f32 %v816_v56  ;;  %v1021_v10 = vadd.f32 %v1020_v52, %v1019_v1 }
 0x184   : > { %1660 = vtanh.f32 %v817_v38 }
 0x185   : > { %1662 = vtanh.f32 %v818_v41  ;;  %v1022_v13 = vmul.f32 0.013888889, %v1021_v10 }
 0x187   : > { %v1647_v27 = vpop.eup %1646  ;;  %v1023_v40 = vadd.f32 1e-06, %v1022_v13 }
 0x188   : > { %v1649_v14 = vpop.eup %1648  ;;  %v828_v39 = vadd.f32 1.0, %v1647_v27 }
 0x189   : > { %v1651_v2 = vpop.eup %1650  ;;  %v829_v21 = vadd.f32 1.0, %v1649_v14  ;;  %1664 = vrsqrt.f32 %v1023_v40 }
 0x18a   : > { %v1653_v47 = vpop.eup %1652  ;;  %v830_v51 = vadd.f32 1.0, %v1651_v2  ;;  %v837_v23 = vmul.f32 %v828_v39, %v765_v62  ;;  %v1136_v2 = vpop.permute.xlu0 %1135 }
 0x18b   : > { %v1655_v4 = vpop.eup %1654  ;;  %v831_v25 = vadd.f32 1.0, %v1653_v47  ;;  %v838_v54 = vmul.f32 %v829_v21, %v766_v42  ;;  %v1141_v42 = vpop.permute.xlu1 %1140 }
 0x18c   : > { %v1657_v31 = vpop.eup %1656  ;;  %v832_v28 = vadd.f32 1.0, %v1655_v4  ;;  %v839_v29 = vmul.f32 %v830_v51, %v767_v26  ;;  %v1482_v9 = vpack.c.bf16 %v837_v23, %v837_v23 }
 0x18d   : > { %v1659_v17 = vpop.eup %1658  ;;  %v833_v46 = vadd.f32 1.0, %v1657_v31  ;;  %v840_v18 = vmul.f32 %v831_v25, %v768_v24  ;;  %v1483_v58 = vpack.c.bf16 %v838_v54, %v838_v54 }
 0x18e   : > { %v1661_v60 = vpop.eup %1660  ;;  %v834_v0 = vadd.f32 1.0, %v1659_v17  ;;  %v841_v56 = vmul.f32 %v832_v28, %v769_v55  ;;  %v1484_v38 = vpack.c.bf16 %v839_v29, %v839_v29  ;;  %884 = vst.msk [vmem:[%s2335_s18] sm:$0xf] %vm883_vm3, %v1482_v9  ;;  %v1146_v28 = vpop.permute.xlu0 %1145 }
 0x18f   : > { %v1663_v33 = vpop.eup %1662  ;;  %v835_v1 = vadd.f32 1.0, %v1661_v60  ;;  %v842_v41 = vmul.f32 %v833_v46, %v770_v16  ;;  %v1485_v52 = vpack.c.bf16 %v840_v18, %v840_v18  ;;  %885 = vst.msk [vmem:[%s2335_s18 + $0x4] sm:$0xf] %vm883_vm3, %v1483_v58 }
 0x190   : > { %v836_v10 = vadd.f32 1.0, %v1663_v33  ;;  %v843_v13 = vmul.f32 %v834_v0, %v771_v19  ;;  %v1486_v27 = vpack.c.bf16 %v841_v56, %v841_v56  ;;  %886 = vst.msk [vmem:[%s2335_s18 + $0x8] sm:$0xf] %vm883_vm3, %v1484_v38 }
 0x191   : > { %v844_v14 = vmul.f32 %v835_v1, %v772_v34  ;;  %v1487_v62 = vpack.c.bf16 %v842_v41, %v842_v41  ;;  %887 = vst.msk [vmem:[%s2335_s18 + $0xc] sm:$0xf] %vm883_vm3, %v1485_v52 }
 0x192   : > { %v845_v7 = vmul.f32 %v836_v10, %v773_v36  ;;  %v1488_v39 = vpack.c.bf16 %v843_v13, %v843_v13  ;;  %888 = vst.msk [vmem:[%s2335_s18 + $0x10] sm:$0xf] %vm883_vm3, %v1486_v27 }
 0x193   : > { %v1489_v40 = vpack.c.bf16 %v844_v14, %v844_v14  ;;  %889 = vst.msk [vmem:[%s2335_s18 + $0x14] sm:$0xf] %vm883_vm3, %v1487_v62  ;;  %v1665_v8 = vpop.eup %1664 }
 0x194   : > { %v1490_v21 = vpack.c.bf16 %v845_v7, %v845_v7  ;;  %890 = vst.msk [vmem:[%s2335_s18 + $0x18] sm:$0xf] %vm883_vm3, %v1488_v39  ;;  %v1025_v47 = vmul.f32 %v1665_v8, %v2168_v37  ;;  %v1026_v26 = vmul.f32 %v1665_v8, %v2171_v43  ;;  %v1027_v51 = vmul.f32 %v1665_v8, %v2174_v53 }
 0x195   : > { %891 = vst.msk [vmem:[%s2335_s18 + $0x1c] sm:$0xf] %vm883_vm3, %v1489_v40  ;;  %v1028_v23 = vmul.f32 %v1665_v8, %v2177_v59  ;;  %v1029_v4 = vmul.f32 %v1665_v8, %v2180_v5  ;;  %v1030_v24 = vmul.f32 %v1665_v8, %v2183_v11  ;;  %v1031_v25 = vmul.f32 %v1665_v8, %v2186_v30 }
 0x196   : > { %892 = vst.msk [vmem:[%s2335_s18 + $0x20] sm:$0xf] %vm883_vm3, %v1490_v21  ;;  %v1032_v54 = vmul.f32 %v1665_v8, %v2193_v35  ;;  %v1033_v31 = vmul.f32 %v1665_v8, %v2195_v15  ;;  %v1089_v37 = vmul.f32 %v2230_v20, %v1025_v47  ;;  %v1090_v43 = vmul.f32 %v2232_v44, %v1026_v26  ;;  %v1151_v44 = vpop.permute.xlu1 %1150  ;;  %v1235_v58 = vld [vmem:[%s2335_s18] sm:$0xff] (%p1771_p3)  }
 0x197   : > { %v1091_v53 = vmul.f32 %v2263_v49, %v1027_v51  ;;  %v1092_v59 = vmul.f32 %v2265_v50, %v1028_v23  ;;  %v1093_v55 = vmul.f32 %v2288_v57, %v1029_v4  ;;  %v1094_v5 = vmul.f32 %v2290_v12, %v1030_v24  ;;  %1236 = vst [vmem:[%s1219_s29] sm:$0xff] (%p1771_p3), %v1235_v58  }
 0x198   : > { %v1095_v11 = vmul.f32 %v2313_v22, %v1031_v25  ;;  %v1096_v30 = vmul.f32 %v2315_v32, %v1032_v54  ;;  %v1097_v35 = vmul.f32 %v2319_v3, %v1033_v31  ;;  %v1153_v15 = vadd.f32 %v2321_v6, %v1089_v37  ;;  %v1239_v60 = vld [vmem:[%s2335_s18 + $0x8] sm:$0xff] (%p1771_p3)  }
 0x199   : > { %v1154_v20 = vadd.f32 %v2324_v45, %v1090_v43  ;;  %v1155_v49 = vadd.f32 %v2326_v48, %v1091_v53  ;;  %v1156_v50 = vadd.f32 %v1126_v61, %v1092_v59  ;;  %v1157_v57 = vadd.f32 %v1131_v63, %v1093_v55  ;;  %1240 = vst [vmem:[%s1219_s29 + $0x8] sm:$0xff] (%p1771_p3), %v1239_v60  }
 0x19a   : > { %v1158_v12 = vadd.f32 %v1136_v2, %v1094_v5  ;;  %v1159_v22 = vadd.f32 %v1141_v42, %v1095_v11  ;;  %v1160_v32 = vadd.f32 %v1146_v28, %v1096_v30  ;;  %v1161_v3 = vadd.f32 %v1151_v44, %v1097_v35  ;;  %v1243_v61 = vld [vmem:[%s2335_s18 + $0x10] sm:$0xff] (%p1771_p3)  }
 0x19b   : > { %v1491_v6 = vpack.c.bf16 %v1153_v15, %v1153_v15  ;;  %v1492_v45 = vpack.c.bf16 %v1154_v20, %v1154_v20  ;;  %v1493_v29 = vpack.c.bf16 %v1155_v49, %v1155_v49  ;;  %v1494_v9 = vpack.c.bf16 %v1156_v50, %v1156_v50  ;;  %1215 = sbr.rel (!%p1771_p3) target bundleno = 426 (0x1aa), region = 44  ;;  %1244 = vst [vmem:[%s1219_s29 + $0x10] sm:$0xff] (%p1771_p3), %v1243_v61  }
 0x19c   : > { %v1495_v48 = vpack.c.bf16 %v1157_v57, %v1157_v57  ;;  %v1496_v17 = vpack.c.bf16 %v1158_v12, %v1158_v12  ;;  %v1497_v16 = vpack.c.bf16 %v1159_v22, %v1159_v22  ;;  %v1498_v46 = vpack.c.bf16 %v1160_v32, %v1160_v32  ;;  %v1247_v63 = vld [vmem:[%s2335_s18 + $0x18] sm:$0xff] (%p1771_p3)  }
 0x19d   : > { %v1499_v18 = vpack.c.bf16 %v1161_v3, %v1161_v3  ;;  %1470 = vst.msk [vmem:[%s2335_s18 + $0x24] sm:$0xf] %vm883_vm3, %v1491_v6  ;;  %1471 = vst.msk [vmem:[%s2335_s18 + $0x28] sm:$0xf] %vm883_vm3, %v1492_v45  ;;  %v1251_v19 = vld [vmem:[%s2335_s18 + $0x20] sm:$0xf] (%p1771_p3) }
 0x19e   : > { %1472 = vst.msk [vmem:[%s2335_s18 + $0x2c] sm:$0xf] %vm883_vm3, %v1493_v29  ;;  %1473 = vst.msk [vmem:[%s2335_s18 + $0x30] sm:$0xf] %vm883_vm3, %v1494_v9 }
 0x19f   : > { %1474 = vst.msk [vmem:[%s2335_s18 + $0x34] sm:$0xf] %vm883_vm3, %v1495_v48  ;;  %1475 = vst.msk [vmem:[%s2335_s18 + $0x38] sm:$0xf] %vm883_vm3, %v1496_v17 }
 0x1a0   : > { %1476 = vst.msk [vmem:[%s2335_s18 + $0x3c] sm:$0xf] %vm883_vm3, %v1497_v16  ;;  %1477 = vst.msk [vmem:[%s2335_s18 + $0x40] sm:$0xf] %vm883_vm3, %v1498_v46 }
 0x1a1   : > { %1478 = vst.msk [vmem:[%s2335_s18 + $0x44] sm:$0xf] %vm883_vm3, %v1499_v18  ;;  %1248 = vst [vmem:[%s1219_s29 + $0x18] sm:$0xff] (%p1771_p3), %v1247_v63  }
 0x1a2   : > { %1252 = vst [vmem:[%s1219_s29 + $0x20] sm:$0xf] %v1251_v19 }
 0x1a4   : > { %v1253_v0 = vld [vmem:[%s2335_s18 + $0x24] sm:$0xff]  }
 0x1a5   : > { %v1257_v56 = vld [vmem:[%s2335_s18 + $0x2c] sm:$0xff]   ;;  %1254 = vst [vmem:[%s1219_s29 + $0x48] sm:$0xff] %v1253_v0  }
 0x1a6   : > { %v1261_v38 = vld [vmem:[%s2335_s18 + $0x34] sm:$0xff]   ;;  %1258 = vst [vmem:[%s1219_s29 + $0x50] sm:$0xff] %v1257_v56  }
 0x1a7   : > { %v1265_v33 = vld [vmem:[%s2335_s18 + $0x3c] sm:$0xff]   ;;  %1262 = vst [vmem:[%s1219_s29 + $0x58] sm:$0xff] %v1261_v38  }
 0x1a8   : > { %1266 = vst [vmem:[%s1219_s29 + $0x60] sm:$0xff] %v1265_v33   ;;  %v1269_v34 = vld [vmem:[%s2335_s18 + $0x44] sm:$0xf] }
 0x1a9   : > { %1270 = vst [vmem:[%s1219_s29 + $0x68] sm:$0xf] %v1269_v34 }
 0x1aa PF: > { %s15_s22 = sadd.s32 1, %s1704_s22   ;;  %s2434_s18 = smov %s1692_s19 }
 0x1ab   : > { %p12_p9 = scmp.ge.s32.totalorder %s15_s22, 4   ;;  %s2435_s19 = smov %s1780_s28 }
 0x1ac   : > { %s2436_s20 = smov %s1700_s21  ;;  %s2437_s21 = smov %s2439_s24 }
 0x1ad   :  { %14 = sbr.rel (!%p12_p9) target bundleno = 3 (0x3), region = 115 }

// kernel: decoder_forward.6
= control target key start
LH: loop header
LB: loop body
LE: loop exit
PB: predicated region body
PF: predicated region fallthrough
CT: control target
= control target key end

     0   :  { %s1320_s21 = smov 0   ;;  %s1322_s22 = smov 0   ;;  %s1605_s0 = inlined_call_operand.vmem [shape: bf16[2,2,40,256], index: 0, kind: input, shape index: {}]   ;;  %s1606_s1 = inlined_call_operand.vmem [shape: bf16[2,40,256], index: 1, kind: input, shape index: {}]   ;;  %s1607_s2 = inlined_call_operand.vmem [shape: bf16[2,24,40], index: 2, kind: input, shape index: {}]   ;;  %s1608_s3 = inlined_call_operand.vmem [shape: f32[2,24,1], index: 3, kind: input, shape index: {}]   ;;  %s1609_s4 = inlined_call_operand.vmem [shape: f32[2,24,1], index: 4, kind: input, shape index: {}]   ;;  %s1610_s5 = inlined_call_operand.vmem [shape: f32[2,24,1], index: 5, kind: input, shape index: {}]   ;;  %s1611_s6 = inlined_call_operand.vmem [shape: bf16[2,2,24,256], index: 6, kind: output, shape index: {}]  }
   0x1   :  { %s1324_s23 = smov 0   ;;  %s1326_s24 = smov 0  }
   0x2   :  { %s1328_s25 = smov 0  }
   0x3 LB: > { %s28_s26 = sadd.s32 1, %s1278_s24  ;;  %s1107_s27 = sadd.s32 4294967295, %s1282_s25   ;;  %s1282_s25 = sphi %s1328_s25, %s16_s25   ;;  %s1278_s24 = sphi %s1326_s24, %s1616_s24   ;;  %s1274_s23 = sphi %s1324_s23, %s1615_s23   ;;  %s1270_s22 = sphi %s1322_s22, %s1614_s22   ;;  %s1266_s21 = sphi %s1320_s21, %s1613_s21  }
   0x4   : > { %p30_p0 = scmp.ge.s32.totalorder %s28_s26, 2  ;;  %p44_p1 = scmp.ne.s32.totalorder %s1270_s22, %s1266_s21 }
   0x5   : > { %p45_p2 = scmp.eq.s32.totalorder %s1282_s25, 0  ;;  %p188_p4 = scmp.eq.s32.totalorder %s1107_s27, 1 }
   0x6   : > { %s1618_s26 = smov (%p30_p0, %s28_s26), 0  ;;  %s37_s29 = sadd.s32 1, %s1270_s22 }
   0x7   : > { %p46_p3 = por %p45_p2, %p44_p1  ;;  %s32_s28 = ssub.s32 %s1278_s24, %s1618_s26 }
   0x8   : > { %p35_p5 = scmp.eq.s32.totalorder %s32_s28, 0  ;;  %p1355_p6 = por %p188_p4, %p44_p1 }
   0x9   : > { %p1110_p7 = scmp.ge.s32.totalorder %s1282_s25, 2 }
   0xa   : > { %s1360_s7 = scalar_select %p35_p5, %s1270_s22, %s37_s29  }
   0xb   : > { %222 = sbr.rel (%p1110_p7) target bundleno = 28 (0x1c), region = 32 }
  0x12   : > { %225 = sbr.rel (!%p46_p3) target bundleno = 28 (0x1c), region = 36  ;;  %s227_s8 = sand.u32 (%p46_p3), 1, %s1270_s22  }
  0x13   : > { %s1172_s9 = smul.u32 (%p46_p3), 40, %s1278_s24 }
  0x14   : > { %s1171_s10 = smul.u32 (%p46_p3), 80, %s227_s8 }
  0x15   : > { %s234_s13 = scalar_lea.vmem (%p46_p3), %s1605_s0, %s1172_s9 }
  0x16   : > { %v280_v0 = vld [vmem:[%s234_s13] sm:$0xff] (%p46_p3)  ;;  %v282_v1 = vld [vmem:[%s234_s13 + $0x8] sm:$0xff] (%p46_p3)  ;;  %v284_v2 = vld [vmem:[%s234_s13 + $0x10] sm:$0xff] (%p46_p3)  ;;  %s229_s14 = scalar_lea.vmem (%p46_p3), [#allocation2], %s1171_s10 }
  0x17   : > { %281 = vst [vmem:[%s229_s14] sm:$0xff] (%p46_p3), %v280_v0  ;;  %283 = vst [vmem:[%s229_s14 + $0x8] sm:$0xff] (%p46_p3), %v282_v1  ;;  %v286_v3 = vld [vmem:[%s234_s13 + $0x18] sm:$0xff] (%p46_p3)  ;;  %v288_v4 = vld [vmem:[%s234_s13 + $0x20] sm:$0xff] (%p46_p3) }
  0x18   : > { %285 = vst [vmem:[%s229_s14 + $0x10] sm:$0xff] (%p46_p3), %v284_v2  ;;  %v290_v5 = vld [vmem:[%s234_s13 + $0x50] sm:$0xff] (%p46_p3)  ;;  %287 = vst [vmem:[%s229_s14 + $0x18] sm:$0xff] (%p46_p3), %v286_v3  ;;  %v292_v6 = vld [vmem:[%s234_s13 + $0x58] sm:$0xff] (%p46_p3) }
  0x19   : > { %289 = vst [vmem:[%s229_s14 + $0x20] sm:$0xff] %v288_v4  ;;  %291 = vst [vmem:[%s229_s14 + $0x28] sm:$0xff] %v290_v5  ;;  %v294_v7 = vld [vmem:[%s234_s13 + $0x60] sm:$0xff]  ;;  %v296_v8 = vld [vmem:[%s234_s13 + $0x68] sm:$0xff] }
  0x1a   : > { %293 = vst [vmem:[%s229_s14 + $0x30] sm:$0xff] %v292_v6  ;;  %295 = vst [vmem:[%s229_s14 + $0x38] sm:$0xff] %v294_v7  ;;  %v298_v9 = vld [vmem:[%s234_s13 + $0x70] sm:$0xff] }
  0x1b   : > { %297 = vst [vmem:[%s229_s14 + $0x40] sm:$0xff] %v296_v8  ;;  %299 = vst [vmem:[%s229_s14 + $0x48] sm:$0xff] %v298_v9 }
  0x1c PF: > { %p1112_p8 = scmp.ge.s32.totalorder %s1282_s25, 1  ;;  %p317_p9 = scmp.lt.s32.totalorder %s1282_s25, 3 }
  0x1e   : > { %p318_p10 = pnand %p1112_p8, %p317_p9 }
  0x1f   : > { %s324_s15 = sand.u32 (!%p318_p10), 1, %s1266_s21   ;;  %p363_p11 = scmp.lt.s32.totalorder (!%p318_p10), %s1274_s23, 1  ;;  %v1284_v10 = vmov (!%p318_p10), 0   ;;  %v392_v11 = vld [vmem:[%s1608_s3] sm:$0xff] (!%p318_p10)  ;;  %v393_v14 = vld [vmem:[%s1608_s3 + $0x8] sm:$0xff] (!%p318_p10)  ;;  %v394_v36 = vld [vmem:[%s1608_s3 + $0x10] sm:$0xff] (!%p318_p10) }
  0x20   : > { %321 = sbr.rel (%p318_p10) target bundleno = 381 (0x17d), region = 78  ;;  %489 = vmatprep.mubr.bf16.mxu0 (!%p318_p10), %v1284_v10  ;;  %803 = vmatprep.mubr.bf16.mxu1 (!%p318_p10), %v1284_v10  ;;  %v1137_v41 = vld [vmem:[%s1608_s3 + $0x20] sm:$0xff] (!%p318_p10)  ;;  %v1136_v46 = vld [vmem:[%s1608_s3 + $0x18] sm:$0xff] (!%p318_p10)  ;;  %vm450_vm0 = vcmask (!%p318_p10), 1043456   ;;  %v1138_v54 = vld [vmem:[%s1608_s3 + $0x28] sm:$0xff] (!%p318_p10)  ;;  %vm443_vm1 = vcmask (!%p318_p10), 326656  }
  0x21   : > { %s1173_s16 = smul.u32 (!%p318_p10), 80, %s324_s15  ;;  %1218 = vset.pattern.permute.xlu0 (!%p318_p10), %v1284_v10  ;;  %1219 = vset.pattern.permute.xlu1 (!%p318_p10), %v1284_v10  ;;  %v567_v47 = vld [vmem:[%s1609_s4] sm:$0xff] (!%p318_p10)  ;;  %v569_v55 = vld [vmem:[%s1609_s4 + $0x10] sm:$0xff] (!%p318_p10)  ;;  %v568_v60 = vld [vmem:[%s1609_s4 + $0x8] sm:$0xff] (!%p318_p10) }
  0x22   : > { %397 = vperm.xlu0 (!%p318_p10), %1218, %v392_v11   ;;  %407 = vperm.xlu1 (!%p318_p10), %1219, %v394_v36   ;;  %v1220_v58 = vld [vmem:[%s1607_s2] sm:$0xff] (!%p318_p10)   ;;  %v1221_v59 = vld [vmem:[%s1607_s2 + $0xc] sm:$0xff] (!%p318_p10)   ;;  %v1150_v63 = vld [vmem:[%s1609_s4 + $0x18] sm:$0xff] (!%p318_p10)  ;;  %s1174_s28 = smul.u32 (!%p318_p10), 48, %s324_s15 }
  0x23   : > { %s326_s27 = scalar_lea.vmem (!%p318_p10), [#allocation2], %s1173_s16  ;;  %v592_v61 = vld [vmem:[%s1610_s5 + $0x8] sm:$0xff] (!%p318_p10)  ;;  %v591_v62 = vld [vmem:[%s1610_s5] sm:$0xff] (!%p318_p10)  ;;  %v1223_v1 = vld [vmem:[%s1607_s2 + $0x14] ss:$0 sps:$4 sm:$0xff] (!%p318_p10)  }
  0x24   : > { %v379_v12 = vld [vmem:[%s326_s27] sm:$0xff] (!%p318_p10)  ;;  %v380_v13 = vld [vmem:[%s326_s27 + $0x8] sm:$0xff] (!%p318_p10)  ;;  %v1129_v16 = vld [vmem:[%s326_s27 + $0x30] sm:$0xff] (!%p318_p10)  ;;  %s1564_s21 = scalar_lea.vmem (!%p318_p10), [#allocation3], %s1174_s28 }
  0x25   : > { %v1128_v15 = vld [vmem:[%s326_s27 + $0x28] sm:$0xff] (!%p318_p10)  ;;  %v381_v17 = vld [vmem:[%s326_s27 + $0x10] sm:$0xff] (!%p318_p10)  ;;  %v382_v18 = vld [vmem:[%s326_s27 + $0x18] sm:$0xff] (!%p318_p10) }
  0x26   : > { %v1130_v19 = vld [vmem:[%s326_s27 + $0x38] sm:$0xff] (!%p318_p10)  ;;  %v1131_v20 = vld [vmem:[%s326_s27 + $0x40] sm:$0xff] (!%p318_p10)  ;;  %402 = vperm.xlu0 (!%p318_p10), %1218, %v393_v14   ;;  %v1132_v35 = vld [vmem:[%s326_s27 + $0x48] sm:$0xff] (!%p318_p10)  ;;  %713 = vperm.xlu1 (!%p318_p10), %1219, %v1136_v46  }
  0x27   : > { %s364_s17 = scalar_select %p363_p11, %s1274_s23, 1  ;;  %v383_v30 = vld [vmem:[%s326_s27 + $0x20] sm:$0xff]  ;;  %v1222_v0 = vld [vmem:[%s1607_s2 + $0x8] ss:$0 sps:$4 sm:$0xff]   ;;  %v1153_v6 = vld [vmem:[%s1610_s5 + $0x18] sm:$0xff] }
  0x28   : > { %v593_v2 = vld [vmem:[%s1610_s5 + $0x10] sm:$0xff]  ;;  %v1152_v3 = vld [vmem:[%s1609_s4 + $0x28] sm:$0xff]  ;;  %v1151_v4 = vld [vmem:[%s1609_s4 + $0x20] sm:$0xff]  ;;  %s1176_s15 = smul.u32 (%p1355_p6), 24, %s1274_s23 }
  0x29   : > { %s1175_s20 = smul.u32 40, %s364_s17  ;;  %v1154_v5 = vld [vmem:[%s1610_s5 + $0x20] sm:$0xff]  ;;  %v1155_v7 = vld [vmem:[%s1610_s5 + $0x28] sm:$0xff] }
  0x2a   : > { %718 = vperm.xlu0 %1218, %v1137_v41   ;;  %723 = vperm.xlu1 %1219, %v1138_v54   ;;  %s965_s9 = scalar_lea.vmem (%p1355_p6), %s1611_s6, %s1176_s15 }
  0x2b   : > { %s370_s10 = scalar_lea.vmem %s1606_s1, %s1175_s20 }
  0x2c   : > { %v374_v21 = vld [vmem:[%s370_s10] sm:$0xff]  ;;  %v375_v22 = vld [vmem:[%s370_s10 + $0x8] sm:$0xff]  ;;  %v376_v23 = vld [vmem:[%s370_s10 + $0x10] sm:$0xff] }
  0x2d   : > { %v384_v24 = vmul.bf16 %v379_v12, %v374_v21  ;;  %v385_v25 = vmul.bf16 %v380_v13, %v375_v22  ;;  %v698_v26 = vmul.bf16 %v1128_v15, %v374_v21  ;;  %v699_v27 = vmul.bf16 %v1129_v16, %v375_v22  ;;  %v377_v28 = vld [vmem:[%s370_s10 + $0x18] sm:$0xff]  ;;  %v378_v29 = vld [vmem:[%s370_s10 + $0x20] sm:$0xff] }
  0x2e   : > { %v386_v31 = vmul.bf16 %v381_v17, %v376_v23  ;;  %v387_v32 = vmul.bf16 %v382_v18, %v377_v28  ;;  %v700_v33 = vmul.bf16 %v1130_v19, %v376_v23  ;;  %v701_v34 = vmul.bf16 %v1131_v20, %v377_v28  ;;  %572 = vperm.xlu0 %1218, %v567_v47  }
  0x2f   : > { %v1117_v37 = vcombine.high %v384_v24, %v385_v25  ;;  %v1142_v38 = vcombine.high %v698_v26, %v699_v27  ;;  %v1116_v39 = vcombine.low %v384_v24, %v385_v25  ;;  %v1141_v40 = vcombine.low %v698_v26, %v699_v27  ;;  %577 = vperm.xlu1 %1219, %v568_v60  }
  0x30   : > { %v1119_v42 = vcombine.high %v386_v31, %v387_v32  ;;  %v1144_v43 = vcombine.high %v700_v33, %v701_v34  ;;  %v388_v44 = vmul.bf16 %v383_v30, %v378_v29  ;;  %v702_v45 = vmul.bf16 %v1132_v35, %v378_v29 }
  0x31   : > { %457 = vmatprep.subr.bf16.mxu0 %v1117_v37  ;;  %771 = vmatprep.subr.bf16.mxu1 %v1142_v38  ;;  %v1118_v48 = vcombine.low %v386_v31, %v387_v32  ;;  %v1143_v49 = vcombine.low %v700_v33, %v701_v34 }
  0x32   : > { %458 = vmatpush1.bf16.msra.mxu0 %v1116_v39  ;;  %772 = vmatpush1.bf16.msra.mxu1 %v1141_v40  ;;  %v1121_v50 = vcombine.high %v388_v44, %v388_v44  ;;  %v1146_v51 = vcombine.high %v702_v45, %v702_v45  ;;  %v1120_v52 = vcombine.low %v388_v44, %v388_v44 }
  0x33   : > { %459 = vmatprep.subr.bf16.mxu0 %v1119_v42  ;;  %773 = vmatprep.subr.bf16.mxu1 %v1144_v43  ;;  %v1145_v53 = vcombine.low %v702_v45, %v702_v45 }
  0x34   : > { %v452_v56 = vsel %vm450_vm0, %v1120_v52, 0  ;;  %582 = vperm.xlu0 %1218, %v569_v55   ;;  %596 = vperm.xlu1 %1219, %v591_v62  }
  0x35   : > { %v766_v57 = vsel %vm450_vm0, %v1145_v53, 0 }
  0x36   : > { %460 = vmatpush1.bf16.msra.mxu0 %v1118_v48  ;;  %774 = vmatpush1.bf16.msra.mxu1 %v1143_v49 }
  0x37   : > { %1122 = vmatprep.subr.msk.bf16.mxu0 %vm450_vm0, %v1121_v50  ;;  %1147 = vmatprep.subr.msk.bf16.mxu1 %vm450_vm0, %v1146_v51 }
  0x38   : > { %601 = vperm.xlu0 %1218, %v592_v61   ;;  %606 = vperm.xlu1 %1219, %v593_v2  }
  0x3a   : > { %462 = vmatpush1.bf16.msra.mxu0 %v452_v56  ;;  %776 = vmatpush1.bf16.msra.mxu1 %v766_v57 }
  0x3c   : > { %886 = vperm.xlu0 %1218, %v1150_v63   ;;  %891 = vperm.xlu1 %1219, %v1151_v4  }
  0x3d   : > { %1123 = vmatmul.mubr.msk.bf16.vlgmr.msra.gmra.mrb[0].mxu0 %vm443_vm1, %v1220_v58  ;;  %1148 = vmatmul.mubr.msk.bf16.vlgmr.msra.gmra.mrb[0].mxu1 %vm443_vm1, %v1221_v59 }
  0x3e   : > { %499 = vmatprep.mubr.bf16.mxu0 %v1284_v10  ;;  %813 = vmatprep.mubr.bf16.mxu1 %v1284_v10 }
  0x40   : > { %896 = vperm.xlu0 %1218, %v1152_v3   ;;  %911 = vperm.xlu1 %1219, %v1153_v6  }
  0x44   : > { %916 = vperm.xlu0 %1218, %v1154_v5   ;;  %921 = vperm.xlu1 %1219, %v1155_v7  }
  0x45   : > { %1124 = vmatmul.mubr.msk.bf16.gmra.mrb[4].mxu0 %vm443_vm1, %v1222_v0  ;;  %1149 = vmatmul.mubr.msk.bf16.gmra.mrb[4].mxu1 %vm443_vm1, %v1223_v1 }
  0xa1   : > { %v398_v8 = vpop.permute.xlu0 %397  ;;  %v408_v10 = vpop.permute.xlu1 %407 }
  0xa5   : > { %v403_v9 = vpop.permute.xlu0 %402  ;;  %v714_v12 = vpop.permute.xlu1 %713 }
  0xa9   : > { %v719_v11 = vpop.permute.xlu0 %718  ;;  %v724_v33 = vpop.permute.xlu1 %723 }
 0x110   : > { %v491_v13 = vpop.f32.mrb[0].mxu0  ;;  %v805_v14 = vpop.f32.mrb[0].mxu1 }
 0x111   : > { %v1454_v15 = vadd.f32 %v805_v14, %v714_v12  ;;  %v493_v16 = vpop.f32.mrb[1].mxu0  ;;  %v807_v17 = vpop.f32.mrb[1].mxu1  ;;  %v492_v21 = vadd.f32 %v491_v13, %v398_v8 }
 0x112   : > { %v1456_v18 = vadd.f32 %v807_v17, %v714_v12  ;;  %v495_v19 = vpop.f32.mrb[2].mxu0  ;;  %v809_v20 = vpop.f32.mrb[2].mxu1  ;;  %v494_v26 = vadd.f32 %v493_v16, %v398_v8 }
 0x113   : > { %v496_v22 = vadd.f32 %v495_v19, %v403_v9  ;;  %v810_v23 = vadd.f32 %v809_v20, %v719_v11  ;;  %v497_v24 = vpop.f32.mrb[3].mxu0  ;;  %v811_v25 = vpop.f32.mrb[3].mxu1 }
 0x114   : > { %v498_v27 = vadd.f32 %v497_v24, %v403_v9  ;;  %v1458_v28 = vadd.f32 %v811_v25, %v719_v11 }
 0x115   : > { %v508_v29 = vadd.f32 %v496_v22, %v492_v21  ;;  %v822_v30 = vadd.f32 %v810_v23, %v1454_v15 }
 0x116   : > { %v516_v31 = vadd.f32 %v498_v27, %v494_v26  ;;  %v830_v32 = vadd.f32 %v1458_v28, %v1456_v18 }
 0x118   : > { %v501_v34 = vpop.f32.mrb[4].mxu0  ;;  %v815_v35 = vpop.f32.mrb[4].mxu1 }
 0x119   : > { %v502_v36 = vadd.f32 %v501_v34, %v408_v10  ;;  %v816_v37 = vadd.f32 %v815_v35, %v724_v33  ;;  %v503_v38 = vpop.f32.mrb[5].mxu0  ;;  %v817_v39 = vpop.f32.mrb[5].mxu1 }
 0x11a   : > { %v504_v40 = vadd.f32 %v503_v38, %v408_v10  ;;  %v818_v41 = vadd.f32 %v817_v39, %v724_v33  ;;  %v505_v42 = vpop.f32.mrb[6].mxu0  ;;  %v819_v43 = vpop.f32.mrb[6].mxu1 }
 0x11b   : > { %v509_v44 = vadd.f32 %v508_v29, %v502_v36  ;;  %v823_v45 = vadd.f32 %v822_v30, %v816_v37  ;;  %v506_v46 = vpop.f32.mrb[7].mxu0  ;;  %v820_v47 = vpop.f32.mrb[7].mxu1 }
 0x11c   : > { %v517_v48 = vadd.f32 %v516_v31, %v504_v40  ;;  %v831_v49 = vadd.f32 %v830_v32, %v818_v41 }
 0x11d   : > { %v510_v50 = vrot.slane %v509_v44, 4  ;;  %v824_v51 = vrot.slane %v823_v45, 4 }
 0x11e   : > { %v518_v52 = vrot.slane %v517_v48, 4  ;;  %v832_v53 = vrot.slane %v831_v49, 4 }
 0x11f   : > { %v511_v54 = vadd.f32 %v510_v50, %v509_v44  ;;  %v825_v55 = vadd.f32 %v824_v51, %v823_v45 }
 0x120   : > { %v519_v56 = vadd.f32 %v518_v52, %v517_v48  ;;  %v833_v57 = vadd.f32 %v832_v53, %v831_v49 }
 0x121   : > { %v512_v58 = vrot.slane %v511_v54, 2  ;;  %v826_v59 = vrot.slane %v825_v55, 2 }
 0x122   : > { %v520_v60 = vrot.slane %v519_v56, 2  ;;  %v834_v61 = vrot.slane %v833_v57, 2 }
 0x123   : > { %v513_v62 = vadd.f32 %v512_v58, %v511_v54  ;;  %v827_v63 = vadd.f32 %v826_v59, %v825_v55  ;;  %v573_v58 = vpop.permute.xlu0 %572  ;;  %v578_v59 = vpop.permute.xlu1 %577 }
 0x124   : > { %v521_v0 = vadd.f32 %v520_v60, %v519_v56  ;;  %v835_v1 = vadd.f32 %v834_v61, %v833_v57 }
 0x125   : > { %v514_v2 = vrot.slane %v513_v62, 1  ;;  %v828_v3 = vrot.slane %v827_v63, 1 }
 0x126   : > { %v522_v4 = vrot.slane %v521_v0, 1  ;;  %v836_v5 = vrot.slane %v835_v1, 1 }
 0x127   : > { %v515_v6 = vadd.f32 %v514_v2, %v513_v62  ;;  %v829_v7 = vadd.f32 %v828_v3, %v827_v63 }
 0x128   : > { %v523_v8 = vadd.f32 %v522_v4, %v521_v0  ;;  %v837_v9 = vadd.f32 %v836_v5, %v835_v1 }
 0x129   : > { %v525_v10 = vmul.f32 0.041666668, %v515_v6  ;;  %v838_v11 = vmul.f32 0.041666668, %v829_v7 }
 0x12a   : > { %v526_v12 = vmul.f32 0.041666668, %v523_v8  ;;  %v839_v13 = vmul.f32 0.041666668, %v837_v9  ;;  %v583_v8 = vpop.permute.xlu0 %582  ;;  %v597_v9 = vpop.permute.xlu1 %596 }
 0x12b   : > { %v1463_v14 = vsub.f32 %v492_v21, %v525_v10  ;;  %v1465_v16 = vsub.f32 %v496_v22, %v525_v10  ;;  %v1467_v17 = vsub.f32 %v502_v36, %v525_v10  ;;  %v1470_v19 = vsub.f32 %v1454_v15, %v838_v11 }
 0x12c   : > { %v1472_v20 = vsub.f32 %v810_v23, %v838_v11  ;;  %v1474_v24 = vsub.f32 %v816_v37, %v838_v11  ;;  %v1476_v25 = vsub.f32 %v494_v26, %v526_v12  ;;  %v1478_v29 = vsub.f32 %v498_v27, %v526_v12 }
 0x12d   : > { %v533_v30 = vmul.f32 %v1463_v14, %v1463_v14  ;;  %v535_v21 = vmul.f32 %v1465_v16, %v1465_v16  ;;  %v846_v22 = vmul.f32 %v1470_v19, %v1470_v19  ;;  %v537_v15 = vmul.f32 %v1467_v17, %v1467_v17 }
 0x12e   : > { %v848_v23 = vmul.f32 %v1472_v20, %v1472_v20  ;;  %v1490_v31 = vsub.f32 %v504_v40, %v526_v12  ;;  %v534_v26 = vmul.f32 %v1476_v25, %v1476_v25  ;;  %v536_v32 = vmul.f32 %v1478_v29, %v1478_v29 }
 0x12f   : > { %v539_v27 = vadd.f32 %v535_v21, %v533_v30  ;;  %v1497_v33 = vsub.f32 %v1456_v18, %v839_v13  ;;  %v1500_v34 = vsub.f32 %v1458_v28, %v839_v13  ;;  %v850_v35 = vmul.f32 %v1474_v24, %v1474_v24 }
 0x130   : > { %v852_v36 = vadd.f32 %v848_v23, %v846_v22  ;;  %v538_v37 = vmul.f32 %v1490_v31, %v1490_v31  ;;  %v1506_v38 = vsub.f32 %v818_v41, %v839_v13  ;;  %v547_v40 = vadd.f32 %v536_v32, %v534_v26  ;;  %v602_v23 = vpop.permute.xlu0 %601  ;;  %v607_v26 = vpop.permute.xlu1 %606 }
 0x131   : > { %v540_v39 = vadd.f32 %v539_v27, %v537_v15  ;;  %v847_v42 = vmul.f32 %v1497_v33, %v1497_v33  ;;  %v849_v18 = vmul.f32 %v1500_v34, %v1500_v34 }
 0x132   : > { %v853_v43 = vadd.f32 %v852_v36, %v850_v35  ;;  %v548_v44 = vadd.f32 %v547_v40, %v538_v37  ;;  %v851_v45 = vmul.f32 %v1506_v38, %v1506_v38 }
 0x133   : > { %v541_v28 = vrot.slane %v540_v39, 4  ;;  %v860_v46 = vadd.f32 %v849_v18, %v847_v42 }
 0x134   : > { %v854_v47 = vrot.slane %v853_v43, 4  ;;  %v549_v49 = vrot.slane %v548_v44, 4  ;;  %v887_v27 = vpop.permute.xlu0 %886  ;;  %v892_v32 = vpop.permute.xlu1 %891 }
 0x135   : > { %v542_v48 = vadd.f32 %v541_v28, %v540_v39  ;;  %v861_v41 = vadd.f32 %v860_v46, %v851_v45 }
 0x136   : > { %v855_v50 = vadd.f32 %v854_v47, %v853_v43  ;;  %v550_v52 = vadd.f32 %v549_v49, %v548_v44 }
 0x137   : > { %v543_v51 = vrot.slane %v542_v48, 2  ;;  %v862_v53 = vrot.slane %v861_v41, 4 }
 0x138   : > { %v856_v54 = vrot.slane %v855_v50, 2  ;;  %v551_v56 = vrot.slane %v550_v52, 2  ;;  %v897_v49 = vpop.permute.xlu0 %896 }
 0x139   : > { %v544_v55 = vadd.f32 %v543_v51, %v542_v48  ;;  %v863_v57 = vadd.f32 %v862_v53, %v861_v41 }
 0x13a   : > { %v857_v60 = vadd.f32 %v856_v54, %v855_v50  ;;  %v552_v62 = vadd.f32 %v551_v56, %v550_v52 }
 0x13b   : > { %v545_v61 = vrot.slane %v544_v55, 1  ;;  %v864_v63 = vrot.slane %v863_v57, 2 }
 0x13c   : > { %v858_v0 = vrot.slane %v857_v60, 1  ;;  %v553_v2 = vrot.slane %v552_v62, 1 }
 0x13d   : > { %v546_v1 = vadd.f32 %v545_v61, %v544_v55  ;;  %v865_v3 = vadd.f32 %v864_v63, %v863_v57 }
 0x13e   : > { %v859_v4 = vadd.f32 %v858_v0, %v857_v60  ;;  %v554_v6 = vadd.f32 %v553_v2, %v552_v62  ;;  %v917_v0 = vpop.permute.xlu0 %916 }
 0x13f   : > { %v555_v5 = vmul.f32 0.041666668, %v546_v1  ;;  %v866_v7 = vrot.slane %v865_v3, 1 }
 0x140   : > { %v868_v10 = vmul.f32 0.041666668, %v859_v4  ;;  %v556_v12 = vmul.f32 0.041666668, %v554_v6 }
 0x141   : > { %v557_v11 = vadd.f32 1e-06, %v555_v5  ;;  %v867_v13 = vadd.f32 %v866_v7, %v865_v3 }
 0x142   : > { %v870_v30 = vadd.f32 1e-06, %v868_v10  ;;  %v558_v21 = vadd.f32 1e-06, %v556_v12 }
 0x143   : > { %1224 = vrsqrt.f32 %v557_v11  ;;  %v869_v22 = vmul.f32 0.041666668, %v867_v13 }
 0x144   : > { %1226 = vrsqrt.f32 %v870_v30 }
 0x145   : > { %1228 = vrsqrt.f32 %v558_v21  ;;  %v871_v15 = vadd.f32 1e-06, %v869_v22 }
 0x147   : > { %1230 = vrsqrt.f32 %v871_v15 }
 0x14d   : > { %v1225_v35 = vpop.eup %1224 }
 0x14e   : > { %v1227_v36 = vpop.eup %1226  ;;  %v561_v37 = vmul.f32 %v1225_v35, %v1463_v14  ;;  %v563_v39 = vmul.f32 %v1225_v35, %v1465_v16  ;;  %v565_v40 = vmul.f32 %v1225_v35, %v1467_v17  ;;  %v912_v14 = vpop.permute.xlu1 %911 }
 0x14f   : > { %v1229_v42 = vpop.eup %1228  ;;  %v874_v18 = vmul.f32 %v1227_v36, %v1470_v19  ;;  %v876_v43 = vmul.f32 %v1227_v36, %v1472_v20  ;;  %v878_v28 = vmul.f32 %v1227_v36, %v1474_v24 }
 0x150   : > { %v585_v44 = vmul.f32 %v573_v58, %v561_v37  ;;  %v587_v45 = vmul.f32 %v578_v59, %v563_v39  ;;  %v589_v46 = vmul.f32 %v583_v8, %v565_v40  ;;  %v562_v47 = vmul.f32 %v1229_v42, %v1476_v25 }
 0x151   : > { %v564_v48 = vmul.f32 %v1229_v42, %v1478_v29  ;;  %v566_v19 = vmul.f32 %v1229_v42, %v1490_v31  ;;  %v1231_v20 = vpop.eup %1230  ;;  %v899_v51 = vmul.f32 %v887_v27, %v874_v18  ;;  %v901_v52 = vmul.f32 %v892_v32, %v876_v43 }
 0x152   : > { %v1522_v41 = vadd.f32 %v597_v9, %v585_v44  ;;  %v1524_v16 = vadd.f32 %v602_v23, %v587_v45  ;;  %v1526_v17 = vadd.f32 %v607_v26, %v589_v46  ;;  %v586_v50 = vmul.f32 %v573_v58, %v562_v47  ;;  %v922_v2 = vpop.permute.xlu1 %921 }
 0x153   : > { %v903_v53 = vmul.f32 %v897_v49, %v878_v28  ;;  %v588_v54 = vmul.f32 %v578_v59, %v564_v48  ;;  %v590_v55 = vmul.f32 %v583_v8, %v566_v19  ;;  %v875_v60 = vmul.f32 %v1231_v20, %v1497_v33 }
 0x154   : > { %v621_v24 = vmul.f32 0.044715, %v1522_v41  ;;  %v623_v25 = vmul.f32 0.044715, %v1524_v16  ;;  %v625_v29 = vmul.f32 0.044715, %v1526_v17  ;;  %v1533_v57 = vadd.f32 %v597_v9, %v586_v50 }
 0x155   : > { %v877_v31 = vmul.f32 %v1231_v20, %v1500_v34  ;;  %v1539_v62 = vadd.f32 %v602_v23, %v588_v54  ;;  %v1541_v63 = vadd.f32 %v607_v26, %v590_v55  ;;  %v924_v1 = vadd.f32 %v912_v14, %v899_v51 }
 0x156   : > { %v627_v56 = vmul.f32 %v621_v24, %v1522_v41  ;;  %v629_v58 = vmul.f32 %v623_v25, %v1524_v16  ;;  %v631_v61 = vmul.f32 %v625_v29, %v1526_v17  ;;  %v622_v3 = vmul.f32 0.044715, %v1533_v57 }
 0x157   : > { %v879_v33 = vmul.f32 %v1231_v20, %v1506_v38  ;;  %v926_v5 = vadd.f32 %v917_v0, %v901_v52  ;;  %v928_v6 = vadd.f32 %v922_v2, %v903_v53  ;;  %v624_v8 = vmul.f32 0.044715, %v1539_v62 }
 0x158   : > { %v633_v59 = vmul.f32 %v627_v56, %v1522_v41  ;;  %v635_v34 = vmul.f32 %v629_v58, %v1524_v16  ;;  %v637_v4 = vmul.f32 %v631_v61, %v1526_v17  ;;  %v626_v9 = vmul.f32 0.044715, %v1541_v63 }
 0x159   : > { %v628_v10 = vmul.f32 %v622_v3, %v1533_v57  ;;  %v900_v12 = vmul.f32 %v887_v27, %v875_v60  ;;  %v902_v13 = vmul.f32 %v892_v32, %v877_v31  ;;  %v630_v21 = vmul.f32 %v624_v8, %v1539_v62 }
 0x15a   : > { %v639_v7 = vadd.f32 %v633_v59, %v1522_v41  ;;  %v641_v11 = vadd.f32 %v635_v34, %v1524_v16  ;;  %v643_v38 = vadd.f32 %v637_v4, %v1526_v17  ;;  %v632_v22 = vmul.f32 %v626_v9, %v1541_v63 }
 0x15b   : > { %v634_v15 = vmul.f32 %v628_v10, %v1533_v57  ;;  %v904_v35 = vmul.f32 %v897_v49, %v879_v33  ;;  %v925_v36 = vadd.f32 %v912_v14, %v900_v12  ;;  %v636_v37 = vmul.f32 %v630_v21, %v1539_v62 }
 0x15c   : > { %v645_v30 = vmul.f32 0.7978846, %v639_v7  ;;  %v647_v23 = vmul.f32 0.7978846, %v641_v11  ;;  %v649_v26 = vmul.f32 0.7978846, %v643_v38  ;;  %v638_v39 = vmul.f32 %v632_v22, %v1541_v63 }
 0x15d   : > { %v640_v40 = vadd.f32 %v634_v15, %v1533_v57  ;;  %v927_v27 = vadd.f32 %v917_v0, %v902_v13  ;;  %v929_v32 = vadd.f32 %v922_v2, %v904_v35  ;;  %v1168_v42 = vpack.c.bf16 %v925_v36, %v924_v1 }
 0x15e   : > { %1232 = vtanh.f32 %v645_v30  ;;  %v642_v18 = vadd.f32 %v636_v37, %v1539_v62  ;;  %v644_v43 = vadd.f32 %v638_v39, %v1541_v63  ;;  %v615_v20 = vmul.f32 0.5, %v1522_v41 }
 0x15f   : > { %1234 = vtanh.f32 %v647_v23  ;;  %v646_v28 = vmul.f32 0.7978846, %v640_v40  ;;  %v1169_v44 = vpack.c.bf16 %v927_v27, %v926_v5  ;;  %v1170_v45 = vpack.c.bf16 %v929_v32, %v928_v6  ;;  %1159 = vst [vmem:[%s1564_s21 + $0x18] sm:$0xff] %v1168_v42 }
 0x160   : > { %1236 = vtanh.f32 %v649_v26  ;;  %v648_v46 = vmul.f32 0.7978846, %v642_v18  ;;  %v650_v47 = vmul.f32 0.7978846, %v644_v43  ;;  %v617_v52 = vmul.f32 0.5, %v1524_v16 }
 0x161   : > { %1238 = vtanh.f32 %v646_v28  ;;  %1160 = vst [vmem:[%s1564_s21 + $0x20] sm:$0xff] %v1169_v44  ;;  %1161 = vst [vmem:[%s1564_s21 + $0x28] sm:$0xff] %v1170_v45  ;;  %v616_v25 = vmul.f32 0.5, %v1533_v57  ;;  %v619_v55 = vmul.f32 0.5, %v1526_v17  ;;  %v618_v31 = vmul.f32 0.5, %v1539_v62 }
 0x162   : > { %1240 = vtanh.f32 %v648_v46  ;;  %v620_v0 = vmul.f32 0.5, %v1541_v63 }
 0x163   : > { %1242 = vtanh.f32 %v650_v47 }
 0x166   : > { %v1009_v33 = vld [vmem:[%s1564_s21 + $0x18] sm:$0xff] (%p1355_p6) }
 0x167   : > { %1010 = vst [vmem:[%s965_s9 + $0x30] sm:$0xff] (%p1355_p6), %v1009_v33 }
 0x168   : > { %v1233_v48 = vpop.eup %1232  ;;  %v1011_v34 = vld [vmem:[%s1564_s21 + $0x20] sm:$0xff] (%p1355_p6)  ;;  %v1013_v4 = vld [vmem:[%s1564_s21 + $0x28] sm:$0xff] (%p1355_p6) }
 0x169   : > { %v1235_v49 = vpop.eup %1234  ;;  %v657_v14 = vadd.f32 1.0, %v1233_v48  ;;  %1012 = vst [vmem:[%s965_s9 + $0x38] sm:$0xff] (%p1355_p6), %v1011_v34  ;;  %1014 = vst [vmem:[%s965_s9 + $0x40] sm:$0xff] (%p1355_p6), %v1013_v4 }
 0x16a   : > { %v1237_v19 = vpop.eup %1236  ;;  %v659_v50 = vadd.f32 1.0, %v1235_v49 }
 0x16b   : > { %v1239_v24 = vpop.eup %1238  ;;  %v661_v51 = vadd.f32 1.0, %v1237_v19  ;;  %v663_v53 = vmul.f32 %v657_v14, %v615_v20 }
 0x16c   : > { %v658_v29 = vadd.f32 1.0, %v1239_v24  ;;  %v1241_v54 = vpop.eup %1240  ;;  %v665_v60 = vmul.f32 %v659_v50, %v617_v52 }
 0x16d   : > { %v1243_v56 = vpop.eup %1242  ;;  %v660_v41 = vadd.f32 1.0, %v1241_v54  ;;  %v667_v61 = vmul.f32 %v661_v51, %v619_v55 }
 0x16e   : > { %v664_v58 = vmul.f32 %v658_v29, %v616_v25  ;;  %v662_v16 = vadd.f32 1.0, %v1243_v56  ;;  %960 = sbr.rel (!%p1355_p6) target bundleno = 381 (0x17d), region = 86 }
 0x16f   : > { %v666_v59 = vmul.f32 %v660_v41, %v618_v31 }
 0x170   : > { %v1165_v1 = vpack.c.bf16 %v664_v58, %v663_v53  ;;  %v668_v57 = vmul.f32 %v662_v16, %v620_v0 }
 0x171   : > { %v1166_v2 = vpack.c.bf16 %v666_v59, %v665_v60 }
 0x172   : > { %689 = vst [vmem:[%s1564_s21] sm:$0xff] %v1165_v1  ;;  %v1167_v3 = vpack.c.bf16 %v668_v57, %v667_v61 }
 0x173   : > { %690 = vst [vmem:[%s1564_s21 + $0x8] sm:$0xff] %v1166_v2 }
 0x174   : > { %691 = vst [vmem:[%s1564_s21 + $0x10] sm:$0xff] %v1167_v3 }
 0x179   : > { %v1003_v17 = vld [vmem:[%s1564_s21] sm:$0xff] }
 0x17a   : > { %v1005_v62 = vld [vmem:[%s1564_s21 + $0x8] sm:$0xff]  ;;  %1004 = vst [vmem:[%s965_s9] sm:$0xff] %v1003_v17 }
 0x17b   : > { %v1007_v63 = vld [vmem:[%s1564_s21 + $0x10] sm:$0xff]  ;;  %1006 = vst [vmem:[%s965_s9 + $0x8] sm:$0xff] %v1005_v62 }
 0x17c   : > { %1008 = vst [vmem:[%s965_s9 + $0x10] sm:$0xff] %v1007_v63 }
 0x17d PF: > { %s16_s25 = sadd.s32 1, %s1282_s25   ;;  %s1613_s21 = smov %s1270_s22 }
 0x17e   : > { %p13_p12 = scmp.ge.s32.totalorder %s16_s25, 4   ;;  %s1614_s22 = smov %s1360_s7 }
 0x17f   : > { %s1615_s23 = smov %s1278_s24  ;;  %s1616_s24 = smov %s1618_s26 }
 0x180   :  { %15 = sbr.rel (!%p13_p12) target bundleno = 3 (0x3), region = 164 }

// kernel: decoder_forward.7
= control target key start
LH: loop header
LB: loop body
LE: loop exit
PB: predicated region body
PF: predicated region fallthrough
CT: control target
= control target key end

     0   :  { %s1432_s15 = smov 0   ;;  %s1434_s16 = smov 0   ;;  %s1727_s0 = inlined_call_operand.vmem [shape: bf16[2,2,24,1024], index: 0, kind: input, shape index: {}]   ;;  %s1728_s1 = inlined_call_operand.vmem [shape: bf16[2,24,1024], index: 1, kind: input, shape index: {}]   ;;  %s1729_s2 = inlined_call_operand.vmem [shape: bf16[2,12,24], index: 2, kind: input, shape index: {}]   ;;  %s1730_s3 = inlined_call_operand.vmem [shape: f32[2,12,1], index: 3, kind: input, shape index: {}]   ;;  %s1731_s4 = inlined_call_operand.vmem [shape: bf16[2,2,12,1024], index: 4, kind: output, shape index: {}]  }
   0x1   :  { %s1436_s17 = smov 0   ;;  %s1438_s18 = smov 0  }
   0x2   :  { %s1440_s19 = smov 0  }
   0x3 LB: > { %s26_s20 = sadd.s32 1, %s1400_s18  ;;  %s1197_s21 = sadd.s32 4294967295, %s1404_s19   ;;  %s1404_s19 = sphi %s1440_s19, %s14_s19   ;;  %s1400_s18 = sphi %s1438_s18, %s1736_s18   ;;  %s1396_s17 = sphi %s1436_s17, %s1735_s17   ;;  %s1392_s16 = sphi %s1434_s16, %s1734_s16   ;;  %s1388_s15 = sphi %s1432_s15, %s1733_s15  }
   0x4   : > { %p28_p0 = scmp.ge.s32.totalorder %s26_s20, 2  ;;  %p42_p1 = scmp.ne.s32.totalorder %s1392_s16, %s1388_s15 }
   0x5   : > { %p43_p2 = scmp.eq.s32.totalorder %s1404_s19, 0  ;;  %p144_p4 = scmp.eq.s32.totalorder %s1197_s21, 1 }
   0x6   : > { %s1738_s20 = smov (%p28_p0, %s26_s20), 0  ;;  %s35_s23 = sadd.s32 1, %s1392_s16 }
   0x7   : > { %p44_p3 = por %p43_p2, %p42_p1  ;;  %s30_s22 = ssub.s32 %s1400_s18, %s1738_s20 }
   0x8   : > { %p33_p5 = scmp.eq.s32.totalorder %s30_s22, 0  ;;  %p1467_p6 = por %p144_p4, %p42_p1 }
   0x9   : > { %p1200_p7 = scmp.ge.s32.totalorder %s1404_s19, 2 }
   0xa   : > { %s1472_s25 = scalar_select %p33_p5, %s1392_s16, %s35_s23  }
   0xb   : > { %172 = sbr.rel (%p1200_p7) target bundleno = 35 (0x23), region = 24 }
  0x12   : > { %175 = sbr.rel (!%p44_p3) target bundleno = 35 (0x23), region = 28  ;;  %s177_s26 = sand.u32 (%p44_p3), 1, %s1392_s16  }
  0x13   : > { %s1318_s27 = smul.u32 (%p44_p3), 96, %s1400_s18 }
  0x14   : > { %s1317_s28 = smul.u32 (%p44_p3), 192, %s177_s26 }
  0x15   : > { %s1480_s5 = scalar_lea.vmem (%p44_p3), %s1727_s0, %s1318_s27 }
  0x16   : > { %v197_v0 = vld [vmem:[%s1480_s5] sm:$0xff] (%p44_p3)  ;;  %v199_v1 = vld [vmem:[%s1480_s5 + $0x8] sm:$0xff] (%p44_p3)  ;;  %v201_v2 = vld [vmem:[%s1480_s5 + $0x10] sm:$0xff] (%p44_p3)  ;;  %s1485_s6 = scalar_lea.vmem (%p44_p3), [#allocation2], %s1317_s28 }
  0x17   : > { %198 = vst [vmem:[%s1485_s6] sm:$0xff] (%p44_p3), %v197_v0  ;;  %200 = vst [vmem:[%s1485_s6 + $0x8] sm:$0xff] (%p44_p3), %v199_v1  ;;  %v203_v3 = vld [vmem:[%s1480_s5 + $0x18] sm:$0xff] (%p44_p3)  ;;  %v205_v4 = vld [vmem:[%s1480_s5 + $0x20] sm:$0xff] (%p44_p3) }
  0x18   : > { %202 = vst [vmem:[%s1485_s6 + $0x10] sm:$0xff] (%p44_p3), %v201_v2  ;;  %v207_v5 = vld [vmem:[%s1480_s5 + $0x28] sm:$0xff] (%p44_p3)  ;;  %204 = vst [vmem:[%s1485_s6 + $0x18] sm:$0xff] (%p44_p3), %v203_v3  ;;  %v209_v6 = vld [vmem:[%s1480_s5 + $0x30] sm:$0xff] (%p44_p3) }
  0x19   : > { %206 = vst [vmem:[%s1485_s6 + $0x20] sm:$0xff] %v205_v4  ;;  %208 = vst [vmem:[%s1485_s6 + $0x28] sm:$0xff] %v207_v5  ;;  %v211_v7 = vld [vmem:[%s1480_s5 + $0x38] sm:$0xff]  ;;  %v213_v8 = vld [vmem:[%s1480_s5 + $0x40] sm:$0xff] }
  0x1a   : > { %210 = vst [vmem:[%s1485_s6 + $0x30] sm:$0xff] %v209_v6  ;;  %212 = vst [vmem:[%s1485_s6 + $0x38] sm:$0xff] %v211_v7  ;;  %v215_v9 = vld [vmem:[%s1480_s5 + $0x48] sm:$0xff]  ;;  %v217_v10 = vld [vmem:[%s1480_s5 + $0x50] sm:$0xff] }
  0x1b   : > { %214 = vst [vmem:[%s1485_s6 + $0x40] sm:$0xff] %v213_v8  ;;  %v219_v11 = vld [vmem:[%s1480_s5 + $0x58] sm:$0xff]  ;;  %216 = vst [vmem:[%s1485_s6 + $0x48] sm:$0xff] %v215_v9  ;;  %v221_v12 = vld [vmem:[%s1480_s5 + $0xc0] sm:$0xff] }
  0x1c   : > { %218 = vst [vmem:[%s1485_s6 + $0x50] sm:$0xff] %v217_v10  ;;  %220 = vst [vmem:[%s1485_s6 + $0x58] sm:$0xff] %v219_v11  ;;  %v223_v13 = vld [vmem:[%s1480_s5 + $0xc8] sm:$0xff]  ;;  %v225_v14 = vld [vmem:[%s1480_s5 + $0xd0] sm:$0xff] }
  0x1d   : > { %222 = vst [vmem:[%s1485_s6 + $0x60] sm:$0xff] %v221_v12  ;;  %224 = vst [vmem:[%s1485_s6 + $0x68] sm:$0xff] %v223_v13  ;;  %v227_v15 = vld [vmem:[%s1480_s5 + $0xd8] sm:$0xff]  ;;  %v229_v16 = vld [vmem:[%s1480_s5 + $0xe0] sm:$0xff] }
  0x1e   : > { %226 = vst [vmem:[%s1485_s6 + $0x70] sm:$0xff] %v225_v14  ;;  %v231_v17 = vld [vmem:[%s1480_s5 + $0xe8] sm:$0xff]  ;;  %228 = vst [vmem:[%s1485_s6 + $0x78] sm:$0xff] %v227_v15  ;;  %v233_v18 = vld [vmem:[%s1480_s5 + $0xf0] sm:$0xff] }
  0x1f   : > { %230 = vst [vmem:[%s1485_s6 + $0x80] sm:$0xff] %v229_v16  ;;  %232 = vst [vmem:[%s1485_s6 + $0x88] sm:$0xff] %v231_v17  ;;  %v235_v19 = vld [vmem:[%s1480_s5 + $0xf8] sm:$0xff]  ;;  %v237_v20 = vld [vmem:[%s1480_s5 + $0x100] sm:$0xff] }
  0x20   : > { %234 = vst [vmem:[%s1485_s6 + $0x90] sm:$0xff] %v233_v18  ;;  %236 = vst [vmem:[%s1485_s6 + $0x98] sm:$0xff] %v235_v19  ;;  %v239_v21 = vld [vmem:[%s1480_s5 + $0x108] sm:$0xff]  ;;  %v241_v22 = vld [vmem:[%s1480_s5 + $0x110] sm:$0xff] }
  0x21   : > { %238 = vst [vmem:[%s1485_s6 + $0xa0] sm:$0xff] %v237_v20  ;;  %v243_v23 = vld [vmem:[%s1480_s5 + $0x118] sm:$0xff]  ;;  %240 = vst [vmem:[%s1485_s6 + $0xa8] sm:$0xff] %v239_v21 }
  0x22   : > { %242 = vst [vmem:[%s1485_s6 + $0xb0] sm:$0xff] %v241_v22  ;;  %244 = vst [vmem:[%s1485_s6 + $0xb8] sm:$0xff] %v243_v23 }
  0x23 PF: > { %p1202_p8 = scmp.ge.s32.totalorder %s1404_s19, 1  ;;  %p262_p9 = scmp.lt.s32.totalorder %s1404_s19, 3 }
  0x25   : > { %p263_p10 = pnand %p1202_p8, %p262_p9 }
  0x26   : > { %s269_s7 = sand.u32 (!%p263_p10), 1, %s1388_s15   ;;  %p304_p11 = scmp.lt.s32.totalorder (!%p263_p10), %s1396_s17, 1  ;;  %v1406_v24 = vmov (!%p263_p10), 0   ;;  %v353_v25 = vld [vmem:[%s1730_s3] sm:$0xff] (!%p263_p10)  ;;  %v1252_v26 = vld [vmem:[%s1730_s3 + $0x10] sm:$0xff] (!%p263_p10)  ;;  %vm434_vm0 = vcmask (!%p263_p10), 1043456  }
  0x27   : > { %266 = sbr.rel (%p263_p10) target bundleno = 317 (0x13d), region = 55  ;;  %491 = vmatprep.mubr.bf16.mxu0 (!%p263_p10), %v1406_v24  ;;  %534 = vmatprep.mubr.bf16.mxu1 (!%p263_p10), %v1406_v24  ;;  %v354_v27 = vld [vmem:[%s1730_s3 + $0x8] sm:$0xf] (!%p263_p10)  ;;  %v1364_v15 = vld [vmem:[%s1729_s2] sm:$0x3f] (!%p263_p10)   ;;  %vm430_vm1 = vcmask (!%p263_p10), 195584  }
  0x28   : > { %s1319_s8 = smul.u32 (!%p263_p10), 192, %s269_s7  ;;  %1362 = vset.pattern.permute.xlu0 (!%p263_p10), %v1406_v24  ;;  %1363 = vset.pattern.permute.xlu1 (!%p263_p10), %v1406_v24  ;;  %v1253_v17 = vld [vmem:[%s1730_s3 + $0x18] sm:$0xf] (!%p263_p10)  ;;  %s1203_s10 = sshll.u32 (!%p263_p10), %s269_s7, 7 }
  0x29   : > { %357 = vperm.xlu0 (!%p263_p10), %1362, %v353_v25   ;;  %720 = vperm.xlu1 (!%p263_p10), %1363, %v1252_v26   ;;  %s1672_s15 = scalar_lea.vmem (!%p263_p10), [#allocation3], %s1203_s10 }
  0x2a   : > { %s1552_s23 = scalar_lea.vmem (!%p263_p10), [#allocation2], %s1319_s8 }
  0x2b   : > { %v327_v28 = vld [vmem:[%s1552_s23] sm:$0xff] (!%p263_p10)  ;;  %v328_v30 = vld [vmem:[%s1552_s23 + $0x8] sm:$0xff] (!%p263_p10)  ;;  %v329_v49 = vld [vmem:[%s1552_s23 + $0x10] sm:$0xff] (!%p263_p10) }
  0x2c   : > { %v331_v29 = vld [vmem:[%s1552_s23 + $0x20] sm:$0xff] (!%p263_p10)  ;;  %v332_v31 = vld [vmem:[%s1552_s23 + $0x28] sm:$0xff] (!%p263_p10)  ;;  %v333_v50 = vld [vmem:[%s1552_s23 + $0x30] sm:$0xff] (!%p263_p10) }
  0x2d   : > { %v335_v32 = vld [vmem:[%s1552_s23 + $0x40] sm:$0xff] (!%p263_p10)  ;;  %362 = vperm.xlu0 (!%p263_p10), %1362, %v354_v27   ;;  %v336_v43 = vld [vmem:[%s1552_s23 + $0x48] sm:$0xff] (!%p263_p10)  ;;  %v330_v56 = vld [vmem:[%s1552_s23 + $0x18] sm:$0xff] (!%p263_p10)  ;;  %725 = vperm.xlu1 (!%p263_p10), %1363, %v1253_v17  }
  0x2e   : > { %s305_s9 = scalar_select %p304_p11, %s1396_s17, 1  ;;  %v334_v57 = vld [vmem:[%s1552_s23 + $0x38] sm:$0xff]  ;;  %v337_v63 = vld [vmem:[%s1552_s23 + $0x50] sm:$0xff]  ;;  %v1238_v5 = vld [vmem:[%s1552_s23 + $0x60] sm:$0xff] }
  0x2f   : > { %v338_v4 = vld [vmem:[%s1552_s23 + $0x58] sm:$0xff]  ;;  %v1242_v6 = vld [vmem:[%s1552_s23 + $0x80] sm:$0xff]  ;;  %v1239_v7 = vld [vmem:[%s1552_s23 + $0x68] sm:$0xff]  ;;  %s1316_s7 = sshll.u32 (%p1467_p6), %s1396_s17, 6 }
  0x30   : > { %s1320_s14 = smul.u32 96, %s305_s9  ;;  %v1243_v14 = vld [vmem:[%s1552_s23 + $0x88] sm:$0xff]  ;;  %v1246_v26 = vld [vmem:[%s1552_s23 + $0xa0] sm:$0xff]  ;;  %s1060_s13 = scalar_lea.vmem (%p1467_p6), %s1731_s4, %s1316_s7 }
  0x32   : > { %s1559_s28 = scalar_lea.vmem %s1728_s1, %s1320_s14 }
  0x33   : > { %v315_v33 = vld [vmem:[%s1559_s28] sm:$0xff]  ;;  %v316_v35 = vld [vmem:[%s1559_s28 + $0x8] sm:$0xff]  ;;  %v1579_v44 = vld [vmem:[%s1559_s28 + $0x10] sm:$0xff] }
  0x34   : > { %v319_v34 = vld [vmem:[%s1559_s28 + $0x20] sm:$0xff]  ;;  %v339_v36 = vmul.bf16 %v327_v28, %v315_v33  ;;  %v1568_v38 = vld [vmem:[%s1559_s28 + $0x28] sm:$0xff]  ;;  %v340_v41 = vmul.bf16 %v328_v30, %v316_v35  ;;  %v1582_v45 = vld [vmem:[%s1559_s28 + $0x30] sm:$0xff]  ;;  %v341_v60 = vmul.bf16 %v329_v49, %v1579_v44  ;;  %v700_v18 = vmul.bf16 %v1238_v5, %v315_v33 }
  0x35   : > { %v343_v37 = vmul.bf16 %v331_v29, %v319_v34  ;;  %v1571_v39 = vld [vmem:[%s1559_s28 + $0x40] sm:$0xff]  ;;  %v1574_v40 = vld [vmem:[%s1559_s28 + $0x48] sm:$0xff]  ;;  %v344_v42 = vmul.bf16 %v332_v31, %v1568_v38  ;;  %v1588_v51 = vld [vmem:[%s1559_s28 + $0x18] sm:$0xff]  ;;  %v345_v61 = vmul.bf16 %v333_v50, %v1582_v45  ;;  %v704_v19 = vmul.bf16 %v1242_v6, %v319_v34 }
  0x36   : > { %v347_v48 = vmul.bf16 %v335_v32, %v1571_v39  ;;  %v348_v54 = vmul.bf16 %v336_v43, %v1574_v40  ;;  %v1592_v55 = vld [vmem:[%s1559_s28 + $0x38] sm:$0xff]  ;;  %v1599_v62 = vld [vmem:[%s1559_s28 + $0x50] sm:$0xff]  ;;  %v342_v3 = vmul.bf16 %v330_v56, %v1588_v51  ;;  %v701_v20 = vmul.bf16 %v1239_v7, %v316_v35  ;;  %v1247_v30 = vld [vmem:[%s1552_s23 + $0xa8] sm:$0xff] }
  0x37   : > { %v1207_v46 = vcombine.high %v339_v36, %v343_v37  ;;  %v1206_v47 = vcombine.low %v339_v36, %v343_v37  ;;  %v1209_v52 = vcombine.high %v340_v41, %v344_v42  ;;  %v1208_v53 = vcombine.low %v340_v41, %v344_v42  ;;  %v1603_v0 = vld [vmem:[%s1559_s28 + $0x58] sm:$0xff]  ;;  %v1240_v37 = vld [vmem:[%s1552_s23 + $0x70] sm:$0xff] }
  0x38   : > { %v1215_v58 = vcombine.high %v347_v48, %v347_v48  ;;  %v1214_v59 = vcombine.low %v347_v48, %v347_v48  ;;  %v1217_v1 = vcombine.high %v348_v54, %v348_v54  ;;  %v1216_v2 = vcombine.low %v348_v54, %v348_v54  ;;  %v1245_v41 = vld [vmem:[%s1552_s23 + $0x98] sm:$0xff]  ;;  %v1248_v54 = vld [vmem:[%s1552_s23 + $0xb0] sm:$0xff] }
  0x39   : > { %459 = vmatprep.subr.bf16.mxu0 %v1207_v46  ;;  %502 = vmatprep.subr.bf16.mxu1 %v1209_v52  ;;  %v1211_v9 = vcombine.high %v341_v60, %v345_v61  ;;  %v346_v10 = vmul.bf16 %v334_v57, %v1592_v55  ;;  %v349_v12 = vmul.bf16 %v337_v63, %v1599_v62  ;;  %v1249_v56 = vld [vmem:[%s1552_s23 + $0xb8] sm:$0xff] }
  0x3a   : > { %460 = vmatpush1.bf16.msra.mxu0 %v1206_v47  ;;  %503 = vmatpush1.bf16.msra.mxu1 %v1208_v53  ;;  %v436_v8 = vsel %vm434_vm0, %v1214_v59, 0  ;;  %v442_v11 = vsel %vm434_vm0, %v1216_v2, 0  ;;  %v350_v13 = vmul.bf16 %v338_v4, %v1603_v0  ;;  %v1210_v21 = vcombine.low %v341_v60, %v345_v61  ;;  %v1365_v59 = vld [vmem:[%s1729_s2 + $0x8] sm:$0x3f]  }
  0x3b   : > { %1222 = vmatprep.subr.msk.bf16.mxu0 %vm434_vm0, %v1215_v58  ;;  %1224 = vmatprep.subr.msk.bf16.mxu1 %vm434_vm0, %v1217_v1  ;;  %v1213_v16 = vcombine.high %v342_v3, %v346_v10  ;;  %v1212_v22 = vcombine.low %v342_v3, %v346_v10  ;;  %v1219_v23 = vcombine.high %v349_v12, %v349_v12 }
  0x3c   : > { %v1218_v25 = vcombine.low %v349_v12, %v349_v12  ;;  %v705_v27 = vmul.bf16 %v1243_v14, %v1568_v38  ;;  %v1221_v28 = vcombine.high %v350_v13, %v350_v13  ;;  %v1220_v29 = vcombine.low %v350_v13, %v350_v13  ;;  %v1244_v38 = vld [vmem:[%s1552_s23 + $0x90] sm:$0xff] }
  0x3d   : > { %v708_v31 = vmul.bf16 %v1246_v26, %v1571_v39  ;;  %v1256_v33 = vcombine.high %v700_v18, %v704_v19  ;;  %v709_v36 = vmul.bf16 %v1247_v30, %v1574_v40  ;;  %v1241_v39 = vld [vmem:[%s1552_s23 + $0x78] sm:$0xff]  ;;  %v1255_v42 = vcombine.low %v700_v18, %v704_v19 }
  0x3e   : > { %462 = vmatpush1.bf16.msra.mxu0 %v436_v8  ;;  %505 = vmatpush1.bf16.msra.mxu1 %v442_v11  ;;  %v448_v32 = vsel %vm434_vm0, %v1218_v25, 0  ;;  %v454_v34 = vsel %vm434_vm0, %v1220_v29, 0  ;;  %v1258_v35 = vcombine.high %v701_v20, %v705_v27  ;;  %v1257_v43 = vcombine.low %v701_v20, %v705_v27 }
  0x3f   : > { %545 = vmatprep.subr.bf16.mxu0 %v1211_v9  ;;  %588 = vmatprep.subr.bf16.mxu1 %v1213_v16  ;;  %v1264_v46 = vcombine.high %v708_v31, %v708_v31  ;;  %v1263_v47 = vcombine.low %v708_v31, %v708_v31  ;;  %v702_v48 = vmul.bf16 %v1240_v37, %v1579_v44 }
  0x40   : > { %v706_v49 = vmul.bf16 %v1244_v38, %v1582_v45  ;;  %v1266_v40 = vcombine.high %v709_v36, %v709_v36  ;;  %v1265_v50 = vcombine.low %v709_v36, %v709_v36  ;;  %v703_v52 = vmul.bf16 %v1241_v39, %v1588_v51 }
  0x41   : > { %1223 = vmatmul.mubr.msk.bf16.vlgmr.msra.gmra.mrb[0].mxu0 %vm430_vm1, %v1364_v15  ;;  %1225 = vmatmul.mubr.msk.bf16.vlgmr.msra.gmra.mrb[0].mxu1 %vm430_vm1, %v1364_v15  ;;  %v707_v53 = vmul.bf16 %v1245_v41, %v1592_v55  ;;  %v797_v44 = vsel %vm434_vm0, %v1263_v47, 0  ;;  %v710_v57 = vmul.bf16 %v1248_v54, %v1599_v62  ;;  %v711_v58 = vmul.bf16 %v1249_v56, %v1603_v0 }
  0x42   : > { %546 = vmatpush1.bf16.msra.mxu0 %v1210_v21  ;;  %589 = vmatpush1.bf16.msra.mxu1 %v1212_v22  ;;  %v1260_v45 = vcombine.high %v702_v48, %v706_v49  ;;  %v803_v51 = vsel %vm434_vm0, %v1265_v50, 0  ;;  %v1259_v60 = vcombine.low %v702_v48, %v706_v49 }
  0x43   : > { %1226 = vmatprep.subr.msk.bf16.mxu0 %vm434_vm0, %v1219_v23  ;;  %1228 = vmatprep.subr.msk.bf16.mxu1 %vm434_vm0, %v1221_v28  ;;  %v1262_v55 = vcombine.high %v703_v52, %v707_v53  ;;  %v1261_v61 = vcombine.low %v703_v52, %v707_v53  ;;  %v1268_v62 = vcombine.high %v710_v57, %v710_v57 }
  0x44   : > { %577 = vmatprep.mubr.bf16.mxu0 %v1406_v24  ;;  %620 = vmatprep.mubr.bf16.mxu1 %v1406_v24  ;;  %v1267_v63 = vcombine.low %v710_v57, %v710_v57  ;;  %v1270_v1 = vcombine.high %v711_v58, %v711_v58  ;;  %v1269_v2 = vcombine.low %v711_v58, %v711_v58 }
  0x46   : > { %548 = vmatpush1.bf16.msra.mxu0 %v448_v32  ;;  %591 = vmatpush1.bf16.msra.mxu1 %v454_v34  ;;  %v809_v0 = vsel %vm434_vm0, %v1267_v63, 0  ;;  %v815_v3 = vsel %vm434_vm0, %v1269_v2, 0 }
  0x47   : > { %820 = vmatprep.subr.bf16.mxu0 %v1256_v33  ;;  %863 = vmatprep.subr.bf16.mxu1 %v1258_v35 }
  0x49   : > { %1227 = vmatmul.mubr.msk.bf16.vlgmr.msra.gmra.mrb[4].mxu0 %vm430_vm1, %v1364_v15  ;;  %1229 = vmatmul.mubr.msk.bf16.vlgmr.msra.gmra.mrb[4].mxu1 %vm430_vm1, %v1364_v15 }
  0x4a   : > { %821 = vmatpush1.bf16.msra.mxu0 %v1255_v42  ;;  %864 = vmatpush1.bf16.msra.mxu1 %v1257_v43 }
  0x4b   : > { %1271 = vmatprep.subr.msk.bf16.mxu0 %vm434_vm0, %v1264_v46  ;;  %1273 = vmatprep.subr.msk.bf16.mxu1 %vm434_vm0, %v1266_v40 }
  0x4c   : > { %852 = vmatprep.mubr.bf16.mxu0 %v1406_v24  ;;  %895 = vmatprep.mubr.bf16.mxu1 %v1406_v24 }
  0x4e   : > { %823 = vmatpush1.bf16.msra.mxu0 %v797_v44  ;;  %866 = vmatpush1.bf16.msra.mxu1 %v803_v51 }
  0x4f   : > { %906 = vmatprep.subr.bf16.mxu0 %v1260_v45  ;;  %949 = vmatprep.subr.bf16.mxu1 %v1262_v55 }
  0x51   : > { %1272 = vmatmul.mubr.msk.bf16.vlgmr.msra.gmra.mrb[8].mxu0 %vm430_vm1, %v1365_v59  ;;  %1274 = vmatmul.mubr.msk.bf16.vlgmr.msra.gmra.mrb[8].mxu1 %vm430_vm1, %v1365_v59 }
  0x52   : > { %907 = vmatpush1.bf16.msra.mxu0 %v1259_v60  ;;  %950 = vmatpush1.bf16.msra.mxu1 %v1261_v61 }
  0x53   : > { %1275 = vmatprep.subr.msk.bf16.mxu0 %vm434_vm0, %v1268_v62  ;;  %1277 = vmatprep.subr.msk.bf16.mxu1 %vm434_vm0, %v1270_v1 }
  0x54   : > { %938 = vmatprep.mubr.bf16.mxu0 %v1406_v24  ;;  %981 = vmatprep.mubr.bf16.mxu1 %v1406_v24 }
  0x56   : > { %909 = vmatpush1.bf16.msra.mxu0 %v809_v0  ;;  %952 = vmatpush1.bf16.msra.mxu1 %v815_v3 }
  0x59   : > { %1276 = vmatmul.mubr.msk.bf16.vlgmr.msra.gmra.mrb[12].mxu0 %vm430_vm1, %v1365_v59  ;;  %1278 = vmatmul.mubr.msk.bf16.vlgmr.msra.gmra.mrb[12].mxu1 %vm430_vm1, %v1365_v59 }
  0xa8   : > { %v358_v4 = vpop.permute.xlu0 %357  ;;  %v721_v27 = vpop.permute.xlu1 %720 }
  0xac   : > { %v363_v6 = vpop.permute.xlu0 %362  ;;  %v726_v50 = vpop.permute.xlu1 %725 }
 0x114   : > { %v493_v5 = vpop.f32.mrb[0].mxu0  ;;  %v536_v8 = vpop.f32.mrb[0].mxu1 }
 0x115   : > { %v494_v7 = vadd.f32 %v493_v5, %v358_v4  ;;  %v495_v9 = vpop.f32.mrb[1].mxu0  ;;  %v537_v10 = vadd.f32 %v536_v8, %v358_v4  ;;  %v538_v12 = vpop.f32.mrb[1].mxu1 }
 0x116   : > { %v496_v11 = vadd.f32 %v495_v9, %v358_v4  ;;  %v497_v13 = vpop.f32.mrb[2].mxu0  ;;  %v539_v14 = vadd.f32 %v538_v12, %v358_v4  ;;  %v540_v15 = vpop.f32.mrb[2].mxu1 }
 0x117   : > { %v498_v24 = vadd.f32 %v497_v13, %v363_v6  ;;  %v499_v16 = vpop.f32.mrb[3].mxu0  ;;  %v541_v18 = vadd.f32 %v540_v15, %v363_v6  ;;  %v542_v20 = vpop.f32.mrb[3].mxu1 }
 0x118   : > { %v1300_v17 = vpack.c.bf16 %v496_v11, %v494_v7  ;;  %v500_v19 = vadd.f32 %v499_v16, %v363_v6  ;;  %v1301_v21 = vpack.c.bf16 %v539_v14, %v537_v10  ;;  %v543_v22 = vadd.f32 %v542_v20, %v363_v6 }
 0x11a   : > { %679 = vst [vmem:[%s1672_s15] sm:$0xff] %v1300_v17  ;;  %v1304_v23 = vpack.c.bf16 %v500_v19, %v498_v24  ;;  %680 = vst [vmem:[%s1672_s15 + $0x8] sm:$0xff] %v1301_v21  ;;  %v1305_v25 = vpack.c.bf16 %v543_v22, %v541_v18 }
 0x11c   : > { %683 = vst [vmem:[%s1672_s15 + $0x20] sm:$0x33] %v1304_v23  ;;  %v579_v26 = vpop.f32.mrb[4].mxu0  ;;  %684 = vst [vmem:[%s1672_s15 + $0x28] sm:$0x33] %v1305_v25  ;;  %v622_v29 = vpop.f32.mrb[4].mxu1 }
 0x11d   : > { %v580_v28 = vadd.f32 %v579_v26, %v358_v4  ;;  %v581_v30 = vpop.f32.mrb[5].mxu0  ;;  %v623_v31 = vadd.f32 %v622_v29, %v358_v4  ;;  %v624_v33 = vpop.f32.mrb[5].mxu1 }
 0x11e   : > { %v582_v32 = vadd.f32 %v581_v30, %v358_v4  ;;  %v583_v34 = vpop.f32.mrb[6].mxu0  ;;  %v625_v35 = vadd.f32 %v624_v33, %v358_v4  ;;  %v626_v37 = vpop.f32.mrb[6].mxu1 }
 0x11f   : > { %v584_v36 = vadd.f32 %v583_v34, %v363_v6  ;;  %v585_v38 = vpop.f32.mrb[7].mxu0  ;;  %v627_v41 = vadd.f32 %v626_v37, %v363_v6  ;;  %v628_v43 = vpop.f32.mrb[7].mxu1 }
 0x120   : > { %v1302_v39 = vpack.c.bf16 %v582_v32, %v580_v28  ;;  %v586_v42 = vadd.f32 %v585_v38, %v363_v6  ;;  %v1303_v46 = vpack.c.bf16 %v625_v35, %v623_v31  ;;  %v629_v47 = vadd.f32 %v628_v43, %v363_v6 }
 0x121   : > { %v1073_v23 = vld [vmem:[%s1672_s15] sm:$0xff] (%p1467_p6)  ;;  %v1075_v25 = vld [vmem:[%s1672_s15 + $0x8] sm:$0xff] (%p1467_p6) }
 0x122   : > { %681 = vst [vmem:[%s1672_s15 + $0x10] sm:$0xff] %v1302_v39  ;;  %v1306_v48 = vpack.c.bf16 %v586_v42, %v584_v36  ;;  %682 = vst [vmem:[%s1672_s15 + $0x18] sm:$0xff] %v1303_v46  ;;  %v1307_v49 = vpack.c.bf16 %v629_v47, %v627_v41 }
 0x123   : > { %v1081_v28 = vld [vmem:[%s1672_s15 + $0x20] sm:$0xff] (%p1467_p6)  ;;  %v1083_v29 = vld [vmem:[%s1672_s15 + $0x28] sm:$0xff] (%p1467_p6)  ;;  %1074 = vst [vmem:[%s1060_s13] sm:$0xff] (%p1467_p6), %v1073_v23  ;;  %1076 = vst [vmem:[%s1060_s13 + $0x8] sm:$0xff] (%p1467_p6), %v1075_v25 }
 0x124   : > { %685 = vst [vmem:[%s1672_s15 + $0x30] sm:$0x33] %v1306_v48  ;;  %v854_v40 = vpop.f32.mrb[8].mxu0  ;;  %686 = vst [vmem:[%s1672_s15 + $0x38] sm:$0x33] %v1307_v49  ;;  %v897_v53 = vpop.f32.mrb[8].mxu1 }
 0x125   : > { %v855_v52 = vadd.f32 %v854_v40, %v721_v27  ;;  %v856_v54 = vpop.f32.mrb[9].mxu0  ;;  %v898_v56 = vadd.f32 %v897_v53, %v721_v27  ;;  %v899_v45 = vpop.f32.mrb[9].mxu1  ;;  %1082 = vst [vmem:[%s1060_s13 + $0x20] sm:$0xff] (%p1467_p6), %v1081_v28  ;;  %1084 = vst [vmem:[%s1060_s13 + $0x28] sm:$0xff] (%p1467_p6), %v1083_v29 }
 0x126   : > { %v857_v44 = vadd.f32 %v856_v54, %v721_v27  ;;  %v858_v57 = vpop.f32.mrb[10].mxu0  ;;  %v900_v51 = vadd.f32 %v899_v45, %v721_v27  ;;  %v901_v58 = vpop.f32.mrb[10].mxu1 }
 0x127   : > { %v859_v55 = vadd.f32 %v858_v57, %v726_v50  ;;  %v860_v59 = vpop.f32.mrb[11].mxu0  ;;  %v902_v61 = vadd.f32 %v901_v58, %v726_v50  ;;  %v903_v63 = vpop.f32.mrb[11].mxu1 }
 0x128   : > { %v1308_v60 = vpack.c.bf16 %v857_v44, %v855_v52  ;;  %v861_v62 = vadd.f32 %v860_v59, %v726_v50  ;;  %v1309_v1 = vpack.c.bf16 %v900_v51, %v898_v56  ;;  %v904_v2 = vadd.f32 %v903_v63, %v726_v50 }
 0x129   : > { %v1077_v26 = vld [vmem:[%s1672_s15 + $0x10] sm:$0xff] (%p1467_p6) }
 0x12a   : > { %1287 = vst [vmem:[%s1672_s15 + $0x40] sm:$0xff] %v1308_v60  ;;  %v1312_v0 = vpack.c.bf16 %v861_v62, %v859_v55  ;;  %1288 = vst [vmem:[%s1672_s15 + $0x48] sm:$0xff] %v1309_v1  ;;  %v1313_v3 = vpack.c.bf16 %v904_v2, %v902_v61 }
 0x12b   : > { %1078 = vst [vmem:[%s1060_s13 + $0x10] sm:$0xff] (%p1467_p6), %v1077_v26  ;;  %v1085_v30 = vld [vmem:[%s1672_s15 + $0x30] sm:$0xff] (%p1467_p6)  ;;  %v1087_v31 = vld [vmem:[%s1672_s15 + $0x38] sm:$0xff] (%p1467_p6) }
 0x12c   : > { %1291 = vst [vmem:[%s1672_s15 + $0x60] sm:$0x33] %v1312_v0  ;;  %v940_v4 = vpop.f32.mrb[12].mxu0  ;;  %1292 = vst [vmem:[%s1672_s15 + $0x68] sm:$0x33] %v1313_v3  ;;  %v983_v6 = vpop.f32.mrb[12].mxu1 }
 0x12d   : > { %v941_v5 = vadd.f32 %v940_v4, %v721_v27  ;;  %v942_v7 = vpop.f32.mrb[13].mxu0  ;;  %v984_v8 = vadd.f32 %v983_v6, %v721_v27  ;;  %v985_v10 = vpop.f32.mrb[13].mxu1  ;;  %1086 = vst [vmem:[%s1060_s13 + $0x30] sm:$0xff] (%p1467_p6), %v1085_v30  ;;  %1088 = vst [vmem:[%s1060_s13 + $0x38] sm:$0xff] (%p1467_p6), %v1087_v31 }
 0x12e   : > { %v943_v9 = vadd.f32 %v942_v7, %v721_v27  ;;  %v944_v11 = vpop.f32.mrb[14].mxu0  ;;  %v986_v12 = vadd.f32 %v985_v10, %v721_v27  ;;  %v987_v14 = vpop.f32.mrb[14].mxu1  ;;  %1055 = sbr.rel (!%p1467_p6) target bundleno = 317 (0x13d), region = 63  ;;  %v1079_v27 = vld [vmem:[%s1672_s15 + $0x18] sm:$0xff] (%p1467_p6) }
 0x12f   : > { %v945_v13 = vadd.f32 %v944_v11, %v726_v50  ;;  %v946_v24 = vpop.f32.mrb[15].mxu0  ;;  %v988_v16 = vadd.f32 %v987_v14, %v726_v50  ;;  %v989_v18 = vpop.f32.mrb[15].mxu1  ;;  %1080 = vst [vmem:[%s1060_s13 + $0x18] sm:$0xff] (%p1467_p6), %v1079_v27 }
 0x130   : > { %v1310_v15 = vpack.c.bf16 %v943_v9, %v941_v5  ;;  %v947_v17 = vadd.f32 %v946_v24, %v726_v50  ;;  %v1311_v19 = vpack.c.bf16 %v986_v12, %v984_v8  ;;  %v990_v20 = vadd.f32 %v989_v18, %v726_v50 }
 0x131   : > { %v1089_v32 = vld [vmem:[%s1672_s15 + $0x40] sm:$0xff] (%p1467_p6)  ;;  %v1091_v33 = vld [vmem:[%s1672_s15 + $0x48] sm:$0xff] (%p1467_p6) }
 0x132   : > { %1289 = vst [vmem:[%s1672_s15 + $0x50] sm:$0xff] %v1310_v15  ;;  %v1314_v21 = vpack.c.bf16 %v947_v17, %v945_v13  ;;  %1290 = vst [vmem:[%s1672_s15 + $0x58] sm:$0xff] %v1311_v19  ;;  %v1315_v22 = vpack.c.bf16 %v990_v20, %v988_v16 }
 0x133   : > { %1090 = vst [vmem:[%s1060_s13 + $0x80] sm:$0xff] (%p1467_p6), %v1089_v32  ;;  %1092 = vst [vmem:[%s1060_s13 + $0x88] sm:$0xff] (%p1467_p6), %v1091_v33  ;;  %v1097_v36 = vld [vmem:[%s1672_s15 + $0x60] sm:$0xff] (%p1467_p6)  ;;  %v1099_v37 = vld [vmem:[%s1672_s15 + $0x68] sm:$0xff] (%p1467_p6) }
 0x134   : > { %1293 = vst [vmem:[%s1672_s15 + $0x70] sm:$0x33] %v1314_v21  ;;  %1294 = vst [vmem:[%s1672_s15 + $0x78] sm:$0x33] %v1315_v22 }
 0x135   : > { %1098 = vst [vmem:[%s1060_s13 + $0xa0] sm:$0xff] %v1097_v36  ;;  %1100 = vst [vmem:[%s1060_s13 + $0xa8] sm:$0xff] %v1099_v37 }
 0x139   : > { %v1093_v34 = vld [vmem:[%s1672_s15 + $0x50] sm:$0xff]  ;;  %v1095_v35 = vld [vmem:[%s1672_s15 + $0x58] sm:$0xff] }
 0x13a   : > { %1094 = vst [vmem:[%s1060_s13 + $0x90] sm:$0xff] %v1093_v34  ;;  %1096 = vst [vmem:[%s1060_s13 + $0x98] sm:$0xff] %v1095_v35 }
 0x13b   : > { %v1101_v38 = vld [vmem:[%s1672_s15 + $0x70] sm:$0xff]  ;;  %v1103_v39 = vld [vmem:[%s1672_s15 + $0x78] sm:$0xff] }
 0x13c   : > { %1102 = vst [vmem:[%s1060_s13 + $0xb0] sm:$0xff] %v1101_v38  ;;  %1104 = vst [vmem:[%s1060_s13 + $0xb8] sm:$0xff] %v1103_v39 }
 0x13d PF: > { %s14_s19 = sadd.s32 1, %s1404_s19   ;;  %s1733_s15 = smov %s1392_s16 }
 0x13e   : > { %p11_p12 = scmp.ge.s32.totalorder %s14_s19, 4   ;;  %s1734_s16 = smov %s1472_s25 }
 0x13f   : > { %s1735_s17 = smov %s1400_s18  ;;  %s1736_s18 = smov %s1738_s20 }
 0x140   :  { %13 = sbr.rel (!%p11_p12) target bundleno = 3 (0x3), region = 124 }

// kernel: squeeze.2
= control target key start
LH: loop header
LB: loop body
LE: loop exit
PB: predicated region body
PF: predicated region fallthrough
CT: control target
= control target key end

     0   :  { %vm2209_vm0 = vcmask 1047556   ;;  %s4513_s18 = smov 96   ;;  %vm1538_vm1 = vcmask 261120   ;;  %s5330_s0 = inlined_call_operand.vmem [shape: bf16[1,2,12,1024], index: 0, kind: input, shape index: {}]   ;;  %s5331_s1 = inlined_call_operand.vmem [shape: bf16[2,3,2,2,32,32], index: 1, kind: output, shape index: {}]  }
   0x1   :  { %v3941_v0 = vld [vmem:[%s5330_s0 + $0x7] sm:$0x1]  ;;  %v3942_v1 = vld [vmem:[%s5330_s0 + $0x6] sm:$0x1]  ;;  %v3943_v2 = vld [vmem:[%s5330_s0 + $0x5] sm:$0x1] }
   0x2   :  { %v1425_v3 = vunpack.c.l.bf16 %v3941_v0  ;;  %v1441_v4 = vunpack.c.l.bf16 %v3942_v1  ;;  %v1457_v5 = vunpack.c.l.bf16 %v3943_v2  ;;  %v3944_v6 = vld [vmem:[%s5330_s0 + $0x4] sm:$0x1]  ;;  %v3945_v7 = vld [vmem:[%s5330_s0 + $0x3] sm:$0x1]  ;;  %v3946_v8 = vld [vmem:[%s5330_s0 + $0x2] sm:$0x1] }
   0x3   :  { %v1473_v9 = vunpack.c.l.bf16 %v3944_v6  ;;  %v1489_v10 = vunpack.c.l.bf16 %v3945_v7  ;;  %v1505_v11 = vunpack.c.l.bf16 %v3946_v8  ;;  %v3947_v12 = vld [vmem:[%s5330_s0 + $0x1] sm:$0x1]  ;;  %v1533_v13 = vld [vmem:[%s5330_s0] sm:$0x1]  ;;  %v3925_v16 = vld [vmem:[%s5330_s0 + $0x17] sm:$0x1] }
   0x4   :  { %1428 = vst [vmem:[#allocation1 + $0x38] sm:$0x3] %v1425_v3  ;;  %1444 = vst [vmem:[#allocation1 + $0x30] sm:$0x3] %v1441_v4  ;;  %v1520_v14 = vunpack.c.l.bf16 %v3947_v12  ;;  %v1534_v15 = vunpack.c.l.bf16 %v1533_v13  ;;  %v3926_v17 = vld [vmem:[%s5330_s0 + $0x16] sm:$0x1]  ;;  %v1169_v19 = vunpack.c.l.bf16 %v3925_v16 }
   0x5   :  { %1460 = vst [vmem:[#allocation1 + $0x28] sm:$0x3] %v1457_v5  ;;  %v3927_v18 = vld [vmem:[%s5330_s0 + $0x15] sm:$0x1]  ;;  %1476 = vst [vmem:[#allocation1 + $0x20] sm:$0x3] %v1473_v9  ;;  %v1185_v20 = vunpack.c.l.bf16 %v3926_v17 }
   0x6   :  { %1492 = vst [vmem:[#allocation1 + $0x18] sm:$0x3] %v1489_v10  ;;  %1508 = vst [vmem:[#allocation1 + $0x10] sm:$0x3] %v1505_v11  ;;  %v1201_v21 = vunpack.c.l.bf16 %v3927_v18  ;;  %v3928_v22 = vld [vmem:[%s5330_s0 + $0x14] sm:$0x1] }
   0x7   :  { %v3929_v23 = vld [vmem:[%s5330_s0 + $0x13] sm:$0x1]  ;;  %v3930_v24 = vld [vmem:[%s5330_s0 + $0x12] sm:$0x1]  ;;  %1523 = vst [vmem:[#allocation1 + $0x8] sm:$0x3] %v1520_v14  ;;  %v1217_v25 = vunpack.c.l.bf16 %v3928_v22 }
   0x8   :  { %1536 = vst [vmem:[#allocation1] sm:$0x3] %v1534_v15  ;;  %v1233_v26 = vunpack.c.l.bf16 %v3929_v23  ;;  %v1249_v27 = vunpack.c.l.bf16 %v3930_v24  ;;  %v3931_v28 = vld [vmem:[%s5330_s0 + $0x11] sm:$0x1]  ;;  %v3932_v29 = vld [vmem:[%s5330_s0 + $0x10] sm:$0x1] }
   0x9   :  { %v3933_v30 = vld [vmem:[%s5330_s0 + $0xf] sm:$0x1]  ;;  %1172 = vst [vmem:[#allocation1 + $0xb8] sm:$0x3] %v1169_v19  ;;  %1188 = vst [vmem:[#allocation1 + $0xb0] sm:$0x3] %v1185_v20  ;;  %v1265_v31 = vunpack.c.l.bf16 %v3931_v28  ;;  %v1281_v32 = vunpack.c.l.bf16 %v3932_v29 }
   0xa   :  { %1204 = vst [vmem:[#allocation1 + $0xa8] sm:$0x3] %v1201_v21  ;;  %v1297_v33 = vunpack.c.l.bf16 %v3933_v30  ;;  %v3934_v34 = vld [vmem:[%s5330_s0 + $0xe] sm:$0x1]  ;;  %v3935_v35 = vld [vmem:[%s5330_s0 + $0xd] sm:$0x1] }
   0xb   :  { %v3936_v36 = vld [vmem:[%s5330_s0 + $0xc] sm:$0x1]  ;;  %1220 = vst [vmem:[#allocation1 + $0xa0] sm:$0x3] %v1217_v25  ;;  %1236 = vst [vmem:[#allocation1 + $0x98] sm:$0x3] %v1233_v26  ;;  %v1313_v37 = vunpack.c.l.bf16 %v3934_v34  ;;  %v1329_v38 = vunpack.c.l.bf16 %v3935_v35 }
   0xc   :  { %1252 = vst [vmem:[#allocation1 + $0x90] sm:$0x3] %v1249_v27  ;;  %v1345_v39 = vunpack.c.l.bf16 %v3936_v36  ;;  %v3937_v40 = vld [vmem:[%s5330_s0 + $0xb] sm:$0x1]  ;;  %v3938_v41 = vld [vmem:[%s5330_s0 + $0xa] sm:$0x1] }
   0xd   :  { %v3939_v42 = vld [vmem:[%s5330_s0 + $0x9] sm:$0x1]  ;;  %1268 = vst [vmem:[#allocation1 + $0x88] sm:$0x3] %v1265_v31  ;;  %1284 = vst [vmem:[#allocation1 + $0x80] sm:$0x3] %v1281_v32  ;;  %v1361_v43 = vunpack.c.l.bf16 %v3937_v40  ;;  %v1377_v44 = vunpack.c.l.bf16 %v3938_v41 }
   0xe   :  { %1300 = vst [vmem:[#allocation1 + $0x78] sm:$0x3] %v1297_v33  ;;  %v1393_v45 = vunpack.c.l.bf16 %v3939_v42  ;;  %v3940_v46 = vld [vmem:[%s5330_s0 + $0x8] sm:$0x1]  ;;  %v3917_v47 = vld [vmem:[%s5330_s0 + $0x1f] sm:$0x1] }
   0xf   :  { %v3918_v48 = vld [vmem:[%s5330_s0 + $0x1e] sm:$0x1]  ;;  %1316 = vst [vmem:[#allocation1 + $0x70] sm:$0x3] %v1313_v37  ;;  %1332 = vst [vmem:[#allocation1 + $0x68] sm:$0x3] %v1329_v38  ;;  %v1409_v49 = vunpack.c.l.bf16 %v3940_v46  ;;  %v1041_v50 = vunpack.c.l.bf16 %v3917_v47 }
  0x10   :  { %1348 = vst [vmem:[#allocation1 + $0x60] sm:$0x3] %v1345_v39  ;;  %v1057_v51 = vunpack.c.l.bf16 %v3918_v48  ;;  %v3919_v52 = vld [vmem:[%s5330_s0 + $0x1d] sm:$0x1]  ;;  %v3920_v53 = vld [vmem:[%s5330_s0 + $0x1c] sm:$0x1] }
  0x11   :  { %v3921_v54 = vld [vmem:[%s5330_s0 + $0x1b] sm:$0x1]  ;;  %1364 = vst [vmem:[#allocation1 + $0x58] sm:$0x3] %v1361_v43  ;;  %1380 = vst [vmem:[#allocation1 + $0x50] sm:$0x3] %v1377_v44  ;;  %v1073_v55 = vunpack.c.l.bf16 %v3919_v52  ;;  %v1089_v56 = vunpack.c.l.bf16 %v3920_v53 }
  0x12   :  { %1396 = vst [vmem:[#allocation1 + $0x48] sm:$0x3] %v1393_v45  ;;  %v1105_v57 = vunpack.c.l.bf16 %v3921_v54  ;;  %v3922_v58 = vld [vmem:[%s5330_s0 + $0x1a] sm:$0x1]  ;;  %v3923_v59 = vld [vmem:[%s5330_s0 + $0x19] sm:$0x1] }
  0x13   :  { %v3924_v60 = vld [vmem:[%s5330_s0 + $0x18] sm:$0x1]  ;;  %v2219_v62 = vld [vmem:[#allocation1 + $0x1] ss:$8 sm:$0xf0]   ;;  %v1121_v63 = vunpack.c.l.bf16 %v3922_v58  ;;  %v1137_v0 = vunpack.c.l.bf16 %v3923_v59 }
  0x14   :  { %v2208_v61 = vld [vmem:[#allocation1] ss:$8 sm:$0xf0]   ;;  %1412 = vst [vmem:[#allocation1 + $0x40] sm:$0x3] %v1409_v49  ;;  %v1153_v1 = vunpack.c.l.bf16 %v3924_v60 }
  0x15   :  { %1044 = vst [vmem:[#allocation1 + $0xf8] sm:$0x3] %v1041_v50  ;;  %1060 = vst [vmem:[#allocation1 + $0xf0] sm:$0x3] %v1057_v51  ;;  %v3909_v6 = vld [vmem:[%s5330_s0 + $0x27] sm:$0x1] }
  0x16   :  { %v2207_v2 = vld [vmem:[#allocation1] ss:$8 sm:$0xf]   ;;  %v2217_v3 = vld [vmem:[#allocation1 + $0x1] ss:$8 sm:$0xf]   ;;  %v913_v12 = vunpack.c.l.bf16 %v3909_v6 }
  0x17   :  { %1076 = vst [vmem:[#allocation1 + $0xe8] sm:$0x3] %v1073_v55  ;;  %1092 = vst [vmem:[#allocation1 + $0xe0] sm:$0x3] %v1089_v56  ;;  %v2210_v4 = vsel %vm2209_vm0, %v2208_v61, %v2207_v2  ;;  %v2221_v5 = vsel %vm2209_vm0, %v2219_v62, %v2217_v3  ;;  %v3910_v7 = vld [vmem:[%s5330_s0 + $0x26] sm:$0x1] }
  0x18   :  { %1108 = vst [vmem:[#allocation1 + $0xd8] sm:$0x3] %v1105_v57  ;;  %1124 = vst [vmem:[#allocation1 + $0xd0] sm:$0x3] %v1121_v63  ;;  %v3911_v8 = vld [vmem:[%s5330_s0 + $0x25] sm:$0x1]  ;;  %v4333_v9 = vpack.i.bf16 %v2221_v5, %v2210_v4  ;;  %v929_v13 = vunpack.c.l.bf16 %v3910_v7 }
  0x19   :  { %1140 = vst [vmem:[#allocation1 + $0xc8] sm:$0x3] %v1137_v0  ;;  %1156 = vst [vmem:[#allocation1 + $0xc0] sm:$0x3] %v1153_v1  ;;  %v945_v14 = vunpack.c.l.bf16 %v3911_v8  ;;  %v3912_v22 = vld [vmem:[%s5330_s0 + $0x24] sm:$0x1] }
  0x1a   :  { %v2252_v10 = vld [vmem:[#allocation1 + $0x80] ss:$8 sm:$0xf0]   ;;  %v2263_v11 = vld [vmem:[#allocation1 + $0x81] ss:$8 sm:$0xf0]   ;;  %4334 = vrot.lane.b32.xlu0 %v4333_v9, %s4513_s18  ;;  %v961_v27 = vunpack.c.l.bf16 %v3912_v22 }
  0x1b   :  { %v2250_v15 = vld [vmem:[#allocation1 + $0x80] ss:$8 sm:$0xf]   ;;  %v2261_v16 = vld [vmem:[#allocation1 + $0x81] ss:$8 sm:$0xf]  }
  0x1c   :  { %v2254_v17 = vsel %vm2209_vm0, %v2252_v10, %v2250_v15  ;;  %v2265_v18 = vsel %vm2209_vm0, %v2263_v11, %v2261_v16  ;;  %v2230_v19 = vld [vmem:[#allocation1 + $0x40] ss:$8 sm:$0xf0]   ;;  %v2241_v20 = vld [vmem:[#allocation1 + $0x41] ss:$8 sm:$0xf0]  }
  0x1d   :  { %916 = vst [vmem:[#allocation1 + $0x138] sm:$0x3] %v913_v12  ;;  %932 = vst [vmem:[#allocation1 + $0x130] sm:$0x3] %v929_v13  ;;  %v4343_v21 = vpack.i.bf16 %v2265_v18, %v2254_v17  ;;  %v3913_v23 = vld [vmem:[%s5330_s0 + $0x23] sm:$0x1] }
  0x1e   :  { %948 = vst [vmem:[#allocation1 + $0x128] sm:$0x3] %v945_v14  ;;  %v3914_v24 = vld [vmem:[%s5330_s0 + $0x22] sm:$0x1]  ;;  %v977_v28 = vunpack.c.l.bf16 %v3913_v23  ;;  %964 = vst [vmem:[#allocation1 + $0x120] sm:$0x3] %v961_v27 }
  0x1f   :  { %v2228_v25 = vld [vmem:[#allocation1 + $0x40] ss:$8 sm:$0xf]   ;;  %v2239_v26 = vld [vmem:[#allocation1 + $0x41] ss:$8 sm:$0xf]   ;;  %v993_v29 = vunpack.c.l.bf16 %v3914_v24  ;;  %4344 = vrot.lane.b32.xlu1 %v4343_v21, %s4513_s18 }
  0x20   :  { %v2232_v30 = vsel %vm2209_vm0, %v2230_v19, %v2228_v25  ;;  %v2243_v31 = vsel %vm2209_vm0, %v2241_v20, %v2239_v26  ;;  %v2274_v32 = vld [vmem:[#allocation1 + $0xc0] ss:$8 sm:$0xf0]   ;;  %v2285_v33 = vld [vmem:[#allocation1 + $0xc1] ss:$8 sm:$0xf0]  }
  0x21   :  { %v4338_v34 = vpack.i.bf16 %v2243_v31, %v2232_v30  ;;  %v2272_v35 = vld [vmem:[#allocation1 + $0xc0] ss:$8 sm:$0xf]   ;;  %v2283_v36 = vld [vmem:[#allocation1 + $0xc1] ss:$8 sm:$0xf]  }
  0x22   :  { %980 = vst [vmem:[#allocation1 + $0x118] sm:$0x3] %v977_v28  ;;  %996 = vst [vmem:[#allocation1 + $0x110] sm:$0x3] %v993_v29  ;;  %v2276_v37 = vsel %vm2209_vm0, %v2274_v32, %v2272_v35  ;;  %v2287_v38 = vsel %vm2209_vm0, %v2285_v33, %v2283_v36  ;;  %v3915_v39 = vld [vmem:[%s5330_s0 + $0x21] sm:$0x1] }
  0x23   :  { %v3916_v40 = vld [vmem:[%s5330_s0 + $0x20] sm:$0x1]  ;;  %v3901_v41 = vld [vmem:[%s5330_s0 + $0x2f] sm:$0x1]  ;;  %4339 = vrot.lane.b32.xlu0 %v4338_v34, %s4513_s18  ;;  %v4348_v42 = vpack.i.bf16 %v2287_v38, %v2276_v37  ;;  %v1009_v43 = vunpack.c.l.bf16 %v3915_v39  ;;  %v3902_v46 = vld [vmem:[%s5330_s0 + $0x2e] sm:$0x1] }
  0x24   :  { %v1025_v44 = vunpack.c.l.bf16 %v3916_v40  ;;  %v785_v45 = vunpack.c.l.bf16 %v3901_v41  ;;  %v3903_v47 = vld [vmem:[%s5330_s0 + $0x2d] sm:$0x1]  ;;  %v3904_v48 = vld [vmem:[%s5330_s0 + $0x2c] sm:$0x1]  ;;  %v801_v49 = vunpack.c.l.bf16 %v3902_v46  ;;  %v3905_v52 = vld [vmem:[%s5330_s0 + $0x2b] sm:$0x1] }
  0x25   :  { %v817_v50 = vunpack.c.l.bf16 %v3903_v47  ;;  %v833_v51 = vunpack.c.l.bf16 %v3904_v48  ;;  %v3906_v53 = vld [vmem:[%s5330_s0 + $0x2a] sm:$0x1]  ;;  %v3907_v54 = vld [vmem:[%s5330_s0 + $0x29] sm:$0x1]  ;;  %4349 = vrot.lane.b32.xlu1 %v4348_v42, %s4513_s18  ;;  %1012 = vst [vmem:[#allocation1 + $0x108] sm:$0x3] %v1009_v43  ;;  %v849_v55 = vunpack.c.l.bf16 %v3905_v52 }
  0x26   :  { %1028 = vst [vmem:[#allocation1 + $0x100] sm:$0x3] %v1025_v44  ;;  %788 = vst [vmem:[#allocation1 + $0x178] sm:$0x3] %v785_v45  ;;  %v865_v56 = vunpack.c.l.bf16 %v3906_v53  ;;  %v881_v57 = vunpack.c.l.bf16 %v3907_v54  ;;  %v3908_v58 = vld [vmem:[%s5330_s0 + $0x28] sm:$0x1] }
  0x27   :  { %v3893_v59 = vld [vmem:[%s5330_s0 + $0x37] sm:$0x1]  ;;  %v3894_v60 = vld [vmem:[%s5330_s0 + $0x36] sm:$0x1]  ;;  %804 = vst [vmem:[#allocation1 + $0x170] sm:$0x3] %v801_v49  ;;  %v897_v61 = vunpack.c.l.bf16 %v3908_v58 }
  0x28   :  { %820 = vst [vmem:[#allocation1 + $0x168] sm:$0x3] %v817_v50  ;;  %836 = vst [vmem:[#allocation1 + $0x160] sm:$0x3] %v833_v51  ;;  %v657_v62 = vunpack.c.l.bf16 %v3893_v59  ;;  %v673_v63 = vunpack.c.l.bf16 %v3894_v60  ;;  %v3895_v0 = vld [vmem:[%s5330_s0 + $0x35] sm:$0x1] }
  0x29   :  { %v3896_v1 = vld [vmem:[%s5330_s0 + $0x34] sm:$0x1]  ;;  %v3897_v2 = vld [vmem:[%s5330_s0 + $0x33] sm:$0x1]  ;;  %852 = vst [vmem:[#allocation1 + $0x158] sm:$0x3] %v849_v55  ;;  %v689_v3 = vunpack.c.l.bf16 %v3895_v0 }
  0x2a   :  { %868 = vst [vmem:[#allocation1 + $0x150] sm:$0x3] %v865_v56  ;;  %884 = vst [vmem:[#allocation1 + $0x148] sm:$0x3] %v881_v57  ;;  %v705_v4 = vunpack.c.l.bf16 %v3896_v1  ;;  %v721_v5 = vunpack.c.l.bf16 %v3897_v2  ;;  %v3898_v6 = vld [vmem:[%s5330_s0 + $0x32] sm:$0x1] }
  0x2b   :  { %v3899_v7 = vld [vmem:[%s5330_s0 + $0x31] sm:$0x1]  ;;  %v3900_v8 = vld [vmem:[%s5330_s0 + $0x30] sm:$0x1]  ;;  %900 = vst [vmem:[#allocation1 + $0x140] sm:$0x3] %v897_v61  ;;  %v737_v11 = vunpack.c.l.bf16 %v3898_v6 }
  0x2c   :  { %v2296_v9 = vld [vmem:[#allocation1 + $0x100] ss:$8 sm:$0xf0]   ;;  %v2307_v10 = vld [vmem:[#allocation1 + $0x101] ss:$8 sm:$0xf0]   ;;  %v753_v12 = vunpack.c.l.bf16 %v3899_v7  ;;  %v769_v13 = vunpack.c.l.bf16 %v3900_v8 }
  0x2d   :  { %660 = vst [vmem:[#allocation1 + $0x1b8] sm:$0x3] %v657_v62  ;;  %676 = vst [vmem:[#allocation1 + $0x1b0] sm:$0x3] %v673_v63  ;;  %v3885_v14 = vld [vmem:[%s5330_s0 + $0x3f] sm:$0x1] }
  0x2e   :  { %692 = vst [vmem:[#allocation1 + $0x1a8] sm:$0x3] %v689_v3  ;;  %708 = vst [vmem:[#allocation1 + $0x1a0] sm:$0x3] %v705_v4  ;;  %v3886_v15 = vld [vmem:[%s5330_s0 + $0x3e] sm:$0x1]  ;;  %v529_v17 = vunpack.c.l.bf16 %v3885_v14 }
  0x2f   :  { %724 = vst [vmem:[#allocation1 + $0x198] sm:$0x3] %v721_v5  ;;  %v3887_v16 = vld [vmem:[%s5330_s0 + $0x3d] sm:$0x1]  ;;  %740 = vst [vmem:[#allocation1 + $0x190] sm:$0x3] %v737_v11  ;;  %v545_v18 = vunpack.c.l.bf16 %v3886_v15 }
  0x30   :  { %756 = vst [vmem:[#allocation1 + $0x188] sm:$0x3] %v753_v12  ;;  %772 = vst [vmem:[#allocation1 + $0x180] sm:$0x3] %v769_v13  ;;  %v561_v19 = vunpack.c.l.bf16 %v3887_v16  ;;  %v3888_v20 = vld [vmem:[%s5330_s0 + $0x3c] sm:$0x1] }
  0x31   :  { %v3889_v21 = vld [vmem:[%s5330_s0 + $0x3b] sm:$0x1]  ;;  %v3890_v22 = vld [vmem:[%s5330_s0 + $0x3a] sm:$0x1]  ;;  %v577_v23 = vunpack.c.l.bf16 %v3888_v20  ;;  %v3891_v26 = vld [vmem:[%s5330_s0 + $0x39] sm:$0x1] }
  0x32   :  { %v593_v24 = vunpack.c.l.bf16 %v3889_v21  ;;  %v609_v25 = vunpack.c.l.bf16 %v3890_v22  ;;  %v3892_v27 = vld [vmem:[%s5330_s0 + $0x38] sm:$0x1]  ;;  %v3877_v28 = vld [vmem:[%s5330_s0 + $0x47] sm:$0x1]  ;;  %532 = vst [vmem:[#allocation1 + $0x1f8] sm:$0x3] %v529_v17  ;;  %v625_v31 = vunpack.c.l.bf16 %v3891_v26 }
  0x33   :  { %v2294_v29 = vld [vmem:[#allocation1 + $0x100] ss:$8 sm:$0xf]   ;;  %v2305_v30 = vld [vmem:[#allocation1 + $0x101] ss:$8 sm:$0xf]   ;;  %v641_v32 = vunpack.c.l.bf16 %v3892_v27  ;;  %v401_v33 = vunpack.c.l.bf16 %v3877_v28 }
  0x34   :  { %548 = vst [vmem:[#allocation1 + $0x1f0] sm:$0x3] %v545_v18  ;;  %564 = vst [vmem:[#allocation1 + $0x1e8] sm:$0x3] %v561_v19  ;;  %v2298_v34 = vsel %vm2209_vm0, %v2296_v9, %v2294_v29  ;;  %v2309_v35 = vsel %vm2209_vm0, %v2307_v10, %v2305_v30  ;;  %v3878_v39 = vld [vmem:[%s5330_s0 + $0x46] sm:$0x1] }
  0x35   :  { %v2318_v36 = vld [vmem:[#allocation1 + $0x140] ss:$8 sm:$0xf0]   ;;  %v2329_v37 = vld [vmem:[#allocation1 + $0x141] ss:$8 sm:$0xf0]   ;;  %v4353_v38 = vpack.i.bf16 %v2309_v35, %v2298_v34  ;;  %v417_v44 = vunpack.c.l.bf16 %v3878_v39 }
  0x36   :  { %580 = vst [vmem:[#allocation1 + $0x1e0] sm:$0x3] %v577_v23  ;;  %596 = vst [vmem:[#allocation1 + $0x1d8] sm:$0x3] %v593_v24  ;;  %v3879_v40 = vld [vmem:[%s5330_s0 + $0x45] sm:$0x1] }
  0x37   :  { %612 = vst [vmem:[#allocation1 + $0x1d0] sm:$0x3] %v609_v25  ;;  %628 = vst [vmem:[#allocation1 + $0x1c8] sm:$0x3] %v625_v31  ;;  %v3880_v41 = vld [vmem:[%s5330_s0 + $0x44] sm:$0x1]  ;;  %v433_v45 = vunpack.c.l.bf16 %v3879_v40  ;;  %4354 = vrot.lane.b32.xlu0 %v4353_v38, %s4513_s18 }
  0x38   :  { %644 = vst [vmem:[#allocation1 + $0x1c0] sm:$0x3] %v641_v32  ;;  %404 = vst [vmem:[#allocation1 + $0x238] sm:$0x3] %v401_v33  ;;  %v449_v46 = vunpack.c.l.bf16 %v3880_v41  ;;  %v3881_v56 = vld [vmem:[%s5330_s0 + $0x43] sm:$0x1] }
  0x39   :  { %v2316_v42 = vld [vmem:[#allocation1 + $0x140] ss:$8 sm:$0xf]   ;;  %v2327_v43 = vld [vmem:[#allocation1 + $0x141] ss:$8 sm:$0xf]   ;;  %v465_v60 = vunpack.c.l.bf16 %v3881_v56 }
  0x3a   :  { %v2320_v47 = vsel %vm2209_vm0, %v2318_v36, %v2316_v42  ;;  %v2331_v48 = vsel %vm2209_vm0, %v2329_v37, %v2327_v43  ;;  %v2340_v49 = vld [vmem:[#allocation1 + $0x180] ss:$8 sm:$0xf0]   ;;  %v2351_v50 = vld [vmem:[#allocation1 + $0x181] ss:$8 sm:$0xf0]  }
  0x3b   :  { %v4358_v51 = vpack.i.bf16 %v2331_v48, %v2320_v47  ;;  %v2338_v52 = vld [vmem:[#allocation1 + $0x180] ss:$8 sm:$0xf]   ;;  %v2349_v53 = vld [vmem:[#allocation1 + $0x181] ss:$8 sm:$0xf]  }
  0x3c   :  { %420 = vst [vmem:[#allocation1 + $0x230] sm:$0x3] %v417_v44  ;;  %436 = vst [vmem:[#allocation1 + $0x228] sm:$0x3] %v433_v45  ;;  %v2342_v54 = vsel %vm2209_vm0, %v2340_v49, %v2338_v52  ;;  %v2353_v55 = vsel %vm2209_vm0, %v2351_v50, %v2349_v53  ;;  %v3882_v57 = vld [vmem:[%s5330_s0 + $0x42] sm:$0x1] }
  0x3d   :  { %452 = vst [vmem:[#allocation1 + $0x220] sm:$0x3] %v449_v46  ;;  %v3883_v58 = vld [vmem:[%s5330_s0 + $0x41] sm:$0x1]  ;;  %4359 = vrot.lane.b32.xlu1 %v4358_v51, %s4513_s18  ;;  %v4363_v59 = vpack.i.bf16 %v2353_v55, %v2342_v54  ;;  %v481_v61 = vunpack.c.l.bf16 %v3882_v57  ;;  %v3884_v63 = vld [vmem:[%s5330_s0 + $0x40] sm:$0x1] }
  0x3e   :  { %v497_v62 = vunpack.c.l.bf16 %v3883_v58  ;;  %v3869_v0 = vld [vmem:[%s5330_s0 + $0x4f] sm:$0x1]  ;;  %v3870_v1 = vld [vmem:[%s5330_s0 + $0x4e] sm:$0x1]  ;;  %v513_v4 = vunpack.c.l.bf16 %v3884_v63  ;;  %468 = vst [vmem:[#allocation1 + $0x218] sm:$0x3] %v465_v60 }
  0x3f   :  { %v2362_v2 = vld [vmem:[#allocation1 + $0x1c0] ss:$8 sm:$0xf0]   ;;  %v2373_v3 = vld [vmem:[#allocation1 + $0x1c1] ss:$8 sm:$0xf0]   ;;  %v273_v5 = vunpack.c.l.bf16 %v3869_v0  ;;  %v289_v6 = vunpack.c.l.bf16 %v3870_v1  ;;  %4364 = vrot.lane.b32.xlu0 %v4363_v59, %s4513_s18 }
  0x40   :  { %v2360_v7 = vld [vmem:[#allocation1 + $0x1c0] ss:$8 sm:$0xf]   ;;  %v2371_v8 = vld [vmem:[#allocation1 + $0x1c1] ss:$8 sm:$0xf]  }
  0x41   :  { %484 = vst [vmem:[#allocation1 + $0x210] sm:$0x3] %v481_v61  ;;  %500 = vst [vmem:[#allocation1 + $0x208] sm:$0x3] %v497_v62  ;;  %v2364_v9 = vsel %vm2209_vm0, %v2362_v2, %v2360_v7  ;;  %v2375_v10 = vsel %vm2209_vm0, %v2373_v3, %v2371_v8  ;;  %v3871_v11 = vld [vmem:[%s5330_s0 + $0x4d] sm:$0x1] }
  0x42   :  { %516 = vst [vmem:[#allocation1 + $0x200] sm:$0x3] %v513_v4  ;;  %276 = vst [vmem:[#allocation1 + $0x278] sm:$0x3] %v273_v5  ;;  %v3872_v12 = vld [vmem:[%s5330_s0 + $0x4c] sm:$0x1]  ;;  %v4368_v14 = vpack.i.bf16 %v2375_v10, %v2364_v9  ;;  %v305_v15 = vunpack.c.l.bf16 %v3871_v11 }
  0x43   :  { %292 = vst [vmem:[#allocation1 + $0x270] sm:$0x3] %v289_v6  ;;  %v3873_v13 = vld [vmem:[%s5330_s0 + $0x4b] sm:$0x1]  ;;  %v321_v16 = vunpack.c.l.bf16 %v3872_v12  ;;  %v3874_v18 = vld [vmem:[%s5330_s0 + $0x4a] sm:$0x1] }
  0x44   :  { %v337_v17 = vunpack.c.l.bf16 %v3873_v13  ;;  %v3875_v19 = vld [vmem:[%s5330_s0 + $0x49] sm:$0x1]  ;;  %v3876_v20 = vld [vmem:[%s5330_s0 + $0x48] sm:$0x1]  ;;  %v353_v21 = vunpack.c.l.bf16 %v3874_v18  ;;  %4369 = vrot.lane.b32.xlu1 %v4368_v14, %s4513_s18  ;;  %308 = vst [vmem:[#allocation1 + $0x268] sm:$0x3] %v305_v15 }
  0x45   :  { %v369_v22 = vunpack.c.l.bf16 %v3875_v19  ;;  %v385_v23 = vunpack.c.l.bf16 %v3876_v20  ;;  %v2384_v24 = vld [vmem:[#allocation1 + $0x200] ss:$8 sm:$0xf0]   ;;  %v2395_v25 = vld [vmem:[#allocation1 + $0x201] ss:$8 sm:$0xf0]  }
  0x46   :  { %324 = vst [vmem:[#allocation1 + $0x260] sm:$0x3] %v321_v16  ;;  %340 = vst [vmem:[#allocation1 + $0x258] sm:$0x3] %v337_v17  ;;  %v3861_v26 = vld [vmem:[%s5330_s0 + $0x57] sm:$0x1] }
  0x47   :  { %v3862_v27 = vld [vmem:[%s5330_s0 + $0x56] sm:$0x1]  ;;  %v3863_v28 = vld [vmem:[%s5330_s0 + $0x55] sm:$0x1]  ;;  %356 = vst [vmem:[#allocation1 + $0x250] sm:$0x3] %v353_v21  ;;  %v145_v29 = vunpack.c.l.bf16 %v3861_v26 }
  0x48   :  { %372 = vst [vmem:[#allocation1 + $0x248] sm:$0x3] %v369_v22  ;;  %388 = vst [vmem:[#allocation1 + $0x240] sm:$0x3] %v385_v23  ;;  %v161_v30 = vunpack.c.l.bf16 %v3862_v27  ;;  %v177_v31 = vunpack.c.l.bf16 %v3863_v28  ;;  %v3864_v32 = vld [vmem:[%s5330_s0 + $0x54] sm:$0x1] }
  0x49   :  { %v3865_v33 = vld [vmem:[%s5330_s0 + $0x53] sm:$0x1]  ;;  %v3866_v34 = vld [vmem:[%s5330_s0 + $0x52] sm:$0x1]  ;;  %v193_v35 = vunpack.c.l.bf16 %v3864_v32  ;;  %v3867_v38 = vld [vmem:[%s5330_s0 + $0x51] sm:$0x1] }
  0x4a   :  { %v209_v36 = vunpack.c.l.bf16 %v3865_v33  ;;  %v225_v37 = vunpack.c.l.bf16 %v3866_v34  ;;  %v3868_v39 = vld [vmem:[%s5330_s0 + $0x50] sm:$0x1]  ;;  %v3853_v40 = vld [vmem:[%s5330_s0 + $0x5f] sm:$0x1]  ;;  %148 = vst [vmem:[#allocation1 + $0x2b8] sm:$0x3] %v145_v29  ;;  %v241_v41 = vunpack.c.l.bf16 %v3867_v38 }
  0x4b   :  { %164 = vst [vmem:[#allocation1 + $0x2b0] sm:$0x3] %v161_v30  ;;  %180 = vst [vmem:[#allocation1 + $0x2a8] sm:$0x3] %v177_v31  ;;  %v257_v42 = vunpack.c.l.bf16 %v3868_v39  ;;  %v17_v43 = vunpack.c.l.bf16 %v3853_v40  ;;  %v3854_v44 = vld [vmem:[%s5330_s0 + $0x5e] sm:$0x1] }
  0x4c   :  { %v3855_v45 = vld [vmem:[%s5330_s0 + $0x5d] sm:$0x1]  ;;  %v3856_v46 = vld [vmem:[%s5330_s0 + $0x5c] sm:$0x1]  ;;  %196 = vst [vmem:[#allocation1 + $0x2a0] sm:$0x3] %v193_v35  ;;  %v33_v49 = vunpack.c.l.bf16 %v3854_v44 }
  0x4d   :  { %v2382_v47 = vld [vmem:[#allocation1 + $0x200] ss:$8 sm:$0xf]   ;;  %v2393_v48 = vld [vmem:[#allocation1 + $0x201] ss:$8 sm:$0xf]   ;;  %v49_v50 = vunpack.c.l.bf16 %v3855_v45  ;;  %v65_v51 = vunpack.c.l.bf16 %v3856_v46 }
  0x4e   :  { %212 = vst [vmem:[#allocation1 + $0x298] sm:$0x3] %v209_v36  ;;  %228 = vst [vmem:[#allocation1 + $0x290] sm:$0x3] %v225_v37  ;;  %v2386_v52 = vsel %vm2209_vm0, %v2384_v24, %v2382_v47  ;;  %v2397_v53 = vsel %vm2209_vm0, %v2395_v25, %v2393_v48  ;;  %v3857_v54 = vld [vmem:[%s5330_s0 + $0x5b] sm:$0x1] }
  0x4f   :  { %244 = vst [vmem:[#allocation1 + $0x288] sm:$0x3] %v241_v41  ;;  %260 = vst [vmem:[#allocation1 + $0x280] sm:$0x3] %v257_v42  ;;  %v3858_v55 = vld [vmem:[%s5330_s0 + $0x5a] sm:$0x1]  ;;  %v4373_v57 = vpack.i.bf16 %v2397_v53, %v2386_v52  ;;  %v81_v58 = vunpack.c.l.bf16 %v3857_v54 }
  0x50   :  { %20 = vst [vmem:[#allocation1 + $0x2f8] sm:$0x3] %v17_v43  ;;  %v3859_v56 = vld [vmem:[%s5330_s0 + $0x59] sm:$0x1]  ;;  %36 = vst [vmem:[#allocation1 + $0x2f0] sm:$0x3] %v33_v49  ;;  %v97_v59 = vunpack.c.l.bf16 %v3858_v55 }
  0x51   :  { %52 = vst [vmem:[#allocation1 + $0x2e8] sm:$0x3] %v49_v50  ;;  %68 = vst [vmem:[#allocation1 + $0x2e0] sm:$0x3] %v65_v51  ;;  %v113_v60 = vunpack.c.l.bf16 %v3859_v56  ;;  %v3860_v61 = vld [vmem:[%s5330_s0 + $0x58] sm:$0x1]  ;;  %4374 = vrot.lane.b32.xlu0 %v4373_v57, %s4513_s18 }
  0x52   :  { %v2406_v62 = vld [vmem:[#allocation1 + $0x240] ss:$8 sm:$0xf0]   ;;  %v2417_v63 = vld [vmem:[#allocation1 + $0x241] ss:$8 sm:$0xf0]   ;;  %v129_v0 = vunpack.c.l.bf16 %v3860_v61 }
  0x53   :  { %v2404_v1 = vld [vmem:[#allocation1 + $0x240] ss:$8 sm:$0xf]   ;;  %v2415_v2 = vld [vmem:[#allocation1 + $0x241] ss:$8 sm:$0xf]  }
  0x54   :  { %84 = vst [vmem:[#allocation1 + $0x2d8] sm:$0x3] %v81_v58  ;;  %100 = vst [vmem:[#allocation1 + $0x2d0] sm:$0x3] %v97_v59  ;;  %v2408_v4 = vsel %vm2209_vm0, %v2406_v62, %v2404_v1  ;;  %v2419_v5 = vsel %vm2209_vm0, %v2417_v63, %v2415_v2  ;;  %s4514_s0 = smov 64  }
  0x55   :  { %116 = vst [vmem:[#allocation1 + $0x2c8] sm:$0x3] %v113_v60  ;;  %v2469_v3 = vld [vmem:[#allocation1] ss:$8 sm:$0xf]   ;;  %v4378_v7 = vpack.i.bf16 %v2419_v5, %v2408_v4 }
  0x56   :  { %132 = vst [vmem:[#allocation1 + $0x2c0] sm:$0x3] %v129_v0  ;;  %v2470_v6 = vld [vmem:[#allocation1] ss:$8 sm:$0xf0]  }
  0x57   :  { %v2479_v8 = vld [vmem:[#allocation1 + $0x1] ss:$8 sm:$0xf]   ;;  %v2428_v10 = vld [vmem:[#allocation1 + $0x280] ss:$8 sm:$0xf0]   ;;  %4379 = vrot.lane.b32.xlu1 %v4378_v7, %s4513_s18  ;;  %v2472_v19 = vsel %vm2209_vm0, %v2470_v6, %v2469_v3 }
  0x58   :  { %v2481_v9 = vld [vmem:[#allocation1 + $0x1] ss:$8 sm:$0xf0]   ;;  %v2426_v12 = vld [vmem:[#allocation1 + $0x280] ss:$8 sm:$0xf]  }
  0x59   :  { %v2439_v11 = vld [vmem:[#allocation1 + $0x281] ss:$8 sm:$0xf0]   ;;  %v2490_v14 = vld [vmem:[#allocation1 + $0x40] ss:$8 sm:$0xf]   ;;  %v2430_v15 = vsel %vm2209_vm0, %v2428_v10, %v2426_v12  ;;  %v2483_v20 = vsel %vm2209_vm0, %v2481_v9, %v2479_v8 }
  0x5a   :  { %v2437_v13 = vld [vmem:[#allocation1 + $0x281] ss:$8 sm:$0xf]   ;;  %v2450_v17 = vld [vmem:[#allocation1 + $0x2c0] ss:$8 sm:$0xf0]   ;;  %v4393_v28 = vpack.i.bf16 %v2483_v20, %v2472_v19 }
  0x5b   :  { %v2441_v16 = vsel %vm2209_vm0, %v2439_v11, %v2437_v13  ;;  %v2461_v18 = vld [vmem:[#allocation1 + $0x2c1] ss:$8 sm:$0xf0]   ;;  %v2492_v22 = vld [vmem:[#allocation1 + $0x40] ss:$8 sm:$0xf0]  }
  0x5c   :  { %v4383_v21 = vpack.i.bf16 %v2441_v16, %v2430_v15  ;;  %v2501_v23 = vld [vmem:[#allocation1 + $0x41] ss:$8 sm:$0xf]   ;;  %v2512_v25 = vld [vmem:[#allocation1 + $0x80] ss:$8 sm:$0xf]   ;;  %v2494_v31 = vsel %vm2209_vm0, %v2492_v22, %v2490_v14 }
  0x5d   :  { %v2503_v24 = vld [vmem:[#allocation1 + $0x41] ss:$8 sm:$0xf0]   ;;  %v2448_v26 = vld [vmem:[#allocation1 + $0x2c0] ss:$8 sm:$0xf]  }
  0x5e   :  { %4384 = vrot.lane.b32.xlu0 %v4383_v21, %s4513_s18  ;;  %v2459_v27 = vld [vmem:[#allocation1 + $0x2c1] ss:$8 sm:$0xf]   ;;  %v2452_v29 = vsel %vm2209_vm0, %v2450_v17, %v2448_v26  ;;  %v2505_v32 = vsel %vm2209_vm0, %v2503_v24, %v2501_v23  ;;  %v2514_v33 = vld [vmem:[#allocation1 + $0x80] ss:$8 sm:$0xf0]  }
  0x5f   :  { %v2463_v30 = vsel %vm2209_vm0, %v2461_v18, %v2459_v27  ;;  %v2523_v34 = vld [vmem:[#allocation1 + $0x81] ss:$8 sm:$0xf]   ;;  %v2516_v36 = vsel %vm2209_vm0, %v2514_v33, %v2512_v25  ;;  %v2534_v38 = vld [vmem:[#allocation1 + $0xc0] ss:$8 sm:$0xf]   ;;  %v4398_v42 = vpack.i.bf16 %v2505_v32, %v2494_v31 }
  0x60   :  { %v4388_v35 = vpack.i.bf16 %v2463_v30, %v2452_v29  ;;  %v2525_v37 = vld [vmem:[#allocation1 + $0x81] ss:$8 sm:$0xf0]   ;;  %v2536_v40 = vld [vmem:[#allocation1 + $0xc0] ss:$8 sm:$0xf0]  }
  0x61   :  { %v2527_v39 = vsel %vm2209_vm0, %v2525_v37, %v2523_v34  ;;  %v2545_v41 = vld [vmem:[#allocation1 + $0xc1] ss:$8 sm:$0xf]   ;;  %v2556_v45 = vld [vmem:[#allocation1 + $0x100] ss:$8 sm:$0xf]   ;;  %v2538_v46 = vsel %vm2209_vm0, %v2536_v40, %v2534_v38 }
  0x62   :  { %4389 = vrot.lane.b32.xlu1 %v4388_v35, %s4513_s18  ;;  %4394 = vrot.lane.b32.xlu0 %v4393_v28, %s4514_s0  ;;  %v4403_v43 = vpack.i.bf16 %v2527_v39, %v2516_v36  ;;  %v2547_v44 = vld [vmem:[#allocation1 + $0xc1] ss:$8 sm:$0xf0]   ;;  %v2558_v48 = vld [vmem:[#allocation1 + $0x100] ss:$8 sm:$0xf0]  }
  0x63   :  { %v2549_v47 = vsel %vm2209_vm0, %v2547_v44, %v2545_v41  ;;  %v2567_v49 = vld [vmem:[#allocation1 + $0x101] ss:$8 sm:$0xf]   ;;  %v2560_v50 = vsel %vm2209_vm0, %v2558_v48, %v2556_v45  ;;  %v2578_v52 = vld [vmem:[#allocation1 + $0x140] ss:$8 sm:$0xf]  }
  0x64   :  { %v2569_v51 = vld [vmem:[#allocation1 + $0x101] ss:$8 sm:$0xf0]   ;;  %v2580_v54 = vld [vmem:[#allocation1 + $0x140] ss:$8 sm:$0xf0]   ;;  %v4408_v56 = vpack.i.bf16 %v2549_v47, %v2538_v46 }
  0x65   :  { %v2571_v53 = vsel %vm2209_vm0, %v2569_v51, %v2567_v49  ;;  %v2589_v55 = vld [vmem:[#allocation1 + $0x141] ss:$8 sm:$0xf]   ;;  %v2600_v59 = vld [vmem:[#allocation1 + $0x180] ss:$8 sm:$0xf]   ;;  %v2582_v60 = vsel %vm2209_vm0, %v2580_v54, %v2578_v52 }
  0x66   :  { %4399 = vrot.lane.b32.xlu1 %v4398_v42, %s4514_s0  ;;  %4404 = vrot.lane.b32.xlu0 %v4403_v43, %s4514_s0  ;;  %v4413_v57 = vpack.i.bf16 %v2571_v53, %v2560_v50  ;;  %v2591_v58 = vld [vmem:[#allocation1 + $0x141] ss:$8 sm:$0xf0]   ;;  %v2602_v62 = vld [vmem:[#allocation1 + $0x180] ss:$8 sm:$0xf0]  }
  0x67   :  { %v2593_v61 = vsel %vm2209_vm0, %v2591_v58, %v2589_v55  ;;  %v2611_v63 = vld [vmem:[#allocation1 + $0x181] ss:$8 sm:$0xf]   ;;  %v2604_v0 = vsel %vm2209_vm0, %v2602_v62, %v2600_v59  ;;  %v2622_v2 = vld [vmem:[#allocation1 + $0x1c0] ss:$8 sm:$0xf]  }
  0x68   :  { %v2613_v1 = vld [vmem:[#allocation1 + $0x181] ss:$8 sm:$0xf0]   ;;  %v2624_v4 = vld [vmem:[#allocation1 + $0x1c0] ss:$8 sm:$0xf0]   ;;  %v4418_v6 = vpack.i.bf16 %v2593_v61, %v2582_v60 }
  0x69   :  { %v2615_v3 = vsel %vm2209_vm0, %v2613_v1, %v2611_v63  ;;  %v2633_v5 = vld [vmem:[#allocation1 + $0x1c1] ss:$8 sm:$0xf]   ;;  %v2644_v9 = vld [vmem:[#allocation1 + $0x200] ss:$8 sm:$0xf]   ;;  %v2626_v10 = vsel %vm2209_vm0, %v2624_v4, %v2622_v2 }
  0x6a   :  { %4409 = vrot.lane.b32.xlu1 %v4408_v56, %s4514_s0  ;;  %4414 = vrot.lane.b32.xlu0 %v4413_v57, %s4514_s0  ;;  %v4423_v7 = vpack.i.bf16 %v2615_v3, %v2604_v0  ;;  %v2635_v8 = vld [vmem:[#allocation1 + $0x1c1] ss:$8 sm:$0xf0]   ;;  %v2646_v12 = vld [vmem:[#allocation1 + $0x200] ss:$8 sm:$0xf0]  }
  0x6b   :  { %v2637_v11 = vsel %vm2209_vm0, %v2635_v8, %v2633_v5  ;;  %v2655_v13 = vld [vmem:[#allocation1 + $0x201] ss:$8 sm:$0xf]   ;;  %v2648_v14 = vsel %vm2209_vm0, %v2646_v12, %v2644_v9  ;;  %v2666_v16 = vld [vmem:[#allocation1 + $0x240] ss:$8 sm:$0xf]  }
  0x6c   :  { %v2657_v15 = vld [vmem:[#allocation1 + $0x201] ss:$8 sm:$0xf0]   ;;  %v2668_v18 = vld [vmem:[#allocation1 + $0x240] ss:$8 sm:$0xf0]   ;;  %v4428_v20 = vpack.i.bf16 %v2637_v11, %v2626_v10 }
  0x6d   :  { %v2659_v17 = vsel %vm2209_vm0, %v2657_v15, %v2655_v13  ;;  %v2677_v19 = vld [vmem:[#allocation1 + $0x241] ss:$8 sm:$0xf]   ;;  %v2688_v23 = vld [vmem:[#allocation1 + $0x280] ss:$8 sm:$0xf]   ;;  %v2670_v24 = vsel %vm2209_vm0, %v2668_v18, %v2666_v16 }
  0x6e   :  { %4419 = vrot.lane.b32.xlu1 %v4418_v6, %s4514_s0  ;;  %4424 = vrot.lane.b32.xlu0 %v4423_v7, %s4514_s0  ;;  %v4433_v21 = vpack.i.bf16 %v2659_v17, %v2648_v14  ;;  %v2679_v22 = vld [vmem:[#allocation1 + $0x241] ss:$8 sm:$0xf0]   ;;  %v2690_v26 = vld [vmem:[#allocation1 + $0x280] ss:$8 sm:$0xf0]  }
  0x6f   :  { %v2681_v25 = vsel %vm2209_vm0, %v2679_v22, %v2677_v19  ;;  %v2699_v27 = vld [vmem:[#allocation1 + $0x281] ss:$8 sm:$0xf]   ;;  %v2692_v28 = vsel %vm2209_vm0, %v2690_v26, %v2688_v23  ;;  %v2710_v30 = vld [vmem:[#allocation1 + $0x2c0] ss:$8 sm:$0xf]  }
  0x70   :  { %v2701_v29 = vld [vmem:[#allocation1 + $0x281] ss:$8 sm:$0xf0]   ;;  %v2712_v32 = vld [vmem:[#allocation1 + $0x2c0] ss:$8 sm:$0xf0]   ;;  %v4438_v34 = vpack.i.bf16 %v2681_v25, %v2670_v24 }
  0x71   :  { %v2703_v31 = vsel %vm2209_vm0, %v2701_v29, %v2699_v27  ;;  %v2721_v33 = vld [vmem:[#allocation1 + $0x2c1] ss:$8 sm:$0xf]   ;;  %v2731_v37 = vld [vmem:[#allocation1] ss:$8 sm:$0xf]   ;;  %v2714_v38 = vsel %vm2209_vm0, %v2712_v32, %v2710_v30 }
  0x72   :  { %4429 = vrot.lane.b32.xlu1 %v4428_v20, %s4514_s0  ;;  %4434 = vrot.lane.b32.xlu0 %v4433_v21, %s4514_s0  ;;  %v4443_v35 = vpack.i.bf16 %v2703_v31, %v2692_v28  ;;  %v2723_v36 = vld [vmem:[#allocation1 + $0x2c1] ss:$8 sm:$0xf0]   ;;  %v2732_v40 = vld [vmem:[#allocation1] ss:$8 sm:$0xf0]  }
  0x73   :  { %v2725_v39 = vsel %vm2209_vm0, %v2723_v36, %v2721_v33  ;;  %v2734_v41 = vsel %vm2209_vm0, %v2732_v40, %v2731_v37  ;;  %v2741_v42 = vld [vmem:[#allocation1 + $0x1] ss:$8 sm:$0xf]   ;;  %v2752_v45 = vld [vmem:[#allocation1 + $0x40] ss:$8 sm:$0xf]  }
  0x74   :  { %v2743_v43 = vld [vmem:[#allocation1 + $0x1] ss:$8 sm:$0xf0]   ;;  %v2754_v46 = vld [vmem:[#allocation1 + $0x40] ss:$8 sm:$0xf0]   ;;  %v4448_v47 = vpack.i.bf16 %v2725_v39, %v2714_v38 }
  0x75   :  { %v2745_v44 = vsel %vm2209_vm0, %v2743_v43, %v2741_v42  ;;  %v2763_v49 = vld [vmem:[#allocation1 + $0x41] ss:$8 sm:$0xf]   ;;  %v2756_v51 = vsel %vm2209_vm0, %v2754_v46, %v2752_v45  ;;  %v2774_v53 = vld [vmem:[#allocation1 + $0x80] ss:$8 sm:$0xf]  }
  0x76   :  { %4439 = vrot.lane.b32.xlu1 %v4438_v34, %s4514_s0  ;;  %4444 = vrot.lane.b32.xlu0 %v4443_v35, %s4514_s0  ;;  %v4453_v48 = vpack.i.bf16 %v2745_v44, %v2734_v41  ;;  %v2765_v50 = vld [vmem:[#allocation1 + $0x41] ss:$8 sm:$0xf0]   ;;  %v2776_v54 = vld [vmem:[#allocation1 + $0x80] ss:$8 sm:$0xf0]  }
  0x77   :  { %v2767_v52 = vsel %vm2209_vm0, %v2765_v50, %v2763_v49  ;;  %v2778_v55 = vsel %vm2209_vm0, %v2776_v54, %v2774_v53  ;;  %v2785_v56 = vld [vmem:[#allocation1 + $0x81] ss:$8 sm:$0xf]   ;;  %v2796_v59 = vld [vmem:[#allocation1 + $0xc0] ss:$8 sm:$0xf]  }
  0x78   :  { %v2787_v57 = vld [vmem:[#allocation1 + $0x81] ss:$8 sm:$0xf0]   ;;  %v2798_v60 = vld [vmem:[#allocation1 + $0xc0] ss:$8 sm:$0xf0]   ;;  %v4458_v61 = vpack.i.bf16 %v2767_v52, %v2756_v51 }
  0x79   :  { %v2789_v58 = vsel %vm2209_vm0, %v2787_v57, %v2785_v56  ;;  %s4515_s18 = smov 32   ;;  %v2807_v63 = vld [vmem:[#allocation1 + $0xc1] ss:$8 sm:$0xf]   ;;  %v2800_v1 = vsel %vm2209_vm0, %v2798_v60, %v2796_v59 }
  0x7a   :  { %4449 = vrot.lane.b32.xlu1 %v4448_v47, %s4514_s0  ;;  %4454 = vrot.lane.b32.xlu0 %v4453_v48, %s4515_s18  ;;  %v4463_v62 = vpack.i.bf16 %v2789_v58, %v2778_v55  ;;  %v2809_v0 = vld [vmem:[#allocation1 + $0xc1] ss:$8 sm:$0xf0]   ;;  %v2818_v3 = vld [vmem:[#allocation1 + $0x100] ss:$8 sm:$0xf]  }
  0x7b   :  { %v2811_v2 = vsel %vm2209_vm0, %v2809_v0, %v2807_v63  ;;  %v2820_v4 = vld [vmem:[#allocation1 + $0x100] ss:$8 sm:$0xf0]   ;;  %v2829_v6 = vld [vmem:[#allocation1 + $0x101] ss:$8 sm:$0xf]  }
  0x7c   :  { %v2822_v5 = vsel %vm2209_vm0, %v2820_v4, %v2818_v3  ;;  %v2831_v7 = vld [vmem:[#allocation1 + $0x101] ss:$8 sm:$0xf0]   ;;  %v2840_v9 = vld [vmem:[#allocation1 + $0x140] ss:$8 sm:$0xf]   ;;  %v4468_v11 = vpack.i.bf16 %v2811_v2, %v2800_v1 }
  0x7d   :  { %v2833_v8 = vsel %vm2209_vm0, %v2831_v7, %v2829_v6  ;;  %v2842_v10 = vld [vmem:[#allocation1 + $0x140] ss:$8 sm:$0xf0]   ;;  %v2851_v13 = vld [vmem:[#allocation1 + $0x141] ss:$8 sm:$0xf]  }
  0x7e   :  { %4459 = vrot.lane.b32.xlu1 %v4458_v61, %s4515_s18  ;;  %4464 = vrot.lane.b32.xlu0 %v4463_v62, %s4515_s18  ;;  %v4473_v12 = vpack.i.bf16 %v2833_v8, %v2822_v5  ;;  %v2853_v14 = vld [vmem:[#allocation1 + $0x141] ss:$8 sm:$0xf0]   ;;  %v2844_v15 = vsel %vm2209_vm0, %v2842_v10, %v2840_v9  ;;  %v2862_v17 = vld [vmem:[#allocation1 + $0x180] ss:$8 sm:$0xf]  }
  0x7f   :  { %v2855_v16 = vsel %vm2209_vm0, %v2853_v14, %v2851_v13  ;;  %v2864_v18 = vld [vmem:[#allocation1 + $0x180] ss:$8 sm:$0xf0]   ;;  %v2873_v20 = vld [vmem:[#allocation1 + $0x181] ss:$8 sm:$0xf]  }
  0x80   :  { %v2866_v19 = vsel %vm2209_vm0, %v2864_v18, %v2862_v17  ;;  %v2875_v21 = vld [vmem:[#allocation1 + $0x181] ss:$8 sm:$0xf0]   ;;  %v2884_v23 = vld [vmem:[#allocation1 + $0x1c0] ss:$8 sm:$0xf]   ;;  %v4478_v25 = vpack.i.bf16 %v2855_v16, %v2844_v15 }
  0x81   :  { %v2877_v22 = vsel %vm2209_vm0, %v2875_v21, %v2873_v20  ;;  %v2886_v24 = vld [vmem:[#allocation1 + $0x1c0] ss:$8 sm:$0xf0]   ;;  %v2895_v27 = vld [vmem:[#allocation1 + $0x1c1] ss:$8 sm:$0xf]  }
  0x82   :  { %4469 = vrot.lane.b32.xlu1 %v4468_v11, %s4515_s18  ;;  %4474 = vrot.lane.b32.xlu0 %v4473_v12, %s4515_s18  ;;  %v4483_v26 = vpack.i.bf16 %v2877_v22, %v2866_v19  ;;  %v2897_v28 = vld [vmem:[#allocation1 + $0x1c1] ss:$8 sm:$0xf0]   ;;  %v2888_v29 = vsel %vm2209_vm0, %v2886_v24, %v2884_v23  ;;  %v2906_v31 = vld [vmem:[#allocation1 + $0x200] ss:$8 sm:$0xf]  }
  0x83   :  { %v2899_v30 = vsel %vm2209_vm0, %v2897_v28, %v2895_v27  ;;  %v2908_v32 = vld [vmem:[#allocation1 + $0x200] ss:$8 sm:$0xf0]   ;;  %v2917_v34 = vld [vmem:[#allocation1 + $0x201] ss:$8 sm:$0xf]  }
  0x84   :  { %v2910_v33 = vsel %vm2209_vm0, %v2908_v32, %v2906_v31  ;;  %v2919_v35 = vld [vmem:[#allocation1 + $0x201] ss:$8 sm:$0xf0]   ;;  %v2928_v37 = vld [vmem:[#allocation1 + $0x240] ss:$8 sm:$0xf]   ;;  %v4488_v39 = vpack.i.bf16 %v2899_v30, %v2888_v29 }
  0x85   :  { %v2921_v36 = vsel %vm2209_vm0, %v2919_v35, %v2917_v34  ;;  %v2930_v38 = vld [vmem:[#allocation1 + $0x240] ss:$8 sm:$0xf0]   ;;  %v2939_v41 = vld [vmem:[#allocation1 + $0x241] ss:$8 sm:$0xf]  }
  0x86   :  { %4479 = vrot.lane.b32.xlu1 %v4478_v25, %s4515_s18  ;;  %4484 = vrot.lane.b32.xlu0 %v4483_v26, %s4515_s18  ;;  %v4493_v40 = vpack.i.bf16 %v2921_v36, %v2910_v33  ;;  %v2941_v42 = vld [vmem:[#allocation1 + $0x241] ss:$8 sm:$0xf0]   ;;  %v2932_v43 = vsel %vm2209_vm0, %v2930_v38, %v2928_v37  ;;  %v2950_v45 = vld [vmem:[#allocation1 + $0x280] ss:$8 sm:$0xf]  }
  0x87   :  { %v2943_v44 = vsel %vm2209_vm0, %v2941_v42, %v2939_v41  ;;  %v2952_v46 = vld [vmem:[#allocation1 + $0x280] ss:$8 sm:$0xf0]   ;;  %v2961_v49 = vld [vmem:[#allocation1 + $0x281] ss:$8 sm:$0xf]  }
  0x88   :  { %v1537_v47 = vld [vmem:[#allocation1] sm:$0x3]   ;;  %v2954_v48 = vsel %vm2209_vm0, %v2952_v46, %v2950_v45  ;;  %v4498_v54 = vpack.i.bf16 %v2943_v44, %v2932_v43  ;;  %v1543_v60 = vld [vmem:[#allocation1 + $0x8] sm:$0x3]   ;;  %v1550_v61 = vld [vmem:[#allocation1 + $0x10] sm:$0x3]  }
  0x89   :  { %v2963_v50 = vld [vmem:[#allocation1 + $0x281] ss:$8 sm:$0xf0]   ;;  %v2972_v52 = vld [vmem:[#allocation1 + $0x2c0] ss:$8 sm:$0xf]  }
  0x8a   :  { %v2965_v51 = vsel %vm2209_vm0, %v2963_v50, %v2961_v49  ;;  %v2974_v53 = vld [vmem:[#allocation1 + $0x2c0] ss:$8 sm:$0xf0]   ;;  %4489 = vrot.lane.b32.xlu1 %v4488_v39, %s4515_s18  ;;  %4494 = vrot.lane.b32.xlu0 %v4493_v40, %s4515_s18  ;;  %v2983_v56 = vld [vmem:[#allocation1 + $0x2c1] ss:$8 sm:$0xf]  }
  0x8b   :  { %v4503_v55 = vpack.i.bf16 %v2965_v51, %v2954_v48  ;;  %v2985_v57 = vld [vmem:[#allocation1 + $0x2c1] ss:$8 sm:$0xf0]   ;;  %v2976_v58 = vsel %vm2209_vm0, %v2974_v53, %v2972_v52  ;;  %1539 = vst.msk [vmem:[#allocation0] sm:$0x1] %vm1538_vm1, %v1537_v47  }
  0x8c   :  { %v2987_v59 = vsel %vm2209_vm0, %v2985_v57, %v2983_v56  ;;  %1541 = vst.msk [vmem:[#allocation0 + $0x1f] sm:$0x2] %vm1538_vm1, %v1537_v47   ;;  %1546 = vst.msk [vmem:[#allocation0 + $0x4] sm:$0x1] %vm1538_vm1, %v1543_v60   ;;  %v1557_v62 = vld [vmem:[#allocation1 + $0x18] sm:$0x3]  }
  0x8d   :  { %1548 = vst.msk [vmem:[#allocation0 + $0x23] sm:$0x2] %vm1538_vm1, %v1543_v60   ;;  %1553 = vst.msk [vmem:[#allocation0 + $0x8] sm:$0x1] %vm1538_vm1, %v1550_v61   ;;  %v1564_v63 = vld [vmem:[#allocation1 + $0x20] sm:$0x3]   ;;  %v4508_v4 = vpack.i.bf16 %v2987_v59, %v2976_v58 }
  0x8e   :  { %1555 = vst.msk [vmem:[#allocation0 + $0x27] sm:$0x2] %vm1538_vm1, %v1550_v61   ;;  %v1571_v0 = vld [vmem:[#allocation1 + $0x28] sm:$0x3]   ;;  %1560 = vst.msk [vmem:[#allocation0 + $0xc] sm:$0x1] %vm1538_vm1, %v1557_v62   ;;  %4499 = vrot.lane.b32.xlu1 %v4498_v54, %s4515_s18  ;;  %4504 = vrot.lane.b32.xlu0 %v4503_v55, %s4515_s18 }
  0x8f   :  { %1562 = vst.msk [vmem:[#allocation0 + $0x2b] sm:$0x2] %vm1538_vm1, %v1557_v62   ;;  %1567 = vst.msk [vmem:[#allocation0 + $0x10] sm:$0x1] %vm1538_vm1, %v1564_v63   ;;  %v1578_v1 = vld [vmem:[#allocation1 + $0x30] sm:$0x3]  }
  0x90   :  { %1569 = vst.msk [vmem:[#allocation0 + $0x2f] sm:$0x2] %vm1538_vm1, %v1564_v63   ;;  %1574 = vst.msk [vmem:[#allocation0 + $0x14] sm:$0x1] %vm1538_vm1, %v1571_v0   ;;  %v1585_v2 = vld [vmem:[#allocation1 + $0x38] sm:$0x3]  }
  0x91   :  { %1576 = vst.msk [vmem:[#allocation0 + $0x33] sm:$0x2] %vm1538_vm1, %v1571_v0   ;;  %v1648_v3 = vld [vmem:[#allocation1 + $0x80] sm:$0x3]   ;;  %1581 = vst.msk [vmem:[#allocation0 + $0x18] sm:$0x1] %vm1538_vm1, %v1578_v1  }
  0x92   :  { %1583 = vst.msk [vmem:[#allocation0 + $0x37] sm:$0x2] %vm1538_vm1, %v1578_v1   ;;  %1588 = vst.msk [vmem:[#allocation0 + $0x1c] sm:$0x1] %vm1538_vm1, %v1585_v2   ;;  %v1655_v5 = vld [vmem:[#allocation1 + $0x88] sm:$0x3]   ;;  %4509 = vrot.lane.b32.xlu1 %v4508_v4, %s4515_s18 }
  0x93   :  { %1590 = vst.msk [vmem:[#allocation0 + $0x3b] sm:$0x2] %vm1538_vm1, %v1585_v2   ;;  %1651 = vst.msk [vmem:[#allocation0 + $0x80] sm:$0x1] %vm1538_vm1, %v1648_v3   ;;  %v1662_v6 = vld [vmem:[#allocation1 + $0x90] sm:$0x3]  }
  0x94   :  { %1653 = vst.msk [vmem:[#allocation0 + $0x9f] sm:$0x2] %vm1538_vm1, %v1648_v3   ;;  %v1669_v7 = vld [vmem:[#allocation1 + $0x98] sm:$0x3]   ;;  %1658 = vst.msk [vmem:[#allocation0 + $0x84] sm:$0x1] %vm1538_vm1, %v1655_v5  }
  0x95   :  { %1660 = vst.msk [vmem:[#allocation0 + $0xa3] sm:$0x2] %vm1538_vm1, %v1655_v5   ;;  %1665 = vst.msk [vmem:[#allocation0 + $0x88] sm:$0x1] %vm1538_vm1, %v1662_v6   ;;  %v1676_v8 = vld [vmem:[#allocation1 + $0xa0] sm:$0x3]  }
  0x96   :  { %1667 = vst.msk [vmem:[#allocation0 + $0xa7] sm:$0x2] %vm1538_vm1, %v1662_v6   ;;  %1672 = vst.msk [vmem:[#allocation0 + $0x8c] sm:$0x1] %vm1538_vm1, %v1669_v7   ;;  %v1683_v9 = vld [vmem:[#allocation1 + $0xa8] sm:$0x3]  }
  0x97   :  { %1674 = vst.msk [vmem:[#allocation0 + $0xab] sm:$0x2] %vm1538_vm1, %v1669_v7   ;;  %v1690_v10 = vld [vmem:[#allocation1 + $0xb0] sm:$0x3]   ;;  %1679 = vst.msk [vmem:[#allocation0 + $0x90] sm:$0x1] %vm1538_vm1, %v1676_v8   ;;  %v4335_v7 = vpop.permute.xlu0 %4334 }
  0x98   :  { %1681 = vst.msk [vmem:[#allocation0 + $0xaf] sm:$0x2] %vm1538_vm1, %v1676_v8   ;;  %1686 = vst.msk [vmem:[#allocation0 + $0x94] sm:$0x1] %vm1538_vm1, %v1683_v9   ;;  %v1697_v11 = vld [vmem:[#allocation1 + $0xb8] sm:$0x3]  }
  0x99   :  { %1688 = vst.msk [vmem:[#allocation0 + $0xb3] sm:$0x2] %vm1538_vm1, %v1683_v9   ;;  %1693 = vst.msk [vmem:[#allocation0 + $0x98] sm:$0x1] %vm1538_vm1, %v1690_v10   ;;  %v1592_v12 = vld [vmem:[#allocation1 + $0x40] sm:$0x3]  }
  0x9a   :  { %1695 = vst.msk [vmem:[#allocation0 + $0xb7] sm:$0x2] %vm1538_vm1, %v1690_v10   ;;  %v1599_v13 = vld [vmem:[#allocation1 + $0x48] sm:$0x3]   ;;  %1700 = vst.msk [vmem:[#allocation0 + $0x9c] sm:$0x1] %vm1538_vm1, %v1697_v11  }
  0x9b   :  { %1702 = vst.msk [vmem:[#allocation0 + $0xbb] sm:$0x2] %vm1538_vm1, %v1697_v11   ;;  %1595 = vst.msk [vmem:[#allocation0 + $0x40] sm:$0x1] %vm1538_vm1, %v1592_v12   ;;  %v1606_v14 = vld [vmem:[#allocation1 + $0x50] sm:$0x3]   ;;  %v4337_v11 = vunpack.i.h.bf16 %v4335_v7 }
  0x9c   :  { %1597 = vst.msk [vmem:[#allocation0 + $0x5f] sm:$0x2] %vm1538_vm1, %v1592_v12   ;;  %1602 = vst.msk [vmem:[#allocation0 + $0x44] sm:$0x1] %vm1538_vm1, %v1599_v13   ;;  %v1613_v15 = vld [vmem:[#allocation1 + $0x58] sm:$0x3]   ;;  %v4336_v12 = vunpack.i.l.bf16 %v4335_v7 }
  0x9d   :  { %1604 = vst.msk [vmem:[#allocation0 + $0x63] sm:$0x2] %vm1538_vm1, %v1599_v13   ;;  %v1620_v16 = vld [vmem:[#allocation1 + $0x60] sm:$0x3]   ;;  %1609 = vst.msk [vmem:[#allocation0 + $0x48] sm:$0x1] %vm1538_vm1, %v1606_v14  }
  0x9e   :  { %1611 = vst.msk [vmem:[#allocation0 + $0x67] sm:$0x2] %vm1538_vm1, %v1606_v14   ;;  %1616 = vst.msk [vmem:[#allocation0 + $0x4c] sm:$0x1] %vm1538_vm1, %v1613_v15   ;;  %v1627_v17 = vld [vmem:[#allocation1 + $0x68] sm:$0x3]  }
  0x9f   :  { %1618 = vst.msk [vmem:[#allocation0 + $0x6b] sm:$0x2] %vm1538_vm1, %v1613_v15   ;;  %1623 = vst.msk [vmem:[#allocation0 + $0x50] sm:$0x1] %vm1538_vm1, %v1620_v16   ;;  %v1634_v18 = vld [vmem:[#allocation1 + $0x70] sm:$0x3]  }
  0xa0   :  { %1625 = vst.msk [vmem:[#allocation0 + $0x6f] sm:$0x2] %vm1538_vm1, %v1620_v16   ;;  %v1641_v19 = vld [vmem:[#allocation1 + $0x78] sm:$0x3]   ;;  %1630 = vst.msk [vmem:[#allocation0 + $0x54] sm:$0x1] %vm1538_vm1, %v1627_v17  }
  0xa1   :  { %1632 = vst.msk [vmem:[#allocation0 + $0x73] sm:$0x2] %vm1538_vm1, %v1627_v17   ;;  %1637 = vst.msk [vmem:[#allocation0 + $0x58] sm:$0x1] %vm1538_vm1, %v1634_v18   ;;  %v1928_v20 = vld [vmem:[#allocation1 + $0x1c0] sm:$0x3]  }
  0xa2   :  { %1639 = vst.msk [vmem:[#allocation0 + $0x77] sm:$0x2] %vm1538_vm1, %v1634_v18   ;;  %1644 = vst.msk [vmem:[#allocation0 + $0x5c] sm:$0x1] %vm1538_vm1, %v1641_v19   ;;  %v1935_v21 = vld [vmem:[#allocation1 + $0x1c8] sm:$0x3]  }
  0xa3   :  { %1646 = vst.msk [vmem:[#allocation0 + $0x7b] sm:$0x2] %vm1538_vm1, %v1641_v19   ;;  %v1942_v22 = vld [vmem:[#allocation1 + $0x1d0] sm:$0x3]   ;;  %1933 = vst.msk [vmem:[#allocation0 + $0x1df] sm:$0x2] %vm1538_vm1, %v1928_v20   ;;  %v4345_v19 = vpop.permute.xlu1 %4344 }
  0xa4   :  { %1940 = vst.msk [vmem:[#allocation0 + $0x1e3] sm:$0x2] %vm1538_vm1, %v1935_v21   ;;  %1947 = vst.msk [vmem:[#allocation0 + $0x1e7] sm:$0x2] %vm1538_vm1, %v1942_v22   ;;  %v1949_v23 = vld [vmem:[#allocation1 + $0x1d8] sm:$0x3]  }
  0xa5   :  { %v1956_v24 = vld [vmem:[#allocation1 + $0x1e0] sm:$0x3]   ;;  %v1963_v25 = vld [vmem:[#allocation1 + $0x1e8] sm:$0x3]   ;;  %1931 = vst.msk [vmem:[#allocation0 + $0x1c0] sm:$0x1] %vm1538_vm1, %v1928_v20  }
  0xa6   :  { %1938 = vst.msk [vmem:[#allocation0 + $0x1c4] sm:$0x1] %vm1538_vm1, %v1935_v21   ;;  %1945 = vst.msk [vmem:[#allocation0 + $0x1c8] sm:$0x1] %vm1538_vm1, %v1942_v22   ;;  %v1970_v26 = vld [vmem:[#allocation1 + $0x1f0] sm:$0x3]  }
  0xa7   :  { %1954 = vst.msk [vmem:[#allocation0 + $0x1eb] sm:$0x2] %vm1538_vm1, %v1949_v23   ;;  %1961 = vst.msk [vmem:[#allocation0 + $0x1ef] sm:$0x2] %vm1538_vm1, %v1956_v24   ;;  %v1977_v27 = vld [vmem:[#allocation1 + $0x1f8] sm:$0x3]  }
  0xa8   :  { %1968 = vst.msk [vmem:[#allocation0 + $0x1f3] sm:$0x2] %vm1538_vm1, %v1963_v25   ;;  %1952 = vst.msk [vmem:[#allocation0 + $0x1cc] sm:$0x1] %vm1538_vm1, %v1949_v23   ;;  %v2040_v28 = vld [vmem:[#allocation1 + $0x240] sm:$0x3]   ;;  %v4347_v23 = vunpack.i.h.bf16 %v4345_v19 }
  0xa9   :  { %1959 = vst.msk [vmem:[#allocation0 + $0x1d0] sm:$0x1] %vm1538_vm1, %v1956_v24   ;;  %1966 = vst.msk [vmem:[#allocation0 + $0x1d4] sm:$0x1] %vm1538_vm1, %v1963_v25   ;;  %v2047_v29 = vld [vmem:[#allocation1 + $0x248] sm:$0x3]   ;;  %v4346_v24 = vunpack.i.l.bf16 %v4345_v19 }
  0xaa   :  { %1975 = vst.msk [vmem:[#allocation0 + $0x1f7] sm:$0x2] %vm1538_vm1, %v1970_v26   ;;  %1982 = vst.msk [vmem:[#allocation0 + $0x1fb] sm:$0x2] %vm1538_vm1, %v1977_v27   ;;  %v2054_v30 = vld [vmem:[#allocation1 + $0x250] sm:$0x3]  }
  0xab   :  { %1973 = vst.msk [vmem:[#allocation0 + $0x1d8] sm:$0x1] %vm1538_vm1, %v1970_v26   ;;  %1980 = vst.msk [vmem:[#allocation0 + $0x1dc] sm:$0x1] %vm1538_vm1, %v1977_v27   ;;  %v2061_v31 = vld [vmem:[#allocation1 + $0x258] sm:$0x3]  }
  0xac   :  { %2043 = vst.msk [vmem:[#allocation0 + $0x240] sm:$0x1] %vm1538_vm1, %v2040_v28   ;;  %2045 = vst.msk [vmem:[#allocation0 + $0x25f] sm:$0x2] %vm1538_vm1, %v2040_v28   ;;  %v2068_v32 = vld [vmem:[#allocation1 + $0x260] sm:$0x3]  }
  0xad   :  { %2050 = vst.msk [vmem:[#allocation0 + $0x244] sm:$0x1] %vm1538_vm1, %v2047_v29   ;;  %2057 = vst.msk [vmem:[#allocation0 + $0x248] sm:$0x1] %vm1538_vm1, %v2054_v30   ;;  %v2075_v33 = vld [vmem:[#allocation1 + $0x268] sm:$0x3]  }
  0xae   :  { %2064 = vst.msk [vmem:[#allocation0 + $0x24c] sm:$0x1] %vm1538_vm1, %v2061_v31   ;;  %v2082_v34 = vld [vmem:[#allocation1 + $0x270] sm:$0x3]   ;;  %2052 = vst.msk [vmem:[#allocation0 + $0x263] sm:$0x2] %vm1538_vm1, %v2047_v29  }
  0xaf   :  { %2059 = vst.msk [vmem:[#allocation0 + $0x267] sm:$0x2] %vm1538_vm1, %v2054_v30   ;;  %2066 = vst.msk [vmem:[#allocation0 + $0x26b] sm:$0x2] %vm1538_vm1, %v2061_v31   ;;  %v2089_v35 = vld [vmem:[#allocation1 + $0x278] sm:$0x3]   ;;  %v4340_v31 = vpop.permute.xlu0 %4339 }
  0xb0   :  { %2071 = vst.msk [vmem:[#allocation0 + $0x250] sm:$0x1] %vm1538_vm1, %v2068_v32   ;;  %2078 = vst.msk [vmem:[#allocation0 + $0x254] sm:$0x1] %vm1538_vm1, %v2075_v33   ;;  %v1984_v36 = vld [vmem:[#allocation1 + $0x200] sm:$0x3]  }
  0xb1   :  { %2085 = vst.msk [vmem:[#allocation0 + $0x258] sm:$0x1] %vm1538_vm1, %v2082_v34   ;;  %2073 = vst.msk [vmem:[#allocation0 + $0x26f] sm:$0x2] %vm1538_vm1, %v2068_v32   ;;  %v1991_v37 = vld [vmem:[#allocation1 + $0x208] sm:$0x3]  }
  0xb2   :  { %2080 = vst.msk [vmem:[#allocation0 + $0x273] sm:$0x2] %vm1538_vm1, %v2075_v33   ;;  %2087 = vst.msk [vmem:[#allocation0 + $0x277] sm:$0x2] %vm1538_vm1, %v2082_v34   ;;  %v1998_v38 = vld [vmem:[#allocation1 + $0x210] sm:$0x3]  }
  0xb3   :  { %2092 = vst.msk [vmem:[#allocation0 + $0x25c] sm:$0x1] %vm1538_vm1, %v2089_v35   ;;  %2094 = vst.msk [vmem:[#allocation0 + $0x27b] sm:$0x2] %vm1538_vm1, %v2089_v35   ;;  %v2005_v39 = vld [vmem:[#allocation1 + $0x218] sm:$0x3]   ;;  %v4342_v35 = vunpack.i.h.bf16 %v4340_v31 }
  0xb4   :  { %1989 = vst.msk [vmem:[#allocation0 + $0x21f] sm:$0x2] %vm1538_vm1, %v1984_v36   ;;  %1996 = vst.msk [vmem:[#allocation0 + $0x223] sm:$0x2] %vm1538_vm1, %v1991_v37   ;;  %v2012_v40 = vld [vmem:[#allocation1 + $0x220] sm:$0x3]  }
  0xb5   :  { %1987 = vst.msk [vmem:[#allocation0 + $0x200] sm:$0x1] %vm1538_vm1, %v1984_v36   ;;  %1994 = vst.msk [vmem:[#allocation0 + $0x204] sm:$0x1] %vm1538_vm1, %v1991_v37   ;;  %v2019_v41 = vld [vmem:[#allocation1 + $0x228] sm:$0x3]   ;;  %v4341_v36 = vunpack.i.l.bf16 %v4340_v31  ;;  %v4350_v37 = vpop.permute.xlu1 %4349 }
  0xb6   :  { %2003 = vst.msk [vmem:[#allocation0 + $0x227] sm:$0x2] %vm1538_vm1, %v1998_v38   ;;  %2010 = vst.msk [vmem:[#allocation0 + $0x22b] sm:$0x2] %vm1538_vm1, %v2005_v39   ;;  %v2026_v42 = vld [vmem:[#allocation1 + $0x230] sm:$0x3]  }
  0xb7   :  { %2017 = vst.msk [vmem:[#allocation0 + $0x22f] sm:$0x2] %vm1538_vm1, %v2012_v40   ;;  %v2033_v43 = vld [vmem:[#allocation1 + $0x238] sm:$0x3]   ;;  %2001 = vst.msk [vmem:[#allocation0 + $0x208] sm:$0x1] %vm1538_vm1, %v1998_v38   ;;  %v4352_v38 = vunpack.i.h.bf16 %v4350_v37 }
  0xb8   :  { %2008 = vst.msk [vmem:[#allocation0 + $0x20c] sm:$0x1] %vm1538_vm1, %v2005_v39   ;;  %2015 = vst.msk [vmem:[#allocation0 + $0x210] sm:$0x1] %vm1538_vm1, %v2012_v40   ;;  %v1704_v44 = vld [vmem:[#allocation1 + $0xc0] sm:$0x3]   ;;  %v4351_v39 = vunpack.i.l.bf16 %v4350_v37  ;;  %v4355_v40 = vpop.permute.xlu0 %4354 }
  0xb9   :  { %2024 = vst.msk [vmem:[#allocation0 + $0x233] sm:$0x2] %vm1538_vm1, %v2019_v41   ;;  %2031 = vst.msk [vmem:[#allocation0 + $0x237] sm:$0x2] %vm1538_vm1, %v2026_v42   ;;  %v1711_v45 = vld [vmem:[#allocation1 + $0xc8] sm:$0x3]  }
  0xba   :  { %2038 = vst.msk [vmem:[#allocation0 + $0x23b] sm:$0x2] %vm1538_vm1, %v2033_v43   ;;  %2022 = vst.msk [vmem:[#allocation0 + $0x214] sm:$0x1] %vm1538_vm1, %v2019_v41   ;;  %v1718_v46 = vld [vmem:[#allocation1 + $0xd0] sm:$0x3]   ;;  %v4357_v41 = vunpack.i.h.bf16 %v4355_v40 }
  0xbb   :  { %2029 = vst.msk [vmem:[#allocation0 + $0x218] sm:$0x1] %vm1538_vm1, %v2026_v42   ;;  %2036 = vst.msk [vmem:[#allocation0 + $0x21c] sm:$0x1] %vm1538_vm1, %v2033_v43   ;;  %v1725_v47 = vld [vmem:[#allocation1 + $0xd8] sm:$0x3]   ;;  %v4356_v42 = vunpack.i.l.bf16 %v4355_v40  ;;  %v4360_v43 = vpop.permute.xlu1 %4359 }
  0xbc   :  { %1707 = vst.msk [vmem:[#allocation0 + $0xc0] sm:$0x1] %vm1538_vm1, %v1704_v44   ;;  %1709 = vst.msk [vmem:[#allocation0 + $0xdf] sm:$0x2] %vm1538_vm1, %v1704_v44   ;;  %v1732_v48 = vld [vmem:[#allocation1 + $0xe0] sm:$0x3]   ;;  %v4362_v44 = vunpack.i.h.bf16 %v4360_v43 }
  0xbd   :  { %1714 = vst.msk [vmem:[#allocation0 + $0xc4] sm:$0x1] %vm1538_vm1, %v1711_v45   ;;  %1716 = vst.msk [vmem:[#allocation0 + $0xe3] sm:$0x2] %vm1538_vm1, %v1711_v45   ;;  %v1739_v49 = vld [vmem:[#allocation1 + $0xe8] sm:$0x3]   ;;  %v4361_v45 = vunpack.i.l.bf16 %v4360_v43 }
  0xbe   :  { %1721 = vst.msk [vmem:[#allocation0 + $0xc8] sm:$0x1] %vm1538_vm1, %v1718_v46   ;;  %1723 = vst.msk [vmem:[#allocation0 + $0xe7] sm:$0x2] %vm1538_vm1, %v1718_v46   ;;  %v1746_v50 = vld [vmem:[#allocation1 + $0xf0] sm:$0x3]   ;;  %v4365_v46 = vpop.permute.xlu0 %4364 }
  0xbf   :  { %1728 = vst.msk [vmem:[#allocation0 + $0xcc] sm:$0x1] %vm1538_vm1, %v1725_v47   ;;  %1730 = vst.msk [vmem:[#allocation0 + $0xeb] sm:$0x2] %vm1538_vm1, %v1725_v47   ;;  %v1753_v51 = vld [vmem:[#allocation1 + $0xf8] sm:$0x3]   ;;  %v4367_v47 = vunpack.i.h.bf16 %v4365_v46 }
  0xc0   :  { %1735 = vst.msk [vmem:[#allocation0 + $0xd0] sm:$0x1] %vm1538_vm1, %v1732_v48   ;;  %1737 = vst.msk [vmem:[#allocation0 + $0xef] sm:$0x2] %vm1538_vm1, %v1732_v48   ;;  %v1760_v52 = vld [vmem:[#allocation1 + $0x100] sm:$0x3]   ;;  %v4366_v48 = vunpack.i.l.bf16 %v4365_v46 }
  0xc1   :  { %1742 = vst.msk [vmem:[#allocation0 + $0xd4] sm:$0x1] %vm1538_vm1, %v1739_v49   ;;  %1744 = vst.msk [vmem:[#allocation0 + $0xf3] sm:$0x2] %vm1538_vm1, %v1739_v49   ;;  %v1767_v53 = vld [vmem:[#allocation1 + $0x108] sm:$0x3]   ;;  %v4370_v49 = vpop.permute.xlu1 %4369 }
  0xc2   :  { %1749 = vst.msk [vmem:[#allocation0 + $0xd8] sm:$0x1] %vm1538_vm1, %v1746_v50   ;;  %1751 = vst.msk [vmem:[#allocation0 + $0xf7] sm:$0x2] %vm1538_vm1, %v1746_v50   ;;  %v1774_v54 = vld [vmem:[#allocation1 + $0x110] sm:$0x3]   ;;  %v4372_v50 = vunpack.i.h.bf16 %v4370_v49 }
  0xc3   :  { %1756 = vst.msk [vmem:[#allocation0 + $0xdc] sm:$0x1] %vm1538_vm1, %v1753_v51   ;;  %1758 = vst.msk [vmem:[#allocation0 + $0xfb] sm:$0x2] %vm1538_vm1, %v1753_v51   ;;  %v1781_v55 = vld [vmem:[#allocation1 + $0x118] sm:$0x3]   ;;  %v4371_v51 = vunpack.i.l.bf16 %v4370_v49 }
  0xc4   :  { %1763 = vst.msk [vmem:[#allocation0 + $0x100] sm:$0x1] %vm1538_vm1, %v1760_v52   ;;  %1765 = vst.msk [vmem:[#allocation0 + $0x11f] sm:$0x2] %vm1538_vm1, %v1760_v52   ;;  %v1788_v56 = vld [vmem:[#allocation1 + $0x120] sm:$0x3]   ;;  %v4375_v52 = vpop.permute.xlu0 %4374 }
  0xc5   :  { %1770 = vst.msk [vmem:[#allocation0 + $0x104] sm:$0x1] %vm1538_vm1, %v1767_v53   ;;  %1772 = vst.msk [vmem:[#allocation0 + $0x123] sm:$0x2] %vm1538_vm1, %v1767_v53   ;;  %v1795_v57 = vld [vmem:[#allocation1 + $0x128] sm:$0x3]   ;;  %v4377_v53 = vunpack.i.h.bf16 %v4375_v52 }
  0xc6   :  { %1777 = vst.msk [vmem:[#allocation0 + $0x108] sm:$0x1] %vm1538_vm1, %v1774_v54   ;;  %1779 = vst.msk [vmem:[#allocation0 + $0x127] sm:$0x2] %vm1538_vm1, %v1774_v54   ;;  %v1802_v58 = vld [vmem:[#allocation1 + $0x130] sm:$0x3]   ;;  %v4376_v54 = vunpack.i.l.bf16 %v4375_v52 }
  0xc7   :  { %1784 = vst.msk [vmem:[#allocation0 + $0x10c] sm:$0x1] %vm1538_vm1, %v1781_v55   ;;  %1786 = vst.msk [vmem:[#allocation0 + $0x12b] sm:$0x2] %vm1538_vm1, %v1781_v55   ;;  %v1809_v59 = vld [vmem:[#allocation1 + $0x138] sm:$0x3]  }
  0xc8   :  { %1791 = vst.msk [vmem:[#allocation0 + $0x110] sm:$0x1] %vm1538_vm1, %v1788_v56   ;;  %1793 = vst.msk [vmem:[#allocation0 + $0x12f] sm:$0x2] %vm1538_vm1, %v1788_v56   ;;  %v1816_v60 = vld [vmem:[#allocation1 + $0x140] sm:$0x3]  }
  0xc9   :  { %1798 = vst.msk [vmem:[#allocation0 + $0x114] sm:$0x1] %vm1538_vm1, %v1795_v57   ;;  %1800 = vst.msk [vmem:[#allocation0 + $0x133] sm:$0x2] %vm1538_vm1, %v1795_v57   ;;  %v1823_v61 = vld [vmem:[#allocation1 + $0x148] sm:$0x3]   ;;  %v4380_v55 = vpop.permute.xlu1 %4379 }
  0xca   :  { %1805 = vst.msk [vmem:[#allocation0 + $0x118] sm:$0x1] %vm1538_vm1, %v1802_v58   ;;  %1807 = vst.msk [vmem:[#allocation0 + $0x137] sm:$0x2] %vm1538_vm1, %v1802_v58   ;;  %v1830_v62 = vld [vmem:[#allocation1 + $0x150] sm:$0x3]   ;;  %v4382_v56 = vunpack.i.h.bf16 %v4380_v55  ;;  %v4381_v57 = vunpack.i.l.bf16 %v4380_v55 }
  0xcb   :  { %1812 = vst.msk [vmem:[#allocation0 + $0x11c] sm:$0x1] %vm1538_vm1, %v1809_v59   ;;  %1814 = vst.msk [vmem:[#allocation0 + $0x13b] sm:$0x2] %vm1538_vm1, %v1809_v59   ;;  %v1837_v63 = vld [vmem:[#allocation1 + $0x158] sm:$0x3]  }
  0xcc   :  { %1819 = vst.msk [vmem:[#allocation0 + $0x140] sm:$0x1] %vm1538_vm1, %v1816_v60   ;;  %1821 = vst.msk [vmem:[#allocation0 + $0x15f] sm:$0x2] %vm1538_vm1, %v1816_v60   ;;  %v1844_v0 = vld [vmem:[#allocation1 + $0x160] sm:$0x3]  }
  0xcd   :  { %1826 = vst.msk [vmem:[#allocation0 + $0x144] sm:$0x1] %vm1538_vm1, %v1823_v61   ;;  %1828 = vst.msk [vmem:[#allocation0 + $0x163] sm:$0x2] %vm1538_vm1, %v1823_v61   ;;  %v1851_v1 = vld [vmem:[#allocation1 + $0x168] sm:$0x3]  }
  0xce   :  { %1833 = vst.msk [vmem:[#allocation0 + $0x148] sm:$0x1] %vm1538_vm1, %v1830_v62   ;;  %1835 = vst.msk [vmem:[#allocation0 + $0x167] sm:$0x2] %vm1538_vm1, %v1830_v62   ;;  %v1858_v2 = vld [vmem:[#allocation1 + $0x170] sm:$0x3]  }
  0xcf   :  { %1840 = vst.msk [vmem:[#allocation0 + $0x14c] sm:$0x1] %vm1538_vm1, %v1837_v63   ;;  %1842 = vst.msk [vmem:[#allocation0 + $0x16b] sm:$0x2] %vm1538_vm1, %v1837_v63   ;;  %v1865_v3 = vld [vmem:[#allocation1 + $0x178] sm:$0x3]  }
  0xd0   :  { %1847 = vst.msk [vmem:[#allocation0 + $0x150] sm:$0x1] %vm1538_vm1, %v1844_v0   ;;  %1849 = vst.msk [vmem:[#allocation0 + $0x16f] sm:$0x2] %vm1538_vm1, %v1844_v0   ;;  %v1872_v4 = vld [vmem:[#allocation1 + $0x180] sm:$0x3]   ;;  %v4385_v58 = vpop.permute.xlu0 %4384 }
  0xd1   :  { %1854 = vst.msk [vmem:[#allocation0 + $0x154] sm:$0x1] %vm1538_vm1, %v1851_v1   ;;  %1856 = vst.msk [vmem:[#allocation0 + $0x173] sm:$0x2] %vm1538_vm1, %v1851_v1   ;;  %v1879_v5 = vld [vmem:[#allocation1 + $0x188] sm:$0x3]   ;;  %v4387_v59 = vunpack.i.h.bf16 %v4385_v58  ;;  %v4386_v60 = vunpack.i.l.bf16 %v4385_v58 }
  0xd2   :  { %1861 = vst.msk [vmem:[#allocation0 + $0x158] sm:$0x1] %vm1538_vm1, %v1858_v2   ;;  %1863 = vst.msk [vmem:[#allocation0 + $0x177] sm:$0x2] %vm1538_vm1, %v1858_v2   ;;  %v1886_v6 = vld [vmem:[#allocation1 + $0x190] sm:$0x3]  }
  0xd3   :  { %1868 = vst.msk [vmem:[#allocation0 + $0x15c] sm:$0x1] %vm1538_vm1, %v1865_v3   ;;  %1870 = vst.msk [vmem:[#allocation0 + $0x17b] sm:$0x2] %vm1538_vm1, %v1865_v3   ;;  %v1893_v8 = vld [vmem:[#allocation1 + $0x198] sm:$0x3]  }
  0xd4   :  { %1875 = vst.msk [vmem:[#allocation0 + $0x180] sm:$0x1] %vm1538_vm1, %v1872_v4   ;;  %1877 = vst.msk [vmem:[#allocation0 + $0x19f] sm:$0x2] %vm1538_vm1, %v1872_v4   ;;  %v1900_v9 = vld [vmem:[#allocation1 + $0x1a0] sm:$0x3]   ;;  %v4390_v61 = vpop.permute.xlu1 %4389  ;;  %v4395_v62 = vpop.permute.xlu0 %4394 }
  0xd5   :  { %1882 = vst.msk [vmem:[#allocation0 + $0x184] sm:$0x1] %vm1538_vm1, %v1879_v5   ;;  %1884 = vst.msk [vmem:[#allocation0 + $0x1a3] sm:$0x2] %vm1538_vm1, %v1879_v5   ;;  %v1907_v10 = vld [vmem:[#allocation1 + $0x1a8] sm:$0x3]   ;;  %v4392_v63 = vunpack.i.h.bf16 %v4390_v61  ;;  %v4391_v0 = vunpack.i.l.bf16 %v4390_v61  ;;  %v4397_v1 = vunpack.i.h.bf16 %v4395_v62  ;;  %v4396_v2 = vunpack.i.l.bf16 %v4395_v62 }
  0xd6   :  { %1889 = vst.msk [vmem:[#allocation0 + $0x188] sm:$0x1] %vm1538_vm1, %v1886_v6   ;;  %1891 = vst.msk [vmem:[#allocation0 + $0x1a7] sm:$0x2] %vm1538_vm1, %v1886_v6   ;;  %v1914_v13 = vld [vmem:[#allocation1 + $0x1b0] sm:$0x3]  }
  0xd7   :  { %1896 = vst.msk [vmem:[#allocation0 + $0x18c] sm:$0x1] %vm1538_vm1, %v1893_v8   ;;  %1898 = vst.msk [vmem:[#allocation0 + $0x1ab] sm:$0x2] %vm1538_vm1, %v1893_v8   ;;  %v1921_v14 = vld [vmem:[#allocation1 + $0x1b8] sm:$0x3]  }
  0xd8   :  { %1903 = vst.msk [vmem:[#allocation0 + $0x190] sm:$0x1] %vm1538_vm1, %v1900_v9   ;;  %1905 = vst.msk [vmem:[#allocation0 + $0x1af] sm:$0x2] %vm1538_vm1, %v1900_v9   ;;  %v2096_v15 = vld [vmem:[#allocation1 + $0x280] sm:$0x3]   ;;  %v4400_v3 = vpop.permute.xlu1 %4399  ;;  %v4405_v4 = vpop.permute.xlu0 %4404 }
  0xd9   :  { %1910 = vst.msk [vmem:[#allocation0 + $0x194] sm:$0x1] %vm1538_vm1, %v1907_v10   ;;  %1912 = vst.msk [vmem:[#allocation0 + $0x1b3] sm:$0x2] %vm1538_vm1, %v1907_v10   ;;  %v2103_v16 = vld [vmem:[#allocation1 + $0x288] sm:$0x3]   ;;  %v4402_v5 = vunpack.i.h.bf16 %v4400_v3  ;;  %v4401_v6 = vunpack.i.l.bf16 %v4400_v3  ;;  %v4407_v7 = vunpack.i.h.bf16 %v4405_v4  ;;  %v4406_v8 = vunpack.i.l.bf16 %v4405_v4 }
  0xda   :  { %1917 = vst.msk [vmem:[#allocation0 + $0x198] sm:$0x1] %vm1538_vm1, %v1914_v13   ;;  %1919 = vst.msk [vmem:[#allocation0 + $0x1b7] sm:$0x2] %vm1538_vm1, %v1914_v13   ;;  %v2110_v17 = vld [vmem:[#allocation1 + $0x290] sm:$0x3]  }
  0xdb   :  { %1924 = vst.msk [vmem:[#allocation0 + $0x19c] sm:$0x1] %vm1538_vm1, %v1921_v14   ;;  %1926 = vst.msk [vmem:[#allocation0 + $0x1bb] sm:$0x2] %vm1538_vm1, %v1921_v14   ;;  %v2117_v18 = vld [vmem:[#allocation1 + $0x298] sm:$0x3]  }
  0xdc   :  { %2099 = vst.msk [vmem:[#allocation0 + $0x280] sm:$0x1] %vm1538_vm1, %v2096_v15   ;;  %2101 = vst.msk [vmem:[#allocation0 + $0x29f] sm:$0x2] %vm1538_vm1, %v2096_v15   ;;  %v2124_v20 = vld [vmem:[#allocation1 + $0x2a0] sm:$0x3]   ;;  %v4410_v9 = vpop.permute.xlu1 %4409  ;;  %v4415_v10 = vpop.permute.xlu0 %4414 }
  0xdd   :  { %2226 = vst.msk [vmem:[#allocation0 + $0x21] ss:$4 sm:$0xff] %vm1538_vm1, %v4337_v11   ;;  %2215 = vst.msk [vmem:[#allocation0 + $0x1] ss:$4 sm:$0xff] %vm1538_vm1, %v4336_v12   ;;  %v2131_v21 = vld [vmem:[#allocation1 + $0x2a8] sm:$0x3]   ;;  %v4412_v11 = vunpack.i.h.bf16 %v4410_v9  ;;  %v4411_v12 = vunpack.i.l.bf16 %v4410_v9  ;;  %v4417_v13 = vunpack.i.h.bf16 %v4415_v10  ;;  %v4416_v14 = vunpack.i.l.bf16 %v4415_v10 }
  0xde   :  { %2106 = vst.msk [vmem:[#allocation0 + $0x284] sm:$0x1] %vm1538_vm1, %v2103_v16   ;;  %2108 = vst.msk [vmem:[#allocation0 + $0x2a3] sm:$0x2] %vm1538_vm1, %v2103_v16   ;;  %v2138_v22 = vld [vmem:[#allocation1 + $0x2b0] sm:$0x3]  }
  0xdf   :  { %2113 = vst.msk [vmem:[#allocation0 + $0x288] sm:$0x1] %vm1538_vm1, %v2110_v17   ;;  %2115 = vst.msk [vmem:[#allocation0 + $0x2a7] sm:$0x2] %vm1538_vm1, %v2110_v17   ;;  %v2145_v25 = vld [vmem:[#allocation1 + $0x2b8] sm:$0x3]  }
  0xe0   :  { %2120 = vst.msk [vmem:[#allocation0 + $0x28c] sm:$0x1] %vm1538_vm1, %v2117_v18   ;;  %2122 = vst.msk [vmem:[#allocation0 + $0x2ab] sm:$0x2] %vm1538_vm1, %v2117_v18   ;;  %v2152_v26 = vld [vmem:[#allocation1 + $0x2c0] sm:$0x3]   ;;  %v4420_v15 = vpop.permute.xlu1 %4419  ;;  %v4425_v16 = vpop.permute.xlu0 %4424 }
  0xe1   :  { %2127 = vst.msk [vmem:[#allocation0 + $0x290] sm:$0x1] %vm1538_vm1, %v2124_v20   ;;  %2129 = vst.msk [vmem:[#allocation0 + $0x2af] sm:$0x2] %vm1538_vm1, %v2124_v20   ;;  %v2159_v27 = vld [vmem:[#allocation1 + $0x2c8] sm:$0x3]   ;;  %v4422_v17 = vunpack.i.h.bf16 %v4420_v15  ;;  %v4421_v18 = vunpack.i.l.bf16 %v4420_v15  ;;  %v4427_v19 = vunpack.i.h.bf16 %v4425_v16  ;;  %v4426_v20 = vunpack.i.l.bf16 %v4425_v16 }
  0xe2   :  { %2134 = vst.msk [vmem:[#allocation0 + $0x294] sm:$0x1] %vm1538_vm1, %v2131_v21   ;;  %2136 = vst.msk [vmem:[#allocation0 + $0x2b3] sm:$0x2] %vm1538_vm1, %v2131_v21   ;;  %v2166_v28 = vld [vmem:[#allocation1 + $0x2d0] sm:$0x3]  }
  0xe3   :  { %2141 = vst.msk [vmem:[#allocation0 + $0x298] sm:$0x1] %vm1538_vm1, %v2138_v22   ;;  %2143 = vst.msk [vmem:[#allocation0 + $0x2b7] sm:$0x2] %vm1538_vm1, %v2138_v22   ;;  %v2173_v29 = vld [vmem:[#allocation1 + $0x2d8] sm:$0x3]  }
  0xe4   :  { %2148 = vst.msk [vmem:[#allocation0 + $0x29c] sm:$0x1] %vm1538_vm1, %v2145_v25   ;;  %2150 = vst.msk [vmem:[#allocation0 + $0x2bb] sm:$0x2] %vm1538_vm1, %v2145_v25   ;;  %v2180_v30 = vld [vmem:[#allocation1 + $0x2e0] sm:$0x3]   ;;  %v4430_v21 = vpop.permute.xlu1 %4429  ;;  %v4435_v22 = vpop.permute.xlu0 %4434 }
  0xe5   :  { %2155 = vst.msk [vmem:[#allocation0 + $0x2c0] sm:$0x1] %vm1538_vm1, %v2152_v26   ;;  %2157 = vst.msk [vmem:[#allocation0 + $0x2df] sm:$0x2] %vm1538_vm1, %v2152_v26   ;;  %v2187_v32 = vld [vmem:[#allocation1 + $0x2e8] sm:$0x3]   ;;  %v4437_v25 = vunpack.i.h.bf16 %v4435_v22  ;;  %v4436_v26 = vunpack.i.l.bf16 %v4435_v22 }
  0xe6   :  { %2162 = vst.msk [vmem:[#allocation0 + $0x2c4] sm:$0x1] %vm1538_vm1, %v2159_v27   ;;  %2164 = vst.msk [vmem:[#allocation0 + $0x2e3] sm:$0x2] %vm1538_vm1, %v2159_v27   ;;  %v2194_v33 = vld [vmem:[#allocation1 + $0x2f0] sm:$0x3]  }
  0xe7   :  { %2270 = vst.msk [vmem:[#allocation0 + $0xa1] ss:$4 sm:$0xff] %vm1538_vm1, %v4347_v23   ;;  %2259 = vst.msk [vmem:[#allocation0 + $0x81] ss:$4 sm:$0xff] %vm1538_vm1, %v4346_v24   ;;  %v2201_v34 = vld [vmem:[#allocation1 + $0x2f8] sm:$0x3]   ;;  %v4432_v23 = vunpack.i.h.bf16 %v4430_v21  ;;  %v4431_v24 = vunpack.i.l.bf16 %v4430_v21 }
  0xe8   :  { %2169 = vst.msk [vmem:[#allocation0 + $0x2c8] sm:$0x1] %vm1538_vm1, %v2166_v28   ;;  %2171 = vst.msk [vmem:[#allocation0 + $0x2e7] sm:$0x2] %vm1538_vm1, %v2166_v28   ;;  %v4440_v27 = vpop.permute.xlu1 %4439  ;;  %v4445_v28 = vpop.permute.xlu0 %4444 }
  0xe9   :  { %2176 = vst.msk [vmem:[#allocation0 + $0x2cc] sm:$0x1] %vm1538_vm1, %v2173_v29   ;;  %2178 = vst.msk [vmem:[#allocation0 + $0x2eb] sm:$0x2] %vm1538_vm1, %v2173_v29   ;;  %v4442_v29 = vunpack.i.h.bf16 %v4440_v27  ;;  %v4447_v31 = vunpack.i.h.bf16 %v4445_v28 }
  0xea   :  { %2183 = vst.msk [vmem:[#allocation0 + $0x2d0] sm:$0x1] %vm1538_vm1, %v2180_v30   ;;  %2185 = vst.msk [vmem:[#allocation0 + $0x2ef] sm:$0x2] %vm1538_vm1, %v2180_v30   ;;  %v4441_v30 = vunpack.i.l.bf16 %v4440_v27 }
  0xeb   :  { %2190 = vst.msk [vmem:[#allocation0 + $0x2d4] sm:$0x1] %vm1538_vm1, %v2187_v32   ;;  %2192 = vst.msk [vmem:[#allocation0 + $0x2f3] sm:$0x2] %vm1538_vm1, %v2187_v32   ;;  %v4446_v32 = vunpack.i.l.bf16 %v4445_v28 }
  0xec   :  { %2197 = vst.msk [vmem:[#allocation0 + $0x2d8] sm:$0x1] %vm1538_vm1, %v2194_v33   ;;  %2199 = vst.msk [vmem:[#allocation0 + $0x2f7] sm:$0x2] %vm1538_vm1, %v2194_v33   ;;  %v4450_v33 = vpop.permute.xlu1 %4449 }
  0xed   :  { %2204 = vst.msk [vmem:[#allocation0 + $0x2dc] sm:$0x1] %vm1538_vm1, %v2201_v34   ;;  %2206 = vst.msk [vmem:[#allocation0 + $0x2fb] sm:$0x2] %vm1538_vm1, %v2201_v34   ;;  %v4455_v34 = vpop.permute.xlu0 %4454 }
  0xee   :  { %2248 = vst.msk [vmem:[#allocation0 + $0x61] ss:$4 sm:$0xff] %vm1538_vm1, %v4342_v35   ;;  %2237 = vst.msk [vmem:[#allocation0 + $0x41] ss:$4 sm:$0xff] %vm1538_vm1, %v4341_v36   ;;  %v4452_v35 = vunpack.i.h.bf16 %v4450_v33  ;;  %v4451_v36 = vunpack.i.l.bf16 %v4450_v33  ;;  %v4457_v37 = vunpack.i.h.bf16 %v4455_v34 }
  0xef   :  { %2292 = vst.msk [vmem:[#allocation0 + $0xe1] ss:$4 sm:$0xff] %vm1538_vm1, %v4352_v38   ;;  %2281 = vst.msk [vmem:[#allocation0 + $0xc1] ss:$4 sm:$0xff] %vm1538_vm1, %v4351_v39   ;;  %v4456_v38 = vunpack.i.l.bf16 %v4455_v34 }
  0xf0   :  { %2314 = vst.msk [vmem:[#allocation0 + $0x121] ss:$4 sm:$0xff] %vm1538_vm1, %v4357_v41   ;;  %2303 = vst.msk [vmem:[#allocation0 + $0x101] ss:$4 sm:$0xff] %vm1538_vm1, %v4356_v42   ;;  %v4460_v39 = vpop.permute.xlu1 %4459 }
  0xf1   :  { %2336 = vst.msk [vmem:[#allocation0 + $0x161] ss:$4 sm:$0xff] %vm1538_vm1, %v4362_v44   ;;  %2325 = vst.msk [vmem:[#allocation0 + $0x141] ss:$4 sm:$0xff] %vm1538_vm1, %v4361_v45   ;;  %v4465_v40 = vpop.permute.xlu0 %4464  ;;  %v4462_v41 = vunpack.i.h.bf16 %v4460_v39  ;;  %v4461_v42 = vunpack.i.l.bf16 %v4460_v39 }
  0xf2   :  { %2358 = vst.msk [vmem:[#allocation0 + $0x1a1] ss:$4 sm:$0xff] %vm1538_vm1, %v4367_v47   ;;  %2347 = vst.msk [vmem:[#allocation0 + $0x181] ss:$4 sm:$0xff] %vm1538_vm1, %v4366_v48   ;;  %v4467_v43 = vunpack.i.h.bf16 %v4465_v40  ;;  %v4466_v44 = vunpack.i.l.bf16 %v4465_v40 }
  0xf3   :  { %2380 = vst.msk [vmem:[#allocation0 + $0x1e1] ss:$4 sm:$0xff] %vm1538_vm1, %v4372_v50   ;;  %2369 = vst.msk [vmem:[#allocation0 + $0x1c1] ss:$4 sm:$0xff] %vm1538_vm1, %v4371_v51  }
  0xf4   :  { %2402 = vst.msk [vmem:[#allocation0 + $0x221] ss:$4 sm:$0xff] %vm1538_vm1, %v4377_v53   ;;  %2391 = vst.msk [vmem:[#allocation0 + $0x201] ss:$4 sm:$0xff] %vm1538_vm1, %v4376_v54   ;;  %v4470_v45 = vpop.permute.xlu1 %4469 }
  0xf5   :  { %2424 = vst.msk [vmem:[#allocation0 + $0x261] ss:$4 sm:$0xff] %vm1538_vm1, %v4382_v56   ;;  %2413 = vst.msk [vmem:[#allocation0 + $0x241] ss:$4 sm:$0xff] %vm1538_vm1, %v4381_v57   ;;  %v4475_v46 = vpop.permute.xlu0 %4474  ;;  %v4472_v47 = vunpack.i.h.bf16 %v4470_v45  ;;  %v4471_v48 = vunpack.i.l.bf16 %v4470_v45 }
  0xf6   :  { %2446 = vst.msk [vmem:[#allocation0 + $0x2a1] ss:$4 sm:$0xff] %vm1538_vm1, %v4387_v59   ;;  %2435 = vst.msk [vmem:[#allocation0 + $0x281] ss:$4 sm:$0xff] %vm1538_vm1, %v4386_v60   ;;  %v4477_v49 = vunpack.i.h.bf16 %v4475_v46  ;;  %v4476_v50 = vunpack.i.l.bf16 %v4475_v46 }
  0xf7   :  { %2468 = vst.msk [vmem:[#allocation0 + $0x2e1] ss:$4 sm:$0xff] %vm1538_vm1, %v4392_v63   ;;  %2457 = vst.msk [vmem:[#allocation0 + $0x2c1] ss:$4 sm:$0xff] %vm1538_vm1, %v4391_v0  }
  0xf8   :  { %2488 = vst.msk [vmem:[#allocation0 + $0x22] ss:$4 sm:$0xff] %vm1538_vm1, %v4397_v1   ;;  %2477 = vst.msk [vmem:[#allocation0 + $0x2] ss:$4 sm:$0xff] %vm1538_vm1, %v4396_v2   ;;  %v4480_v62 = vpop.permute.xlu1 %4479 }
  0xf9   :  { %2510 = vst.msk [vmem:[#allocation0 + $0x62] ss:$4 sm:$0xff] %vm1538_vm1, %v4402_v5   ;;  %2499 = vst.msk [vmem:[#allocation0 + $0x42] ss:$4 sm:$0xff] %vm1538_vm1, %v4401_v6   ;;  %v4485_v63 = vpop.permute.xlu0 %4484  ;;  %v4482_v1 = vunpack.i.h.bf16 %v4480_v62  ;;  %v4481_v2 = vunpack.i.l.bf16 %v4480_v62 }
  0xfa   :  { %2532 = vst.msk [vmem:[#allocation0 + $0xa2] ss:$4 sm:$0xff] %vm1538_vm1, %v4407_v7   ;;  %2521 = vst.msk [vmem:[#allocation0 + $0x82] ss:$4 sm:$0xff] %vm1538_vm1, %v4406_v8   ;;  %v4487_v3 = vunpack.i.h.bf16 %v4485_v63  ;;  %v4486_v7 = vunpack.i.l.bf16 %v4485_v63 }
  0xfb   :  { %2554 = vst.msk [vmem:[#allocation0 + $0xe2] ss:$4 sm:$0xff] %vm1538_vm1, %v4412_v11   ;;  %2543 = vst.msk [vmem:[#allocation0 + $0xc2] ss:$4 sm:$0xff] %vm1538_vm1, %v4411_v12  }
  0xfc   :  { %2576 = vst.msk [vmem:[#allocation0 + $0x122] ss:$4 sm:$0xff] %vm1538_vm1, %v4417_v13   ;;  %2565 = vst.msk [vmem:[#allocation0 + $0x102] ss:$4 sm:$0xff] %vm1538_vm1, %v4416_v14  }
  0xfd   :  { %2598 = vst.msk [vmem:[#allocation0 + $0x162] ss:$4 sm:$0xff] %vm1538_vm1, %v4422_v17   ;;  %2587 = vst.msk [vmem:[#allocation0 + $0x142] ss:$4 sm:$0xff] %vm1538_vm1, %v4421_v18   ;;  %v4490_v17 = vpop.permute.xlu1 %4489  ;;  %v4495_v18 = vpop.permute.xlu0 %4494 }
  0xfe   :  { %2620 = vst.msk [vmem:[#allocation0 + $0x1a2] ss:$4 sm:$0xff] %vm1538_vm1, %v4427_v19   ;;  %2609 = vst.msk [vmem:[#allocation0 + $0x182] ss:$4 sm:$0xff] %vm1538_vm1, %v4426_v20  }
  0xff   :  { %2642 = vst.msk [vmem:[#allocation0 + $0x1e2] ss:$4 sm:$0xff] %vm1538_vm1, %v4432_v23   ;;  %2631 = vst.msk [vmem:[#allocation0 + $0x1c2] ss:$4 sm:$0xff] %vm1538_vm1, %v4431_v24   ;;  %v4492_v23 = vunpack.i.h.bf16 %v4490_v17  ;;  %v4491_v24 = vunpack.i.l.bf16 %v4490_v17 }
 0x100   :  { %2664 = vst.msk [vmem:[#allocation0 + $0x222] ss:$4 sm:$0xff] %vm1538_vm1, %v4437_v25   ;;  %2653 = vst.msk [vmem:[#allocation0 + $0x202] ss:$4 sm:$0xff] %vm1538_vm1, %v4436_v26   ;;  %v4497_v25 = vunpack.i.h.bf16 %v4495_v18 }
 0x101   :  { %2686 = vst.msk [vmem:[#allocation0 + $0x262] ss:$4 sm:$0xff] %vm1538_vm1, %v4442_v29   ;;  %2675 = vst.msk [vmem:[#allocation0 + $0x242] ss:$4 sm:$0xff] %vm1538_vm1, %v4441_v30  }
 0x102   :  { %2708 = vst.msk [vmem:[#allocation0 + $0x2a2] ss:$4 sm:$0xff] %vm1538_vm1, %v4447_v31   ;;  %2697 = vst.msk [vmem:[#allocation0 + $0x282] ss:$4 sm:$0xff] %vm1538_vm1, %v4446_v32   ;;  %v4496_v31 = vunpack.i.l.bf16 %v4495_v18 }
 0x103   :  { %2730 = vst.msk [vmem:[#allocation0 + $0x2e2] ss:$4 sm:$0xff] %vm1538_vm1, %v4452_v35   ;;  %2719 = vst.msk [vmem:[#allocation0 + $0x2c2] ss:$4 sm:$0xff] %vm1538_vm1, %v4451_v36  }
 0x104   :  { %2750 = vst.msk [vmem:[#allocation0 + $0x23] ss:$4 sm:$0xff] %vm1538_vm1, %v4457_v37   ;;  %2739 = vst.msk [vmem:[#allocation0 + $0x3] ss:$4 sm:$0xff] %vm1538_vm1, %v4456_v38  }
 0x105   :  { %2772 = vst.msk [vmem:[#allocation0 + $0x63] ss:$4 sm:$0xff] %vm1538_vm1, %v4462_v41   ;;  %2761 = vst.msk [vmem:[#allocation0 + $0x43] ss:$4 sm:$0xff] %vm1538_vm1, %v4461_v42   ;;  %v4500_v41 = vpop.permute.xlu1 %4499  ;;  %v4505_v42 = vpop.permute.xlu0 %4504 }
 0x106   :  { %2794 = vst.msk [vmem:[#allocation0 + $0xa3] ss:$4 sm:$0xff] %vm1538_vm1, %v4467_v43   ;;  %2783 = vst.msk [vmem:[#allocation0 + $0x83] ss:$4 sm:$0xff] %vm1538_vm1, %v4466_v44  }
 0x107   :  { %2816 = vst.msk [vmem:[#allocation0 + $0xe3] ss:$4 sm:$0xff] %vm1538_vm1, %v4472_v47   ;;  %2805 = vst.msk [vmem:[#allocation0 + $0xc3] ss:$4 sm:$0xff] %vm1538_vm1, %v4471_v48   ;;  %v4502_v47 = vunpack.i.h.bf16 %v4500_v41  ;;  %v4501_v48 = vunpack.i.l.bf16 %v4500_v41 }
 0x108   :  { %2838 = vst.msk [vmem:[#allocation0 + $0x123] ss:$4 sm:$0xff] %vm1538_vm1, %v4477_v49   ;;  %2827 = vst.msk [vmem:[#allocation0 + $0x103] ss:$4 sm:$0xff] %vm1538_vm1, %v4476_v50   ;;  %v4507_v49 = vunpack.i.h.bf16 %v4505_v42 }
 0x109   :  { %2860 = vst.msk [vmem:[#allocation0 + $0x163] ss:$4 sm:$0xff] %vm1538_vm1, %v4482_v1   ;;  %2849 = vst.msk [vmem:[#allocation0 + $0x143] ss:$4 sm:$0xff] %vm1538_vm1, %v4481_v2   ;;  %v4510_v1 = vpop.permute.xlu1 %4509 }
 0x10a   :  { %2882 = vst.msk [vmem:[#allocation0 + $0x1a3] ss:$4 sm:$0xff] %vm1538_vm1, %v4487_v3   ;;  %2871 = vst.msk [vmem:[#allocation0 + $0x183] ss:$4 sm:$0xff] %vm1538_vm1, %v4486_v7   ;;  %v4511_v7 = vunpack.i.l.bf16 %v4510_v1 }
 0x10b   :  { %v2997_v51 = vld [vmem:[#allocation0] sm:$0xff]  ;;  %v3002_v52 = vld [vmem:[#allocation0 + $0x8] sm:$0xff]  ;;  %v3008_v53 = vld [vmem:[#allocation0 + $0x10] sm:$0xff]  ;;  %2904 = vst.msk [vmem:[#allocation0 + $0x1e3] ss:$4 sm:$0xff] %vm1538_vm1, %v4492_v23  }
 0x10c   :  { %v3015_v54 = vld [vmem:[#allocation0 + $0x18] sm:$0xff]  ;;  %v3022_v55 = vld [vmem:[#allocation0 + $0x20] sm:$0xff]  ;;  %v3029_v56 = vld [vmem:[#allocation0 + $0x28] sm:$0xff]  ;;  %v4046_v57 = vpack.c.bf16 %v3002_v52, %v2997_v51  ;;  %2893 = vst.msk [vmem:[#allocation0 + $0x1c3] ss:$4 sm:$0xff] %vm1538_vm1, %v4491_v24  }
 0x10d   :  { %v3036_v58 = vld [vmem:[#allocation0 + $0x30] sm:$0xff]  ;;  %v3043_v59 = vld [vmem:[#allocation0 + $0x38] sm:$0xff]  ;;  %v4051_v60 = vpack.c.bf16 %v3015_v54, %v3008_v53  ;;  %v4056_v61 = vpack.c.bf16 %v3029_v56, %v3022_v55  ;;  %v3050_v4 = vld [vmem:[#allocation0 + $0x40] sm:$0xff]  ;;  %2926 = vst.msk [vmem:[#allocation0 + $0x223] ss:$4 sm:$0xff] %vm1538_vm1, %v4497_v25   ;;  %v4506_v55 = vunpack.i.l.bf16 %v4505_v42 }
 0x10e   :  { %v4061_v0 = vpack.c.bf16 %v3043_v59, %v3036_v58  ;;  %4047 = vst [vmem:[%s5331_s1] sm:$0xff] %v4046_v57   ;;  %v3057_v5 = vld [vmem:[#allocation0 + $0x48] sm:$0xff]  ;;  %v3064_v6 = vld [vmem:[#allocation0 + $0x50] sm:$0xff]  ;;  %v3071_v8 = vld [vmem:[#allocation0 + $0x58] sm:$0xff] }
 0x10f   :  { %4283 = vst [vmem:[%s5331_s1 + $0x8] sm:$0xff] %v4051_v60   ;;  %4284 = vst [vmem:[%s5331_s1 + $0x10] sm:$0xff] %v4056_v61   ;;  %v3078_v9 = vld [vmem:[#allocation0 + $0x60] sm:$0xff]  ;;  %v3085_v10 = vld [vmem:[#allocation0 + $0x68] sm:$0xff]  ;;  %v4066_v11 = vpack.c.bf16 %v3057_v5, %v3050_v4  ;;  %v4071_v14 = vpack.c.bf16 %v3071_v8, %v3064_v6  ;;  %v4512_v6 = vunpack.i.h.bf16 %v4510_v1 }
 0x110   :  { %4285 = vst [vmem:[%s5331_s1 + $0x18] sm:$0xff] %v4061_v0   ;;  %v3092_v12 = vld [vmem:[#allocation0 + $0x70] sm:$0xff]  ;;  %v3099_v13 = vld [vmem:[#allocation0 + $0x78] sm:$0xff]  ;;  %v4076_v15 = vpack.c.bf16 %v3085_v10, %v3078_v9  ;;  %v3106_v16 = vld [vmem:[#allocation0 + $0x80] sm:$0xff] }
 0x111   :  { %v4081_v19 = vpack.c.bf16 %v3099_v13, %v3092_v12  ;;  %v3113_v20 = vld [vmem:[#allocation0 + $0x88] sm:$0xff]  ;;  %v3120_v21 = vld [vmem:[#allocation0 + $0x90] sm:$0xff]  ;;  %v3127_v22 = vld [vmem:[#allocation0 + $0x98] sm:$0xff]  ;;  %4286 = vst [vmem:[%s5331_s1 + $0x20] sm:$0xff] %v4066_v11  }
 0x112   :  { %v3134_v26 = vld [vmem:[#allocation0 + $0xa0] sm:$0xff]  ;;  %v3141_v27 = vld [vmem:[#allocation0 + $0xa8] sm:$0xff]  ;;  %v3148_v28 = vld [vmem:[#allocation0 + $0xb0] sm:$0xff]  ;;  %4287 = vst [vmem:[%s5331_s1 + $0x28] sm:$0xff] %v4071_v14   ;;  %v4086_v29 = vpack.c.bf16 %v3113_v20, %v3106_v16  ;;  %v4091_v30 = vpack.c.bf16 %v3127_v22, %v3120_v21 }
 0x113   :  { %4288 = vst [vmem:[%s5331_s1 + $0x30] sm:$0xff] %v4076_v15   ;;  %v3155_v32 = vld [vmem:[#allocation0 + $0xb8] sm:$0xff]  ;;  %v3162_v33 = vld [vmem:[#allocation0 + $0xc0] sm:$0xff]  ;;  %v3169_v34 = vld [vmem:[#allocation0 + $0xc8] sm:$0xff]  ;;  %v4096_v35 = vpack.c.bf16 %v3141_v27, %v3134_v26 }
 0x114   :  { %4289 = vst [vmem:[%s5331_s1 + $0x38] sm:$0xff] %v4081_v19   ;;  %v4106_v36 = vpack.c.bf16 %v3169_v34, %v3162_v33  ;;  %v3176_v37 = vld [vmem:[#allocation0 + $0xd0] sm:$0xff]  ;;  %v3183_v38 = vld [vmem:[#allocation0 + $0xd8] sm:$0xff]  ;;  %v3190_v39 = vld [vmem:[#allocation0 + $0xe0] sm:$0xff]  ;;  %v4101_v40 = vpack.c.bf16 %v3155_v32, %v3148_v28 }
 0x115   :  { %4290 = vst [vmem:[%s5331_s1 + $0x40] sm:$0xff] %v4086_v29   ;;  %4291 = vst [vmem:[%s5331_s1 + $0x48] sm:$0xff] %v4091_v30   ;;  %v4111_v43 = vpack.c.bf16 %v3183_v38, %v3176_v37  ;;  %v3197_v44 = vld [vmem:[#allocation0 + $0xe8] sm:$0xff]  ;;  %v3204_v45 = vld [vmem:[#allocation0 + $0xf0] sm:$0xff] }
 0x116   :  { %2915 = vst.msk [vmem:[#allocation0 + $0x203] ss:$4 sm:$0xff] %vm1538_vm1, %v4496_v31   ;;  %v3211_v46 = vld [vmem:[#allocation0 + $0xf8] sm:$0xff]  ;;  %4292 = vst [vmem:[%s5331_s1 + $0x50] sm:$0xff] %v4096_v35   ;;  %v4116_v50 = vpack.c.bf16 %v3197_v44, %v3190_v39  ;;  %v3218_v52 = vld [vmem:[#allocation0 + $0x100] sm:$0xff] }
 0x117   :  { %4294 = vst [vmem:[%s5331_s1 + $0x60] sm:$0xff] %v4106_v36   ;;  %v4121_v51 = vpack.c.bf16 %v3211_v46, %v3204_v45  ;;  %v3225_v53 = vld [vmem:[#allocation0 + $0x108] sm:$0xff]  ;;  %v3232_v54 = vld [vmem:[#allocation0 + $0x110] sm:$0xff]  ;;  %4293 = vst [vmem:[%s5331_s1 + $0x58] sm:$0xff] %v4101_v40  }
 0x118   :  { %4295 = vst [vmem:[%s5331_s1 + $0x68] sm:$0xff] %v4111_v43   ;;  %v4126_v56 = vpack.c.bf16 %v3225_v53, %v3218_v52  ;;  %v3239_v57 = vld [vmem:[#allocation0 + $0x118] sm:$0xff]  ;;  %v3246_v58 = vld [vmem:[#allocation0 + $0x120] sm:$0xff]  ;;  %v3253_v59 = vld [vmem:[#allocation0 + $0x128] sm:$0xff] }
 0x119   :  { %2948 = vst.msk [vmem:[#allocation0 + $0x263] ss:$4 sm:$0xff] %vm1538_vm1, %v4502_v47   ;;  %2937 = vst.msk [vmem:[#allocation0 + $0x243] ss:$4 sm:$0xff] %vm1538_vm1, %v4501_v48   ;;  %v4131_v60 = vpack.c.bf16 %v3239_v57, %v3232_v54  ;;  %v4136_v61 = vpack.c.bf16 %v3253_v59, %v3246_v58  ;;  %v3260_v62 = vld [vmem:[#allocation0 + $0x130] sm:$0xff]  ;;  %v3267_v63 = vld [vmem:[#allocation0 + $0x138] sm:$0xff] }
 0x11a   :  { %2970 = vst.msk [vmem:[#allocation0 + $0x2a3] ss:$4 sm:$0xff] %vm1538_vm1, %v4507_v49   ;;  %4296 = vst [vmem:[%s5331_s1 + $0x70] sm:$0xff] %v4116_v50   ;;  %v3274_v0 = vld [vmem:[#allocation0 + $0x140] sm:$0xff]  ;;  %v4141_v2 = vpack.c.bf16 %v3267_v63, %v3260_v62  ;;  %v3281_v3 = vld [vmem:[#allocation0 + $0x148] sm:$0xff] }
 0x11b   :  { %4297 = vst [vmem:[%s5331_s1 + $0x78] sm:$0xff] %v4121_v51   ;;  %2959 = vst.msk [vmem:[#allocation0 + $0x283] ss:$4 sm:$0xff] %vm1538_vm1, %v4506_v55   ;;  %v3288_v4 = vld [vmem:[#allocation0 + $0x150] sm:$0xff]  ;;  %v3295_v5 = vld [vmem:[#allocation0 + $0x158] sm:$0xff]  ;;  %v4146_v8 = vpack.c.bf16 %v3281_v3, %v3274_v0 }
 0x11c   :  { %4298 = vst [vmem:[%s5331_s1 + $0x80] sm:$0xff] %v4126_v56   ;;  %4299 = vst [vmem:[%s5331_s1 + $0x88] sm:$0xff] %v4131_v60   ;;  %v4151_v9 = vpack.c.bf16 %v3295_v5, %v3288_v4  ;;  %v3302_v10 = vld [vmem:[#allocation0 + $0x160] sm:$0xff]  ;;  %v3309_v11 = vld [vmem:[#allocation0 + $0x168] sm:$0xff] }
 0x11d   :  { %4300 = vst [vmem:[%s5331_s1 + $0x90] sm:$0xff] %v4136_v61   ;;  %v3316_v12 = vld [vmem:[#allocation0 + $0x170] sm:$0xff]  ;;  %4301 = vst [vmem:[%s5331_s1 + $0x98] sm:$0xff] %v4141_v2   ;;  %v4156_v13 = vpack.c.bf16 %v3309_v11, %v3302_v10  ;;  %v3323_v14 = vld [vmem:[#allocation0 + $0x178] sm:$0xff] }
 0x11e   :  { %v3330_v15 = vld [vmem:[#allocation0 + $0x180] sm:$0xff]  ;;  %v3337_v16 = vld [vmem:[#allocation0 + $0x188] sm:$0xff]  ;;  %2992 = vst.msk [vmem:[#allocation0 + $0x2e3] ss:$4 sm:$0xff] %vm1538_vm1, %v4512_v6   ;;  %2981 = vst.msk [vmem:[#allocation0 + $0x2c3] ss:$4 sm:$0xff] %vm1538_vm1, %v4511_v7   ;;  %v4161_v17 = vpack.c.bf16 %v3323_v14, %v3316_v12 }
 0x11f   :  { %4302 = vst [vmem:[%s5331_s1 + $0xa0] sm:$0xff] %v4146_v8   ;;  %4303 = vst [vmem:[%s5331_s1 + $0xa8] sm:$0xff] %v4151_v9   ;;  %v4166_v18 = vpack.c.bf16 %v3337_v16, %v3330_v15  ;;  %v3344_v19 = vld [vmem:[#allocation0 + $0x190] sm:$0xff]  ;;  %v3351_v20 = vld [vmem:[#allocation0 + $0x198] sm:$0xff] }
 0x120   :  { %v3358_v21 = vld [vmem:[#allocation0 + $0x1a0] sm:$0xff]  ;;  %4304 = vst [vmem:[%s5331_s1 + $0xb0] sm:$0xff] %v4156_v13   ;;  %v4171_v22 = vpack.c.bf16 %v3351_v20, %v3344_v19  ;;  %v3365_v23 = vld [vmem:[#allocation0 + $0x1a8] sm:$0xff]  ;;  %v3372_v24 = vld [vmem:[#allocation0 + $0x1b0] sm:$0xff] }
 0x121   :  { %v3379_v25 = vld [vmem:[#allocation0 + $0x1b8] sm:$0xff]  ;;  %4305 = vst [vmem:[%s5331_s1 + $0xb8] sm:$0xff] %v4161_v17   ;;  %4306 = vst [vmem:[%s5331_s1 + $0xc0] sm:$0xff] %v4166_v18   ;;  %v4176_v26 = vpack.c.bf16 %v3365_v23, %v3358_v21  ;;  %v3386_v28 = vld [vmem:[#allocation0 + $0x1c0] sm:$0xff] }
 0x122   :  { %v4181_v27 = vpack.c.bf16 %v3379_v25, %v3372_v24  ;;  %v3393_v29 = vld [vmem:[#allocation0 + $0x1c8] sm:$0xff]  ;;  %v3400_v30 = vld [vmem:[#allocation0 + $0x1d0] sm:$0xff]  ;;  %4307 = vst [vmem:[%s5331_s1 + $0xc8] sm:$0xff] %v4171_v22   ;;  %v3407_v32 = vld [vmem:[#allocation0 + $0x1d8] sm:$0xff] }
 0x123   :  { %v4186_v31 = vpack.c.bf16 %v3393_v29, %v3386_v28  ;;  %v3414_v33 = vld [vmem:[#allocation0 + $0x1e0] sm:$0xff]  ;;  %v3421_v34 = vld [vmem:[#allocation0 + $0x1e8] sm:$0xff]  ;;  %4308 = vst [vmem:[%s5331_s1 + $0xd0] sm:$0xff] %v4176_v26   ;;  %v4191_v35 = vpack.c.bf16 %v3407_v32, %v3400_v30  ;;  %v3428_v36 = vld [vmem:[#allocation0 + $0x1f0] sm:$0xff] }
 0x124   :  { %4309 = vst [vmem:[%s5331_s1 + $0xd8] sm:$0xff] %v4181_v27   ;;  %v3435_v37 = vld [vmem:[#allocation0 + $0x1f8] sm:$0xff]  ;;  %v3442_v38 = vld [vmem:[#allocation0 + $0x200] sm:$0xff]  ;;  %v4196_v39 = vpack.c.bf16 %v3421_v34, %v3414_v33  ;;  %v3449_v40 = vld [vmem:[#allocation0 + $0x208] sm:$0xff] }
 0x125   :  { %4310 = vst [vmem:[%s5331_s1 + $0xe0] sm:$0xff] %v4186_v31   ;;  %v3456_v41 = vld [vmem:[#allocation0 + $0x210] sm:$0xff]  ;;  %v3463_v42 = vld [vmem:[#allocation0 + $0x218] sm:$0xff]  ;;  %v4201_v43 = vpack.c.bf16 %v3435_v37, %v3428_v36  ;;  %4311 = vst [vmem:[%s5331_s1 + $0xe8] sm:$0xff] %v4191_v35   ;;  %v4206_v44 = vpack.c.bf16 %v3449_v40, %v3442_v38 }
 0x126   :  { %v4211_v45 = vpack.c.bf16 %v3463_v42, %v3456_v41  ;;  %v3470_v46 = vld [vmem:[#allocation0 + $0x220] sm:$0xff]  ;;  %v3477_v47 = vld [vmem:[#allocation0 + $0x228] sm:$0xff]  ;;  %v3484_v48 = vld [vmem:[#allocation0 + $0x230] sm:$0xff]  ;;  %4312 = vst [vmem:[%s5331_s1 + $0xf0] sm:$0xff] %v4196_v39  }
 0x127   :  { %v3491_v49 = vld [vmem:[#allocation0 + $0x238] sm:$0xff]  ;;  %v3526_v50 = vld [vmem:[#allocation0 + $0x260] sm:$0xff]  ;;  %v3533_v51 = vld [vmem:[#allocation0 + $0x268] sm:$0xff]  ;;  %4313 = vst [vmem:[%s5331_s1 + $0xf8] sm:$0xff] %v4201_v43   ;;  %v4216_v52 = vpack.c.bf16 %v3477_v47, %v3470_v46 }
 0x128   :  { %4314 = vst [vmem:[%s5331_s1 + $0x100] sm:$0xff] %v4206_v44   ;;  %4315 = vst [vmem:[%s5331_s1 + $0x108] sm:$0xff] %v4211_v45   ;;  %v4236_v53 = vpack.c.bf16 %v3533_v51, %v3526_v50  ;;  %v3540_v54 = vld [vmem:[#allocation0 + $0x270] sm:$0xff]  ;;  %v3547_v55 = vld [vmem:[#allocation0 + $0x278] sm:$0xff]  ;;  %v4221_v56 = vpack.c.bf16 %v3491_v49, %v3484_v48 }
 0x129   :  { %v3498_v57 = vld [vmem:[#allocation0 + $0x240] sm:$0xff]  ;;  %v4241_v58 = vpack.c.bf16 %v3547_v55, %v3540_v54  ;;  %v3505_v59 = vld [vmem:[#allocation0 + $0x248] sm:$0xff]  ;;  %v3512_v60 = vld [vmem:[#allocation0 + $0x250] sm:$0xff]  ;;  %4316 = vst [vmem:[%s5331_s1 + $0x110] sm:$0xff] %v4216_v52  }
 0x12a   :  { %v3519_v61 = vld [vmem:[#allocation0 + $0x258] sm:$0xff]  ;;  %4320 = vst [vmem:[%s5331_s1 + $0x130] sm:$0xff] %v4236_v53   ;;  %v3554_v62 = vld [vmem:[#allocation0 + $0x280] sm:$0xff]  ;;  %v3561_v63 = vld [vmem:[#allocation0 + $0x288] sm:$0xff]  ;;  %v4226_v1 = vpack.c.bf16 %v3505_v59, %v3498_v57 }
 0x12b   :  { %v3568_v0 = vld [vmem:[#allocation0 + $0x290] sm:$0xff]  ;;  %4317 = vst [vmem:[%s5331_s1 + $0x118] sm:$0xff] %v4221_v56   ;;  %v4231_v2 = vpack.c.bf16 %v3519_v61, %v3512_v60  ;;  %4321 = vst [vmem:[%s5331_s1 + $0x138] sm:$0xff] %v4241_v58   ;;  %v4246_v3 = vpack.c.bf16 %v3561_v63, %v3554_v62  ;;  %v3575_v4 = vld [vmem:[#allocation0 + $0x298] sm:$0xff] }
 0x12c   :  { %v3582_v5 = vld [vmem:[#allocation0 + $0x2a0] sm:$0xff]  ;;  %v3589_v6 = vld [vmem:[#allocation0 + $0x2a8] sm:$0xff]  ;;  %v4251_v7 = vpack.c.bf16 %v3575_v4, %v3568_v0  ;;  %v3596_v9 = vld [vmem:[#allocation0 + $0x2b0] sm:$0xff]  ;;  %4318 = vst [vmem:[%s5331_s1 + $0x120] sm:$0xff] %v4226_v1  }
 0x12d   :  { %v4256_v8 = vpack.c.bf16 %v3589_v6, %v3582_v5  ;;  %v3603_v10 = vld [vmem:[#allocation0 + $0x2b8] sm:$0xff]  ;;  %v3610_v11 = vld [vmem:[#allocation0 + $0x2c0] sm:$0xff]  ;;  %4319 = vst [vmem:[%s5331_s1 + $0x128] sm:$0xff] %v4231_v2   ;;  %4322 = vst [vmem:[%s5331_s1 + $0x140] sm:$0xff] %v4246_v3  }
 0x12e   :  { %v4261_v12 = vpack.c.bf16 %v3603_v10, %v3596_v9  ;;  %v3617_v13 = vld [vmem:[#allocation0 + $0x2c8] sm:$0xff]  ;;  %v3624_v14 = vld [vmem:[#allocation0 + $0x2d0] sm:$0xff]  ;;  %v3631_v15 = vld [vmem:[#allocation0 + $0x2d8] sm:$0xff]  ;;  %4323 = vst [vmem:[%s5331_s1 + $0x148] sm:$0xff] %v4251_v7  }
 0x12f   :  { %4324 = vst [vmem:[%s5331_s1 + $0x150] sm:$0xff] %v4256_v8   ;;  %v4266_v16 = vpack.c.bf16 %v3617_v13, %v3610_v11  ;;  %v4271_v17 = vpack.c.bf16 %v3631_v15, %v3624_v14  ;;  %v3638_v18 = vld [vmem:[#allocation0 + $0x2e0] sm:$0xff]  ;;  %v3645_v19 = vld [vmem:[#allocation0 + $0x2e8] sm:$0xff]  ;;  %v3652_v20 = vld [vmem:[#allocation0 + $0x2f0] sm:$0xff] }
 0x130   :  { %4325 = vst [vmem:[%s5331_s1 + $0x158] sm:$0xff] %v4261_v12   ;;  %v4276_v21 = vpack.c.bf16 %v3645_v19, %v3638_v18  ;;  %v3659_v22 = vld [vmem:[#allocation0 + $0x2f8] sm:$0xff] }
 0x131   :  { %4326 = vst [vmem:[%s5331_s1 + $0x160] sm:$0xff] %v4266_v16   ;;  %4327 = vst [vmem:[%s5331_s1 + $0x168] sm:$0xff] %v4271_v17   ;;  %v4281_v23 = vpack.c.bf16 %v3659_v22, %v3652_v20 }
 0x132   :  { %4328 = vst [vmem:[%s5331_s1 + $0x170] sm:$0xff] %v4276_v21  }
 0x133   :  { %4329 = vst [vmem:[%s5331_s1 + $0x178] sm:$0xff] %v4281_v23  }

</bundles_post_ra>
